<compile_context>
chip_gen: v7x
topology: tpu7x:2x2x1
jax: 0.10.0
libtpu: 0.0.40
codegen_flags: <defaults>
</compile_context>

<pallas_src>
import jax
import jax.numpy as jnp
from jax.experimental import pallas as pl
from jax.experimental.pallas import tpu as pltpu

CONV_LANES = 128   # conv output channels padded to one full lane tile
FC1_OUT = 1024     # 1000 padded to a multiple of 128
FC2_OUT = 128      # 10 padded to a full lane tile


# ----------------------------------------------------------------------------
# Pallas kernels
# ----------------------------------------------------------------------------
def _conv_relu_pool_kernel(p_ref, w_ref, b_ref, o_ref):
    # p_ref: (1, 4, P, KKC) bf16   -- 4 = the 2x2 pool-window parities
    # w_ref: (KKC, 128)     bf16
    # b_ref: (1, 128)       f32
    # o_ref: (1, P, 128)    bf16   -- pooled output, lane-dense (128 channels)
    w = w_ref[...]
    m = jnp.dot(p_ref[0, 0], w, preferred_element_type=jnp.float32)
    for q in (1, 2, 3):
        m = jnp.maximum(
            m, jnp.dot(p_ref[0, q], w, preferred_element_type=jnp.float32))
    # max over pool positions commutes with (+bias) and ReLU.
    o_ref[0] = jnp.maximum(m + b_ref[...], 0.0).astype(o_ref.dtype)


def _linear_kernel(x_ref, w_ref, b_ref, o_ref):
    # x_ref: (N, Din)  w_ref: (Din, TN) bf16  b_ref: (1, TN) f32  o: (N, TN) f32
    acc = jnp.dot(x_ref[...].astype(jnp.bfloat16), w_ref[...],
                  preferred_element_type=jnp.float32)
    o_ref[...] = acc + b_ref[...]


# ----------------------------------------------------------------------------
# pallas_call wrappers
# ----------------------------------------------------------------------------
def conv_relu_pool(patches, w_mat, b_row):
    # patches: (N, 4, P, KKC) bf16 ; returns pooled activations (N, P, 128) bf16
    N, Q, P, KKC = patches.shape
    Cout = w_mat.shape[1]
    return pl.pallas_call(
        _conv_relu_pool_kernel,
        out_shape=jax.ShapeDtypeStruct((N, P, Cout), jnp.bfloat16),
        grid=(N,),
        in_specs=[
            pl.BlockSpec((1, Q, P, KKC), lambda n: (n, 0, 0, 0)),
            pl.BlockSpec((KKC, Cout), lambda n: (0, 0)),
            pl.BlockSpec((1, Cout), lambda n: (0, 0)),
        ],
        out_specs=pl.BlockSpec((1, P, Cout), lambda n: (n, 0, 0)),
        compiler_params=pltpu.CompilerParams(
            dimension_semantics=("parallel",)),
    )(patches, w_mat, b_row)


def linear(x, w_mat, b_row):
    # x: (N, Din), w: (Din, Dout) bf16, b: (1, Dout) f32 -> (N, Dout) f32
    N, Din = x.shape
    Dout = w_mat.shape[1]
    tn = 256 if Dout % 256 == 0 else Dout        # Dout tile (multiple of 128)
    return pl.pallas_call(
        _linear_kernel,
        out_shape=jax.ShapeDtypeStruct((N, Dout), jnp.float32),
        grid=(Dout // tn,),
        in_specs=[
            pl.BlockSpec((N, Din), lambda j: (0, 0)),
            pl.BlockSpec((Din, tn), lambda j: (0, j)),
            pl.BlockSpec((1, tn), lambda j: (0, j)),
        ],
        out_specs=pl.BlockSpec((N, tn), lambda j: (0, j)),
        compiler_params=pltpu.CompilerParams(
            dimension_semantics=("parallel",)),
    )(x, w_mat, b_row)


# ----------------------------------------------------------------------------
# Glue (plain JAX): pool-grouped im2col, parameter setup
# ----------------------------------------------------------------------------
def pooled_patches(x_nhwc, K=5, pad=2):
    # x: (N, H, W, C) -> (N, 4, (H/2)*(W/2), K*K*C)
    # axis 1 enumerates the (row, col) parity inside each 2x2 pool window;
    # patch features are ordered (kh, kw, cin) to match the weight reshape.
    N, H, W, C = x_nhwc.shape
    xp = jnp.pad(x_nhwc, ((0, 0), (pad, pad), (pad, pad), (0, 0)))
    cols = []
    for dy in range(K):
        for dx in range(K):
            cols.append(xp[:, dy:dy + H, dx:dx + W, :])   # (N, H, W, C)
    p = jnp.stack(cols, axis=3)                           # (N, H, W, KK, C)
    p = p.reshape(N, H // 2, 2, W // 2, 2, K * K * C)     # (N,Ho,2,Wo,2,KKC)
    p = jnp.transpose(p, (0, 2, 4, 1, 3, 5))              # (N,2,2,Ho,Wo,KKC)
    return p.reshape(N, 4, (H // 2) * (W // 2), K * K * C)


def init_params(key):
    ks = jax.random.split(key, 8)
    # PyTorch layouts: conv (Cout, Cin, KH, KW); fc (Dout, Din).
    w1 = jax.random.normal(ks[0], (32, 1, 5, 5), jnp.float32) * 0.10
    b1 = jax.random.normal(ks[1], (32,), jnp.float32) * 0.01
    w2 = jax.random.normal(ks[2], (64, 32, 5, 5), jnp.float32) * 0.02
    b2 = jax.random.normal(ks[3], (64,), jnp.float32) * 0.01
    wf1 = jax.random.normal(ks[4], (1000, 7 * 7 * 64), jnp.float32) * 0.01
    bf1 = jax.random.normal(ks[5], (1000,), jnp.float32) * 0.01
    wf2 = jax.random.normal(ks[6], (10, 1000), jnp.float32) * 0.02
    bf2 = jax.random.normal(ks[7], (10,), jnp.float32) * 0.01

    def conv_wb(w, b):
        cout = w.shape[0]
        wk = jnp.transpose(w, (2, 3, 1, 0)).reshape(-1, cout)   # (K*K*Cin,Cout)
        wk = jnp.pad(wk, ((0, 0), (0, CONV_LANES - cout)))      # lane-pad Cout
        bk = jnp.pad(b, (0, CONV_LANES - cout)).reshape(1, CONV_LANES)
        return wk.astype(jnp.bfloat16), bk                       # bias stays f32

    w1k, b1k = conv_wb(w1, b1)
    w2k, b2k = conv_wb(w2, b2)

    # fc1: fold the NCHW-flatten permutation and the channel pad (64->128)
    # into the weight, and pad Dout 1000->1024.  Row index of the kernel
    # weight = (h*7 + w)*128 + c, matching a plain NHWC reshape of h2.
    wf1_t = wf1.T.reshape(64, 7 * 7, 1000)            # (c, hw, Dout)
    wf1_t = jnp.transpose(wf1_t, (1, 0, 2))           # (hw, c, Dout)
    wf1_t = jnp.pad(wf1_t, ((0, 0), (0, CONV_LANES - 64), (0, FC1_OUT - 1000)))
    wf1k = wf1_t.reshape(7 * 7 * CONV_LANES, FC1_OUT).astype(jnp.bfloat16)
    bf1k = jnp.pad(bf1, (0, FC1_OUT - 1000)).reshape(1, FC1_OUT)

    # fc2: pad Din 1000->1024 (fc1's padded columns are exactly zero) and
    # Dout 10->128; real logits are sliced out in the wrapper.
    wf2k = jnp.pad(wf2.T, ((0, FC1_OUT - 1000), (0, FC2_OUT - 10)))
    wf2k = wf2k.astype(jnp.bfloat16)
    bf2k = jnp.pad(bf2, (0, FC2_OUT - 10)).reshape(1, FC2_OUT)

    return {"w1": w1k, "b1": b1k, "w2": w2k, "b2": b2k,
            "wf1": wf1k, "bf1": bf1k, "wf2": wf2k, "bf2": bf2k}


def convnet_forward(x_nchw, params):
    N = x_nchw.shape[0]
    x = jnp.transpose(x_nchw, (0, 2, 3, 1)).astype(jnp.bfloat16)  # NHWC (N,28,28,1)

    # layer1: Conv(1->32, k5, pad2) + ReLU + MaxPool(2,2)   (one fused kernel)
    p1 = pooled_patches(x, K=5, pad=2)                 # (N, 4, 196, 25) bf16
    h1 = conv_relu_pool(p1, params["w1"], params["b1"])  # (N, 196, 128) bf16
    h1 = h1[:, :, :32].reshape(N, 14, 14, 32)          # drop pad channels

    # layer2: Conv(32->64, k5, pad2) + ReLU + MaxPool(2,2)  (one fused kernel)
    p2 = pooled_patches(h1, K=5, pad=2)                # (N, 4, 49, 800) bf16
    h2 = conv_relu_pool(p2, params["w2"], params["b2"])  # (N, 49, 128) bf16

    # flatten NHWC directly; the NCHW ordering + channel pad is baked into wf1
    flat = h2.reshape(N, 7 * 7 * CONV_LANES)

    # TODO(synk): nn.Dropout(p=0.5) is only active in training mode; eval
    # semantics (identity) are used here.

    f1 = linear(flat, params["wf1"], params["bf1"])    # (N, 1024) f32
    f2 = linear(f1, params["wf2"], params["bf2"])      # (N, 128)  f32
    return f2[:, :10]                                  # real logits


if __name__ == "__main__":
    key = jax.random.PRNGKey(0)
    pkey, xkey = jax.random.split(key)
    params = init_params(pkey)
    # 28x28 input is required by fc1 = Linear(7*7*64, 1000)
    x = jax.random.normal(xkey, (2, 1, 28, 28), jnp.float32)

    out = jax.jit(convnet_forward)(x, params)
    jax.block_until_ready(out)
    assert out.shape == (2, 10) and out.dtype == jnp.float32
    assert bool(jnp.isfinite(out).all())
    print("KERNEL_OK")
</pallas_src>

<mosaic_0001>
module attributes {stable_mosaic.version = 11 : i64} {
  func.func @_conv_relu_pool_kernel(%arg0: i32, %arg1: memref<1x4x196x25xbf16, #tpu.memory_space<vmem>>, %arg2: memref<25x128xbf16, #tpu.memory_space<vmem>>, %arg3: memref<1x128xf32, #tpu.memory_space<vmem>>, %arg4: memref<1x196x128xbf16, #tpu.memory_space<vmem>>) attributes {dimension_semantics = [#tpu.dimension_semantics<parallel>], iteration_bounds = array<i64: 2>, scalar_prefetch = 0 : i64, scratch_operands = 0 : i64, tpu.core_type = #tpu.core_type<tc>, window_params = [{transform_indices = @transform_0, window_bounds = array<i64: 1, 4, 196, 25>}, {pipeline_mode = #tpu.pipeline_mode<synchronous>, transform_indices = @transform_1, window_bounds = array<i64: 25, 128>}, {pipeline_mode = #tpu.pipeline_mode<synchronous>, transform_indices = @transform_2, window_bounds = array<i64: 1, 128>}, {transform_indices = @transform_3, window_bounds = array<i64: 1, 196, 128>}]} {
    %c0 = arith.constant 0 : index
    %c0_0 = arith.constant 0 : index
    %0 = vector.load %arg2[%c0, %c0_0] : memref<25x128xbf16, #tpu.memory_space<vmem>>, vector<25x128xbf16>
    %c0_1 = arith.constant 0 : index
    %c0_2 = arith.constant 0 : index
    %c0_3 = arith.constant 0 : index
    %c0_4 = arith.constant 0 : index
    %1 = vector.load %arg1[%c0_1, %c0_2, %c0_3, %c0_4] : memref<1x4x196x25xbf16, #tpu.memory_space<vmem>>, vector<1x1x196x25xbf16>
    %2 = vector.shape_cast %1 : vector<1x1x196x25xbf16> to vector<196x25xbf16>
    %cst = arith.constant dense<0.000000e+00> : vector<196x128xf32>
    %3 = tpu.matmul %2, %0, %cst {dimension_numbers = #tpu.dot_dimension_numbers<[1], [0], [0], [1], [0, 0, 1, 1], [], []>} : vector<196x25xbf16>, vector<25x128xbf16>, vector<196x128xf32> -> vector<196x128xf32>
    %c0_5 = arith.constant 0 : index
    %c1 = arith.constant 1 : index
    %c0_6 = arith.constant 0 : index
    %c0_7 = arith.constant 0 : index
    %4 = vector.load %arg1[%c0_5, %c1, %c0_6, %c0_7] : memref<1x4x196x25xbf16, #tpu.memory_space<vmem>>, vector<1x1x196x25xbf16>
    %5 = vector.shape_cast %4 : vector<1x1x196x25xbf16> to vector<196x25xbf16>
    %cst_8 = arith.constant dense<0.000000e+00> : vector<196x128xf32>
    %6 = tpu.matmul %5, %0, %cst_8 {dimension_numbers = #tpu.dot_dimension_numbers<[1], [0], [0], [1], [0, 0, 1, 1], [], []>} : vector<196x25xbf16>, vector<25x128xbf16>, vector<196x128xf32> -> vector<196x128xf32>
    %7 = arith.maximumf %3, %6 : vector<196x128xf32>
    %c0_9 = arith.constant 0 : index
    %c2 = arith.constant 2 : index
    %c0_10 = arith.constant 0 : index
    %c0_11 = arith.constant 0 : index
    %8 = vector.load %arg1[%c0_9, %c2, %c0_10, %c0_11] : memref<1x4x196x25xbf16, #tpu.memory_space<vmem>>, vector<1x1x196x25xbf16>
    %9 = vector.shape_cast %8 : vector<1x1x196x25xbf16> to vector<196x25xbf16>
    %cst_12 = arith.constant dense<0.000000e+00> : vector<196x128xf32>
    %10 = tpu.matmul %9, %0, %cst_12 {dimension_numbers = #tpu.dot_dimension_numbers<[1], [0], [0], [1], [0, 0, 1, 1], [], []>} : vector<196x25xbf16>, vector<25x128xbf16>, vector<196x128xf32> -> vector<196x128xf32>
    %11 = arith.maximumf %7, %10 : vector<196x128xf32>
    %c0_13 = arith.constant 0 : index
    %c3 = arith.constant 3 : index
    %c0_14 = arith.constant 0 : index
    %c0_15 = arith.constant 0 : index
    %12 = vector.load %arg1[%c0_13, %c3, %c0_14, %c0_15] : memref<1x4x196x25xbf16, #tpu.memory_space<vmem>>, vector<1x1x196x25xbf16>
    %13 = vector.shape_cast %12 : vector<1x1x196x25xbf16> to vector<196x25xbf16>
    %cst_16 = arith.constant dense<0.000000e+00> : vector<196x128xf32>
    %14 = tpu.matmul %13, %0, %cst_16 {dimension_numbers = #tpu.dot_dimension_numbers<[1], [0], [0], [1], [0, 0, 1, 1], [], []>} : vector<196x25xbf16>, vector<25x128xbf16>, vector<196x128xf32> -> vector<196x128xf32>
    %15 = arith.maximumf %11, %14 : vector<196x128xf32>
    %c0_17 = arith.constant 0 : index
    %c0_18 = arith.constant 0 : index
    %16 = vector.load %arg3[%c0_17, %c0_18] : memref<1x128xf32, #tpu.memory_space<vmem>>, vector<1x128xf32>
    %17 = vector.broadcast %16 : vector<1x128xf32> to vector<196x128xf32>
    %18 = arith.addf %15, %17 : vector<196x128xf32>
    %cst_19 = arith.constant 0.000000e+00 : f32
    %19 = vector.broadcast %cst_19 : f32 to vector<196x128xf32>
    %20 = arith.maximumf %18, %19 : vector<196x128xf32>
    %21 = arith.truncf %20 : vector<196x128xf32> to vector<196x128xbf16>
    %c0_20 = arith.constant 0 : index
    %c0_21 = arith.constant 0 : index
    %c0_22 = arith.constant 0 : index
    %22 = vector.load %arg4[%c0_20, %c0_21, %c0_22] : memref<1x196x128xbf16, #tpu.memory_space<vmem>>, vector<1x196x128xbf16>
    %23 = vector.shape_cast %22 : vector<1x196x128xbf16> to vector<196x128xbf16>
    %24 = vector.shape_cast %21 : vector<196x128xbf16> to vector<1x196x128xbf16>
    tpu.vector_store %arg4[%c0_20, %c0_21, %c0_22], %24 {strides = array<i32>} : memref<1x196x128xbf16, #tpu.memory_space<vmem>>, vector<1x196x128xbf16>,
    return
  }
  func.func @transform_0(%arg0: i32) -> (i32, i32, i32, i32) {
    %c0_i32 = arith.constant 0 : i32
    %c0_i32_0 = arith.constant 0 : i32
    %c0_i32_1 = arith.constant 0 : i32
    %c0_i32_2 = arith.constant 0 : i32
    return %arg0, %c0_i32, %c0_i32_0, %c0_i32_1 : i32, i32, i32, i32
  }
  func.func @transform_1(%arg0: i32) -> (i32, i32) {
    %c0_i32 = arith.constant 0 : i32
    %c0_i32_0 = arith.constant 0 : i32
    %c0_i32_1 = arith.constant 0 : i32
    return %c0_i32, %c0_i32_0 : i32, i32
  }
  func.func @transform_2(%arg0: i32) -> (i32, i32) {
    %c0_i32 = arith.constant 0 : i32
    %c0_i32_0 = arith.constant 0 : i32
    %c0_i32_1 = arith.constant 0 : i32
    return %c0_i32, %c0_i32_0 : i32, i32
  }
  func.func @transform_3(%arg0: i32) -> (i32, i32, i32) {
    %c0_i32 = arith.constant 0 : i32
    %c0_i32_0 = arith.constant 0 : i32
    %c0_i32_1 = arith.constant 0 : i32
    return %arg0, %c0_i32, %c0_i32_0 : i32, i32, i32
  }
}

module attributes {stable_mosaic.version = 11 : i64} {
  func.func @_conv_relu_pool_kernel(%arg0: i32, %arg1: memref<1x4x49x800xbf16, #tpu.memory_space<vmem>>, %arg2: memref<800x128xbf16, #tpu.memory_space<vmem>>, %arg3: memref<1x128xf32, #tpu.memory_space<vmem>>, %arg4: memref<1x49x128xbf16, #tpu.memory_space<vmem>>) attributes {dimension_semantics = [#tpu.dimension_semantics<parallel>], iteration_bounds = array<i64: 2>, scalar_prefetch = 0 : i64, scratch_operands = 0 : i64, tpu.core_type = #tpu.core_type<tc>, window_params = [{transform_indices = @transform_0, window_bounds = array<i64: 1, 4, 49, 800>}, {pipeline_mode = #tpu.pipeline_mode<synchronous>, transform_indices = @transform_1, window_bounds = array<i64: 800, 128>}, {pipeline_mode = #tpu.pipeline_mode<synchronous>, transform_indices = @transform_2, window_bounds = array<i64: 1, 128>}, {transform_indices = @transform_3, window_bounds = array<i64: 1, 49, 128>}]} {
    %c0 = arith.constant 0 : index
    %c0_0 = arith.constant 0 : index
    %0 = vector.load %arg2[%c0, %c0_0] : memref<800x128xbf16, #tpu.memory_space<vmem>>, vector<800x128xbf16>
    %c0_1 = arith.constant 0 : index
    %c0_2 = arith.constant 0 : index
    %c0_3 = arith.constant 0 : index
    %c0_4 = arith.constant 0 : index
    %1 = vector.load %arg1[%c0_1, %c0_2, %c0_3, %c0_4] : memref<1x4x49x800xbf16, #tpu.memory_space<vmem>>, vector<1x1x49x800xbf16>
    %2 = vector.shape_cast %1 : vector<1x1x49x800xbf16> to vector<49x800xbf16>
    %cst = arith.constant dense<0.000000e+00> : vector<49x128xf32>
    %3 = tpu.matmul %2, %0, %cst {dimension_numbers = #tpu.dot_dimension_numbers<[1], [0], [0], [1], [0, 0, 1, 1], [], []>} : vector<49x800xbf16>, vector<800x128xbf16>, vector<49x128xf32> -> vector<49x128xf32>
    %c0_5 = arith.constant 0 : index
    %c1 = arith.constant 1 : index
    %c0_6 = arith.constant 0 : index
    %c0_7 = arith.constant 0 : index
    %4 = vector.load %arg1[%c0_5, %c1, %c0_6, %c0_7] : memref<1x4x49x800xbf16, #tpu.memory_space<vmem>>, vector<1x1x49x800xbf16>
    %5 = vector.shape_cast %4 : vector<1x1x49x800xbf16> to vector<49x800xbf16>
    %cst_8 = arith.constant dense<0.000000e+00> : vector<49x128xf32>
    %6 = tpu.matmul %5, %0, %cst_8 {dimension_numbers = #tpu.dot_dimension_numbers<[1], [0], [0], [1], [0, 0, 1, 1], [], []>} : vector<49x800xbf16>, vector<800x128xbf16>, vector<49x128xf32> -> vector<49x128xf32>
    %7 = arith.maximumf %3, %6 : vector<49x128xf32>
    %c0_9 = arith.constant 0 : index
    %c2 = arith.constant 2 : index
    %c0_10 = arith.constant 0 : index
    %c0_11 = arith.constant 0 : index
    %8 = vector.load %arg1[%c0_9, %c2, %c0_10, %c0_11] : memref<1x4x49x800xbf16, #tpu.memory_space<vmem>>, vector<1x1x49x800xbf16>
    %9 = vector.shape_cast %8 : vector<1x1x49x800xbf16> to vector<49x800xbf16>
    %cst_12 = arith.constant dense<0.000000e+00> : vector<49x128xf32>
    %10 = tpu.matmul %9, %0, %cst_12 {dimension_numbers = #tpu.dot_dimension_numbers<[1], [0], [0], [1], [0, 0, 1, 1], [], []>} : vector<49x800xbf16>, vector<800x128xbf16>, vector<49x128xf32> -> vector<49x128xf32>
    %11 = arith.maximumf %7, %10 : vector<49x128xf32>
    %c0_13 = arith.constant 0 : index
    %c3 = arith.constant 3 : index
    %c0_14 = arith.constant 0 : index
    %c0_15 = arith.constant 0 : index
    %12 = vector.load %arg1[%c0_13, %c3, %c0_14, %c0_15] : memref<1x4x49x800xbf16, #tpu.memory_space<vmem>>, vector<1x1x49x800xbf16>
    %13 = vector.shape_cast %12 : vector<1x1x49x800xbf16> to vector<49x800xbf16>
    %cst_16 = arith.constant dense<0.000000e+00> : vector<49x128xf32>
    %14 = tpu.matmul %13, %0, %cst_16 {dimension_numbers = #tpu.dot_dimension_numbers<[1], [0], [0], [1], [0, 0, 1, 1], [], []>} : vector<49x800xbf16>, vector<800x128xbf16>, vector<49x128xf32> -> vector<49x128xf32>
    %15 = arith.maximumf %11, %14 : vector<49x128xf32>
    %c0_17 = arith.constant 0 : index
    %c0_18 = arith.constant 0 : index
    %16 = vector.load %arg3[%c0_17, %c0_18] : memref<1x128xf32, #tpu.memory_space<vmem>>, vector<1x128xf32>
    %17 = vector.broadcast %16 : vector<1x128xf32> to vector<49x128xf32>
    %18 = arith.addf %15, %17 : vector<49x128xf32>
    %cst_19 = arith.constant 0.000000e+00 : f32
    %19 = vector.broadcast %cst_19 : f32 to vector<49x128xf32>
    %20 = arith.maximumf %18, %19 : vector<49x128xf32>
    %21 = arith.truncf %20 : vector<49x128xf32> to vector<49x128xbf16>
    %c0_20 = arith.constant 0 : index
    %c0_21 = arith.constant 0 : index
    %c0_22 = arith.constant 0 : index
    %22 = vector.load %arg4[%c0_20, %c0_21, %c0_22] : memref<1x49x128xbf16, #tpu.memory_space<vmem>>, vector<1x49x128xbf16>
    %23 = vector.shape_cast %22 : vector<1x49x128xbf16> to vector<49x128xbf16>
    %24 = vector.shape_cast %21 : vector<49x128xbf16> to vector<1x49x128xbf16>
    tpu.vector_store %arg4[%c0_20, %c0_21, %c0_22], %24 {strides = array<i32>} : memref<1x49x128xbf16, #tpu.memory_space<vmem>>, vector<1x49x128xbf16>,
    return
  }
  func.func @transform_0(%arg0: i32) -> (i32, i32, i32, i32) {
    %c0_i32 = arith.constant 0 : i32
    %c0_i32_0 = arith.constant 0 : i32
    %c0_i32_1 = arith.constant 0 : i32
    %c0_i32_2 = arith.constant 0 : i32
    return %arg0, %c0_i32, %c0_i32_0, %c0_i32_1 : i32, i32, i32, i32
  }
  func.func @transform_1(%arg0: i32) -> (i32, i32) {
    %c0_i32 = arith.constant 0 : i32
    %c0_i32_0 = arith.constant 0 : i32
    %c0_i32_1 = arith.constant 0 : i32
    return %c0_i32, %c0_i32_0 : i32, i32
  }
  func.func @transform_2(%arg0: i32) -> (i32, i32) {
    %c0_i32 = arith.constant 0 : i32
    %c0_i32_0 = arith.constant 0 : i32
    %c0_i32_1 = arith.constant 0 : i32
    return %c0_i32, %c0_i32_0 : i32, i32
  }
  func.func @transform_3(%arg0: i32) -> (i32, i32, i32) {
    %c0_i32 = arith.constant 0 : i32
    %c0_i32_0 = arith.constant 0 : i32
    %c0_i32_1 = arith.constant 0 : i32
    return %arg0, %c0_i32, %c0_i32_0 : i32, i32, i32
  }
}

module attributes {stable_mosaic.version = 11 : i64} {
  func.func @_linear_kernel(%arg0: i32, %arg1: memref<2x6272xbf16, #tpu.memory_space<vmem>>, %arg2: memref<6272x256xbf16, #tpu.memory_space<vmem>>, %arg3: memref<1x256xf32, #tpu.memory_space<vmem>>, %arg4: memref<2x256xf32, #tpu.memory_space<vmem>>) attributes {dimension_semantics = [#tpu.dimension_semantics<parallel>], iteration_bounds = array<i64: 4>, scalar_prefetch = 0 : i64, scratch_operands = 0 : i64, tpu.core_type = #tpu.core_type<tc>, window_params = [{pipeline_mode = #tpu.pipeline_mode<synchronous>, transform_indices = @transform_0, window_bounds = array<i64: 2, 6272>}, {transform_indices = @transform_1, window_bounds = array<i64: 6272, 256>}, {transform_indices = @transform_2, window_bounds = array<i64: 1, 256>}, {transform_indices = @transform_3, window_bounds = array<i64: 2, 256>}]} {
    %c0 = arith.constant 0 : index
    %c0_0 = arith.constant 0 : index
    %0 = vector.load %arg1[%c0, %c0_0] : memref<2x6272xbf16, #tpu.memory_space<vmem>>, vector<2x6272xbf16>
    %c0_1 = arith.constant 0 : index
    %c0_2 = arith.constant 0 : index
    %1 = vector.load %arg2[%c0_1, %c0_2] : memref<6272x256xbf16, #tpu.memory_space<vmem>>, vector<6272x256xbf16>
    %cst = arith.constant dense<0.000000e+00> : vector<2x256xf32>
    %2 = tpu.matmul %0, %1, %cst {dimension_numbers = #tpu.dot_dimension_numbers<[1], [0], [0], [1], [0, 0, 1, 1], [], []>} : vector<2x6272xbf16>, vector<6272x256xbf16>, vector<2x256xf32> -> vector<2x256xf32>
    %c0_3 = arith.constant 0 : index
    %c0_4 = arith.constant 0 : index
    %3 = vector.load %arg3[%c0_3, %c0_4] : memref<1x256xf32, #tpu.memory_space<vmem>>, vector<1x256xf32>
    %4 = vector.broadcast %3 : vector<1x256xf32> to vector<2x256xf32>
    %5 = arith.addf %2, %4 : vector<2x256xf32>
    %c0_5 = arith.constant 0 : index
    %c0_6 = arith.constant 0 : index
    %6 = vector.load %arg4[%c0_5, %c0_6] : memref<2x256xf32, #tpu.memory_space<vmem>>, vector<2x256xf32>
    tpu.vector_store %arg4[%c0_5, %c0_6], %5 {strides = array<i32>} : memref<2x256xf32, #tpu.memory_space<vmem>>, vector<2x256xf32>,
    return
  }
  func.func @transform_0(%arg0: i32) -> (i32, i32) {
    %c0_i32 = arith.constant 0 : i32
    %c0_i32_0 = arith.constant 0 : i32
    %c0_i32_1 = arith.constant 0 : i32
    return %c0_i32, %c0_i32_0 : i32, i32
  }
  func.func @transform_1(%arg0: i32) -> (i32, i32) {
    %c0_i32 = arith.constant 0 : i32
    %c0_i32_0 = arith.constant 0 : i32
    return %c0_i32, %arg0 : i32, i32
  }
  func.func @transform_2(%arg0: i32) -> (i32, i32) {
    %c0_i32 = arith.constant 0 : i32
    %c0_i32_0 = arith.constant 0 : i32
    return %c0_i32, %arg0 : i32, i32
  }
  func.func @transform_3(%arg0: i32) -> (i32, i32) {
    %c0_i32 = arith.constant 0 : i32
    %c0_i32_0 = arith.constant 0 : i32
    return %c0_i32, %arg0 : i32, i32
  }
}

module attributes {stable_mosaic.version = 11 : i64} {
  func.func @_linear_kernel(%arg0: i32, %arg1: memref<2x1024xf32, #tpu.memory_space<vmem>>, %arg2: memref<1024x128xbf16, #tpu.memory_space<vmem>>, %arg3: memref<1x128xf32, #tpu.memory_space<vmem>>, %arg4: memref<2x128xf32, #tpu.memory_space<vmem>>) attributes {dimension_semantics = [#tpu.dimension_semantics<parallel>], iteration_bounds = array<i64: 1>, scalar_prefetch = 0 : i64, scratch_operands = 0 : i64, tpu.core_type = #tpu.core_type<tc>, window_params = [{pipeline_mode = #tpu.pipeline_mode<synchronous>, transform_indices = @transform_0, window_bounds = array<i64: 2, 1024>}, {transform_indices = @transform_1, window_bounds = array<i64: 1024, 128>}, {transform_indices = @transform_2, window_bounds = array<i64: 1, 128>}, {transform_indices = @transform_3, window_bounds = array<i64: 2, 128>}]} {
    %c0 = arith.constant 0 : index
    %c0_0 = arith.constant 0 : index
    %0 = vector.load %arg1[%c0, %c0_0] : memref<2x1024xf32, #tpu.memory_space<vmem>>, vector<2x1024xf32>
    %1 = arith.truncf %0 : vector<2x1024xf32> to vector<2x1024xbf16>
    %c0_1 = arith.constant 0 : index
    %c0_2 = arith.constant 0 : index
    %2 = vector.load %arg2[%c0_1, %c0_2] : memref<1024x128xbf16, #tpu.memory_space<vmem>>, vector<1024x128xbf16>
    %cst = arith.constant dense<0.000000e+00> : vector<2x128xf32>
    %3 = tpu.matmul %1, %2, %cst {dimension_numbers = #tpu.dot_dimension_numbers<[1], [0], [0], [1], [0, 0, 1, 1], [], []>} : vector<2x1024xbf16>, vector<1024x128xbf16>, vector<2x128xf32> -> vector<2x128xf32>
    %c0_3 = arith.constant 0 : index
    %c0_4 = arith.constant 0 : index
    %4 = vector.load %arg3[%c0_3, %c0_4] : memref<1x128xf32, #tpu.memory_space<vmem>>, vector<1x128xf32>
    %5 = vector.broadcast %4 : vector<1x128xf32> to vector<2x128xf32>
    %6 = arith.addf %3, %5 : vector<2x128xf32>
    %c0_5 = arith.constant 0 : index
    %c0_6 = arith.constant 0 : index
    %7 = vector.load %arg4[%c0_5, %c0_6] : memref<2x128xf32, #tpu.memory_space<vmem>>, vector<2x128xf32>
    tpu.vector_store %arg4[%c0_5, %c0_6], %6 {strides = array<i32>} : memref<2x128xf32, #tpu.memory_space<vmem>>, vector<2x128xf32>,
    return
  }
  func.func @transform_0(%arg0: i32) -> (i32, i32) {
    %c0_i32 = arith.constant 0 : i32
    %c0_i32_0 = arith.constant 0 : i32
    %c0_i32_1 = arith.constant 0 : i32
    return %c0_i32, %c0_i32_0 : i32, i32
  }
  func.func @transform_1(%arg0: i32) -> (i32, i32) {
    %c0_i32 = arith.constant 0 : i32
    %c0_i32_0 = arith.constant 0 : i32
    return %c0_i32, %arg0 : i32, i32
  }
  func.func @transform_2(%arg0: i32) -> (i32, i32) {
    %c0_i32 = arith.constant 0 : i32
    %c0_i32_0 = arith.constant 0 : i32
    return %c0_i32, %arg0 : i32, i32
  }
  func.func @transform_3(%arg0: i32) -> (i32, i32) {
    %c0_i32 = arith.constant 0 : i32
    %c0_i32_0 = arith.constant 0 : i32
    return %c0_i32, %arg0 : i32, i32
  }
}

</mosaic_0001>

<bundles_post_ra>
// kernel: convnet_forward.4
= control target key start
LH: loop header
LB: loop body
LE: loop exit
PB: predicated region body
PF: predicated region fallthrough
CT: control target
= control target key end

     0   :  { %s2257_s12 = smov 0   ;;  %s2772_s0 = inlined_call_operand.vmem [shape: bf16[2,4,196,25], index: 0, kind: input, shape index: {}]   ;;  %s2773_s1 = inlined_call_operand.vmem [shape: bf16[25,128], index: 1, kind: input, shape index: {}]   ;;  %s2774_s2 = inlined_call_operand.vmem [shape: f32[1,128], index: 2, kind: input, shape index: {}]   ;;  %s2775_s3 = inlined_call_operand.vmem [shape: bf16[2,196,128], index: 3, kind: output, shape index: {}]  }
   0x1 LB: > { %s1563_s13 = sadd.s32 4294967295, %s2232_s12   ;;  %p1567_p0 = scmp.ge.s32.totalorder %s2232_s12, 1  ;;  %s2232_s12 = sphi %s2257_s12, %s13_s12  }
   0x2   : > { %p137_p1 = scmp.lt.s32.totalorder %s2232_s12, 3 }
   0x4   : > { %p138_p2 = pnand %p1567_p0, %p137_p1 }
   0x6   : > { %141 = sbr.rel (%p138_p2) target bundleno = 445 (0x1bd), region = 32 }
   0xd   : > { %v2172_v0 = vld [vmem:[%s2773_s1] sm:$0xff]   ;;  %v2234_v1 = vmov 0.0   ;;  %v2173_v2 = vld [vmem:[%s2773_s1 + $0x8] sm:$0x1f]   ;;  %vm315_vm0 = vcmask 1043456   ;;  %vm316_vm1 = vcmask 1044480  }
   0xe   : > { %1935 = vmatprep.subr.bf16.mxu0 %v2234_v1  ;;  %1991 = vmatprep.subr.bf16.mxu1 %v2234_v1  ;;  %p161_p3 = scmp.lt.s32.totalorder %s1563_s13, 1  ;;  %v2235_v3 = vmov 65535   ;;  %vm2236_vm2 = vmmov 0   ;;  %vm275_vm3 = vcmask 203776  }
   0xf   : > { %1936 = vmatpush3.bf16.msra.mxu0 %v2172_v0  ;;  %1992 = vmatpush3.bf16.msra.mxu1 %v2172_v0  ;;  %v317_v4 = vsel %vm315_vm0, 4294967295, %v2235_v3 }
  0x10   : > { %1937 = vmatprep.subr.bf16.mxu0 %v2234_v1  ;;  %1993 = vmatprep.subr.bf16.mxu1 %v2234_v1  ;;  %v318_v5 = vsel %vm316_vm1, %v317_v4, 0  ;;  %s2806_s13 = smov (!%p161_p3, %s1563_s13), 1 }
  0x11   : > { %1939 = vmatprep.mubr.msk.bf16.mxu0 %vm2236_vm2, %v2234_v1  ;;  %1995 = vmatprep.mubr.msk.bf16.mxu1 %vm2236_vm2, %v2234_v1  ;;  %v320_v6 = vand.u32 %v2173_v2, %v318_v5  ;;  %s2159_s18 = smul.u32 400, %s2806_s13 }
  0x12   : > { %s2160_s24 = smul.u32 100, %s2806_s13 }
  0x13   : > { %1938 = vmatpush3.bf16.msra.mxu0 %v320_v6  ;;  %1994 = vmatpush3.bf16.msra.mxu1 %v320_v6  ;;  %s2285_s21 = scalar_lea.vmem %s2772_s0, %s2159_s18 }
  0x14   : > { %2047 = vmatprep.subr.bf16.mxu0 %v2234_v1  ;;  %2103 = vmatprep.subr.bf16.mxu1 %v2234_v1  ;;  %v2174_v7 = vld [vmem:[%s2285_s21] sm:$0xff]   ;;  %v2176_v9 = vld [vmem:[%s2285_s21 + $0x8] sm:$0xff]   ;;  %v2178_v11 = vld [vmem:[%s2285_s21 + $0x10] sm:$0xff]   ;;  %s2665_s27 = scalar_lea.vmem %s2775_s3, %s2160_s24 }
  0x15   : > { %v2175_v8 = vld [vmem:[%s2285_s21 + $0x64] sm:$0xff]   ;;  %v2177_v10 = vld [vmem:[%s2285_s21 + $0x6c] sm:$0xff]   ;;  %v2179_v12 = vld [vmem:[%s2285_s21 + $0x74] sm:$0xff]  }
  0x16   : > { %1940 = vmatmul.mubr.msk.bf16.vlgmr.msra.gmra.mrb[0].mxu0 %vm275_vm3, %v2174_v7  ;;  %1996 = vmatmul.mubr.msk.bf16.vlgmr.msra.gmra.mrb[0].mxu1 %vm275_vm3, %v2175_v8  ;;  %v2180_v13 = vld [vmem:[%s2285_s21 + $0x18] sm:$0xff]   ;;  %v2182_v15 = vld [vmem:[%s2285_s21 + $0x20] sm:$0xff]   ;;  %v2184_v17 = vld [vmem:[%s2285_s21 + $0x28] sm:$0xff]  }
  0x17   : > { %2048 = vmatpush3.bf16.msra.mxu0 %v2172_v0  ;;  %2104 = vmatpush3.bf16.msra.mxu1 %v2172_v0  ;;  %v2181_v14 = vld [vmem:[%s2285_s21 + $0x7c] sm:$0xff]   ;;  %v2183_v16 = vld [vmem:[%s2285_s21 + $0x84] sm:$0xff]   ;;  %v2185_v18 = vld [vmem:[%s2285_s21 + $0x8c] sm:$0xff]  }
  0x18   : > { %1943 = vmatprep.mubr.msk.bf16.mxu0 %vm2236_vm2, %v2234_v1  ;;  %1999 = vmatprep.mubr.msk.bf16.mxu1 %vm2236_vm2, %v2234_v1  ;;  %v2186_v19 = vld [vmem:[%s2285_s21 + $0x30] sm:$0xff]   ;;  %v2188_v21 = vld [vmem:[%s2285_s21 + $0x38] sm:$0xff]   ;;  %v2190_v23 = vld [vmem:[%s2285_s21 + $0x40] sm:$0xff]  }
  0x19   : > { %2049 = vmatprep.subr.bf16.mxu0 %v2234_v1  ;;  %2105 = vmatprep.subr.bf16.mxu1 %v2234_v1  ;;  %v2187_v20 = vld [vmem:[%s2285_s21 + $0x94] sm:$0xff]   ;;  %v2189_v22 = vld [vmem:[%s2285_s21 + $0x9c] sm:$0xff]   ;;  %v2191_v24 = vld [vmem:[%s2285_s21 + $0xa4] sm:$0xff]  }
  0x1a   : > { %v2192_v25 = vld [vmem:[%s2285_s21 + $0x48] sm:$0xff]   ;;  %v2194_v27 = vld [vmem:[%s2285_s21 + $0x50] sm:$0xff]   ;;  %v2196_v29 = vld [vmem:[%s2285_s21 + $0x58] sm:$0xff]  }
  0x1b   : > { %2050 = vmatpush3.bf16.msra.mxu0 %v320_v6  ;;  %2106 = vmatpush3.bf16.msra.mxu1 %v320_v6  ;;  %v2193_v26 = vld [vmem:[%s2285_s21 + $0xac] sm:$0xff]   ;;  %v2195_v28 = vld [vmem:[%s2285_s21 + $0xb4] sm:$0xff]   ;;  %v2197_v30 = vld [vmem:[%s2285_s21 + $0xbc] sm:$0xff]  }
  0x1c   : > { %v2198_v31 = vld [vmem:[%s2285_s21 + $0x60] ss:$0 sps:$4 sm:$0x33]   ;;  %v2199_v32 = vld [vmem:[%s2285_s21 + $0xc4] ss:$0 sps:$4 sm:$0x33]  }
  0x1d   : > { %v2200_v33 = vld [vmem:[%s2285_s21 + $0xc8] sm:$0xff]   ;;  %v2202_v35 = vld [vmem:[%s2285_s21 + $0xd0] sm:$0xff]   ;;  %v2204_v37 = vld [vmem:[%s2285_s21 + $0xd8] sm:$0xff]  }
  0x1e   : > { %1944 = vmatmul.mubr.msk.bf16.gmra.mrb[4].mxu0 %vm275_vm3, %v2176_v9  ;;  %2000 = vmatmul.mubr.msk.bf16.gmra.mrb[4].mxu1 %vm275_vm3, %v2177_v10  ;;  %v2201_v34 = vld [vmem:[%s2285_s21 + $0x12c] sm:$0xff]   ;;  %v2203_v36 = vld [vmem:[%s2285_s21 + $0x134] sm:$0xff]   ;;  %v2205_v38 = vld [vmem:[%s2285_s21 + $0x13c] sm:$0xff]  }
  0x1f   : > { %1947 = vmatprep.mubr.msk.bf16.mxu0 %vm2236_vm2, %v2234_v1  ;;  %2003 = vmatprep.mubr.msk.bf16.mxu1 %vm2236_vm2, %v2234_v1  ;;  %v2206_v39 = vld [vmem:[%s2285_s21 + $0xe0] sm:$0xff]   ;;  %v2208_v41 = vld [vmem:[%s2285_s21 + $0xe8] sm:$0xff]   ;;  %v2210_v43 = vld [vmem:[%s2285_s21 + $0xf0] sm:$0xff]  }
  0x20   : > { %v2207_v40 = vld [vmem:[%s2285_s21 + $0x144] sm:$0xff]   ;;  %v2209_v42 = vld [vmem:[%s2285_s21 + $0x14c] sm:$0xff]   ;;  %v2211_v44 = vld [vmem:[%s2285_s21 + $0x154] sm:$0xff]  }
  0x21   : > { %v2212_v45 = vld [vmem:[%s2285_s21 + $0xf8] sm:$0xff]   ;;  %v2214_v47 = vld [vmem:[%s2285_s21 + $0x100] sm:$0xff]   ;;  %v2216_v49 = vld [vmem:[%s2285_s21 + $0x108] sm:$0xff]  }
  0x22   : > { %v2213_v46 = vld [vmem:[%s2285_s21 + $0x15c] sm:$0xff]   ;;  %v2215_v48 = vld [vmem:[%s2285_s21 + $0x164] sm:$0xff]   ;;  %v2217_v50 = vld [vmem:[%s2285_s21 + $0x16c] sm:$0xff]  }
  0x23   : > { %v2218_v51 = vld [vmem:[%s2285_s21 + $0x110] sm:$0xff]   ;;  %v2220_v53 = vld [vmem:[%s2285_s21 + $0x118] sm:$0xff]   ;;  %v2222_v55 = vld [vmem:[%s2285_s21 + $0x120] sm:$0xff]  }
  0x24   : > { %v2219_v52 = vld [vmem:[%s2285_s21 + $0x174] sm:$0xff]   ;;  %v2221_v54 = vld [vmem:[%s2285_s21 + $0x17c] sm:$0xff]   ;;  %v2223_v56 = vld [vmem:[%s2285_s21 + $0x184] sm:$0xff]  }
  0x25   : > { %v2224_v57 = vld [vmem:[%s2285_s21 + $0x128] ss:$0 sps:$4 sm:$0x33]   ;;  %v2225_v58 = vld [vmem:[%s2285_s21 + $0x18c] ss:$0 sps:$4 sm:$0x33]  }
  0x26   : > { %1948 = vmatmul.mubr.msk.bf16.gmra.mrb[8].mxu0 %vm275_vm3, %v2178_v11  ;;  %2004 = vmatmul.mubr.msk.bf16.gmra.mrb[8].mxu1 %vm275_vm3, %v2179_v12 }
  0x27   : > { %1951 = vmatprep.mubr.msk.bf16.mxu0 %vm2236_vm2, %v2234_v1  ;;  %2007 = vmatprep.mubr.msk.bf16.mxu1 %vm2236_vm2, %v2234_v1 }
  0x2e   : > { %1952 = vmatmul.mubr.msk.bf16.gmra.mrb[12].mxu0 %vm275_vm3, %v2180_v13  ;;  %2008 = vmatmul.mubr.msk.bf16.gmra.mrb[12].mxu1 %vm275_vm3, %v2181_v14 }
  0x2f   : > { %1955 = vmatprep.mubr.msk.bf16.mxu0 %vm2236_vm2, %v2234_v1  ;;  %2011 = vmatprep.mubr.msk.bf16.mxu1 %vm2236_vm2, %v2234_v1 }
  0x36   : > { %1956 = vmatmul.mubr.msk.bf16.gmra.mrb[16].mxu0 %vm275_vm3, %v2182_v15  ;;  %2012 = vmatmul.mubr.msk.bf16.gmra.mrb[16].mxu1 %vm275_vm3, %v2183_v16 }
  0x37   : > { %1959 = vmatprep.mubr.msk.bf16.mxu0 %vm2236_vm2, %v2234_v1  ;;  %2015 = vmatprep.mubr.msk.bf16.mxu1 %vm2236_vm2, %v2234_v1 }
  0x3e   : > { %1960 = vmatmul.mubr.msk.bf16.gmra.mrb[20].mxu0 %vm275_vm3, %v2184_v17  ;;  %2016 = vmatmul.mubr.msk.bf16.gmra.mrb[20].mxu1 %vm275_vm3, %v2185_v18 }
  0x3f   : > { %1963 = vmatprep.mubr.msk.bf16.mxu0 %vm2236_vm2, %v2234_v1  ;;  %2019 = vmatprep.mubr.msk.bf16.mxu1 %vm2236_vm2, %v2234_v1 }
  0x46   : > { %1964 = vmatmul.mubr.msk.bf16.gmra.mrb[24].mxu0 %vm275_vm3, %v2186_v19  ;;  %2020 = vmatmul.mubr.msk.bf16.gmra.mrb[24].mxu1 %vm275_vm3, %v2187_v20 }
  0x47   : > { %1967 = vmatprep.mubr.msk.bf16.mxu0 %vm2236_vm2, %v2234_v1  ;;  %2023 = vmatprep.mubr.msk.bf16.mxu1 %vm2236_vm2, %v2234_v1 }
  0x4e   : > { %1968 = vmatmul.mubr.msk.bf16.gmra.mrb[28].mxu0 %vm275_vm3, %v2188_v21  ;;  %2024 = vmatmul.mubr.msk.bf16.gmra.mrb[28].mxu1 %vm275_vm3, %v2189_v22 }
  0x4f   : > { %1971 = vmatprep.mubr.msk.bf16.mxu0 %vm2236_vm2, %v2234_v1  ;;  %2027 = vmatprep.mubr.msk.bf16.mxu1 %vm2236_vm2, %v2234_v1 }
  0x56   : > { %1972 = vmatmul.mubr.msk.bf16.gmra.mrb[32].mxu0 %vm275_vm3, %v2190_v23  ;;  %2028 = vmatmul.mubr.msk.bf16.gmra.mrb[32].mxu1 %vm275_vm3, %v2191_v24 }
  0x57   : > { %1975 = vmatprep.mubr.msk.bf16.mxu0 %vm2236_vm2, %v2234_v1  ;;  %2031 = vmatprep.mubr.msk.bf16.mxu1 %vm2236_vm2, %v2234_v1 }
  0x5e   : > { %1976 = vmatmul.mubr.msk.bf16.gmra.mrb[36].mxu0 %vm275_vm3, %v2192_v25  ;;  %2032 = vmatmul.mubr.msk.bf16.gmra.mrb[36].mxu1 %vm275_vm3, %v2193_v26 }
  0x5f   : > { %1979 = vmatprep.mubr.msk.bf16.mxu0 %vm2236_vm2, %v2234_v1  ;;  %2035 = vmatprep.mubr.msk.bf16.mxu1 %vm2236_vm2, %v2234_v1 }
  0x66   : > { %1980 = vmatmul.mubr.msk.bf16.gmra.mrb[40].mxu0 %vm275_vm3, %v2194_v27  ;;  %2036 = vmatmul.mubr.msk.bf16.gmra.mrb[40].mxu1 %vm275_vm3, %v2195_v28 }
  0x67   : > { %1983 = vmatprep.mubr.msk.bf16.mxu0 %vm2236_vm2, %v2234_v1  ;;  %2039 = vmatprep.mubr.msk.bf16.mxu1 %vm2236_vm2, %v2234_v1 }
  0x6e   : > { %1984 = vmatmul.mubr.msk.bf16.gmra.mrb[44].mxu0 %vm275_vm3, %v2196_v29  ;;  %2040 = vmatmul.mubr.msk.bf16.gmra.mrb[44].mxu1 %vm275_vm3, %v2197_v30 }
  0x6f   : > { %1987 = vmatprep.mubr.msk.bf16.mxu0 %vm2236_vm2, %v2234_v1  ;;  %2043 = vmatprep.mubr.msk.bf16.mxu1 %vm2236_vm2, %v2234_v1 }
  0x76   : > { %1988 = vmatmul.mubr.msk.bf16.gmra.mrb[48].mxu0 %vm275_vm3, %v2198_v31  ;;  %2044 = vmatmul.mubr.msk.bf16.gmra.mrb[48].mxu1 %vm275_vm3, %v2199_v32 }
  0x77   : > { %2051 = vmatprep.mubr.msk.bf16.mxu0 %vm2236_vm2, %v2234_v1  ;;  %2107 = vmatprep.mubr.msk.bf16.mxu1 %vm2236_vm2, %v2234_v1 }
  0x7e   : > { %2052 = vmatmul.mubr.msk.bf16.vlgmr.msra.gmra.mrb[52].mxu0 %vm275_vm3, %v2200_v33  ;;  %2108 = vmatmul.mubr.msk.bf16.vlgmr.msra.gmra.mrb[52].mxu1 %vm275_vm3, %v2201_v34 }
  0x7f   : > { %2055 = vmatprep.mubr.msk.bf16.mxu0 %vm2236_vm2, %v2234_v1  ;;  %2111 = vmatprep.mubr.msk.bf16.mxu1 %vm2236_vm2, %v2234_v1 }
  0x86   : > { %2056 = vmatmul.mubr.msk.bf16.gmra.mrb[56].mxu0 %vm275_vm3, %v2202_v35  ;;  %2112 = vmatmul.mubr.msk.bf16.gmra.mrb[56].mxu1 %vm275_vm3, %v2203_v36 }
  0x87   : > { %2059 = vmatprep.mubr.msk.bf16.mxu0 %vm2236_vm2, %v2234_v1  ;;  %2115 = vmatprep.mubr.msk.bf16.mxu1 %vm2236_vm2, %v2234_v1 }
  0x8e   : > { %2060 = vmatmul.mubr.msk.bf16.gmra.mrb[60].mxu0 %vm275_vm3, %v2204_v37  ;;  %2116 = vmatmul.mubr.msk.bf16.gmra.mrb[60].mxu1 %vm275_vm3, %v2205_v38 }
  0x8f   : > { %2063 = vmatprep.mubr.msk.bf16.mxu0 %vm2236_vm2, %v2234_v1  ;;  %2119 = vmatprep.mubr.msk.bf16.mxu1 %vm2236_vm2, %v2234_v1 }
  0x96   : > { %2064 = vmatmul.mubr.msk.bf16.gmra.mrb[64].mxu0 %vm275_vm3, %v2206_v39  ;;  %2120 = vmatmul.mubr.msk.bf16.gmra.mrb[64].mxu1 %vm275_vm3, %v2207_v40 }
  0x97   : > { %2067 = vmatprep.mubr.msk.bf16.mxu0 %vm2236_vm2, %v2234_v1  ;;  %2123 = vmatprep.mubr.msk.bf16.mxu1 %vm2236_vm2, %v2234_v1 }
  0x9e   : > { %2068 = vmatmul.mubr.msk.bf16.gmra.mrb[68].mxu0 %vm275_vm3, %v2208_v41  ;;  %2124 = vmatmul.mubr.msk.bf16.gmra.mrb[68].mxu1 %vm275_vm3, %v2209_v42 }
  0x9f   : > { %2071 = vmatprep.mubr.msk.bf16.mxu0 %vm2236_vm2, %v2234_v1  ;;  %2127 = vmatprep.mubr.msk.bf16.mxu1 %vm2236_vm2, %v2234_v1 }
  0xa6   : > { %2072 = vmatmul.mubr.msk.bf16.gmra.mrb[72].mxu0 %vm275_vm3, %v2210_v43  ;;  %2128 = vmatmul.mubr.msk.bf16.gmra.mrb[72].mxu1 %vm275_vm3, %v2211_v44 }
  0xa7   : > { %2075 = vmatprep.mubr.msk.bf16.mxu0 %vm2236_vm2, %v2234_v1  ;;  %2131 = vmatprep.mubr.msk.bf16.mxu1 %vm2236_vm2, %v2234_v1 }
  0xae   : > { %2076 = vmatmul.mubr.msk.bf16.gmra.mrb[76].mxu0 %vm275_vm3, %v2212_v45  ;;  %2132 = vmatmul.mubr.msk.bf16.gmra.mrb[76].mxu1 %vm275_vm3, %v2213_v46 }
  0xaf   : > { %2079 = vmatprep.mubr.msk.bf16.mxu0 %vm2236_vm2, %v2234_v1  ;;  %2135 = vmatprep.mubr.msk.bf16.mxu1 %vm2236_vm2, %v2234_v1 }
  0xb6   : > { %2080 = vmatmul.mubr.msk.bf16.gmra.mrb[80].mxu0 %vm275_vm3, %v2214_v47  ;;  %2136 = vmatmul.mubr.msk.bf16.gmra.mrb[80].mxu1 %vm275_vm3, %v2215_v48 }
  0xb7   : > { %2083 = vmatprep.mubr.msk.bf16.mxu0 %vm2236_vm2, %v2234_v1  ;;  %2139 = vmatprep.mubr.msk.bf16.mxu1 %vm2236_vm2, %v2234_v1 }
  0xbe   : > { %2084 = vmatmul.mubr.msk.bf16.gmra.mrb[84].mxu0 %vm275_vm3, %v2216_v49  ;;  %2140 = vmatmul.mubr.msk.bf16.gmra.mrb[84].mxu1 %vm275_vm3, %v2217_v50 }
  0xbf   : > { %2087 = vmatprep.mubr.msk.bf16.mxu0 %vm2236_vm2, %v2234_v1  ;;  %2143 = vmatprep.mubr.msk.bf16.mxu1 %vm2236_vm2, %v2234_v1 }
  0xc6   : > { %2088 = vmatmul.mubr.msk.bf16.gmra.mrb[88].mxu0 %vm275_vm3, %v2218_v51  ;;  %2144 = vmatmul.mubr.msk.bf16.gmra.mrb[88].mxu1 %vm275_vm3, %v2219_v52 }
  0xc7   : > { %2091 = vmatprep.mubr.msk.bf16.mxu0 %vm2236_vm2, %v2234_v1  ;;  %2147 = vmatprep.mubr.msk.bf16.mxu1 %vm2236_vm2, %v2234_v1 }
  0xce   : > { %2092 = vmatmul.mubr.msk.bf16.gmra.mrb[92].mxu0 %vm275_vm3, %v2220_v53  ;;  %2148 = vmatmul.mubr.msk.bf16.gmra.mrb[92].mxu1 %vm275_vm3, %v2221_v54 }
  0xcf   : > { %2095 = vmatprep.mubr.msk.bf16.mxu0 %vm2236_vm2, %v2234_v1  ;;  %2151 = vmatprep.mubr.msk.bf16.mxu1 %vm2236_vm2, %v2234_v1 }
  0xd6   : > { %2096 = vmatmul.mubr.msk.bf16.gmra.mrb[96].mxu0 %vm275_vm3, %v2222_v55  ;;  %2152 = vmatmul.mubr.msk.bf16.gmra.mrb[96].mxu1 %vm275_vm3, %v2223_v56 }
  0xd7   : > { %2099 = vmatprep.mubr.msk.bf16.mxu0 %vm2236_vm2, %v2234_v1  ;;  %2155 = vmatprep.mubr.msk.bf16.mxu1 %vm2236_vm2, %v2234_v1 }
  0xde   : > { %2100 = vmatmul.mubr.msk.bf16.gmra.mrb[100].mxu0 %vm275_vm3, %v2224_v57  ;;  %2156 = vmatmul.mubr.msk.bf16.gmra.mrb[100].mxu1 %vm275_vm3, %v2225_v58 }
  0xe9   : > { %v2495_v59 = vpop.f32.mrb[0].mxu0  ;;  %v2497_v60 = vpop.f32.mrb[0].mxu1 }
  0xea   : > { %v1941_v61 = vpop.f32.mrb[1].mxu0  ;;  %v722_v62 = vmax.f32 %v2495_v59, %v2497_v60  ;;  %v1997_v63 = vpop.f32.mrb[1].mxu1 }
  0xeb   : > { %v2501_v0 = vpop.f32.mrb[2].mxu0  ;;  %v2503_v2 = vpop.f32.mrb[2].mxu1 }
  0xec   : > { %v1942_v1 = vpop.f32.mrb[3].mxu0  ;;  %v723_v3 = vmax.f32 %v2501_v0, %v2503_v2  ;;  %v1998_v4 = vpop.f32.mrb[3].mxu1 }
  0xf1   : > { %v2507_v5 = vpop.f32.mrb[4].mxu0  ;;  %v2509_v6 = vpop.f32.mrb[4].mxu1 }
  0xf2   : > { %v1945_v7 = vpop.f32.mrb[5].mxu0  ;;  %v2001_v9 = vpop.f32.mrb[5].mxu1 }
  0xf3   : > { %v2513_v10 = vpop.f32.mrb[6].mxu0  ;;  %v2515_v11 = vpop.f32.mrb[6].mxu1 }
  0xf4   : > { %v1946_v12 = vpop.f32.mrb[7].mxu0  ;;  %v2002_v14 = vpop.f32.mrb[7].mxu1 }
  0xf9   : > { %v2519_v15 = vpop.f32.mrb[8].mxu0  ;;  %v2521_v16 = vpop.f32.mrb[8].mxu1 }
  0xfa   : > { %v1949_v17 = vpop.f32.mrb[9].mxu0  ;;  %v2005_v19 = vpop.f32.mrb[9].mxu1 }
  0xfb   : > { %v2525_v20 = vpop.f32.mrb[10].mxu0  ;;  %v2527_v21 = vpop.f32.mrb[10].mxu1 }
  0xfc   : > { %v1950_v22 = vpop.f32.mrb[11].mxu0  ;;  %v2006_v24 = vpop.f32.mrb[11].mxu1 }
 0x101   : > { %v2531_v25 = vpop.f32.mrb[12].mxu0  ;;  %v2533_v26 = vpop.f32.mrb[12].mxu1 }
 0x102   : > { %v1953_v27 = vpop.f32.mrb[13].mxu0  ;;  %v2009_v29 = vpop.f32.mrb[13].mxu1 }
 0x103   : > { %v2537_v30 = vpop.f32.mrb[14].mxu0  ;;  %v2539_v31 = vpop.f32.mrb[14].mxu1 }
 0x104   : > { %v1954_v32 = vpop.f32.mrb[15].mxu0  ;;  %v2010_v34 = vpop.f32.mrb[15].mxu1 }
 0x109   : > { %v2543_v35 = vpop.f32.mrb[16].mxu0  ;;  %v2545_v36 = vpop.f32.mrb[16].mxu1 }
 0x10a   : > { %v1957_v37 = vpop.f32.mrb[17].mxu0  ;;  %v2013_v39 = vpop.f32.mrb[17].mxu1 }
 0x10b   : > { %v2549_v40 = vpop.f32.mrb[18].mxu0  ;;  %v2551_v41 = vpop.f32.mrb[18].mxu1 }
 0x10c   : > { %v1958_v42 = vpop.f32.mrb[19].mxu0  ;;  %v2014_v44 = vpop.f32.mrb[19].mxu1 }
 0x111   : > { %v2555_v45 = vpop.f32.mrb[20].mxu0  ;;  %v2557_v46 = vpop.f32.mrb[20].mxu1 }
 0x112   : > { %v1961_v47 = vpop.f32.mrb[21].mxu0  ;;  %v2017_v49 = vpop.f32.mrb[21].mxu1 }
 0x113   : > { %v2561_v50 = vpop.f32.mrb[22].mxu0  ;;  %v2563_v51 = vpop.f32.mrb[22].mxu1 }
 0x114   : > { %v1962_v52 = vpop.f32.mrb[23].mxu0  ;;  %v2018_v54 = vpop.f32.mrb[23].mxu1 }
 0x119   : > { %v2567_v55 = vpop.f32.mrb[24].mxu0  ;;  %v2569_v56 = vpop.f32.mrb[24].mxu1 }
 0x11a   : > { %v1965_v57 = vpop.f32.mrb[25].mxu0  ;;  %v2021_v61 = vpop.f32.mrb[25].mxu1 }
 0x11b   : > { %v2573_v63 = vpop.f32.mrb[26].mxu0  ;;  %v2575_v1 = vpop.f32.mrb[26].mxu1 }
 0x11c   : > { %v1966_v4 = vpop.f32.mrb[27].mxu0  ;;  %v2022_v9 = vpop.f32.mrb[27].mxu1 }
 0x121   : > { %v2579_v12 = vpop.f32.mrb[28].mxu0  ;;  %v2581_v14 = vpop.f32.mrb[28].mxu1 }
 0x122   : > { %v1969_v17 = vpop.f32.mrb[29].mxu0  ;;  %v2025_v22 = vpop.f32.mrb[29].mxu1 }
 0x123   : > { %v2585_v24 = vpop.f32.mrb[30].mxu0  ;;  %v2587_v27 = vpop.f32.mrb[30].mxu1 }
 0x124   : > { %v1970_v29 = vpop.f32.mrb[31].mxu0  ;;  %v2026_v34 = vpop.f32.mrb[31].mxu1 }
 0x129   : > { %v2591_v37 = vpop.f32.mrb[32].mxu0  ;;  %v2593_v39 = vpop.f32.mrb[32].mxu1 }
 0x12a   : > { %v1973_v42 = vpop.f32.mrb[33].mxu0  ;;  %v2029_v47 = vpop.f32.mrb[33].mxu1 }
 0x12b   : > { %v2597_v49 = vpop.f32.mrb[34].mxu0  ;;  %v2599_v52 = vpop.f32.mrb[34].mxu1 }
 0x12c   : > { %v1974_v54 = vpop.f32.mrb[35].mxu0  ;;  %v2030_v61 = vpop.f32.mrb[35].mxu1 }
 0x131   : > { %v2603_v4 = vpop.f32.mrb[36].mxu0  ;;  %v2605_v9 = vpop.f32.mrb[36].mxu1 }
 0x132   : > { %v1977_v17 = vpop.f32.mrb[37].mxu0  ;;  %v2033_v29 = vpop.f32.mrb[37].mxu1 }
 0x133   : > { %v2609_v34 = vpop.f32.mrb[38].mxu0  ;;  %v2611_v42 = vpop.f32.mrb[38].mxu1 }
 0x134   : > { %v1978_v47 = vpop.f32.mrb[39].mxu0  ;;  %v2034_v44 = vpop.f32.mrb[39].mxu1 }
 0x139   : > { %v2615_v57 = vpop.f32.mrb[40].mxu0  ;;  %v2617_v61 = vpop.f32.mrb[40].mxu1 }
 0x13a   : > { %v1981_v32 = vpop.f32.mrb[41].mxu0  ;;  %v2037_v19 = vpop.f32.mrb[41].mxu1 }
 0x13b   : > { %v2621_v22 = vpop.f32.mrb[42].mxu0  ;;  %v2623_v29 = vpop.f32.mrb[42].mxu1 }
 0x13c   : > { %v1982_v7 = vpop.f32.mrb[43].mxu0  ;;  %v2038_v58 = vpop.f32.mrb[43].mxu1 }
 0x141   : > { %v2627_v54 = vpop.f32.mrb[44].mxu0  ;;  %v2629_v44 = vpop.f32.mrb[44].mxu1 }
 0x142   : > { %v1985_v53 = vpop.f32.mrb[45].mxu0  ;;  %v2041_v48 = vpop.f32.mrb[45].mxu1 }
 0x143   : > { %v2633_v17 = vpop.f32.mrb[46].mxu0  ;;  %v2635_v19 = vpop.f32.mrb[46].mxu1 }
 0x144   : > { %v1986_v43 = vpop.f32.mrb[47].mxu0  ;;  %v2042_v38 = vpop.f32.mrb[47].mxu1 }
 0x149   : > { %v2639_v47 = vpop.f32.mrb[48].mxu0  ;;  %v2641_v58 = vpop.f32.mrb[48].mxu1 }
 0x14a   : > { %2778 = vst [vmem:[#allocation2_spill] sm:$0xff] %v2639_v47  ;;  %2779 = vst [vmem:[#allocation3_spill] sm:$0xff] %v2641_v58  ;;  %v1989_v33 = vpop.f32.mrb[49].mxu0  ;;  %v2045_v28 = vpop.f32.mrb[49].mxu1 }
 0x14b   : > { %v455_v32 = vpop.f32.mrb[50].mxu0  ;;  %v719_v48 = vpop.f32.mrb[50].mxu1  ;;  %v2651_v33 = vld [vmem:[%s2774_s2] ss:$0 sm:$0xff] }
 0x14c   : > { %v1990_v23 = vpop.f32.mrb[51].mxu0  ;;  %v2046_v18 = vpop.f32.mrb[51].mxu1 }
 0x151   : > { %v909_v13 = vpop.f32.mrb[52].mxu0  ;;  %v1198_v38 = vpop.f32.mrb[52].mxu1 }
 0x152   : > { %v1011_v43 = vmax.f32 %v722_v62, %v909_v13  ;;  %v2053_v7 = vpop.f32.mrb[53].mxu0  ;;  %v2109_v8 = vpop.f32.mrb[53].mxu1 }
 0x153   : > { %v912_v53 = vpop.f32.mrb[54].mxu0  ;;  %v1201_v18 = vpop.f32.mrb[54].mxu1  ;;  %v2780_v8 = vmax.f32 %v2507_v5, %v2509_v6 }
 0x154   : > { %v1300_v28 = vmax.f32 %v1011_v43, %v1198_v38  ;;  %v1012_v23 = vmax.f32 %v723_v3, %v912_v53  ;;  %v2054_v32 = vpop.f32.mrb[55].mxu0  ;;  %v2110_v48 = vpop.f32.mrb[55].mxu1 }
 0x156   : > { %v1332_v59 = vadd.f32 %v2651_v33, %v1300_v28  ;;  %v1301_v60 = vmax.f32 %v1012_v23, %v1201_v18  ;;  %v2781_v28 = vmax.f32 %v2513_v10, %v2515_v11 }
 0x158   : > { %v1333_v62 = vadd.f32 %v2651_v33, %v1301_v60  ;;  %v1357_v7 = vmax.f32 %v1332_v59, 0.0 }
 0x159   : > { %v917_v13 = vpop.f32.mrb[56].mxu0  ;;  %v1206_v38 = vpop.f32.mrb[56].mxu1 }
 0x15a   : > { %v1358_v58 = vmax.f32 %v1333_v62, 0.0  ;;  %v1013_v43 = vmax.f32 %v2780_v8, %v917_v13  ;;  %v2057_v47 = vpop.f32.mrb[57].mxu0  ;;  %v2113_v0 = vpop.f32.mrb[57].mxu1 }
 0x15b   : > { %v920_v2 = vpop.f32.mrb[58].mxu0  ;;  %v1209_v18 = vpop.f32.mrb[58].mxu1  ;;  %v2783_v0 = vmax.f32 %v2525_v20, %v2527_v21 }
 0x15c   : > { %v1807_v3 = vpack.c.bf16 %v1358_v58, %v1357_v7  ;;  %v1302_v53 = vmax.f32 %v1013_v43, %v1206_v38  ;;  %v1014_v23 = vmax.f32 %v2781_v28, %v920_v2  ;;  %v2058_v32 = vpop.f32.mrb[59].mxu0  ;;  %v2114_v5 = vpop.f32.mrb[59].mxu1  ;;  %v2782_v58 = vmax.f32 %v2519_v15, %v2521_v16 }
 0x15e   : > { %1808 = vst [vmem:[%s2665_s27] sm:$0xff] %v1807_v3   ;;  %v1334_v6 = vadd.f32 %v2651_v33, %v1302_v53  ;;  %v1303_v47 = vmax.f32 %v1014_v23, %v1209_v18 }
 0x160   : > { %v1335_v48 = vadd.f32 %v2651_v33, %v1303_v47  ;;  %v1359_v60 = vmax.f32 %v1334_v6, 0.0  ;;  %v2784_v6 = vmax.f32 %v2531_v25, %v2533_v26 }
 0x161   : > { %v925_v59 = vpop.f32.mrb[60].mxu0  ;;  %v1214_v7 = vpop.f32.mrb[60].mxu1 }
 0x162   : > { %v1360_v62 = vmax.f32 %v1335_v48, 0.0  ;;  %v1015_v13 = vmax.f32 %v2782_v58, %v925_v59  ;;  %v2061_v10 = vpop.f32.mrb[61].mxu0  ;;  %v2117_v11 = vpop.f32.mrb[61].mxu1  ;;  %v2785_v58 = vmax.f32 %v2537_v30, %v2539_v31 }
 0x163   : > { %v928_v8 = vpop.f32.mrb[62].mxu0  ;;  %v1217_v3 = vpop.f32.mrb[62].mxu1 }
 0x164   : > { %v1812_v43 = vpack.c.bf16 %v1360_v62, %v1359_v60  ;;  %v1304_v38 = vmax.f32 %v1015_v13, %v1214_v7  ;;  %v1016_v2 = vmax.f32 %v2783_v0, %v928_v8  ;;  %v2062_v53 = vpop.f32.mrb[63].mxu0  ;;  %v2118_v28 = vpop.f32.mrb[63].mxu1 }
 0x166   : > { %1864 = vst [vmem:[%s2665_s27 + $0x8] sm:$0xff] %v1812_v43   ;;  %v1336_v23 = vadd.f32 %v2651_v33, %v1304_v38  ;;  %v1305_v18 = vmax.f32 %v1016_v2, %v1217_v3  ;;  %v2786_v2 = vmax.f32 %v2543_v35, %v2545_v36 }
 0x168   : > { %v1337_v15 = vadd.f32 %v2651_v33, %v1305_v18  ;;  %v1361_v32 = vmax.f32 %v1336_v23, 0.0 }
 0x169   : > { %v933_v16 = vpop.f32.mrb[64].mxu0  ;;  %v1222_v48 = vpop.f32.mrb[64].mxu1 }
 0x16a   : > { %v1362_v5 = vmax.f32 %v1337_v15, 0.0  ;;  %v1017_v47 = vmax.f32 %v2784_v6, %v933_v16  ;;  %v2065_v20 = vpop.f32.mrb[65].mxu0  ;;  %v2121_v21 = vpop.f32.mrb[65].mxu1  ;;  %v2787_v15 = vmax.f32 %v2549_v40, %v2551_v41 }
 0x16b   : > { %v936_v59 = vpop.f32.mrb[66].mxu0  ;;  %v1225_v7 = vpop.f32.mrb[66].mxu1 }
 0x16c   : > { %v1817_v60 = vpack.c.bf16 %v1362_v5, %v1361_v32  ;;  %v1306_v62 = vmax.f32 %v1017_v47, %v1222_v48  ;;  %v1018_v13 = vmax.f32 %v2785_v58, %v936_v59  ;;  %v2066_v10 = vpop.f32.mrb[67].mxu0  ;;  %v2122_v11 = vpop.f32.mrb[67].mxu1  ;;  %v2788_v59 = vmax.f32 %v2555_v45, %v2557_v46 }
 0x16d   : > { %v2789_v10 = vmax.f32 %v2561_v50, %v2563_v51 }
 0x16e   : > { %1865 = vst [vmem:[%s2665_s27 + $0x10] sm:$0xff] %v1817_v60   ;;  %v1338_v8 = vadd.f32 %v2651_v33, %v1306_v62  ;;  %v1307_v43 = vmax.f32 %v1018_v13, %v1225_v7 }
 0x170   : > { %v1339_v25 = vadd.f32 %v2651_v33, %v1307_v43  ;;  %v1363_v38 = vmax.f32 %v1338_v8, 0.0 }
 0x171   : > { %v941_v26 = vpop.f32.mrb[68].mxu0  ;;  %v1230_v53 = vpop.f32.mrb[68].mxu1 }
 0x172   : > { %v1364_v0 = vmax.f32 %v1339_v25, 0.0  ;;  %v1019_v3 = vmax.f32 %v2786_v2, %v941_v26  ;;  %v2069_v30 = vpop.f32.mrb[69].mxu0  ;;  %v2125_v31 = vpop.f32.mrb[69].mxu1 }
 0x173   : > { %v944_v28 = vpop.f32.mrb[70].mxu0  ;;  %v1233_v32 = vpop.f32.mrb[70].mxu1 }
 0x174   : > { %v1822_v23 = vpack.c.bf16 %v1364_v0, %v1363_v38  ;;  %v1308_v18 = vmax.f32 %v1019_v3, %v1230_v53  ;;  %v1020_v16 = vmax.f32 %v2787_v15, %v944_v28  ;;  %v2070_v5 = vpop.f32.mrb[71].mxu0  ;;  %v2126_v6 = vpop.f32.mrb[71].mxu1  ;;  %v2790_v3 = vmax.f32 %v2567_v55, %v2569_v56 }
 0x176   : > { %1866 = vst [vmem:[%s2665_s27 + $0x18] sm:$0xff] %v1822_v23   ;;  %v1340_v47 = vadd.f32 %v2651_v33, %v1308_v18  ;;  %v1309_v48 = vmax.f32 %v1020_v16, %v1233_v32  ;;  %v2791_v18 = vmax.f32 %v2573_v63, %v2575_v1 }
 0x178   : > { %v1341_v35 = vadd.f32 %v2651_v33, %v1309_v48  ;;  %v1365_v20 = vmax.f32 %v1340_v47, 0.0 }
 0x179   : > { %v949_v36 = vpop.f32.mrb[72].mxu0  ;;  %v1238_v62 = vpop.f32.mrb[72].mxu1 }
 0x17a   : > { %v1366_v21 = vmax.f32 %v1341_v35, 0.0  ;;  %v1021_v60 = vmax.f32 %v2788_v59, %v949_v36  ;;  %v2073_v40 = vpop.f32.mrb[73].mxu0  ;;  %v2129_v41 = vpop.f32.mrb[73].mxu1  ;;  %v2792_v36 = vmax.f32 %v2579_v12, %v2581_v14 }
 0x17b   : > { %v952_v58 = vpop.f32.mrb[74].mxu0  ;;  %v1241_v8 = vpop.f32.mrb[74].mxu1  ;;  %v2793_v40 = vmax.f32 %v2585_v24, %v2587_v27 }
 0x17c   : > { %v1827_v13 = vpack.c.bf16 %v1366_v21, %v1365_v20  ;;  %v1310_v7 = vmax.f32 %v1021_v60, %v1238_v62  ;;  %v1022_v11 = vmax.f32 %v2789_v10, %v952_v58  ;;  %v2074_v43 = vpop.f32.mrb[75].mxu0  ;;  %v2130_v25 = vpop.f32.mrb[75].mxu1 }
 0x17d   : > { %v2794_v25 = vmax.f32 %v2591_v37, %v2593_v39 }
 0x17e   : > { %1867 = vst [vmem:[%s2665_s27 + $0x20] sm:$0xff] %v1827_v13   ;;  %v1342_v26 = vadd.f32 %v2651_v33, %v1310_v7  ;;  %v1311_v38 = vmax.f32 %v1022_v11, %v1241_v8 }
 0x180   : > { %v1343_v45 = vadd.f32 %v2651_v33, %v1311_v38  ;;  %v1367_v0 = vmax.f32 %v1342_v26, 0.0 }
 0x181   : > { %v957_v46 = vpop.f32.mrb[76].mxu0  ;;  %v1246_v30 = vpop.f32.mrb[76].mxu1 }
 0x182   : > { %v1368_v2 = vmax.f32 %v1343_v45, 0.0  ;;  %v1023_v53 = vmax.f32 %v2790_v3, %v957_v46  ;;  %v2077_v50 = vpop.f32.mrb[77].mxu0  ;;  %v2133_v51 = vpop.f32.mrb[77].mxu1 }
 0x183   : > { %v960_v31 = vpop.f32.mrb[78].mxu0  ;;  %v1249_v16 = vpop.f32.mrb[78].mxu1 }
 0x184   : > { %v1832_v28 = vpack.c.bf16 %v1368_v2, %v1367_v0  ;;  %v1312_v23 = vmax.f32 %v1023_v53, %v1246_v30  ;;  %v1024_v15 = vmax.f32 %v2791_v18, %v960_v31  ;;  %v2078_v32 = vpop.f32.mrb[79].mxu0  ;;  %v2134_v5 = vpop.f32.mrb[79].mxu1  ;;  %v2795_v2 = vmax.f32 %v2597_v49, %v2599_v52 }
 0x185   : > { %v2796_v18 = vmax.f32 %v2603_v4, %v2605_v9 }
 0x186   : > { %1868 = vst [vmem:[%s2665_s27 + $0x28] sm:$0xff] %v1832_v28   ;;  %v1344_v6 = vadd.f32 %v2651_v33, %v1312_v23  ;;  %v1313_v47 = vmax.f32 %v1024_v15, %v1249_v16 }
 0x188   : > { %v1345_v55 = vadd.f32 %v2651_v33, %v1313_v47  ;;  %v1369_v48 = vmax.f32 %v1344_v6, 0.0  ;;  %v2797_v47 = vmax.f32 %v2609_v34, %v2611_v42 }
 0x189   : > { %v965_v56 = vpop.f32.mrb[80].mxu0  ;;  %v1254_v21 = vpop.f32.mrb[80].mxu1 }
 0x18a   : > { %v1370_v35 = vmax.f32 %v1345_v55, 0.0  ;;  %v1025_v20 = vmax.f32 %v2792_v36, %v965_v56  ;;  %v2081_v63 = vpop.f32.mrb[81].mxu0  ;;  %v2137_v1 = vpop.f32.mrb[81].mxu1 }
 0x18b   : > { %v968_v59 = vpop.f32.mrb[82].mxu0  ;;  %v1257_v58 = vpop.f32.mrb[82].mxu1  ;;  %v2798_v1 = vmax.f32 %v2615_v57, %v2617_v61 }
 0x18c   : > { %v1837_v60 = vpack.c.bf16 %v1370_v35, %v1369_v48  ;;  %v1314_v62 = vmax.f32 %v1025_v20, %v1254_v21  ;;  %v1026_v41 = vmax.f32 %v2793_v40, %v968_v59  ;;  %v2082_v13 = vpop.f32.mrb[83].mxu0  ;;  %v2138_v7 = vpop.f32.mrb[83].mxu1 }
 0x18e   : > { %1869 = vst [vmem:[%s2665_s27 + $0x30] sm:$0xff] %v1837_v60   ;;  %v1346_v10 = vadd.f32 %v2651_v33, %v1314_v62  ;;  %v1315_v11 = vmax.f32 %v1026_v41, %v1257_v58  ;;  %v2799_v58 = vmax.f32 %v2621_v22, %v2623_v29 }
 0x190   : > { %v1347_v12 = vadd.f32 %v2651_v33, %v1315_v11  ;;  %v1371_v8 = vmax.f32 %v1346_v10, 0.0 }
 0x191   : > { %v973_v14 = vpop.f32.mrb[84].mxu0  ;;  %v1262_v38 = vpop.f32.mrb[84].mxu1 }
 0x192   : > { %v1372_v43 = vmax.f32 %v1347_v12, 0.0  ;;  %v1027_v26 = vmax.f32 %v2794_v25, %v973_v14  ;;  %v2085_v24 = vpop.f32.mrb[85].mxu0  ;;  %v2141_v27 = vpop.f32.mrb[85].mxu1  ;;  %v2800_v25 = vmax.f32 %v2627_v54, %v2629_v44 }
 0x193   : > { %v976_v45 = vpop.f32.mrb[86].mxu0  ;;  %v1265_v53 = vpop.f32.mrb[86].mxu1 }
 0x194   : > { %v1842_v46 = vpack.c.bf16 %v1372_v43, %v1371_v8  ;;  %v1316_v0 = vmax.f32 %v1027_v26, %v1262_v38  ;;  %v1028_v3 = vmax.f32 %v2795_v2, %v976_v45  ;;  %v2086_v30 = vpop.f32.mrb[87].mxu0  ;;  %v2142_v50 = vpop.f32.mrb[87].mxu1 }
 0x196   : > { %1870 = vst [vmem:[%s2665_s27 + $0x38] sm:$0xff] %v1842_v46   ;;  %v1348_v51 = vadd.f32 %v2651_v33, %v1316_v0  ;;  %v1317_v31 = vmax.f32 %v1028_v3, %v1265_v53  ;;  %v2801_v46 = vmax.f32 %v2633_v17, %v2635_v19 }
 0x198   : > { %v1349_v37 = vadd.f32 %v2651_v33, %v1317_v31  ;;  %v1373_v28 = vmax.f32 %v1348_v51, 0.0 }
 0x199   : > { %v981_v39 = vpop.f32.mrb[88].mxu0  ;;  %v1270_v16 = vpop.f32.mrb[88].mxu1 }
 0x19a   : > { %v1374_v23 = vmax.f32 %v1349_v37, 0.0  ;;  %v1029_v15 = vmax.f32 %v2796_v18, %v981_v39  ;;  %v2089_v49 = vpop.f32.mrb[89].mxu0  ;;  %v2145_v52 = vpop.f32.mrb[89].mxu1  ;;  %v2802_v37 = vld [vmem:[#allocation2_spill] sm:$0xff]  ;;  %v2803_v39 = vld [vmem:[#allocation3_spill] sm:$0xff] }
 0x19b   : > { %v984_v32 = vpop.f32.mrb[90].mxu0  ;;  %v1273_v56 = vpop.f32.mrb[90].mxu1 }
 0x19c   : > { %v1847_v5 = vpack.c.bf16 %v1374_v23, %v1373_v28  ;;  %v1318_v6 = vmax.f32 %v1029_v15, %v1270_v16  ;;  %v1030_v55 = vmax.f32 %v2797_v47, %v984_v32  ;;  %v2090_v48 = vpop.f32.mrb[91].mxu0  ;;  %v2146_v35 = vpop.f32.mrb[91].mxu1  ;;  %v2804_v28 = vmax.f32 %v2802_v37, %v2803_v39 }
 0x19e   : > { %1871 = vst [vmem:[%s2665_s27 + $0x40] sm:$0xff] %v1847_v5   ;;  %v1350_v36 = vadd.f32 %v2651_v33, %v1318_v6  ;;  %v1319_v20 = vmax.f32 %v1030_v55, %v1273_v56 }
 0x1a0   : > { %v1351_v4 = vadd.f32 %v2651_v33, %v1319_v20  ;;  %v1375_v21 = vmax.f32 %v1350_v36, 0.0 }
 0x1a1   : > { %v989_v9 = vpop.f32.mrb[92].mxu0  ;;  %v1278_v60 = vpop.f32.mrb[92].mxu1 }
 0x1a2   : > { %v1376_v63 = vmax.f32 %v1351_v4, 0.0  ;;  %v1031_v59 = vmax.f32 %v2798_v1, %v989_v9  ;;  %v2093_v34 = vpop.f32.mrb[93].mxu0  ;;  %v2149_v42 = vpop.f32.mrb[93].mxu1 }
 0x1a3   : > { %v992_v62 = vpop.f32.mrb[94].mxu0  ;;  %v1281_v7 = vpop.f32.mrb[94].mxu1 }
 0x1a4   : > { %v1852_v40 = vpack.c.bf16 %v1376_v63, %v1375_v21  ;;  %v1320_v41 = vmax.f32 %v1031_v59, %v1278_v60  ;;  %v1032_v13 = vmax.f32 %v2799_v58, %v992_v62  ;;  %v2094_v10 = vpop.f32.mrb[95].mxu0  ;;  %v2150_v11 = vpop.f32.mrb[95].mxu1 }
 0x1a6   : > { %1872 = vst [vmem:[%s2665_s27 + $0x48] sm:$0xff] %v1852_v40   ;;  %v1352_v12 = vadd.f32 %v2651_v33, %v1320_v41  ;;  %v1321_v14 = vmax.f32 %v1032_v13, %v1281_v7 }
 0x1a8   : > { %v1353_v57 = vadd.f32 %v2651_v33, %v1321_v14  ;;  %v1377_v8 = vmax.f32 %v1352_v12, 0.0 }
 0x1a9   : > { %v997_v61 = vpop.f32.mrb[96].mxu0  ;;  %v1286_v38 = vpop.f32.mrb[96].mxu1 }
 0x1aa   : > { %v1378_v43 = vmax.f32 %v1353_v57, 0.0  ;;  %v1033_v26 = vmax.f32 %v2800_v25, %v997_v61  ;;  %v2097_v22 = vpop.f32.mrb[97].mxu0  ;;  %v2153_v29 = vpop.f32.mrb[97].mxu1 }
 0x1ab   : > { %v1000_v24 = vpop.f32.mrb[98].mxu0  ;;  %v1289_v2 = vpop.f32.mrb[98].mxu1 }
 0x1ac   : > { %v1857_v27 = vpack.c.bf16 %v1378_v43, %v1377_v8  ;;  %v1322_v45 = vmax.f32 %v1033_v26, %v1286_v38  ;;  %v1034_v0 = vmax.f32 %v2801_v46, %v1000_v24  ;;  %v2098_v3 = vpop.f32.mrb[99].mxu0  ;;  %v2154_v53 = vpop.f32.mrb[99].mxu1 }
 0x1ae   : > { %1873 = vst [vmem:[%s2665_s27 + $0x50] sm:$0xff] %v1857_v27   ;;  %v1354_v30 = vadd.f32 %v2651_v33, %v1322_v45  ;;  %v1323_v50 = vmax.f32 %v1034_v0, %v1289_v2 }
 0x1b0   : > { %v1355_v54 = vadd.f32 %v2651_v33, %v1323_v50  ;;  %v1379_v51 = vmax.f32 %v1354_v30, 0.0 }
 0x1b1   : > { %v1005_v44 = vpop.f32.mrb[100].mxu0  ;;  %v1294_v17 = vpop.f32.mrb[100].mxu1 }
 0x1b2   : > { %v1380_v31 = vmax.f32 %v1355_v54, 0.0  ;;  %v1035_v23 = vmax.f32 %v2804_v28, %v1005_v44  ;;  %v2101_v19 = vpop.f32.mrb[101].mxu0  ;;  %v2157_v18 = vpop.f32.mrb[101].mxu1 }
 0x1b3   : > { %v1008_v15 = vpop.f32.mrb[102].mxu0  ;;  %v1297_v52 = vpop.f32.mrb[102].mxu1 }
 0x1b4   : > { %v1862_v16 = vpack.c.bf16 %v1380_v31, %v1379_v51  ;;  %v1324_v49 = vmax.f32 %v1035_v23, %v1294_v17  ;;  %v2102_v32 = vpop.f32.mrb[103].mxu0  ;;  %v2158_v5 = vpop.f32.mrb[103].mxu1 }
 0x1b6   : > { %1874 = vst [vmem:[%s2665_s27 + $0x58] sm:$0xff] %v1862_v16   ;;  %v1356_v6 = vadd.f32 %v2651_v33, %v1324_v49 }
 0x1b8   : > { %v1381_v47 = vmax.f32 %v1356_v6, 0.0 }
 0x1ba   : > { %v1803_v55 = vpack.c.bf16 %v1381_v47, %v1381_v47 }
 0x1bc   : > { %1507 = vst [vmem:[%s2665_s27 + $0x60] sm:$0x3] %v1803_v55 }
 0x1bd PF: > { %s13_s12 = sadd.s32 1, %s2232_s12  }
 0x1be   : > { %p10_p4 = scmp.ge.s32.totalorder %s13_s12, 4  }
 0x1c0   :  { %12 = sbr.rel (!%p10_p4) target bundleno = 1 (0x1), region = 65 }

// kernel: convnet_forward.5
= control target key start
LH: loop header
LB: loop body
LE: loop exit
PB: predicated region body
PF: predicated region fallthrough
CT: control target
= control target key end

     0   :  { %s3548_s12 = smov 0   ;;  %s4330_s0 = inlined_call_operand.vmem [shape: bf16[2,4,49,800], index: 0, kind: input, shape index: {}]   ;;  %s4331_s1 = inlined_call_operand.vmem [shape: bf16[800,128], index: 1, kind: input, shape index: {}]   ;;  %s4332_s2 = inlined_call_operand.vmem [shape: f32[1,128], index: 2, kind: input, shape index: {}]   ;;  %s4333_s3 = inlined_call_operand.vmem [shape: bf16[2,49,128], index: 3, kind: output, shape index: {}]  }
   0x1 LB: > { %s2414_s13 = sadd.s32 4294967295, %s3526_s12   ;;  %p2418_p0 = scmp.ge.s32.totalorder %s3526_s12, 1  ;;  %s3526_s12 = sphi %s3548_s12, %s13_s12  }
   0x2   : > { %p137_p1 = scmp.lt.s32.totalorder %s3526_s12, 3 }
   0x4   : > { %p138_p2 = pnand %p2418_p0, %p137_p1 }
   0x5   : > { %v3559_v0 = vld [vmem:[%s4331_s1 + $0x40] sm:$0xff] (!%p138_p2)   ;;  %v3582_v4 = vld [vmem:[%s4331_s1 + $0x48] sm:$0xff] (!%p138_p2)   ;;  %v3606_v8 = vld [vmem:[%s4331_s1 + $0x50] sm:$0xff] (!%p138_p2)   ;;  %p161_p3 = scmp.lt.s32.totalorder (!%p138_p2), %s2414_s13, 1  ;;  %vm729_vm0 = vcmask (!%p138_p2), 261120   ;;  %vm2353_vm1 = vcmask (!%p138_p2), 1040384  }
   0x6   : > { %141 = sbr.rel (%p138_p2) target bundleno = 510 (0x1fe), region = 32  ;;  %v3564_v1 = vld [vmem:[%s4331_s1 + $0xc0] sm:$0xff] (!%p138_p2)   ;;  %2717 = vmatprep.subr.bf16.mxu0 (!%p138_p2), %v3559_v0  ;;  %v3588_v5 = vld [vmem:[%s4331_s1 + $0xc8] sm:$0xff] (!%p138_p2)   ;;  %v3612_v9 = vld [vmem:[%s4331_s1 + $0xd0] sm:$0xff] (!%p138_p2)   ;;  %vm2354_vm2 = vsmask.f32 (!%p138_p2), 256 }
   0x7   : > { %v3570_v2 = vld [vmem:[%s4331_s1] sm:$0xff] (!%p138_p2)   ;;  %2757 = vmatprep.subr.bf16.mxu1 (!%p138_p2), %v3564_v1  ;;  %v3594_v6 = vld [vmem:[%s4331_s1 + $0x8] sm:$0xff] (!%p138_p2)   ;;  %v3618_v10 = vld [vmem:[%s4331_s1 + $0x10] sm:$0xff] (!%p138_p2)  }
   0x8   : > { %v3576_v3 = vld [vmem:[%s4331_s1 + $0x80] sm:$0xff] (!%p138_p2)   ;;  %2718 = vmatpush3.bf16.msra.mxu0 (!%p138_p2), %v3570_v2  ;;  %v3600_v7 = vld [vmem:[%s4331_s1 + $0x88] sm:$0xff] (!%p138_p2)   ;;  %v3624_v11 = vld [vmem:[%s4331_s1 + $0x90] sm:$0xff] (!%p138_p2)  }
   0x9   : > { %2758 = vmatpush3.bf16.msra.mxu1 (!%p138_p2), %v3576_v3  ;;  %2719 = vmatprep.subr.bf16.mxu0 (!%p138_p2), %v3582_v4  ;;  %v3630_v12 = vld [vmem:[%s4331_s1 + $0x58] sm:$0xff] (!%p138_p2)   ;;  %v3654_v16 = vld [vmem:[%s4331_s1 + $0x60] sm:$0xff] (!%p138_p2)   ;;  %v3680_v20 = vld [vmem:[%s4331_s1 + $0x68] sm:$0xff] (!%p138_p2)  }
   0xa   : > { %2759 = vmatprep.subr.bf16.mxu1 (!%p138_p2), %v3588_v5  ;;  %v3636_v13 = vld [vmem:[%s4331_s1 + $0xd8] sm:$0xff] (!%p138_p2)   ;;  %v3660_v17 = vld [vmem:[%s4331_s1 + $0xe0] sm:$0xff] (!%p138_p2)   ;;  %v3686_v21 = vld [vmem:[%s4331_s1 + $0xe8] sm:$0xff] (!%p138_p2)  }
   0xb   : > { %v3642_v14 = vld [vmem:[%s4331_s1 + $0x18] sm:$0xff] (!%p138_p2)   ;;  %v3668_v18 = vld [vmem:[%s4331_s1 + $0x20] sm:$0xff] (!%p138_p2)   ;;  %v3696_v22 = vld [vmem:[%s4331_s1 + $0x28] sm:$0xff] (!%p138_p2)  }
   0xc   : > { %2720 = vmatpush3.bf16.msra.mxu0 (!%p138_p2), %v3594_v6  ;;  %v3648_v15 = vld [vmem:[%s4331_s1 + $0x98] sm:$0xff] (!%p138_p2)   ;;  %v3674_v19 = vld [vmem:[%s4331_s1 + $0xa0] sm:$0xff] (!%p138_p2)   ;;  %v3702_v23 = vld [vmem:[%s4331_s1 + $0xa8] sm:$0xff] (!%p138_p2)  }
   0xd   : > { %2760 = vmatpush3.bf16.msra.mxu1 %v3600_v7  ;;  %2721 = vmatprep.subr.bf16.mxu0 %v3606_v8  ;;  %s4335_s13 = smov (!%p161_p3, %s2414_s13), 1  ;;  %v3708_v24 = vld [vmem:[%s4331_s1 + $0x70] sm:$0xff]   ;;  %v3733_v28 = vld [vmem:[%s4331_s1 + $0x78] sm:$0xff]   ;;  %v3767_v36 = vld [vmem:[%s4331_s1 + $0x140] sm:$0xff]  }
   0xe   : > { %2761 = vmatprep.subr.bf16.mxu1 %v3612_v9  ;;  %v3714_v25 = vld [vmem:[%s4331_s1 + $0xf0] sm:$0xff]   ;;  %s3285_s16 = smul.u32 784, %s4335_s13  ;;  %v3739_v29 = vld [vmem:[%s4331_s1 + $0xf8] sm:$0xff]   ;;  %v3772_v37 = vld [vmem:[%s4331_s1 + $0x100] sm:$0xff]  }
   0xf   : > { %v3721_v26 = vld [vmem:[%s4331_s1 + $0x30] sm:$0xff]   ;;  %v3750_v30 = vld [vmem:[%s4331_s1 + $0x38] sm:$0xff]   ;;  %v3778_v38 = vld [vmem:[%s4331_s1 + $0x148] sm:$0xff]   ;;  %s3286_s26 = smul.u32 28, %s4335_s13 }
  0x10   : > { %2722 = vmatpush3.bf16.msra.mxu0 %v3618_v10  ;;  %v3727_v27 = vld [vmem:[%s4331_s1 + $0xb0] sm:$0xff]   ;;  %s3744_s27 = scalar_lea.vmem %s4330_s0, %s3285_s16  ;;  %v3756_v31 = vld [vmem:[%s4331_s1 + $0xb8] sm:$0xff]   ;;  %v3784_v39 = vld [vmem:[%s4331_s1 + $0x108] sm:$0xff]  }
  0x11   : > { %2762 = vmatpush3.bf16.msra.mxu1 %v3624_v11  ;;  %2723 = vmatprep.subr.bf16.mxu0 %v3630_v12  ;;  %v3327_v32 = vld [vmem:[%s3744_s27] ss:$28 sps:$4 sm:$0xff]   ;;  %v3330_v34 = vld [vmem:[%s3744_s27 + $0x8] ss:$28 sps:$4 sm:$0xff]   ;;  %v3342_v43 = vld [vmem:[%s3744_s27 + $0x38] ss:$28 sps:$4 sm:$0xff]   ;;  %s4315_s13 = scalar_lea.vmem %s4333_s3, %s3286_s26 }
  0x12   : > { %2763 = vmatprep.subr.bf16.mxu1 %v3636_v13  ;;  %v3329_v33 = vld [vmem:[%s3744_s27 + $0x4] ss:$28 sps:$4 sm:$0xff]   ;;  %v3332_v35 = vld [vmem:[%s3744_s27 + $0xc] ss:$28 sps:$4 sm:$0xff]   ;;  %v3337_v40 = vld [vmem:[%s3744_s27 + $0x3c] ss:$28 sps:$4 sm:$0xff]  }
  0x13   : > { %774 = vmatprep.mubr.bf16.mxu0 %v3329_v33  ;;  %838 = vmatprep.mubr.bf16.mxu1 %v3332_v35  ;;  %v3339_v41 = vld [vmem:[%s3744_s27 + $0x44] ss:$28 sps:$4 sm:$0xff]   ;;  %v3801_v45 = vld [vmem:[%s4331_s1 + $0x150] sm:$0xff]   ;;  %v3813_v47 = vld [vmem:[%s4331_s1 + $0x158] sm:$0xff]  }
  0x14   : > { %2724 = vmatpush3.bf16.msra.mxu0 %v3642_v14  ;;  %v3792_v42 = vld [vmem:[%s4331_s1 + $0x180] sm:$0xff]   ;;  %v3807_v46 = vld [vmem:[%s4331_s1 + $0x110] sm:$0xff]   ;;  %v3819_v48 = vld [vmem:[%s4331_s1 + $0x118] sm:$0xff]  }
  0x15   : > { %2764 = vmatpush3.bf16.msra.mxu1 %v3648_v15  ;;  %2725 = vmatprep.subr.bf16.mxu0 %v3654_v16  ;;  %v3343_v44 = vld [vmem:[%s3744_s27 + $0x40] ss:$28 sps:$4 sm:$0xff]   ;;  %v3348_v49 = vld [vmem:[%s3744_s27 + $0x74] ss:$28 sps:$4 sm:$0xff]   ;;  %v3841_v55 = vld [vmem:[%s4331_s1 + $0x168] sm:$0xff]  }
  0x16   : > { %2765 = vmatprep.subr.bf16.mxu1 %v3660_v17  ;;  %v3350_v50 = vld [vmem:[%s3744_s27 + $0x7c] ss:$28 sps:$4 sm:$0xff]   ;;  %v3352_v51 = vld [vmem:[%s3744_s27 + $0x70] ss:$28 sps:$4 sm:$0xff]   ;;  %v3829_v53 = vld [vmem:[%s4331_s1 + $0x160] sm:$0xff]  }
  0x17   : > { %v3353_v52 = vld [vmem:[%s3744_s27 + $0x78] ss:$28 sps:$4 sm:$0xff]   ;;  %v3835_v54 = vld [vmem:[%s4331_s1 + $0x120] sm:$0xff]   ;;  %v3846_v56 = vld [vmem:[%s4331_s1 + $0x128] sm:$0xff]  }
  0x18   : > { %2726 = vmatpush3.bf16.msra.mxu0 %v3668_v18  ;;  %v296_v57 = vld [vmem:[%s3744_s27 + $0xa8] sm:$0x11]  ;;  %v297_v58 = vld [vmem:[%s3744_s27 + $0xb0] sm:$0x11]  ;;  %vm2355_vm3 = vmand %vm2353_vm1, %vm2354_vm2 }
  0x19   : > { %2766 = vmatpush3.bf16.msra.mxu1 %v3674_v19  ;;  %2727 = vmatprep.subr.bf16.mxu0 %v3680_v20  ;;  %v2443_v59 = vcombine.high %v296_v57, %v296_v57  ;;  %v2445_v60 = vcombine.high %v297_v58, %v297_v58  ;;  %v3854_v61 = vld [vmem:[%s4331_s1 + $0x188] sm:$0xff]   ;;  %v3860_v62 = vld [vmem:[%s4331_s1 + $0x170] sm:$0xff]   ;;  %v2442_v63 = vcombine.low %v296_v57, %v296_v57  ;;  %v3375_v57 = vld [vmem:[%s3744_s27 + $0x84] ss:$28 sps:$4 sm:$0xff]  }
  0x1a   : > { %2767 = vmatprep.subr.bf16.mxu1 %v3686_v21  ;;  %v3868_v33 = vld [vmem:[%s4331_s1 + $0x130] sm:$0xff]  }
  0x1b   : > { %v3369_v35 = vld [vmem:[%s3744_s27 + $0x14] ss:$28 sps:$4 sm:$0xff]  }
  0x1c   : > { %2728 = vmatpush3.bf16.msra.mxu0 %v3696_v22 }
  0x1d   : > { %2768 = vmatpush3.bf16.msra.mxu1 %v3702_v23  ;;  %2729 = vmatprep.subr.bf16.mxu0 %v3708_v24 }
  0x1e   : > { %2769 = vmatprep.subr.bf16.mxu1 %v3714_v25 }
  0x20   : > { %2730 = vmatpush3.bf16.msra.mxu0 %v3721_v26 }
  0x21   : > { %2770 = vmatpush3.bf16.msra.mxu1 %v3727_v27  ;;  %2731 = vmatprep.subr.bf16.mxu0 %v3733_v28 }
  0x22   : > { %2771 = vmatprep.subr.bf16.mxu1 %v3739_v29 }
  0x24   : > { %2732 = vmatpush3.bf16.msra.mxu0 %v3750_v30 }
  0x25   : > { %2772 = vmatpush3.bf16.msra.mxu1 %v3756_v31  ;;  %2797 = vmatprep.subr.bf16.mxu0 %v3767_v36 }
  0x26   : > { %3221 = vmatprep.subr.bf16.mxu1 %v3792_v42 }
  0x27   : > { %775 = vmatmul.mubr.bf16.vlgmr.msra.gmra.mrb[0].mxu0 %v3327_v32  ;;  %v2444_v32 = vcombine.low %v297_v58, %v297_v58  ;;  %v3384_v58 = vld [vmem:[%s3744_s27 + $0xd0] ss:$28 sps:$4 sm:$0xff]  }
  0x28   : > { %839 = vmatmul.mubr.bf16.vlgmr.msra.gmra.mrb[0].mxu1 %v3330_v34  ;;  %2798 = vmatpush3.bf16.msra.mxu0 %v3772_v37  ;;  %v3874_v34 = vld [vmem:[%s4331_s1 + $0x178] sm:$0xff]  }
  0x29   : > { %2799 = vmatprep.subr.bf16.mxu0 %v3778_v38  ;;  %782 = vmatprep.mubr.bf16.mxu0 %v3337_v40  ;;  %v3370_v40 = vld [vmem:[%s3744_s27 + $0x18] ss:$28 sps:$4 sm:$0xff]  }
  0x2a   : > { %846 = vmatprep.mubr.bf16.mxu1 %v3339_v41  ;;  %3222 = vmatpush3.bf16.msra.mxu1 %v3792_v42  ;;  %v3883_v41 = vld [vmem:[%s4331_s1 + $0x138] sm:$0xff]  }
  0x2b   : > { %3223 = vmatprep.subr.bf16.mxu1 %v3854_v61 }
  0x2c   : > { %2800 = vmatpush3.bf16.msra.mxu0 %v3784_v39 }
  0x2d   : > { %2801 = vmatprep.subr.bf16.mxu0 %v3801_v45 }
  0x2e   : > { %3224 = vmatpush3.bf16.msra.mxu1 %v3854_v61 }
  0x2f   : > { %783 = vmatmul.mubr.bf16.gmra.mrb[4].mxu0 %v3342_v43  ;;  %2883 = vmatprep.subr.bf16.mxu1 %v3564_v1  ;;  %v3367_v43 = vld [vmem:[%s3744_s27 + $0x10] ss:$28 sps:$4 sm:$0xff]  }
  0x30   : > { %847 = vmatmul.mubr.bf16.gmra.mrb[4].mxu1 %v3343_v44  ;;  %2802 = vmatpush3.bf16.msra.mxu0 %v3807_v46  ;;  %v3371_v44 = vld [vmem:[%s3744_s27 + $0x50] ss:$28 sps:$4 sm:$0xff]  }
  0x31   : > { %2803 = vmatprep.subr.bf16.mxu0 %v3813_v47  ;;  %790 = vmatprep.mubr.bf16.mxu0 %v3348_v49  ;;  %v3372_v49 = vld [vmem:[%s3744_s27 + $0x4c] ss:$28 sps:$4 sm:$0xff]  }
  0x32   : > { %854 = vmatprep.mubr.bf16.mxu1 %v3350_v50  ;;  %v3378_v50 = vld [vmem:[%s3744_s27 + $0x88] ss:$28 sps:$4 sm:$0xff]  }
  0x34   : > { %2804 = vmatpush3.bf16.msra.mxu0 %v3819_v48 }
  0x35   : > { %2805 = vmatprep.subr.bf16.mxu0 %v3829_v53 }
  0x37   : > { %791 = vmatmul.mubr.bf16.gmra.mrb[8].mxu0 %v3352_v51  ;;  %v3374_v51 = vld [vmem:[%s3744_s27 + $0x48] ss:$28 sps:$4 sm:$0xff]  }
  0x38   : > { %855 = vmatmul.mubr.bf16.gmra.mrb[8].mxu1 %v3353_v52  ;;  %2806 = vmatpush3.bf16.msra.mxu0 %v3835_v54  ;;  %v3379_v52 = vld [vmem:[%s3744_s27 + $0xc0] ss:$0 sps:$4 sm:$0x11]  }
  0x39   : > { %2807 = vmatprep.subr.bf16.mxu0 %v3841_v55  ;;  %798 = vmatprep.mubr.bf16.mxu0 %v2443_v59  ;;  %v3377_v59 = vld [vmem:[%s3744_s27 + $0x80] ss:$28 sps:$4 sm:$0xff]  }
  0x3a   : > { %862 = vmatprep.mubr.bf16.mxu1 %v2445_v60  ;;  %v298_v60 = vld [vmem:[%s3744_s27 + $0xb8] sm:$0x11] }
  0x3c   : > { %2808 = vmatpush3.bf16.msra.mxu0 %v3846_v56 }
  0x3d   : > { %2809 = vmatprep.subr.bf16.mxu0 %v3860_v62 }
  0x3f   : > { %799 = vmatmul.mubr.bf16.gmra.mrb[12].mxu0 %v2442_v63  ;;  %v2447_v63 = vcombine.high %v298_v60, %v298_v60 }
  0x40   : > { %863 = vmatmul.mubr.bf16.gmra.mrb[12].mxu1 %v2444_v32  ;;  %902 = vmatprep.mubr.bf16.mxu0 %v3369_v35  ;;  %v2446_v32 = vcombine.low %v298_v60, %v298_v60  ;;  %v3387_v35 = vld [vmem:[%s3744_s27 + $0xc8] ss:$28 sps:$4 sm:$0xff]   ;;  %v3398_v60 = vld [vmem:[%s3744_s27 + $0x13c] ss:$28 sps:$4 sm:$0xff]  }
  0x41   : > { %2810 = vmatpush3.bf16.msra.mxu0 %v3868_v33  ;;  %3225 = vmatprep.mubr.msk.bf16.mxu1 %vm729_vm0, %v3370_v40  ;;  %v3382_v40 = vld [vmem:[%s3744_s27 + $0xcc] ss:$28 sps:$4 sm:$0xff]  }
  0x42   : > { %2811 = vmatprep.subr.bf16.mxu0 %v3874_v34 }
  0x45   : > { %2812 = vmatpush3.bf16.msra.mxu0 %v3883_v41 }
  0x46   : > { %2843 = vmatprep.subr.bf16.mxu0 %v3559_v0 }
  0x48   : > { %903 = vmatmul.mubr.bf16.vlgmr.msra.gmra.mrb[16].mxu0 %v3367_v43  ;;  %3226 = vmatmul.mubr.msk.bf16.vlgmr.msra.gmra.mrb[16].mxu1 %vm729_vm0, %v3371_v44  ;;  %v3385_v43 = vld [vmem:[%s3744_s27 + $0xc4] ss:$28 sps:$4 sm:$0xff]  }
  0x49   : > { %2884 = vmatpush3.bf16.msra.mxu1 %v3576_v3  ;;  %2844 = vmatpush3.bf16.msra.mxu0 %v3570_v2  ;;  %v3388_v44 = vld [vmem:[%s3744_s27 + $0x108] ss:$28 sps:$4 sm:$0xff]  }
  0x4a   : > { %2885 = vmatprep.subr.bf16.mxu1 %v3588_v5  ;;  %2845 = vmatprep.subr.bf16.mxu0 %v3582_v4 }
  0x4b   : > { %910 = vmatprep.mubr.bf16.mxu0 %v3372_v49  ;;  %3229 = vmatprep.mubr.msk.bf16.mxu1 %vm729_vm0, %v3378_v50  ;;  %v3390_v49 = vld [vmem:[%s3744_s27 + $0x100] ss:$28 sps:$4 sm:$0xff]  }
  0x4c   : > { %v3392_v50 = vld [vmem:[%s3744_s27 + $0x104] ss:$28 sps:$4 sm:$0xff]  }
  0x4d   : > { %2886 = vmatpush3.bf16.msra.mxu1 %v3600_v7  ;;  %2846 = vmatpush3.bf16.msra.mxu0 %v3594_v6 }
  0x4e   : > { %2887 = vmatprep.subr.bf16.mxu1 %v3612_v9  ;;  %2847 = vmatprep.subr.bf16.mxu0 %v3606_v8 }
  0x50   : > { %911 = vmatmul.mubr.bf16.gmra.mrb[20].mxu0 %v3374_v51  ;;  %3230 = vmatmul.mubr.msk.bf16.gmra.mrb[20].mxu1 %vm729_vm0, %v3379_v52  ;;  %v3393_v51 = vld [vmem:[%s3744_s27 + $0xfc] ss:$28 sps:$4 sm:$0xff]  }
  0x51   : > { %2888 = vmatpush3.bf16.msra.mxu1 %v3624_v11  ;;  %2848 = vmatpush3.bf16.msra.mxu0 %v3618_v10  ;;  %v3394_v52 = vld [vmem:[%s3744_s27 + $0x140] ss:$28 sps:$4 sm:$0xff]  }
  0x52   : > { %2889 = vmatprep.subr.bf16.mxu1 %v3636_v13  ;;  %2849 = vmatprep.subr.bf16.mxu0 %v3630_v12 }
  0x53   : > { %918 = vmatprep.mubr.bf16.mxu0 %v3375_v57  ;;  %1264 = vmatprep.mubr.bf16.mxu1 %v3384_v58  ;;  %v3396_v57 = vld [vmem:[%s3744_s27 + $0x138] ss:$28 sps:$4 sm:$0xff]  }
  0x54   : > { %v2528_v58 = vld [vmem:[%s3744_s27 + $0x174] sm:$0x11] }
  0x55   : > { %2890 = vmatpush3.bf16.msra.mxu1 %v3648_v15  ;;  %2850 = vmatpush3.bf16.msra.mxu0 %v3642_v14 }
  0x56   : > { %2891 = vmatprep.subr.bf16.mxu1 %v3660_v17  ;;  %2851 = vmatprep.subr.bf16.mxu0 %v3654_v16 }
  0x58   : > { %919 = vmatmul.mubr.bf16.gmra.mrb[24].mxu0 %v3377_v59  ;;  %v2527_v59 = vld [vmem:[%s3744_s27 + $0x16c] sm:$0x11] }
  0x59   : > { %2892 = vmatpush3.bf16.msra.mxu1 %v3674_v19  ;;  %2852 = vmatpush3.bf16.msra.mxu0 %v3668_v18 }
  0x5a   : > { %2893 = vmatprep.subr.bf16.mxu1 %v3686_v21  ;;  %2853 = vmatprep.subr.bf16.mxu0 %v3680_v20 }
  0x5b   : > { %926 = vmatprep.mubr.bf16.mxu0 %v2447_v63  ;;  %v3399_v63 = vld [vmem:[%s3744_s27 + $0x134] ss:$28 sps:$4 sm:$0xff]  }
  0x5d   : > { %2894 = vmatpush3.bf16.msra.mxu1 %v3702_v23  ;;  %2854 = vmatpush3.bf16.msra.mxu0 %v3696_v22 }
  0x5e   : > { %2895 = vmatprep.subr.bf16.mxu1 %v3714_v25  ;;  %2855 = vmatprep.subr.bf16.mxu0 %v3708_v24 }
  0x60   : > { %927 = vmatmul.mubr.bf16.gmra.mrb[28].mxu0 %v2446_v32  ;;  %v2555_v32 = vcombine.high %v2528_v58, %v2528_v58 }
  0x61   : > { %2896 = vmatpush3.bf16.msra.mxu1 %v3727_v27  ;;  %2856 = vmatpush3.bf16.msra.mxu0 %v3721_v26 }
  0x62   : > { %2897 = vmatprep.subr.bf16.mxu1 %v3739_v29  ;;  %2857 = vmatprep.subr.bf16.mxu0 %v3733_v28 }
  0x63   : > { %1200 = vmatprep.mubr.bf16.mxu0 %v3387_v35  ;;  %v2553_v35 = vcombine.high %v2527_v59, %v2527_v59 }
  0x65   : > { %2898 = vmatpush3.bf16.msra.mxu1 %v3756_v31  ;;  %2858 = vmatpush3.bf16.msra.mxu0 %v3750_v30 }
  0x66   : > { %2923 = vmatprep.subr.bf16.mxu0 %v3767_v36  ;;  %3233 = vmatprep.subr.bf16.mxu1 %v3792_v42 }
  0x68   : > { %1265 = vmatmul.mubr.bf16.vlgmr.msra.gmra.mrb[24].mxu1 %v3382_v40  ;;  %1201 = vmatmul.mubr.bf16.vlgmr.msra.gmra.mrb[32].mxu0 %v3385_v43  ;;  %v2552_v40 = vcombine.low %v2527_v59, %v2527_v59  ;;  %v3404_v43 = vld [vmem:[%s3744_s27 + $0xdc] ss:$28 sps:$4 sm:$0xff]  }
  0x69   : > { %2924 = vmatpush3.bf16.msra.mxu0 %v3772_v37  ;;  %1272 = vmatprep.mubr.bf16.mxu1 %v3388_v44  ;;  %v3407_v44 = vld [vmem:[%s3744_s27 + $0xd8] ss:$28 sps:$4 sm:$0xff]  }
  0x6a   : > { %2925 = vmatprep.subr.bf16.mxu0 %v3778_v38  ;;  %1208 = vmatprep.mubr.bf16.mxu0 %v3390_v49  ;;  %v3405_v49 = vld [vmem:[%s3744_s27 + $0xd4] ss:$28 sps:$4 sm:$0xff]   ;;  %v3445_v59 = vld [vmem:[%s3744_s27 + $0x19c] ss:$28 sps:$4 sm:$0xff]  }
  0x6b   : > { %3234 = vmatpush3.bf16.msra.mxu1 %v3792_v42 }
  0x6c   : > { %3235 = vmatprep.subr.bf16.mxu1 %v3854_v61 }
  0x6d   : > { %2926 = vmatpush3.bf16.msra.mxu0 %v3784_v39 }
  0x6e   : > { %2927 = vmatprep.subr.bf16.mxu0 %v3801_v45 }
  0x6f   : > { %3236 = vmatpush3.bf16.msra.mxu1 %v3854_v61 }
  0x70   : > { %1273 = vmatmul.mubr.bf16.gmra.mrb[28].mxu1 %v3392_v50  ;;  %1209 = vmatmul.mubr.bf16.gmra.mrb[36].mxu0 %v3393_v51  ;;  %v3408_v50 = vld [vmem:[%s3744_s27 + $0x114] ss:$28 sps:$4 sm:$0xff]  }
  0x71   : > { %2928 = vmatpush3.bf16.msra.mxu0 %v3807_v46  ;;  %1280 = vmatprep.mubr.bf16.mxu1 %v3394_v52  ;;  %v3409_v51 = vld [vmem:[%s3744_s27 + $0x110] ss:$28 sps:$4 sm:$0xff]  }
  0x72   : > { %2929 = vmatprep.subr.bf16.mxu0 %v3813_v47  ;;  %1216 = vmatprep.mubr.bf16.mxu0 %v3396_v57  ;;  %v3415_v52 = vld [vmem:[%s3744_s27 + $0x14c] ss:$28 sps:$4 sm:$0xff]  }
  0x73   : > { %3009 = vmatprep.subr.bf16.mxu1 %v3564_v1  ;;  %v2554_v1 = vcombine.low %v2528_v58, %v2528_v58  ;;  %v3411_v57 = vld [vmem:[%s3744_s27 + $0x10c] ss:$28 sps:$4 sm:$0xff]   ;;  %v3441_v58 = vld [vmem:[%s3744_s27 + $0x1a0] ss:$28 sps:$4 sm:$0xff]  }
  0x75   : > { %2930 = vmatpush3.bf16.msra.mxu0 %v3819_v48 }
  0x76   : > { %2931 = vmatprep.subr.bf16.mxu0 %v3829_v53 }
  0x78   : > { %1281 = vmatmul.mubr.bf16.gmra.mrb[32].mxu1 %v3398_v60  ;;  %1217 = vmatmul.mubr.bf16.gmra.mrb[40].mxu0 %v3399_v63  ;;  %v3442_v60 = vld [vmem:[%s3744_s27 + $0x1d8] ss:$28 sps:$4 sm:$0xff]  }
  0x79   : > { %2932 = vmatpush3.bf16.msra.mxu0 %v3835_v54  ;;  %1288 = vmatprep.mubr.bf16.mxu1 %v2555_v32  ;;  %v3443_v63 = vld [vmem:[%s3744_s27 + $0x198] ss:$28 sps:$4 sm:$0xff]   ;;  %v3494_v32 = vld [vmem:[%s4331_s1 + $0x40] sm:$0xff]  }
  0x7a   : > { %2933 = vmatprep.subr.bf16.mxu0 %v3841_v55  ;;  %1224 = vmatprep.mubr.bf16.mxu0 %v2553_v35  ;;  %v3446_v35 = vld [vmem:[%s3744_s27 + $0x1d4] ss:$28 sps:$4 sm:$0xff]  }
  0x7d   : > { %2934 = vmatpush3.bf16.msra.mxu0 %v3846_v56 }
  0x7e   : > { %2935 = vmatprep.subr.bf16.mxu0 %v3860_v62 }
  0x80   : > { %1289 = vmatmul.mubr.bf16.gmra.mrb[36].mxu1 %v2554_v1  ;;  %1225 = vmatmul.mubr.bf16.gmra.mrb[44].mxu0 %v2552_v40  ;;  %v3452_v1 = vld [vmem:[%s3744_s27 + $0x210] ss:$28 sps:$4 sm:$0xff]   ;;  %v3495_v40 = vld [vmem:[%s4331_s1 + $0x80] sm:$0xff]  }
  0x81   : > { %2936 = vmatpush3.bf16.msra.mxu0 %v3868_v33  ;;  %3237 = vmatprep.mubr.msk.bf16.mxu1 %vm729_vm0, %v3404_v43  ;;  %v3496_v43 = vld [vmem:[%s4331_s1] sm:$0xff]  }
  0x82   : > { %2937 = vmatprep.subr.bf16.mxu0 %v3874_v34  ;;  %1328 = vmatprep.mubr.bf16.mxu0 %v3407_v44  ;;  %v3497_v44 = vld [vmem:[%s4331_s1 + $0xc8] sm:$0xff]  }
  0x85   : > { %2938 = vmatpush3.bf16.msra.mxu0 %v3883_v41 }
  0x86   : > { %2969 = vmatprep.subr.bf16.mxu0 %v3559_v0  ;;  %v3416_v0 = vld [vmem:[%s3744_s27 + $0x184] ss:$0 sps:$4 sm:$0x11]  }
  0x88   : > { %3238 = vmatmul.mubr.msk.bf16.vlgmr.msra.gmra.mrb[40].mxu1 %vm729_vm0, %v3408_v50  ;;  %1329 = vmatmul.mubr.bf16.vlgmr.msra.gmra.mrb[48].mxu0 %v3405_v49  ;;  %v3498_v49 = vld [vmem:[%s4331_s1 + $0x48] sm:$0xff]  }
  0x89   : > { %3010 = vmatpush3.bf16.msra.mxu1 %v3576_v3  ;;  %2970 = vmatpush3.bf16.msra.mxu0 %v3570_v2  ;;  %v3412_v2 = vld [vmem:[%s3744_s27 + $0x148] ss:$28 sps:$4 sm:$0xff]   ;;  %v3421_v3 = vld [vmem:[%s3744_s27 + $0x194] ss:$28 sps:$4 sm:$0xff]  }
  0x8a   : > { %3011 = vmatprep.subr.bf16.mxu1 %v3588_v5  ;;  %2971 = vmatprep.subr.bf16.mxu0 %v3582_v4  ;;  %v3414_v4 = vld [vmem:[%s3744_s27 + $0x144] ss:$28 sps:$4 sm:$0xff]   ;;  %v3448_v50 = vld [vmem:[%s3744_s27 + $0x1d0] ss:$28 sps:$4 sm:$0xff]  }
  0x8b   : > { %1336 = vmatprep.mubr.bf16.mxu0 %v3409_v51  ;;  %3241 = vmatprep.mubr.msk.bf16.mxu1 %vm729_vm0, %v3415_v52  ;;  %v2529_v5 = vld [vmem:[%s3744_s27 + $0x17c] sm:$0x11]  ;;  %v3453_v51 = vld [vmem:[%s3744_s27 + $0x248] ss:$0 sps:$4 sm:$0x11]  }
  0x8c   : > { %v3499_v52 = vld [vmem:[%s4331_s1 + $0x88] sm:$0xff]  }
  0x8d   : > { %3012 = vmatpush3.bf16.msra.mxu1 %v3600_v7  ;;  %2972 = vmatpush3.bf16.msra.mxu0 %v3594_v6  ;;  %v2557_v6 = vcombine.high %v2529_v5, %v2529_v5  ;;  %v2556_v7 = vcombine.low %v2529_v5, %v2529_v5  ;;  %v3503_v5 = vld [vmem:[%s4331_s1 + $0x90] sm:$0xff]  }
  0x8e   : > { %3013 = vmatprep.subr.bf16.mxu1 %v3612_v9  ;;  %2973 = vmatprep.subr.bf16.mxu0 %v3606_v8  ;;  %v3424_v8 = vld [vmem:[%s3744_s27 + $0x18c] ss:$28 sps:$4 sm:$0xff]  }
  0x8f   : > { %v3419_v9 = vld [vmem:[%s3744_s27 + $0x190] ss:$28 sps:$4 sm:$0xff]  }
  0x90   : > { %1337 = vmatmul.mubr.bf16.gmra.mrb[52].mxu0 %v3411_v57  ;;  %3242 = vmatmul.mubr.msk.bf16.gmra.mrb[44].mxu1 %vm729_vm0, %v3416_v0  ;;  %v3500_v57 = vld [vmem:[%s4331_s1 + $0x8] sm:$0xff]   ;;  %v3501_v0 = vld [vmem:[%s4331_s1 + $0xd0] sm:$0xff]  }
  0x91   : > { %3014 = vmatpush3.bf16.msra.mxu1 %v3624_v11  ;;  %2974 = vmatpush3.bf16.msra.mxu0 %v3618_v10  ;;  %v3422_v10 = vld [vmem:[%s3744_s27 + $0x188] ss:$28 sps:$4 sm:$0xff]  }
  0x92   : > { %3015 = vmatprep.subr.bf16.mxu1 %v3636_v13  ;;  %2975 = vmatprep.subr.bf16.mxu0 %v3630_v12  ;;  %v3425_v11 = vld [vmem:[%s3744_s27 + $0x1cc] ss:$28 sps:$4 sm:$0xff]   ;;  %v3428_v12 = vld [vmem:[%s3744_s27 + $0x1c4] ss:$28 sps:$4 sm:$0xff]  }
  0x93   : > { %1344 = vmatprep.mubr.bf16.mxu0 %v3412_v2  ;;  %1697 = vmatprep.mubr.bf16.mxu1 %v3421_v3  ;;  %v3427_v13 = vld [vmem:[%s3744_s27 + $0x1c8] ss:$28 sps:$4 sm:$0xff]   ;;  %v3502_v2 = vld [vmem:[%s4331_s1 + $0x50] sm:$0xff]  }
  0x94   : > { %v3449_v3 = vld [vmem:[%s3744_s27 + $0x20c] ss:$28 sps:$4 sm:$0xff]  }
  0x95   : > { %3016 = vmatpush3.bf16.msra.mxu1 %v3648_v15  ;;  %2976 = vmatpush3.bf16.msra.mxu0 %v3642_v14  ;;  %v3430_v14 = vld [vmem:[%s3744_s27 + $0x1c0] ss:$28 sps:$4 sm:$0xff]  }
  0x96   : > { %3017 = vmatprep.subr.bf16.mxu1 %v3660_v17  ;;  %2977 = vmatprep.subr.bf16.mxu0 %v3654_v16  ;;  %v3431_v15 = vld [vmem:[%s3744_s27 + $0x204] ss:$28 sps:$4 sm:$0xff]   ;;  %v3434_v16 = vld [vmem:[%s3744_s27 + $0x1fc] ss:$28 sps:$4 sm:$0xff]  }
  0x97   : > { %v3493_v17 = vld [vmem:[%s4331_s1 + $0xc0] sm:$0xff]  }
  0x98   : > { %1345 = vmatmul.mubr.bf16.gmra.mrb[56].mxu0 %v3414_v4  ;;  %v3458_v4 = vld [vmem:[%s3744_s27 + $0x258] ss:$28 sps:$4 sm:$0xff]  }
  0x99   : > { %3018 = vmatpush3.bf16.msra.mxu1 %v3674_v19  ;;  %2978 = vmatpush3.bf16.msra.mxu0 %v3668_v18  ;;  %v2588_v18 = vld [vmem:[%s3744_s27 + $0x238] sm:$0x11]  ;;  %v2587_v19 = vld [vmem:[%s3744_s27 + $0x230] sm:$0x11] }
  0x9a   : > { %3019 = vmatprep.subr.bf16.mxu1 %v3686_v21  ;;  %2979 = vmatprep.subr.bf16.mxu0 %v3680_v20  ;;  %v3433_v20 = vld [vmem:[%s3744_s27 + $0x200] ss:$28 sps:$4 sm:$0xff]   ;;  %v3436_v21 = vld [vmem:[%s3744_s27 + $0x1f8] ss:$28 sps:$4 sm:$0xff]  }
  0x9b   : > { %1352 = vmatprep.mubr.bf16.mxu0 %v2557_v6  ;;  %v3504_v6 = vld [vmem:[%s4331_s1 + $0x10] sm:$0xff]  }
  0x9d   : > { %3020 = vmatpush3.bf16.msra.mxu1 %v3702_v23  ;;  %2980 = vmatpush3.bf16.msra.mxu0 %v3696_v22  ;;  %v2615_v22 = vcombine.high %v2588_v18, %v2588_v18  ;;  %v2613_v23 = vcombine.high %v2587_v19, %v2587_v19 }
  0x9e   : > { %3021 = vmatprep.subr.bf16.mxu1 %v3714_v25  ;;  %2981 = vmatprep.subr.bf16.mxu0 %v3708_v24  ;;  %v2614_v24 = vcombine.low %v2588_v18, %v2588_v18  ;;  %v3513_v18 = vld [vmem:[%s4331_s1 + $0xe8] sm:$0xff]  }
  0xa0   : > { %1353 = vmatmul.mubr.bf16.gmra.mrb[60].mxu0 %v2556_v7  ;;  %v3505_v7 = vld [vmem:[%s4331_s1 + $0xd8] sm:$0xff]  }
  0xa1   : > { %3022 = vmatpush3.bf16.msra.mxu1 %v3727_v27  ;;  %2982 = vmatpush3.bf16.msra.mxu0 %v3721_v26 }
  0xa2   : > { %3023 = vmatprep.subr.bf16.mxu1 %v3739_v29  ;;  %2983 = vmatprep.subr.bf16.mxu0 %v3733_v28 }
  0xa3   : > { %1633 = vmatprep.mubr.bf16.mxu0 %v3424_v8  ;;  %v3506_v8 = vld [vmem:[%s4331_s1 + $0x58] sm:$0xff]  }
  0xa5   : > { %3024 = vmatpush3.bf16.msra.mxu1 %v3756_v31  ;;  %2984 = vmatpush3.bf16.msra.mxu0 %v3750_v30 }
  0xa6   : > { %3049 = vmatprep.subr.bf16.mxu0 %v3767_v36  ;;  %3245 = vmatprep.subr.bf16.mxu1 %v3792_v42 }
  0xa8   : > { %1698 = vmatmul.mubr.bf16.vlgmr.msra.gmra.mrb[48].mxu1 %v3419_v9  ;;  %1634 = vmatmul.mubr.bf16.vlgmr.msra.gmra.mrb[64].mxu0 %v3422_v10  ;;  %v3451_v9 = vld [vmem:[%s3744_s27 + $0x208] ss:$28 sps:$4 sm:$0xff]  }
  0xa9   : > { %3050 = vmatpush3.bf16.msra.mxu0 %v3772_v37  ;;  %1705 = vmatprep.mubr.bf16.mxu1 %v3425_v11  ;;  %v2589_v10 = vld [vmem:[%s3744_s27 + $0x240] sm:$0x11]  ;;  %v3507_v11 = vld [vmem:[%s4331_s1 + $0x98] sm:$0xff]  }
  0xaa   : > { %3051 = vmatprep.subr.bf16.mxu0 %v3778_v38  ;;  %3246 = vmatpush3.bf16.msra.mxu1 %v3792_v42  ;;  %v2612_v42 = vcombine.low %v2587_v19, %v2587_v19  ;;  %v3514_v19 = vld [vmem:[%s4331_s1 + $0x68] sm:$0xff]  }
  0xab   : > { %1641 = vmatprep.mubr.bf16.mxu0 %v3428_v12  ;;  %3247 = vmatprep.subr.bf16.mxu1 %v3854_v61  ;;  %v3508_v12 = vld [vmem:[%s4331_s1 + $0x18] sm:$0xff]  }
  0xad   : > { %3052 = vmatpush3.bf16.msra.mxu0 %v3784_v39 }
  0xae   : > { %3053 = vmatprep.subr.bf16.mxu0 %v3801_v45  ;;  %3248 = vmatpush3.bf16.msra.mxu1 %v3854_v61 }
  0xaf   : > { %3135 = vmatprep.subr.bf16.mxu1 %v3493_v17  ;;  %v3512_v17 = vld [vmem:[%s4331_s1 + $0x20] sm:$0xff]  }
  0xb0   : > { %1706 = vmatmul.mubr.bf16.gmra.mrb[52].mxu1 %v3427_v13  ;;  %1642 = vmatmul.mubr.bf16.gmra.mrb[68].mxu0 %v3430_v14  ;;  %v3509_v13 = vld [vmem:[%s4331_s1 + $0xe0] sm:$0xff]  }
  0xb1   : > { %3054 = vmatpush3.bf16.msra.mxu0 %v3807_v46  ;;  %1713 = vmatprep.mubr.bf16.mxu1 %v3431_v15  ;;  %v3510_v14 = vld [vmem:[%s4331_s1 + $0x60] sm:$0xff]   ;;  %v2617_v15 = vcombine.high %v2589_v10, %v2589_v10 }
  0xb2   : > { %3055 = vmatprep.subr.bf16.mxu0 %v3813_v47  ;;  %1649 = vmatprep.mubr.bf16.mxu0 %v3434_v16  ;;  %v3511_v16 = vld [vmem:[%s4331_s1 + $0xa0] sm:$0xff]  }
  0xb5   : > { %3056 = vmatpush3.bf16.msra.mxu0 %v3819_v48 }
  0xb6   : > { %3057 = vmatprep.subr.bf16.mxu0 %v3829_v53 }
  0xb8   : > { %1714 = vmatmul.mubr.bf16.gmra.mrb[56].mxu1 %v3433_v20  ;;  %1650 = vmatmul.mubr.bf16.gmra.mrb[72].mxu0 %v3436_v21  ;;  %v2616_v20 = vcombine.low %v2589_v10, %v2589_v10  ;;  %v3515_v21 = vld [vmem:[%s4331_s1 + $0xa8] sm:$0xff]  }
  0xb9   : > { %3058 = vmatpush3.bf16.msra.mxu0 %v3835_v54  ;;  %1721 = vmatprep.mubr.bf16.mxu1 %v2615_v22  ;;  %v3516_v22 = vld [vmem:[%s4331_s1 + $0x28] sm:$0xff]  }
  0xba   : > { %3059 = vmatprep.subr.bf16.mxu0 %v3841_v55  ;;  %1657 = vmatprep.mubr.bf16.mxu0 %v2613_v23  ;;  %v3517_v23 = vld [vmem:[%s4331_s1 + $0x70] sm:$0xff]  }
  0xbd   : > { %3060 = vmatpush3.bf16.msra.mxu0 %v3846_v56 }
  0xbe   : > { %3061 = vmatprep.subr.bf16.mxu0 %v3860_v62 }
  0xc0   : > { %1722 = vmatmul.mubr.bf16.gmra.mrb[60].mxu1 %v2614_v24  ;;  %1658 = vmatmul.mubr.bf16.gmra.mrb[76].mxu0 %v2612_v42  ;;  %v3461_v24 = vld [vmem:[%s3744_s27 + $0x250] ss:$28 sps:$4 sm:$0xff]  }
  0xc1   : > { %3062 = vmatpush3.bf16.msra.mxu0 %v3868_v33  ;;  %3249 = vmatprep.mubr.msk.bf16.mxu1 %vm729_vm0, %v3441_v58  ;;  %v3456_v42 = vld [vmem:[%s3744_s27 + $0x254] ss:$28 sps:$4 sm:$0xff]  }
  0xc2   : > { %3063 = vmatprep.subr.bf16.mxu0 %v3874_v34  ;;  %1761 = vmatprep.mubr.bf16.mxu0 %v3445_v59 }
  0xc5   : > { %3064 = vmatpush3.bf16.msra.mxu0 %v3883_v41 }
  0xc6   : > { %3095 = vmatprep.subr.bf16.mxu0 %v3494_v32 }
  0xc8   : > { %3250 = vmatmul.mubr.msk.bf16.vlgmr.msra.gmra.mrb[64].mxu1 %vm729_vm0, %v3442_v60  ;;  %1762 = vmatmul.mubr.bf16.vlgmr.msra.gmra.mrb[80].mxu0 %v3443_v63 }
  0xc9   : > { %3136 = vmatpush3.bf16.msra.mxu1 %v3495_v40  ;;  %3096 = vmatpush3.bf16.msra.mxu0 %v3496_v43 }
  0xca   : > { %3137 = vmatprep.subr.bf16.mxu1 %v3497_v44  ;;  %3097 = vmatprep.subr.bf16.mxu0 %v3498_v49 }
  0xcb   : > { %1769 = vmatprep.mubr.bf16.mxu0 %v3446_v35  ;;  %3253 = vmatprep.mubr.msk.bf16.mxu1 %vm729_vm0, %v3452_v1  ;;  %v2649_v35 = vld [vmem:[%s3744_s27 + $0x304] sm:$0x11] }
  0xcd   : > { %3138 = vmatpush3.bf16.msra.mxu1 %v3499_v52  ;;  %3098 = vmatpush3.bf16.msra.mxu0 %v3500_v57 }
  0xce   : > { %3139 = vmatprep.subr.bf16.mxu1 %v3501_v0  ;;  %3099 = vmatprep.subr.bf16.mxu0 %v3502_v2 }
  0xd0   : > { %1770 = vmatmul.mubr.bf16.gmra.mrb[84].mxu0 %v3448_v50  ;;  %3254 = vmatmul.mubr.msk.bf16.gmra.mrb[68].mxu1 %vm729_vm0, %v3453_v51  ;;  %v2677_v50 = vcombine.high %v2649_v35, %v2649_v35  ;;  %v3482_v51 = vld [vmem:[%s3744_s27 + $0x260] ss:$28 sps:$4 sm:$0xff]  }
  0xd1   : > { %3140 = vmatpush3.bf16.msra.mxu1 %v3503_v5  ;;  %3100 = vmatpush3.bf16.msra.mxu0 %v3504_v6  ;;  %v3480_v5 = vld [vmem:[%s3744_s27 + $0x25c] ss:$28 sps:$4 sm:$0xff]  }
  0xd2   : > { %3141 = vmatprep.subr.bf16.mxu1 %v3505_v7  ;;  %3101 = vmatprep.subr.bf16.mxu0 %v3506_v8  ;;  %v3483_v8 = vld [vmem:[%s3744_s27 + $0x264] ss:$28 sps:$4 sm:$0xff]  }
  0xd3   : > { %1777 = vmatprep.mubr.bf16.mxu0 %v3449_v3  ;;  %2130 = vmatprep.mubr.bf16.mxu1 %v3458_v4  ;;  %v2676_v3 = vcombine.low %v2649_v35, %v2649_v35 }
  0xd5   : > { %3142 = vmatpush3.bf16.msra.mxu1 %v3507_v11  ;;  %3102 = vmatpush3.bf16.msra.mxu0 %v3508_v12  ;;  %v3485_v11 = vld [vmem:[%s3744_s27 + $0x298] ss:$28 sps:$4 sm:$0xff]  }
  0xd6   : > { %3143 = vmatprep.subr.bf16.mxu1 %v3509_v13  ;;  %3103 = vmatprep.subr.bf16.mxu0 %v3510_v14 }
  0xd8   : > { %1778 = vmatmul.mubr.bf16.gmra.mrb[88].mxu0 %v3451_v9 }
  0xd9   : > { %3144 = vmatpush3.bf16.msra.mxu1 %v3511_v16  ;;  %3104 = vmatpush3.bf16.msra.mxu0 %v3512_v17 }
  0xda   : > { %3145 = vmatprep.subr.bf16.mxu1 %v3513_v18  ;;  %3105 = vmatprep.subr.bf16.mxu0 %v3514_v19 }
  0xdb   : > { %1785 = vmatprep.mubr.bf16.mxu0 %v2617_v15 }
  0xdd   : > { %3146 = vmatpush3.bf16.msra.mxu1 %v3515_v21  ;;  %3106 = vmatpush3.bf16.msra.mxu0 %v3516_v22  ;;  %v3487_v21 = vld [vmem:[%s3744_s27 + $0x294] ss:$28 sps:$4 sm:$0xff]   ;;  %v3519_v22 = vld [vmem:[%s4331_s1 + $0x188] sm:$0xff]  }
  0xde   : > { %3147 = vmatprep.subr.bf16.mxu1 %v3714_v25  ;;  %3107 = vmatprep.subr.bf16.mxu0 %v3517_v23  ;;  %v3459_v25 = vld [vmem:[%s3744_s27 + $0x24c] ss:$28 sps:$4 sm:$0xff]  }
  0xe0   : > { %1786 = vmatmul.mubr.bf16.gmra.mrb[92].mxu0 %v2616_v20  ;;  %v3484_v20 = vld [vmem:[%s3744_s27 + $0x29c] ss:$28 sps:$4 sm:$0xff]  }
  0xe1   : > { %3148 = vmatpush3.bf16.msra.mxu1 %v3727_v27  ;;  %3108 = vmatpush3.bf16.msra.mxu0 %v3721_v26  ;;  %v3462_v27 = vld [vmem:[%s3744_s27 + $0x290] ss:$28 sps:$4 sm:$0xff]   ;;  %v3465_v26 = vld [vmem:[%s3744_s27 + $0x288] ss:$28 sps:$4 sm:$0xff]  }
  0xe2   : > { %3149 = vmatprep.subr.bf16.mxu1 %v3739_v29  ;;  %3109 = vmatprep.subr.bf16.mxu0 %v3733_v28  ;;  %v3464_v28 = vld [vmem:[%s3744_s27 + $0x28c] ss:$28 sps:$4 sm:$0xff]   ;;  %v3467_v29 = vld [vmem:[%s3744_s27 + $0x284] ss:$28 sps:$4 sm:$0xff]  }
  0xe3   : > { %2066 = vmatprep.mubr.bf16.mxu0 %v3461_v24 }
  0xe5   : > { %3150 = vmatpush3.bf16.msra.mxu1 %v3756_v31  ;;  %3110 = vmatpush3.bf16.msra.mxu0 %v3750_v30  ;;  %v3468_v30 = vld [vmem:[%s3744_s27 + $0x2c8] ss:$28 sps:$4 sm:$0xff]   ;;  %v3471_v31 = vld [vmem:[%s3744_s27 + $0x2c0] ss:$28 sps:$4 sm:$0xff]  }
  0xe6   : > { %3269 = vmatprep.subr.bf16.mxu1 %v3767_v36  ;;  %3175 = vmatprep.subr.bf16.mxu0 %v3767_v36  ;;  %v2648_v36 = vld [vmem:[%s3744_s27 + $0x2fc] sm:$0x11] }
  0xe7   : > { %v2674_v63 = vcombine.low %v2648_v36, %v2648_v36 }
  0xe8   : > { %2131 = vmatmul.mubr.bf16.vlgmr.msra.gmra.mrb[72].mxu1 %v3456_v42  ;;  %2067 = vmatmul.mubr.bf16.vlgmr.msra.gmra.mrb[96].mxu0 %v3459_v25  ;;  %v3490_v25 = vld [vmem:[%s3744_s27 + $0x2d0] ss:$28 sps:$4 sm:$0xff]  }
  0xe9   : > { %3277 = vmatpush3.bf16.msra.mxu1 %v3772_v37  ;;  %3176 = vmatpush3.bf16.msra.mxu0 %v3772_v37  ;;  %v3470_v37 = vld [vmem:[%s3744_s27 + $0x2c4] ss:$28 sps:$4 sm:$0xff]  }
  0xea   : > { %3270 = vmatprep.subr.bf16.mxu1 %v3778_v38  ;;  %2138 = vmatprep.mubr.bf16.mxu1 %v3462_v27 }
  0xeb   : > { %3177 = vmatprep.subr.bf16.mxu0 %v3778_v38  ;;  %2074 = vmatprep.mubr.bf16.mxu0 %v3465_v26  ;;  %v3473_v38 = vld [vmem:[%s3744_s27 + $0x2bc] ss:$28 sps:$4 sm:$0xff]  }
  0xed   : > { %3278 = vmatpush3.bf16.msra.mxu1 %v3784_v39  ;;  %3178 = vmatpush3.bf16.msra.mxu0 %v3784_v39  ;;  %v2647_v39 = vld [vmem:[%s3744_s27 + $0x2f4] sm:$0x11] }
  0xee   : > { %3271 = vmatprep.subr.bf16.mxu1 %v3801_v45  ;;  %3179 = vmatprep.subr.bf16.mxu0 %v3801_v45  ;;  %v2675_v45 = vcombine.high %v2648_v36, %v2648_v36  ;;  %v2672_v32 = vcombine.low %v2647_v39, %v2647_v39 }
  0xf0   : > { %2139 = vmatmul.mubr.bf16.gmra.mrb[76].mxu1 %v3464_v28  ;;  %2075 = vmatmul.mubr.bf16.gmra.mrb[100].mxu0 %v3467_v29 }
  0xf1   : > { %3279 = vmatpush3.bf16.msra.mxu1 %v3807_v46  ;;  %3180 = vmatpush3.bf16.msra.mxu0 %v3807_v46  ;;  %v2673_v46 = vcombine.high %v2647_v39, %v2647_v39 }
  0xf2   : > { %3272 = vmatprep.subr.bf16.mxu1 %v3813_v47  ;;  %2146 = vmatprep.mubr.bf16.mxu1 %v3468_v30 }
  0xf3   : > { %3181 = vmatprep.subr.bf16.mxu0 %v3813_v47  ;;  %2082 = vmatprep.mubr.bf16.mxu0 %v3471_v31 }
  0xf5   : > { %3280 = vmatpush3.bf16.msra.mxu1 %v3819_v48  ;;  %3182 = vmatpush3.bf16.msra.mxu0 %v3819_v48 }
  0xf6   : > { %3273 = vmatprep.subr.bf16.mxu1 %v3829_v53  ;;  %3183 = vmatprep.subr.bf16.mxu0 %v3829_v53 }
  0xf8   : > { %2147 = vmatmul.mubr.bf16.gmra.mrb[80].mxu1 %v3470_v37  ;;  %2083 = vmatmul.mubr.bf16.gmra.mrb[104].mxu0 %v3473_v38  ;;  %v3489_v38 = vld [vmem:[%s3744_s27 + $0x30c] ss:$0 sps:$4 sm:$0x11]  }
  0xf9   : > { %3281 = vmatpush3.bf16.msra.mxu1 %v3835_v54  ;;  %3184 = vmatpush3.bf16.msra.mxu0 %v3835_v54 }
  0xfa   : > { %3274 = vmatprep.subr.bf16.mxu1 %v3841_v55  ;;  %v2733_v47 = vpop.f32.mrb[0].mxu0  ;;  %2154 = vmatprep.mubr.bf16.mxu1 %v2675_v45 }
  0xfb   : > { %v2773_v58 = vpop.f32.mrb[0].mxu1  ;;  %v2734_v59 = vpop.f32.mrb[1].mxu0  ;;  %3185 = vmatprep.subr.bf16.mxu0 %v3841_v55  ;;  %2090 = vmatprep.mubr.bf16.mxu0 %v2673_v46 }
  0xfc   : > { %v2735_v48 = vadd.f32 %v2734_v59, %v2733_v47  ;;  %v2774_v53 = vpop.f32.mrb[1].mxu1  ;;  %v2736_v60 = vpop.f32.mrb[2].mxu0  ;;  %v3492_v47 = vld [vmem:[%s3744_s27 + $0x2cc] ss:$28 sps:$4 sm:$0xff]  }
  0xfd   : > { %3282 = vmatpush3.bf16.msra.mxu1 %v3846_v56  ;;  %v2775_v1 = vadd.f32 %v2774_v53, %v2773_v58  ;;  %v2776_v54 = vpop.f32.mrb[2].mxu1  ;;  %3186 = vmatpush3.bf16.msra.mxu0 %v3846_v56  ;;  %v2737_v40 = vpop.f32.mrb[3].mxu0 }
  0xfe   : > { %3275 = vmatprep.subr.bf16.mxu1 %v3860_v62  ;;  %v2738_v43 = vadd.f32 %v2737_v40, %v2736_v60  ;;  %v2777_v44 = vpop.f32.mrb[3].mxu1  ;;  %3187 = vmatprep.subr.bf16.mxu0 %v3860_v62 }
  0xff   : > { %v4184_v55 = vadd.f32 %v2775_v1, %v2735_v48  ;;  %v2778_v49 = vadd.f32 %v2777_v44, %v2776_v54 }
 0x100   : > { %2155 = vmatmul.mubr.bf16.gmra.mrb[84].mxu1 %v2674_v63  ;;  %2091 = vmatmul.mubr.bf16.gmra.mrb[108].mxu0 %v2672_v32 }
 0x101   : > { %v4187_v52 = vadd.f32 %v2778_v49, %v2738_v43  ;;  %3283 = vmatpush3.bf16.msra.mxu1 %v3868_v33  ;;  %3188 = vmatpush3.bf16.msra.mxu0 %v3868_v33 }
 0x102   : > { %3276 = vmatprep.subr.bf16.mxu1 %v3874_v34  ;;  %v2739_v56 = vpop.f32.mrb[4].mxu0  ;;  %3189 = vmatprep.subr.bf16.mxu0 %v3874_v34  ;;  %v3518_v34 = vld [vmem:[%s4331_s1 + $0x180] sm:$0xff]  }
 0x103   : > { %v2779_v62 = vpop.f32.mrb[4].mxu1  ;;  %v2740_v57 = vpop.f32.mrb[5].mxu0  ;;  %2218 = vmatprep.mubr.bf16.mxu1 %v2677_v50  ;;  %2194 = vmatprep.mubr.bf16.mxu0 %v3482_v51 }
 0x104   : > { %v2741_v0 = vadd.f32 %v2740_v57, %v2739_v56  ;;  %v2780_v2 = vpop.f32.mrb[5].mxu1  ;;  %v2742_v4 = vpop.f32.mrb[6].mxu0 }
 0x105   : > { %3284 = vmatpush3.bf16.msra.mxu1 %v3883_v41  ;;  %v2781_v6 = vadd.f32 %v2780_v2, %v2779_v62  ;;  %v2782_v33 = vpop.f32.mrb[6].mxu1  ;;  %3190 = vmatpush3.bf16.msra.mxu0 %v3883_v41  ;;  %v2743_v7 = vpop.f32.mrb[7].mxu0 }
 0x106   : > { %3257 = vmatprep.subr.bf16.mxu1 %v3518_v34  ;;  %v2744_v9 = vadd.f32 %v2743_v7, %v2742_v4  ;;  %v2783_v10 = vpop.f32.mrb[7].mxu1 }
 0x107   : > { %v4201_v12 = vadd.f32 %v2781_v6, %v2741_v0  ;;  %v2784_v13 = vadd.f32 %v2783_v10, %v2782_v33 }
 0x108   : > { %2219 = vmatmul.mubr.bf16.vlgmr.msra.gmra.mrb[88].mxu1 %v2676_v3  ;;  %2195 = vmatmul.mubr.bf16.vlgmr.msra.gmra.mrb[112].mxu0 %v3480_v5 }
 0x109   : > { %v4203_v14 = vadd.f32 %v2784_v13, %v2744_v9  ;;  %3258 = vmatpush3.bf16.msra.mxu1 %v3518_v34  ;;  %3261 = vmatprep.mubr.msk.bf16.mxu1 %vm729_vm0, %v3483_v8 }
 0x10a   : > { %3259 = vmatprep.subr.bf16.mxu1 %v3854_v61  ;;  %v2745_v41 = vpop.f32.mrb[8].mxu0  ;;  %2202 = vmatprep.mubr.bf16.mxu0 %v3485_v11  ;;  %v3488_v61 = vld [vmem:[%s3744_s27 + $0x2d4] ss:$28 sps:$4 sm:$0xff]  }
 0x10b   : > { %v2785_v15 = vpop.f32.mrb[8].mxu1  ;;  %v2746_v16 = vpop.f32.mrb[9].mxu0 }
 0x10c   : > { %v2747_v17 = vadd.f32 %v2746_v16, %v2745_v41  ;;  %v2786_v18 = vpop.f32.mrb[9].mxu1  ;;  %v2748_v19 = vpop.f32.mrb[10].mxu0 }
 0x10d   : > { %3260 = vmatpush3.bf16.msra.mxu1 %v3519_v22  ;;  %v2787_v23 = vadd.f32 %v2786_v18, %v2785_v15  ;;  %v2788_v24 = vpop.f32.mrb[10].mxu1  ;;  %v2749_v42 = vpop.f32.mrb[11].mxu0 }
 0x10e   : > { %v2750_v27 = vadd.f32 %v2749_v42, %v2748_v19  ;;  %v2789_v26 = vpop.f32.mrb[11].mxu1 }
 0x10f   : > { %v857_v28 = vadd.f32 %v2787_v23, %v2747_v17  ;;  %v2790_v29 = vadd.f32 %v2789_v26, %v2788_v24 }
 0x110   : > { %3262 = vmatmul.mubr.msk.bf16.vlgmr.msra.gmra.mrb[92].mxu1 %vm729_vm0, %v3484_v20  ;;  %2203 = vmatmul.mubr.bf16.gmra.mrb[116].mxu0 %v3487_v21 }
 0x111   : > { %v860_v30 = vadd.f32 %v2790_v29, %v2750_v27  ;;  %3265 = vmatprep.mubr.msk.bf16.mxu1 %vm729_vm0, %v3488_v61  ;;  %2210 = vmatprep.mubr.bf16.mxu0 %v3490_v25 }
 0x112   : > { %v2751_v31 = vpop.f32.mrb[12].mxu0 }
 0x113   : > { %v2791_v36 = vpop.f32.mrb[12].mxu1  ;;  %v2752_v37 = vpop.f32.mrb[13].mxu0 }
 0x114   : > { %v2753_v39 = vadd.f32 %v2752_v37, %v2751_v31  ;;  %v2792_v45 = vpop.f32.mrb[13].mxu1  ;;  %v2754_v46 = vpop.f32.mrb[14].mxu0 }
 0x115   : > { %v2793_v58 = vadd.f32 %v2792_v45, %v2791_v36  ;;  %v2755_v59 = vpop.f32.mrb[15].mxu0  ;;  %v2794_v48 = vpop.f32.mrb[14].mxu1 }
 0x116   : > { %v2795_v53 = vpop.f32.mrb[15].mxu1 }
 0x117   : > { %v865_v60 = vadd.f32 %v2793_v58, %v2753_v39 }
 0x118   : > { %3266 = vmatmul.mubr.msk.bf16.gmra.mrb[96].mxu1 %vm729_vm0, %v3489_v38  ;;  %2211 = vmatmul.mubr.bf16.gmra.mrb[120].mxu0 %v3492_v47 }
 0x11b   : > { %v2813_v63 = vpop.f32.mrb[16].mxu0  ;;  %v3227_v32 = vpop.f32.mrb[16].mxu1 }
 0x11c   : > { %v2814_v35 = vpop.f32.mrb[17].mxu0  ;;  %v968_v1 = vpop.f32.mrb[17].mxu1 }
 0x11d   : > { %v2815_v54 = vadd.f32 %v2814_v35, %v2813_v63  ;;  %v2816_v40 = vpop.f32.mrb[18].mxu0  ;;  %v3228_v43 = vpop.f32.mrb[18].mxu1 }
 0x11e   : > { %v2817_v44 = vpop.f32.mrb[19].mxu0  ;;  %v971_v49 = vpop.f32.mrb[19].mxu1 }
 0x11f   : > { %v2818_v50 = vadd.f32 %v2817_v44, %v2816_v40  ;;  %v905_v51 = vadd.f32 %v2815_v54, %v4184_v55 }
 0x121   : > { %v4220_v56 = vadd.f32 %v968_v1, %v905_v51  ;;  %v908_v62 = vadd.f32 %v2818_v50, %v4187_v52 }
 0x123   : > { %v4223_v57 = vadd.f32 %v971_v49, %v908_v62  ;;  %v2819_v0 = vpop.f32.mrb[20].mxu0  ;;  %v3231_v2 = vpop.f32.mrb[20].mxu1 }
 0x124   : > { %v2820_v3 = vpop.f32.mrb[21].mxu0  ;;  %v984_v4 = vpop.f32.mrb[21].mxu1 }
 0x125   : > { %v2821_v5 = vadd.f32 %v2820_v3, %v2819_v0  ;;  %v2822_v6 = vpop.f32.mrb[22].mxu0  ;;  %v3232_v33 = vpop.f32.mrb[22].mxu1 }
 0x126   : > { %v2823_v7 = vpop.f32.mrb[23].mxu0  ;;  %v987_v8 = vpop.f32.mrb[23].mxu1 }
 0x127   : > { %v913_v34 = vadd.f32 %v2821_v5, %v4201_v12  ;;  %v2824_v9 = vadd.f32 %v2823_v7, %v2822_v6 }
 0x129   : > { %v4226_v10 = vadd.f32 %v3227_v32, %v913_v34  ;;  %v916_v55 = vadd.f32 %v2824_v9, %v4203_v14 }
 0x12b   : > { %v4229_v11 = vadd.f32 %v3228_v43, %v916_v55  ;;  %v2825_v52 = vpop.f32.mrb[24].mxu0 }
 0x12c   : > { %v2826_v13 = vpop.f32.mrb[25].mxu0 }
 0x12d   : > { %v2827_v41 = vadd.f32 %v2826_v13, %v2825_v52  ;;  %v2828_v15 = vpop.f32.mrb[26].mxu0 }
 0x12e   : > { %v2829_v16 = vpop.f32.mrb[27].mxu0 }
 0x12f   : > { %v2830_v17 = vadd.f32 %v2829_v16, %v2828_v15  ;;  %v921_v18 = vadd.f32 %v2827_v41, %v857_v28 }
 0x131   : > { %v4231_v19 = vadd.f32 %v984_v4, %v921_v18  ;;  %v924_v20 = vadd.f32 %v2830_v17, %v860_v30 }
 0x133   : > { %v4233_v21 = vadd.f32 %v987_v8, %v924_v20  ;;  %v2831_v12 = vpop.f32.mrb[28].mxu0 }
 0x134   : > { %v2832_v22 = vpop.f32.mrb[29].mxu0 }
 0x135   : > { %v2833_v23 = vadd.f32 %v2832_v22, %v2831_v12  ;;  %v2834_v24 = vpop.f32.mrb[30].mxu0 }
 0x136   : > { %v2835_v42 = vpop.f32.mrb[31].mxu0 }
 0x137   : > { %v929_v14 = vadd.f32 %v2833_v23, %v865_v60 }
 0x139   : > { %v4235_v61 = vadd.f32 %v3231_v2, %v929_v14 }
 0x13b   : > { %v2859_v25 = vpop.f32.mrb[32].mxu0  ;;  %v2899_v27 = vpop.f32.mrb[24].mxu1 }
 0x13c   : > { %v2860_v26 = vpop.f32.mrb[33].mxu0  ;;  %v2900_v29 = vpop.f32.mrb[25].mxu1 }
 0x13d   : > { %v2861_v31 = vadd.f32 %v2860_v26, %v2859_v25  ;;  %v2901_v36 = vadd.f32 %v2900_v29, %v2899_v27  ;;  %v2862_v28 = vpop.f32.mrb[34].mxu0  ;;  %v2902_v37 = vpop.f32.mrb[26].mxu1 }
 0x13e   : > { %v2863_v38 = vpop.f32.mrb[35].mxu0  ;;  %v2903_v30 = vpop.f32.mrb[27].mxu1 }
 0x13f   : > { %v1267_v39 = vadd.f32 %v2901_v36, %v2861_v31  ;;  %v2864_v45 = vadd.f32 %v2863_v38, %v2862_v28  ;;  %v2904_v46 = vadd.f32 %v2903_v30, %v2902_v37 }
 0x141   : > { %v1270_v47 = vadd.f32 %v2904_v46, %v2864_v45 }
 0x143   : > { %v2865_v58 = vpop.f32.mrb[36].mxu0  ;;  %v2905_v59 = vpop.f32.mrb[28].mxu1 }
 0x144   : > { %v2866_v48 = vpop.f32.mrb[37].mxu0  ;;  %v2906_v53 = vpop.f32.mrb[29].mxu1 }
 0x145   : > { %v2867_v60 = vadd.f32 %v2866_v48, %v2865_v58  ;;  %v2907_v63 = vadd.f32 %v2906_v53, %v2905_v59  ;;  %v2868_v32 = vpop.f32.mrb[38].mxu0  ;;  %v2908_v35 = vpop.f32.mrb[30].mxu1 }
 0x146   : > { %v2869_v1 = vpop.f32.mrb[39].mxu0  ;;  %v2909_v54 = vpop.f32.mrb[31].mxu1 }
 0x147   : > { %v1275_v40 = vadd.f32 %v2907_v63, %v2867_v60  ;;  %v2870_v43 = vadd.f32 %v2869_v1, %v2868_v32  ;;  %v2910_v44 = vadd.f32 %v2909_v54, %v2908_v35 }
 0x149   : > { %v1278_v49 = vadd.f32 %v2910_v44, %v2870_v43 }
 0x14b   : > { %v2871_v50 = vpop.f32.mrb[40].mxu0  ;;  %v2911_v51 = vpop.f32.mrb[32].mxu1 }
 0x14c   : > { %v2872_v62 = vpop.f32.mrb[41].mxu0  ;;  %v2912_v0 = vpop.f32.mrb[33].mxu1 }
 0x14d   : > { %v2873_v2 = vadd.f32 %v2872_v62, %v2871_v50  ;;  %v2913_v3 = vadd.f32 %v2912_v0, %v2911_v51  ;;  %v2874_v4 = vpop.f32.mrb[42].mxu0  ;;  %v2914_v5 = vpop.f32.mrb[34].mxu1 }
 0x14e   : > { %v2875_v6 = vpop.f32.mrb[43].mxu0  ;;  %v2915_v33 = vpop.f32.mrb[35].mxu1 }
 0x14f   : > { %v1283_v7 = vadd.f32 %v2913_v3, %v2873_v2  ;;  %v2876_v8 = vadd.f32 %v2875_v6, %v2874_v4  ;;  %v2916_v34 = vadd.f32 %v2915_v33, %v2914_v5 }
 0x151   : > { %v1286_v9 = vadd.f32 %v2916_v34, %v2876_v8 }
 0x153   : > { %v2877_v55 = vpop.f32.mrb[44].mxu0  ;;  %v2917_v52 = vpop.f32.mrb[36].mxu1 }
 0x154   : > { %v2878_v13 = vpop.f32.mrb[45].mxu0  ;;  %v2918_v41 = vpop.f32.mrb[37].mxu1 }
 0x155   : > { %v2879_v15 = vadd.f32 %v2878_v13, %v2877_v55  ;;  %v2919_v16 = vadd.f32 %v2918_v41, %v2917_v52  ;;  %v2880_v17 = vpop.f32.mrb[46].mxu0  ;;  %v2920_v18 = vpop.f32.mrb[38].mxu1 }
 0x156   : > { %v2881_v20 = vpop.f32.mrb[47].mxu0  ;;  %v2921_v12 = vpop.f32.mrb[39].mxu1 }
 0x157   : > { %v1291_v22 = vadd.f32 %v2919_v16, %v2879_v15 }
 0x15b   : > { %v2939_v23 = vpop.f32.mrb[48].mxu0  ;;  %v3239_v24 = vpop.f32.mrb[40].mxu1 }
 0x15c   : > { %v2940_v42 = vpop.f32.mrb[49].mxu0  ;;  %v1394_v14 = vpop.f32.mrb[41].mxu1 }
 0x15d   : > { %v2941_v25 = vadd.f32 %v2940_v42, %v2939_v23  ;;  %v2942_v27 = vpop.f32.mrb[50].mxu0  ;;  %v3240_v26 = vpop.f32.mrb[42].mxu1 }
 0x15e   : > { %v2943_v29 = vpop.f32.mrb[51].mxu0  ;;  %v1397_v31 = vpop.f32.mrb[43].mxu1 }
 0x15f   : > { %v2944_v36 = vadd.f32 %v2943_v29, %v2942_v27  ;;  %v1331_v28 = vadd.f32 %v2941_v25, %v1267_v39 }
 0x161   : > { %v4237_v37 = vadd.f32 %v1394_v14, %v1331_v28  ;;  %v1334_v38 = vadd.f32 %v2944_v36, %v1270_v47 }
 0x163   : > { %v1424_v30 = vmax.f32 %v4220_v56, %v4237_v37  ;;  %v4241_v45 = vadd.f32 %v1397_v31, %v1334_v38  ;;  %v2945_v46 = vpop.f32.mrb[52].mxu0  ;;  %v3243_v58 = vpop.f32.mrb[44].mxu1 }
 0x164   : > { %v2946_v59 = vpop.f32.mrb[53].mxu0  ;;  %v1410_v48 = vpop.f32.mrb[45].mxu1 }
 0x165   : > { %v1425_v53 = vmax.f32 %v4223_v57, %v4241_v45  ;;  %v2947_v60 = vadd.f32 %v2946_v59, %v2945_v46  ;;  %v2948_v63 = vpop.f32.mrb[54].mxu0  ;;  %v3244_v32 = vpop.f32.mrb[46].mxu1 }
 0x166   : > { %v2949_v35 = vpop.f32.mrb[55].mxu0  ;;  %v1413_v39 = vpop.f32.mrb[47].mxu1 }
 0x167   : > { %v1339_v1 = vadd.f32 %v2947_v60, %v1275_v40  ;;  %v2950_v54 = vadd.f32 %v2949_v35, %v2948_v63 }
 0x169   : > { %v4245_v47 = vadd.f32 %v3239_v24, %v1339_v1  ;;  %v1342_v43 = vadd.f32 %v2950_v54, %v1278_v49 }
 0x16b   : > { %v1426_v44 = vmax.f32 %v4226_v10, %v4245_v47  ;;  %v4249_v50 = vadd.f32 %v3240_v26, %v1342_v43  ;;  %v2951_v51 = vpop.f32.mrb[56].mxu0 }
 0x16c   : > { %v2952_v62 = vpop.f32.mrb[57].mxu0 }
 0x16d   : > { %v1427_v0 = vmax.f32 %v4229_v11, %v4249_v50  ;;  %v2953_v2 = vadd.f32 %v2952_v62, %v2951_v51  ;;  %v2954_v3 = vpop.f32.mrb[58].mxu0 }
 0x16e   : > { %v2955_v4 = vpop.f32.mrb[59].mxu0 }
 0x16f   : > { %v2956_v5 = vadd.f32 %v2955_v4, %v2954_v3  ;;  %v1347_v6 = vadd.f32 %v2953_v2, %v1283_v7 }
 0x171   : > { %v4253_v40 = vadd.f32 %v1410_v48, %v1347_v6  ;;  %v1350_v33 = vadd.f32 %v2956_v5, %v1286_v9 }
 0x173   : > { %v1428_v49 = vmax.f32 %v4231_v19, %v4253_v40  ;;  %v4257_v8 = vadd.f32 %v1413_v39, %v1350_v33  ;;  %v2957_v34 = vpop.f32.mrb[60].mxu0 }
 0x174   : > { %v2958_v55 = vpop.f32.mrb[61].mxu0 }
 0x175   : > { %v1429_v52 = vmax.f32 %v4233_v21, %v4257_v8  ;;  %v2959_v13 = vadd.f32 %v2958_v55, %v2957_v34  ;;  %v2960_v41 = vpop.f32.mrb[62].mxu0 }
 0x176   : > { %v2961_v15 = vpop.f32.mrb[63].mxu0 }
 0x177   : > { %v1355_v16 = vadd.f32 %v2959_v13, %v1291_v22 }
 0x179   : > { %v4261_v17 = vadd.f32 %v3243_v58, %v1355_v16 }
 0x17b   : > { %v2985_v7 = vpop.f32.mrb[64].mxu0  ;;  %v3025_v18 = vpop.f32.mrb[48].mxu1  ;;  %v1430_v9 = vmax.f32 %v4235_v61, %v4261_v17 }
 0x17c   : > { %v2986_v20 = vpop.f32.mrb[65].mxu0  ;;  %v3026_v12 = vpop.f32.mrb[49].mxu1 }
 0x17d   : > { %v2987_v23 = vadd.f32 %v2986_v20, %v2985_v7  ;;  %v3027_v24 = vadd.f32 %v3026_v12, %v3025_v18  ;;  %v2988_v42 = vpop.f32.mrb[66].mxu0  ;;  %v3028_v14 = vpop.f32.mrb[50].mxu1 }
 0x17e   : > { %v2989_v25 = vpop.f32.mrb[67].mxu0  ;;  %v3029_v27 = vpop.f32.mrb[51].mxu1 }
 0x17f   : > { %v1700_v26 = vadd.f32 %v3027_v24, %v2987_v23  ;;  %v2990_v29 = vadd.f32 %v2989_v25, %v2988_v42  ;;  %v3030_v31 = vadd.f32 %v3029_v27, %v3028_v14 }
 0x181   : > { %v1703_v36 = vadd.f32 %v3030_v31, %v2990_v29 }
 0x183   : > { %v2991_v22 = vpop.f32.mrb[68].mxu0  ;;  %v3031_v28 = vpop.f32.mrb[52].mxu1 }
 0x184   : > { %v2992_v38 = vpop.f32.mrb[69].mxu0  ;;  %v3032_v46 = vpop.f32.mrb[53].mxu1 }
 0x185   : > { %v2993_v58 = vadd.f32 %v2992_v38, %v2991_v22  ;;  %v3033_v59 = vadd.f32 %v3032_v46, %v3031_v28  ;;  %v2994_v48 = vpop.f32.mrb[70].mxu0  ;;  %v3034_v60 = vpop.f32.mrb[54].mxu1 }
 0x186   : > { %v2995_v63 = vpop.f32.mrb[71].mxu0  ;;  %v3035_v32 = vpop.f32.mrb[55].mxu1 }
 0x187   : > { %v1708_v35 = vadd.f32 %v3033_v59, %v2993_v58  ;;  %v2996_v39 = vadd.f32 %v2995_v63, %v2994_v48  ;;  %v3036_v1 = vadd.f32 %v3035_v32, %v3034_v60 }
 0x189   : > { %v1711_v54 = vadd.f32 %v3036_v1, %v2996_v39 }
 0x18b   : > { %v2997_v43 = vpop.f32.mrb[72].mxu0  ;;  %v3037_v51 = vpop.f32.mrb[56].mxu1 }
 0x18c   : > { %v2998_v62 = vpop.f32.mrb[73].mxu0  ;;  %v3038_v2 = vpop.f32.mrb[57].mxu1 }
 0x18d   : > { %v2999_v3 = vadd.f32 %v2998_v62, %v2997_v43  ;;  %v3039_v4 = vadd.f32 %v3038_v2, %v3037_v51  ;;  %v3000_v5 = vpop.f32.mrb[74].mxu0  ;;  %v3040_v6 = vpop.f32.mrb[58].mxu1 }
 0x18e   : > { %v3001_v33 = vpop.f32.mrb[75].mxu0  ;;  %v3041_v34 = vpop.f32.mrb[59].mxu1 }
 0x18f   : > { %v1716_v55 = vadd.f32 %v3039_v4, %v2999_v3  ;;  %v3002_v13 = vadd.f32 %v3001_v33, %v3000_v5  ;;  %v3042_v41 = vadd.f32 %v3041_v34, %v3040_v6 }
 0x191   : > { %v1719_v15 = vadd.f32 %v3042_v41, %v3002_v13 }
 0x193   : > { %v3003_v16 = vpop.f32.mrb[76].mxu0  ;;  %v3043_v7 = vpop.f32.mrb[60].mxu1 }
 0x194   : > { %v3004_v18 = vpop.f32.mrb[77].mxu0  ;;  %v3044_v20 = vpop.f32.mrb[61].mxu1 }
 0x195   : > { %v3005_v12 = vadd.f32 %v3004_v18, %v3003_v16  ;;  %v3045_v23 = vadd.f32 %v3044_v20, %v3043_v7  ;;  %v3006_v24 = vpop.f32.mrb[78].mxu0  ;;  %v3046_v42 = vpop.f32.mrb[62].mxu1 }
 0x196   : > { %v3007_v14 = vpop.f32.mrb[79].mxu0  ;;  %v3047_v25 = vpop.f32.mrb[63].mxu1 }
 0x197   : > { %v1724_v27 = vadd.f32 %v3045_v23, %v3005_v12 }
 0x19b   : > { %v3065_v29 = vpop.f32.mrb[80].mxu0  ;;  %v3251_v31 = vpop.f32.mrb[64].mxu1 }
 0x19c   : > { %v3066_v22 = vpop.f32.mrb[81].mxu0  ;;  %v1827_v28 = vpop.f32.mrb[65].mxu1 }
 0x19d   : > { %v3067_v38 = vadd.f32 %v3066_v22, %v3065_v29  ;;  %v3068_v46 = vpop.f32.mrb[82].mxu0  ;;  %v3252_v58 = vpop.f32.mrb[66].mxu1 }
 0x19e   : > { %v3069_v59 = vpop.f32.mrb[83].mxu0  ;;  %v1830_v48 = vpop.f32.mrb[67].mxu1 }
 0x19f   : > { %v3070_v60 = vadd.f32 %v3069_v59, %v3068_v46  ;;  %v1764_v63 = vadd.f32 %v3067_v38, %v1700_v26 }
 0x1a1   : > { %v1828_v32 = vadd.f32 %v1827_v28, %v1764_v63  ;;  %v1767_v39 = vadd.f32 %v3070_v60, %v1703_v36 }
 0x1a3   : > { %v4268_v1 = vmax.f32 %v1424_v30, %v1828_v32  ;;  %v1831_v43 = vadd.f32 %v1830_v48, %v1767_v39  ;;  %v3071_v51 = vpop.f32.mrb[84].mxu0  ;;  %v3255_v62 = vpop.f32.mrb[68].mxu1 }
 0x1a4   : > { %v3072_v2 = vpop.f32.mrb[85].mxu0  ;;  %v1843_v3 = vpop.f32.mrb[69].mxu1 }
 0x1a5   : > { %v4273_v4 = vmax.f32 %v1425_v53, %v1831_v43  ;;  %v3073_v5 = vadd.f32 %v3072_v2, %v3071_v51  ;;  %v3074_v6 = vpop.f32.mrb[86].mxu0  ;;  %v3256_v26 = vpop.f32.mrb[70].mxu1 }
 0x1a6   : > { %v3075_v33 = vpop.f32.mrb[87].mxu0  ;;  %v1846_v36 = vpop.f32.mrb[71].mxu1 }
 0x1a7   : > { %v1772_v34 = vadd.f32 %v3073_v5, %v1708_v35  ;;  %v3076_v13 = vadd.f32 %v3075_v33, %v3074_v6 }
 0x1a9   : > { %v1836_v56 = vadd.f32 %v3251_v31, %v1772_v34  ;;  %v1775_v37 = vadd.f32 %v3076_v13, %v1711_v54 }
 0x1ab   : > { %v4278_v30 = vmax.f32 %v1426_v44, %v1836_v56  ;;  %v1839_v41 = vadd.f32 %v3252_v58, %v1775_v37  ;;  %v3077_v16 = vpop.f32.mrb[88].mxu0 }
 0x1ac   : > { %v3078_v7 = vpop.f32.mrb[89].mxu0 }
 0x1ad   : > { %v4283_v57 = vmax.f32 %v1427_v0, %v1839_v41  ;;  %v3079_v45 = vadd.f32 %v3078_v7, %v3077_v16  ;;  %v3080_v53 = vpop.f32.mrb[90].mxu0 }
 0x1ae   : > { %v3081_v18 = vpop.f32.mrb[91].mxu0 }
 0x1af   : > { %v3082_v35 = vadd.f32 %v3081_v18, %v3080_v53  ;;  %v1780_v20 = vadd.f32 %v3079_v45, %v1716_v55 }
 0x1b1   : > { %v1844_v12 = vadd.f32 %v1843_v3, %v1780_v20  ;;  %v1783_v54 = vadd.f32 %v3082_v35, %v1719_v15 }
 0x1b3   : > { %v4288_v10 = vmax.f32 %v1428_v49, %v1844_v12  ;;  %v1847_v47 = vadd.f32 %v1846_v36, %v1783_v54  ;;  %v3083_v44 = vpop.f32.mrb[92].mxu0 }
 0x1b4   : > { %v3084_v23 = vpop.f32.mrb[93].mxu0 }
 0x1b5   : > { %v4293_v11 = vmax.f32 %v1429_v52, %v1847_v47  ;;  %v3085_v50 = vadd.f32 %v3084_v23, %v3083_v44  ;;  %v3086_v0 = vpop.f32.mrb[94].mxu0 }
 0x1b6   : > { %v3087_v24 = vpop.f32.mrb[95].mxu0 }
 0x1b7   : > { %v1788_v42 = vadd.f32 %v3085_v50, %v1724_v27 }
 0x1b9   : > { %v1852_v55 = vadd.f32 %v3255_v62, %v1788_v42 }
 0x1bb   : > { %v3111_v14 = vpop.f32.mrb[96].mxu0  ;;  %v3151_v15 = vpop.f32.mrb[72].mxu1  ;;  %v4298_v19 = vmax.f32 %v1430_v9, %v1852_v55 }
 0x1bc   : > { %v3112_v40 = vpop.f32.mrb[97].mxu0  ;;  %v3152_v49 = vpop.f32.mrb[73].mxu1 }
 0x1bd   : > { %v3113_v25 = vadd.f32 %v3112_v40, %v3111_v14  ;;  %v3153_v29 = vadd.f32 %v3152_v49, %v3151_v15  ;;  %v3114_v31 = vpop.f32.mrb[98].mxu0  ;;  %v3154_v21 = vpop.f32.mrb[74].mxu1 }
 0x1be   : > { %v3115_v8 = vpop.f32.mrb[99].mxu0  ;;  %v3155_v52 = vpop.f32.mrb[75].mxu1 }
 0x1bf   : > { %v2133_v22 = vadd.f32 %v3153_v29, %v3113_v25  ;;  %v3116_v28 = vadd.f32 %v3115_v8, %v3114_v31  ;;  %v3156_v38 = vadd.f32 %v3155_v52, %v3154_v21 }
 0x1c1   : > { %v2136_v27 = vadd.f32 %v3156_v38, %v3116_v28 }
 0x1c3   : > { %v3117_v46 = vpop.f32.mrb[100].mxu0  ;;  %v3157_v58 = vpop.f32.mrb[76].mxu1 }
 0x1c4   : > { %v3118_v59 = vpop.f32.mrb[101].mxu0  ;;  %v3158_v48 = vpop.f32.mrb[77].mxu1 }
 0x1c5   : > { %v3119_v60 = vadd.f32 %v3118_v59, %v3117_v46  ;;  %v3159_v61 = vadd.f32 %v3158_v48, %v3157_v58  ;;  %v3120_v17 = vpop.f32.mrb[102].mxu0  ;;  %v3160_v9 = vpop.f32.mrb[78].mxu1 }
 0x1c6   : > { %v3121_v63 = vpop.f32.mrb[103].mxu0  ;;  %v3161_v32 = vpop.f32.mrb[79].mxu1 }
 0x1c7   : > { %v2141_v39 = vadd.f32 %v3159_v61, %v3119_v60  ;;  %v3122_v43 = vadd.f32 %v3121_v63, %v3120_v17  ;;  %v3162_v51 = vadd.f32 %v3161_v32, %v3160_v9  ;;  %v2683_v17 = vld [vmem:[%s4332_s2] ss:$0 sm:$0xff] }
 0x1c9   : > { %v2144_v62 = vadd.f32 %v3162_v51, %v3122_v43 }
 0x1cb   : > { %v3123_v2 = vpop.f32.mrb[104].mxu0  ;;  %v3163_v3 = vpop.f32.mrb[80].mxu1 }
 0x1cc   : > { %v3124_v5 = vpop.f32.mrb[105].mxu0  ;;  %v3164_v6 = vpop.f32.mrb[81].mxu1 }
 0x1cd   : > { %v3125_v26 = vadd.f32 %v3124_v5, %v3123_v2  ;;  %v3165_v33 = vadd.f32 %v3164_v6, %v3163_v3  ;;  %v3126_v36 = vpop.f32.mrb[106].mxu0  ;;  %v3166_v34 = vpop.f32.mrb[82].mxu1 }
 0x1ce   : > { %v3127_v13 = vpop.f32.mrb[107].mxu0  ;;  %v3167_v56 = vpop.f32.mrb[83].mxu1 }
 0x1cf   : > { %v4300_v37 = vadd.f32 %v3165_v33, %v3125_v26  ;;  %v3128_v41 = vadd.f32 %v3127_v13, %v3126_v36  ;;  %v3168_v16 = vadd.f32 %v3167_v56, %v3166_v34 }
 0x1d1   : > { %v4302_v7 = vadd.f32 %v3168_v16, %v3128_v41 }
 0x1d3   : > { %v3129_v45 = vpop.f32.mrb[108].mxu0  ;;  %v3169_v53 = vpop.f32.mrb[84].mxu1 }
 0x1d4   : > { %v3130_v18 = vpop.f32.mrb[109].mxu0  ;;  %v3170_v35 = vpop.f32.mrb[85].mxu1 }
 0x1d5   : > { %v3131_v20 = vadd.f32 %v3130_v18, %v3129_v45  ;;  %v3171_v12 = vadd.f32 %v3170_v35, %v3169_v53  ;;  %v3132_v54 = vpop.f32.mrb[110].mxu0  ;;  %v3172_v47 = vpop.f32.mrb[86].mxu1 }
 0x1d6   : > { %v3133_v44 = vpop.f32.mrb[111].mxu0  ;;  %v3173_v23 = vpop.f32.mrb[87].mxu1 }
 0x1d7   : > { %v2157_v50 = vadd.f32 %v3171_v12, %v3131_v20 }
 0x1db   : > { %v3209_v0 = vpop.f32.mrb[88].mxu1  ;;  %v3191_v24 = vpop.f32.mrb[112].mxu0 }
 0x1dc   : > { %v3210_v42 = vpop.f32.mrb[89].mxu1  ;;  %v3192_v55 = vpop.f32.mrb[113].mxu0 }
 0x1dd   : > { %v3211_v14 = vadd.f32 %v3210_v42, %v3209_v0  ;;  %v3193_v15 = vadd.f32 %v3192_v55, %v3191_v24  ;;  %v3194_v40 = vpop.f32.mrb[114].mxu0  ;;  %v3212_v49 = vpop.f32.mrb[90].mxu1  ;;  %v2356_v42 = vld [vmem:[%s4315_s13 + $0x18] sm:$0x1] }
 0x1de   : > { %v3195_v25 = vpop.f32.mrb[115].mxu0  ;;  %v3213_v29 = vpop.f32.mrb[91].mxu1 }
 0x1df   : > { %v3196_v31 = vadd.f32 %v3195_v25, %v3194_v40  ;;  %v2197_v21 = vadd.f32 %v3193_v15, %v2133_v22  ;;  %v2221_v8 = vadd.f32 %v3211_v14, %v2157_v50 }
 0x1e1   : > { %v2200_v52 = vadd.f32 %v3196_v31, %v2136_v27 }
 0x1e3   : > { %v3263_v28 = vpop.f32.mrb[92].mxu1  ;;  %v3197_v38 = vpop.f32.mrb[116].mxu0 }
 0x1e4   : > { %v2260_v46 = vpop.f32.mrb[93].mxu1  ;;  %v3198_v58 = vpop.f32.mrb[117].mxu0 }
 0x1e5   : > { %v2261_v59 = vadd.f32 %v2260_v46, %v2197_v21  ;;  %v3264_v48 = vpop.f32.mrb[94].mxu1  ;;  %v3199_v60 = vadd.f32 %v3198_v58, %v3197_v38  ;;  %v3200_v61 = vpop.f32.mrb[118].mxu0 }
 0x1e6   : > { %v2263_v9 = vpop.f32.mrb[95].mxu1  ;;  %v3201_v63 = vpop.f32.mrb[119].mxu0 }
 0x1e7   : > { %v2290_v32 = vmax.f32 %v4268_v1, %v2261_v59  ;;  %v2264_v22 = vadd.f32 %v2263_v9, %v2200_v52  ;;  %v2205_v43 = vadd.f32 %v3199_v60, %v2141_v39  ;;  %v3202_v27 = vadd.f32 %v3201_v63, %v3200_v61 }
 0x1e9   : > { %v2304_v51 = vadd.f32 %v2683_v17, %v2290_v32  ;;  %v2291_v2 = vmax.f32 %v4273_v4, %v2264_v22  ;;  %v2269_v3 = vadd.f32 %v3263_v28, %v2205_v43  ;;  %v2208_v5 = vadd.f32 %v3202_v27, %v2144_v62 }
 0x1eb   : > { %v2305_v6 = vadd.f32 %v2683_v17, %v2291_v2  ;;  %v2292_v26 = vmax.f32 %v4278_v30, %v2269_v3  ;;  %v2272_v33 = vadd.f32 %v3264_v48, %v2208_v5  ;;  %v3267_v36 = vpop.f32.mrb[96].mxu1  ;;  %v3203_v34 = vpop.f32.mrb[120].mxu0  ;;  %v2311_v13 = vmax.f32 %v2304_v51, 0.0 }
 0x1ec   : > { %v2285_v56 = vadd.f32 %v3267_v36, %v2221_v8  ;;  %v3204_v41 = vpop.f32.mrb[121].mxu0  ;;  %v2276_v16 = vpop.f32.mrb[97].mxu1 }
 0x1ed   : > { %v2312_v1 = vmax.f32 %v2305_v6, 0.0  ;;  %v2306_v45 = vadd.f32 %v2683_v17, %v2292_v26  ;;  %v2293_v39 = vmax.f32 %v4283_v57, %v2272_v33  ;;  %v3205_v53 = vadd.f32 %v3204_v41, %v3203_v34  ;;  %v3206_v18 = vpop.f32.mrb[122].mxu0  ;;  %v3268_v4 = vpop.f32.mrb[98].mxu1 }
 0x1ee   : > { %v2296_v30 = vmax.f32 %v4298_v19, %v2285_v56  ;;  %v3207_v62 = vpop.f32.mrb[123].mxu0  ;;  %v2279_v35 = vpop.f32.mrb[99].mxu1 }
 0x1ef   : > { %v2703_v20 = vpack.c.bf16 %v2312_v1, %v2311_v13  ;;  %v2307_v12 = vadd.f32 %v2683_v17, %v2293_v39  ;;  %v3208_v54 = vadd.f32 %v3207_v62, %v3206_v18  ;;  %v2213_v57 = vadd.f32 %v3205_v53, %v4300_v37 }
 0x1f0   : > { %v2310_v47 = vadd.f32 %v2683_v17, %v2296_v30  ;;  %v2313_v44 = vmax.f32 %v2306_v45, 0.0 }
 0x1f1   : > { %2704 = vst [vmem:[%s4315_s13] sm:$0xff] %v2703_v20   ;;  %v2314_v23 = vmax.f32 %v2307_v12, 0.0  ;;  %v2216_v50 = vadd.f32 %v3208_v54, %v4302_v7  ;;  %v2277_v19 = vadd.f32 %v2276_v16, %v2213_v57 }
 0x1f2   : > { %v2317_v0 = vmax.f32 %v2310_v47, 0.0 }
 0x1f3   : > { %v2708_v24 = vpack.c.bf16 %v2314_v23, %v2313_v44  ;;  %v2280_v55 = vadd.f32 %v2279_v35, %v2216_v50  ;;  %v2294_v15 = vmax.f32 %v4288_v10, %v2277_v19 }
 0x1f4   : > { %v2699_v14 = vpack.c.bf16 %v2317_v0, %v2317_v0 }
 0x1f5   : > { %2715 = vst [vmem:[%s4315_s13 + $0x8] sm:$0xff] %v2708_v24   ;;  %v2295_v40 = vmax.f32 %v4293_v11, %v2280_v55  ;;  %v2308_v49 = vadd.f32 %v2683_v17, %v2294_v15 }
 0x1f6   : > { %v2357_v37 = vsel %vm2355_vm3, %v2699_v14, %v2356_v42 }
 0x1f7   : > { %2358 = vst [vmem:[%s4315_s13 + $0x18] sm:$0x1] %v2357_v37  ;;  %v2309_v25 = vadd.f32 %v2683_v17, %v2295_v40  ;;  %v2315_v29 = vmax.f32 %v2308_v49, 0.0 }
 0x1f9   : > { %v2316_v31 = vmax.f32 %v2309_v25, 0.0 }
 0x1fb   : > { %v2713_v7 = vpack.c.bf16 %v2316_v31, %v2315_v29 }
 0x1fd   : > { %2716 = vst [vmem:[%s4315_s13 + $0x10] sm:$0xff] %v2713_v7  }
 0x1fe PF: > { %s13_s12 = sadd.s32 1, %s3526_s12  }
 0x1ff   : > { %p10_p4 = scmp.ge.s32.totalorder %s13_s12, 4  }
 0x201   :  { %12 = sbr.rel (!%p10_p4) target bundleno = 1 (0x1), region = 65 }

// kernel: convnet_forward.7
= control target key start
LH: loop header
LB: loop body
LE: loop exit
PB: predicated region body
PF: predicated region fallthrough
CT: control target
= control target key end

     0   :  { %v24_v28 = vlaneseq  ;;  %v1009_v36 = vmov 1983009808   ;;  %s1250_s0 = inlined_call_operand.vmem [shape: f32[2,1024], index: 0, kind: input, shape index: {}]   ;;  %s1251_s1 = inlined_call_operand.vmem [shape: bf16[1024,128], index: 1, kind: input, shape index: {}]   ;;  %s1252_s2 = inlined_call_operand.vmem [shape: f32[1,128], index: 2, kind: input, shape index: {}]   ;;  %s1253_s3 = inlined_call_operand.hbm [shape: f32[2,128], index: 3, kind: output, shape index: {}]  }
   0x1   :  { %v919_v0 = vld [vmem:[%s1251_s1 + $0x40] sm:$0xff]   ;;  %v923_v4 = vld [vmem:[%s1251_s1 + $0x48] sm:$0xff]   ;;  %v927_v8 = vld [vmem:[%s1251_s1 + $0x50] sm:$0xff]   ;;  %v22_v37 = vunpack.c.l.s4 %v1009_v36 }
   0x2   :  { %v920_v1 = vld [vmem:[%s1251_s1 + $0xc0] sm:$0xff]   ;;  %829 = vmatprep.subr.bf16.mxu0 %v919_v0  ;;  %v924_v5 = vld [vmem:[%s1251_s1 + $0xc8] sm:$0xff]   ;;  %v928_v9 = vld [vmem:[%s1251_s1 + $0xd0] sm:$0xff]   ;;  %v25_v33 = vshrl.u32 %v24_v28, 7 }
   0x3   :  { %v921_v2 = vld [vmem:[%s1251_s1] sm:$0xff]   ;;  %851 = vmatprep.subr.bf16.mxu1 %v920_v1  ;;  %v925_v6 = vld [vmem:[%s1251_s1 + $0x8] sm:$0xff]   ;;  %v929_v10 = vld [vmem:[%s1251_s1 + $0x10] sm:$0xff]   ;;  %v23_v39 = vunpack.c.0.s8 %v22_v37 }
   0x4   :  { %v922_v3 = vld [vmem:[%s1251_s1 + $0x80] sm:$0xff]   ;;  %830 = vmatpush3.bf16.msra.mxu0 %v921_v2  ;;  %v926_v7 = vld [vmem:[%s1251_s1 + $0x88] sm:$0xff]   ;;  %v930_v11 = vld [vmem:[%s1251_s1 + $0x90] sm:$0xff]  }
   0x5   :  { %852 = vmatpush3.bf16.msra.mxu1 %v922_v3  ;;  %831 = vmatprep.subr.bf16.mxu0 %v923_v4  ;;  %v931_v12 = vld [vmem:[%s1251_s1 + $0x58] sm:$0xff]   ;;  %v935_v16 = vld [vmem:[%s1251_s1 + $0x60] sm:$0xff]   ;;  %v939_v20 = vld [vmem:[%s1251_s1 + $0x68] sm:$0xff]   ;;  %v1136_v41 = vsub.s32 %v23_v39, %v25_v33 }
   0x6   :  { %853 = vmatprep.subr.bf16.mxu1 %v924_v5  ;;  %v932_v13 = vld [vmem:[%s1251_s1 + $0xd8] sm:$0xff]   ;;  %v936_v17 = vld [vmem:[%s1251_s1 + $0xe0] sm:$0xff]   ;;  %v940_v21 = vld [vmem:[%s1251_s1 + $0xe8] sm:$0xff]  }
   0x7   :  { %v933_v14 = vld [vmem:[%s1251_s1 + $0x18] sm:$0xff]   ;;  %v937_v18 = vld [vmem:[%s1251_s1 + $0x20] sm:$0xff]   ;;  %v941_v22 = vld [vmem:[%s1251_s1 + $0x28] sm:$0xff]  }
   0x8   :  { %832 = vmatpush3.bf16.msra.mxu0 %v925_v6  ;;  %v934_v15 = vld [vmem:[%s1251_s1 + $0x98] sm:$0xff]   ;;  %v938_v19 = vld [vmem:[%s1251_s1 + $0xa0] sm:$0xff]   ;;  %v942_v23 = vld [vmem:[%s1251_s1 + $0xa8] sm:$0xff]  }
   0x9   :  { %854 = vmatpush3.bf16.msra.mxu1 %v926_v7  ;;  %833 = vmatprep.subr.bf16.mxu0 %v927_v8  ;;  %v943_v24 = vld [vmem:[%s1251_s1 + $0x70] sm:$0xff]   ;;  %v947_v29 = vld [vmem:[%s1251_s1 + $0x78] sm:$0xff]   ;;  %v16_v34 = vld [vmem:[%s1250_s0] sm:$0xff] }
   0xa   :  { %855 = vmatprep.subr.bf16.mxu1 %v928_v9  ;;  %v944_v25 = vld [vmem:[%s1251_s1 + $0xf0] sm:$0xff]   ;;  %v948_v30 = vld [vmem:[%s1251_s1 + $0xf8] sm:$0xff]   ;;  %v952_v35 = vld [vmem:[%s1251_s1 + $0x140] sm:$0xff]   ;;  %v20_v40 = vcombine.high %v16_v34, %v16_v34  ;;  %v27_v42 = vrot.slane %v16_v34, %v1136_v41 }
   0xb   :  { %v945_v26 = vld [vmem:[%s1251_s1 + $0x30] sm:$0xff]   ;;  %v949_v31 = vld [vmem:[%s1251_s1 + $0x38] sm:$0xff]   ;;  %v953_v38 = vld [vmem:[%s1251_s1 + $0x1c0] sm:$0xff]  }
   0xc   :  { %834 = vmatpush3.bf16.msra.mxu0 %v929_v10  ;;  %v946_v27 = vld [vmem:[%s1251_s1 + $0xb0] sm:$0xff]   ;;  %v950_v32 = vld [vmem:[%s1251_s1 + $0xb8] sm:$0xff]   ;;  %v34_v43 = vrot.slane %v20_v40, %v1136_v41  ;;  %v35_v44 = vcombine.high %v27_v42, %v27_v42  ;;  %v954_v46 = vld [vmem:[%s1251_s1 + $0x100] sm:$0xff]   ;;  %v62_v47 = vpack.c.bf16 %v27_v42, %v27_v42 }
   0xd   :  { %856 = vmatpush3.bf16.msra.mxu1 %v930_v11  ;;  %835 = vmatprep.subr.bf16.mxu0 %v931_v12  ;;  %v955_v49 = vld [vmem:[%s1251_s1 + $0x180] sm:$0xff]   ;;  %v956_v52 = vld [vmem:[%s1251_s1 + $0x148] sm:$0xff]   ;;  %v960_v56 = vld [vmem:[%s1251_s1 + $0x150] sm:$0xff]  }
   0xe   :  { %857 = vmatprep.subr.bf16.mxu1 %v932_v13  ;;  %v36_v45 = vcombine.high %v34_v43, %v34_v43  ;;  %v64_v48 = vpack.c.bf16 %v34_v43, %v34_v43  ;;  %v63_v50 = vpack.c.bf16 %v35_v44, %v35_v44  ;;  %v957_v53 = vld [vmem:[%s1251_s1 + $0x1c8] sm:$0xff]   ;;  %v961_v57 = vld [vmem:[%s1251_s1 + $0x1d0] sm:$0xff]   ;;  %v964_v60 = vld [vmem:[%s1251_s1 + $0x158] sm:$0xff]  }
   0xf   :  { %v958_v54 = vld [vmem:[%s1251_s1 + $0x108] sm:$0xff]   ;;  %v962_v58 = vld [vmem:[%s1251_s1 + $0x110] sm:$0xff]   ;;  %v965_v61 = vld [vmem:[%s1251_s1 + $0x1d8] sm:$0xff]  }
  0x10   :  { %836 = vmatpush3.bf16.msra.mxu0 %v933_v14  ;;  %v65_v51 = vpack.c.bf16 %v36_v45, %v36_v45  ;;  %621 = vmatprep.mubr.bf16.mxu0 %v63_v50  ;;  %v959_v55 = vld [vmem:[%s1251_s1 + $0x188] sm:$0xff]   ;;  %v963_v59 = vld [vmem:[%s1251_s1 + $0x190] sm:$0xff]   ;;  %v966_v62 = vld [vmem:[%s1251_s1 + $0x118] sm:$0xff]  }
  0x11   :  { %858 = vmatpush3.bf16.msra.mxu1 %v934_v15  ;;  %837 = vmatprep.subr.bf16.mxu0 %v935_v16  ;;  %v967_v63 = vld [vmem:[%s1251_s1 + $0x198] sm:$0xff]   ;;  %v968_v0 = vld [vmem:[%s1251_s1 + $0x160] sm:$0xff]   ;;  %v972_v4 = vld [vmem:[%s1251_s1 + $0x168] sm:$0xff]  }
  0x12   :  { %859 = vmatprep.subr.bf16.mxu1 %v936_v17  ;;  %661 = vmatprep.mubr.bf16.mxu1 %v65_v51  ;;  %v969_v1 = vld [vmem:[%s1251_s1 + $0x1e0] sm:$0xff]   ;;  %v973_v5 = vld [vmem:[%s1251_s1 + $0x1e8] sm:$0xff]   ;;  %v976_v8 = vld [vmem:[%s1251_s1 + $0x170] sm:$0xff]  }
  0x13   :  { %v970_v2 = vld [vmem:[%s1251_s1 + $0x120] sm:$0xff]   ;;  %v974_v6 = vld [vmem:[%s1251_s1 + $0x128] sm:$0xff]   ;;  %v977_v9 = vld [vmem:[%s1251_s1 + $0x1f0] sm:$0xff]  }
  0x14   :  { %838 = vmatpush3.bf16.msra.mxu0 %v937_v18  ;;  %v971_v3 = vld [vmem:[%s1251_s1 + $0x1a0] sm:$0xff]   ;;  %v975_v7 = vld [vmem:[%s1251_s1 + $0x1a8] sm:$0xff]  }
  0x15   :  { %860 = vmatpush3.bf16.msra.mxu1 %v938_v19  ;;  %839 = vmatprep.subr.bf16.mxu0 %v939_v20  ;;  %v17_v10 = vld [vmem:[%s1250_s0 + $0x8] sm:$0xff] }
  0x16   :  { %861 = vmatprep.subr.bf16.mxu1 %v940_v21 }
  0x18   :  { %840 = vmatpush3.bf16.msra.mxu0 %v941_v22 }
  0x19   :  { %862 = vmatpush3.bf16.msra.mxu1 %v942_v23  ;;  %841 = vmatprep.subr.bf16.mxu0 %v943_v24 }
  0x1a   :  { %863 = vmatprep.subr.bf16.mxu1 %v944_v25 }
  0x1c   :  { %842 = vmatpush3.bf16.msra.mxu0 %v945_v26 }
  0x1d   :  { %864 = vmatpush3.bf16.msra.mxu1 %v946_v27  ;;  %843 = vmatprep.subr.bf16.mxu0 %v947_v29 }
  0x1e   :  { %865 = vmatprep.subr.bf16.mxu1 %v948_v30 }
  0x20   :  { %844 = vmatpush3.bf16.msra.mxu0 %v949_v31 }
  0x21   :  { %866 = vmatpush3.bf16.msra.mxu1 %v950_v32  ;;  %873 = vmatprep.subr.bf16.mxu0 %v952_v35 }
  0x22   :  { %895 = vmatprep.subr.bf16.mxu1 %v953_v38 }
  0x23   :  { %622 = vmatmul.mubr.bf16.vlgmr.msra.gmra.mrb[0].mxu0 %v62_v47 }
  0x24   :  { %662 = vmatmul.mubr.bf16.vlgmr.msra.gmra.mrb[0].mxu1 %v64_v48  ;;  %874 = vmatpush3.bf16.msra.mxu0 %v954_v46 }
  0x25   :  { %896 = vmatpush3.bf16.msra.mxu1 %v955_v49  ;;  %875 = vmatprep.subr.bf16.mxu0 %v956_v52 }
  0x26   :  { %897 = vmatprep.subr.bf16.mxu1 %v957_v53 }
  0x28   :  { %876 = vmatpush3.bf16.msra.mxu0 %v958_v54 }
  0x29   :  { %898 = vmatpush3.bf16.msra.mxu1 %v959_v55  ;;  %877 = vmatprep.subr.bf16.mxu0 %v960_v56 }
  0x2a   :  { %899 = vmatprep.subr.bf16.mxu1 %v961_v57 }
  0x2c   :  { %878 = vmatpush3.bf16.msra.mxu0 %v962_v58 }
  0x2d   :  { %900 = vmatpush3.bf16.msra.mxu1 %v963_v59  ;;  %879 = vmatprep.subr.bf16.mxu0 %v964_v60 }
  0x2e   :  { %901 = vmatprep.subr.bf16.mxu1 %v965_v61 }
  0x30   :  { %880 = vmatpush3.bf16.msra.mxu0 %v966_v62 }
  0x31   :  { %902 = vmatpush3.bf16.msra.mxu1 %v967_v63  ;;  %881 = vmatprep.subr.bf16.mxu0 %v968_v0 }
  0x32   :  { %903 = vmatprep.subr.bf16.mxu1 %v969_v1 }
  0x34   :  { %882 = vmatpush3.bf16.msra.mxu0 %v970_v2 }
  0x35   :  { %904 = vmatpush3.bf16.msra.mxu1 %v971_v3  ;;  %883 = vmatprep.subr.bf16.mxu0 %v972_v4 }
  0x36   :  { %905 = vmatprep.subr.bf16.mxu1 %v973_v5 }
  0x37   :  { %8 = vsyncpa [#allocation3], 0  ;;  %v44_v11 = vrot.slane %v17_v10, %v1136_v41  ;;  %v37_v12 = vcombine.high %v17_v10, %v17_v10  ;;  %v978_v13 = vld [vmem:[%s1251_s1 + $0x130] sm:$0xff]   ;;  %v980_v17 = vld [vmem:[%s1251_s1 + $0x178] sm:$0xff]  }
  0x38   :  { %884 = vmatpush3.bf16.msra.mxu0 %v974_v6  ;;  %v979_v14 = vld [vmem:[%s1251_s1 + $0x1b0] sm:$0xff]   ;;  %v981_v18 = vld [vmem:[%s1251_s1 + $0x1f8] sm:$0xff]   ;;  %v764_v28 = vld [vmem:[%s1252_s2] ss:$0 sm:$0xff] }
  0x39   :  { %906 = vmatpush3.bf16.msra.mxu1 %v975_v7  ;;  %v52_v15 = vcombine.high %v44_v11, %v44_v11  ;;  %v51_v16 = vrot.slane %v37_v12, %v1136_v41  ;;  %885 = vmatprep.subr.bf16.mxu0 %v976_v8  ;;  %v982_v21 = vld [vmem:[%s1251_s1 + $0x138] sm:$0xff]   ;;  %v66_v24 = vpack.c.bf16 %v44_v11, %v44_v11 }
  0x3a   :  { %907 = vmatprep.subr.bf16.mxu1 %v977_v9  ;;  %v983_v22 = vld [vmem:[%s1251_s1 + $0x1b8] sm:$0xff]   ;;  %s1010_s1 = smov [#allocation2]  }
  0x3b   :  { %v67_v19 = vpack.c.bf16 %v52_v15, %v52_v15  ;;  %v53_v20 = vcombine.high %v51_v16, %v51_v16  ;;  %v68_v25 = vpack.c.bf16 %v51_v16, %v51_v16  ;;  %s756_s2 = sshll.u32 %s1010_s1, 4  ;;  %s757_s2 = int_to_ptr.vmem [resolvable:$true] %s756_s2 }
  0x3c   :  { %886 = vmatpush3.bf16.msra.mxu0 %v978_v13  ;;  %s985_s10 = scalar_lea.vmem %s757_s2, 32  ;;  %p990_p1 = scmp.lt.s32.totalorder %s757_s2, %s757_s2 }
  0x3d   :  { %908 = vmatpush3.bf16.msra.mxu1 %v979_v14  ;;  %v69_v23 = vpack.c.bf16 %v53_v20, %v53_v20  ;;  %887 = vmatprep.subr.bf16.mxu0 %v980_v17  ;;  %p986_p0 = scmp.ne.s32.totalorder %s757_s2, %s985_s10  ;;  %p991_p2 = scmp.lt.s32.totalorder %s985_s10, %s985_s10 }
  0x3e   :  { %909 = vmatprep.subr.bf16.mxu1 %v981_v18  ;;  %701 = vmatprep.mubr.bf16.mxu0 %v67_v19 }
  0x3f   :  { %741 = vmatprep.mubr.bf16.mxu1 %v69_v23  ;;  %p992_p3 = por %p991_p2, %p990_p1 }
  0x40   :  { %888 = vmatpush3.bf16.msra.mxu0 %v982_v21 }
  0x41   :  { %910 = vmatpush3.bf16.msra.mxu1 %v983_v22  ;;  %p993_p4 = pnand %p992_p3, %p986_p0 }
  0x43   :  { %702 = vmatmul.mubr.bf16.vlgmr.msra.gmra.mrb[4].mxu0 %v66_v24 }
  0x44   :  { %742 = vmatmul.mubr.bf16.vlgmr.msra.gmra.mrb[4].mxu1 %v68_v25 }
  0xf6   :  { %v845_v26 = vpop.f32.mrb[0].mxu0 }
  0xf7   :  { %v867_v27 = vpop.f32.mrb[0].mxu1  ;;  %v846_v29 = vpop.f32.mrb[1].mxu0 }
  0xf8   :  { %v868_v30 = vpop.f32.mrb[1].mxu1  ;;  %v847_v31 = vadd.f32 %v846_v29, %v845_v26  ;;  %v848_v33 = vpop.f32.mrb[2].mxu0 }
  0xf9   :  { %v869_v32 = vadd.f32 %v868_v30, %v867_v27  ;;  %v870_v34 = vpop.f32.mrb[2].mxu1  ;;  %v849_v35 = vpop.f32.mrb[3].mxu0 }
  0xfa   :  { %v871_v36 = vpop.f32.mrb[3].mxu1  ;;  %v624_v37 = vadd.f32 %v847_v31, %v764_v28 }
  0xfc   :  { %v664_v38 = vadd.f32 %v869_v32, %v624_v37 }
 0x116   :  { %v889_v39 = vpop.f32.mrb[4].mxu0 }
 0x117   :  { %v911_v40 = vpop.f32.mrb[4].mxu1  ;;  %v890_v41 = vpop.f32.mrb[5].mxu0 }
 0x118   :  { %v912_v42 = vpop.f32.mrb[5].mxu1  ;;  %v891_v43 = vadd.f32 %v890_v41, %v889_v39  ;;  %v892_v45 = vpop.f32.mrb[6].mxu0 }
 0x119   :  { %v913_v44 = vadd.f32 %v912_v42, %v911_v40  ;;  %v914_v46 = vpop.f32.mrb[6].mxu1  ;;  %v893_v47 = vpop.f32.mrb[7].mxu0 }
 0x11a   :  { %v915_v48 = vpop.f32.mrb[7].mxu1  ;;  %v704_v49 = vadd.f32 %v891_v43, %v664_v38 }
 0x11c   :  { %v744_v50 = vadd.f32 %v913_v44, %v704_v49 }
 0x11e   :  { %749 = vst [vmem:[#allocation2] sm:$0x3] %v744_v50 }
 0x11f   :  { %996 = shalt.err (!%p993_p4)
}
 0x120   :  { %s997_s13 = scalar_lea.hbm %s1253_s3, 32 }
 0x121   :  { %p998_p5 = scmp.ne.s32.totalorder %s1253_s3, %s997_s13  ;;  %p1001_p6 = scmp.lt.u32.totalorder %s997_s13, %s1253_s3 }
 0x123   :  { %p1003_p7 = pnand %p1001_p6, %p998_p5 }
 0x125   :  { %1006 = shalt.err (!%p1003_p7)
}
 0x126   :  { %759 = dma.vmem_to_hbm [thread:$0]  %s757_s2, 32, %s1253_s3, [#allocation3]  }
 0x127   :  { %1007 = dma.done.wait [#allocation3], 32  }
 0x128   :  { %1008 = vsyncadd [#allocation3], 4294967264 }
 0x129   :  { %763 = vsyncpa [#allocation3], 1 }

// kernel: convnet_forward.6
= control target key start
LH: loop header
LB: loop body
LE: loop exit
PB: predicated region body
PF: predicated region fallthrough
CT: control target
= control target key end

     0   :  { %s14894_s12 = smov 0   ;;  %s14896_s13 = smov 0   ;;  %s17576_s0 = inlined_call_operand.vmem [shape: bf16[2,6272], index: 0, kind: input, shape index: {}]   ;;  %s17577_s1 = inlined_call_operand.vmem [shape: bf16[6272,1024], index: 1, kind: input, shape index: {}]   ;;  %s17578_s2 = inlined_call_operand.vmem [shape: f32[1,1024], index: 2, kind: input, shape index: {}]   ;;  %s17579_s3 = inlined_call_operand.vmem [shape: f32[2,1024], index: 3, kind: output, shape index: {}]  }
   0x1   :  { %s14898_s14 = smov 0  }
   0x2 LB: > { %s12739_s15 = sadd.s32 4294967295, %s14870_s14   ;;  %s14911_s16 = sadd.s32 1, %s14870_s14   ;;  %s14870_s14 = sphi %s14898_s14, %s17582_s14   ;;  %s14866_s13 = sphi %s14896_s13, %s17581_s13   ;;  %s14862_s12 = sphi %s14894_s12, %s17580_s12  }
   0x3   : > { %s38_s17 = ssub.s32 %s14870_s14, %s14911_s16  ;;  %s41_s18 = sadd.s32 1, %s14866_s13 }
   0x4   : > { %p39_p0 = scmp.eq.s32.totalorder %s38_s17, 0  ;;  %p48_p1 = scmp.ne.s32.totalorder %s14866_s13, %s14862_s12 }
   0x5   : > { %p49_p2 = scmp.eq.s32.totalorder %s14870_s14, 0  ;;  %p12742_p4 = scmp.ge.s32.totalorder %s14870_s14, 4 }
   0x6   : > { %s14920_s19 = scalar_select %p39_p0, %s14866_s13, %s41_s18  }
   0x7   : > { %p50_p3 = por %p49_p2, %p48_p1  ;;  %129 = sbr.rel (%p12742_p4) target bundleno = 802 (0x322), region = 20 }
   0xe   : > { %132 = sbr.rel (!%p50_p3) target bundleno = 802 (0x322), region = 24  ;;  %s134_s20 = sand.u32 (%p50_p3), 1, %s14866_s13  }
   0xf   : > { %s13537_s21 = sshll.u32 (%p50_p3), %s14870_s14, 3  ;;  %s13634_s22 = smul.u32 (%p50_p3), 6272, %s134_s20 }
  0x10   : > { %s14928_s25 = scalar_lea.vmem (%p50_p3), %s17577_s1, %s13537_s21 }
  0x11   : > { %v1736_v0 = vld [vmem:[%s14928_s25] sm:$0xff] (%p50_p3)  ;;  %s14936_s26 = scalar_lea.vmem (%p50_p3), [#allocation2], %s13634_s22 }
  0x12   : > { %v1738_v1 = vld [vmem:[%s14928_s25 + $0x20] sm:$0xff] (%p50_p3)  ;;  %1737 = vst [vmem:[%s14936_s26] sm:$0xff] (%p50_p3), %v1736_v0 }
  0x13   : > { %v1740_v2 = vld [vmem:[%s14928_s25 + $0x40] sm:$0xff] (%p50_p3)  ;;  %1739 = vst [vmem:[%s14936_s26 + $0x8] sm:$0xff] (%p50_p3), %v1738_v1 }
  0x14   : > { %v1742_v3 = vld [vmem:[%s14928_s25 + $0x60] sm:$0xff] (%p50_p3)  ;;  %1741 = vst [vmem:[%s14936_s26 + $0x10] sm:$0xff] (%p50_p3), %v1740_v2 }
  0x15   : > { %v1744_v4 = vld [vmem:[%s14928_s25 + $0x80] sm:$0xff]  ;;  %1743 = vst [vmem:[%s14936_s26 + $0x18] sm:$0xff] %v1742_v3 }
  0x16   : > { %v1746_v5 = vld [vmem:[%s14928_s25 + $0xa0] sm:$0xff]  ;;  %1745 = vst [vmem:[%s14936_s26 + $0x20] sm:$0xff] %v1744_v4 }
  0x17   : > { %1747 = vst [vmem:[%s14936_s26 + $0x28] sm:$0xff] %v1746_v5  ;;  %v1748_v6 = vld [vmem:[%s14928_s25 + $0xc0] sm:$0xff] }
  0x18   : > { %v1750_v7 = vld [vmem:[%s14928_s25 + $0xe0] sm:$0xff]  ;;  %1749 = vst [vmem:[%s14936_s26 + $0x30] sm:$0xff] %v1748_v6 }
  0x19   : > { %v1752_v8 = vld [vmem:[%s14928_s25 + $0x100] sm:$0xff]  ;;  %1751 = vst [vmem:[%s14936_s26 + $0x38] sm:$0xff] %v1750_v7 }
  0x1a   : > { %1753 = vst [vmem:[%s14936_s26 + $0x40] sm:$0xff] %v1752_v8  ;;  %v1754_v9 = vld [vmem:[%s14928_s25 + $0x120] sm:$0xff] }
  0x1b   : > { %v1756_v10 = vld [vmem:[%s14928_s25 + $0x140] sm:$0xff]  ;;  %1755 = vst [vmem:[%s14936_s26 + $0x48] sm:$0xff] %v1754_v9 }
  0x1c   : > { %v1758_v11 = vld [vmem:[%s14928_s25 + $0x160] sm:$0xff]  ;;  %1757 = vst [vmem:[%s14936_s26 + $0x50] sm:$0xff] %v1756_v10 }
  0x1d   : > { %1759 = vst [vmem:[%s14936_s26 + $0x58] sm:$0xff] %v1758_v11  ;;  %v1760_v12 = vld [vmem:[%s14928_s25 + $0x180] sm:$0xff] }
  0x1e   : > { %v1762_v13 = vld [vmem:[%s14928_s25 + $0x1a0] sm:$0xff]  ;;  %1761 = vst [vmem:[%s14936_s26 + $0x60] sm:$0xff] %v1760_v12 }
  0x1f   : > { %v1764_v14 = vld [vmem:[%s14928_s25 + $0x1c0] sm:$0xff]  ;;  %1763 = vst [vmem:[%s14936_s26 + $0x68] sm:$0xff] %v1762_v13 }
  0x20   : > { %1765 = vst [vmem:[%s14936_s26 + $0x70] sm:$0xff] %v1764_v14  ;;  %v1766_v15 = vld [vmem:[%s14928_s25 + $0x1e0] sm:$0xff] }
  0x21   : > { %v1768_v16 = vld [vmem:[%s14928_s25 + $0x200] sm:$0xff]  ;;  %1767 = vst [vmem:[%s14936_s26 + $0x78] sm:$0xff] %v1766_v15 }
  0x22   : > { %v1770_v17 = vld [vmem:[%s14928_s25 + $0x220] sm:$0xff]  ;;  %1769 = vst [vmem:[%s14936_s26 + $0x80] sm:$0xff] %v1768_v16 }
  0x23   : > { %1771 = vst [vmem:[%s14936_s26 + $0x88] sm:$0xff] %v1770_v17  ;;  %v1772_v18 = vld [vmem:[%s14928_s25 + $0x240] sm:$0xff] }
  0x24   : > { %v1774_v19 = vld [vmem:[%s14928_s25 + $0x260] sm:$0xff]  ;;  %1773 = vst [vmem:[%s14936_s26 + $0x90] sm:$0xff] %v1772_v18 }
  0x25   : > { %v1776_v20 = vld [vmem:[%s14928_s25 + $0x280] sm:$0xff]  ;;  %1775 = vst [vmem:[%s14936_s26 + $0x98] sm:$0xff] %v1774_v19 }
  0x26   : > { %1777 = vst [vmem:[%s14936_s26 + $0xa0] sm:$0xff] %v1776_v20  ;;  %v1778_v21 = vld [vmem:[%s14928_s25 + $0x2a0] sm:$0xff] }
  0x27   : > { %v1780_v22 = vld [vmem:[%s14928_s25 + $0x2c0] sm:$0xff]  ;;  %1779 = vst [vmem:[%s14936_s26 + $0xa8] sm:$0xff] %v1778_v21 }
  0x28   : > { %v1782_v23 = vld [vmem:[%s14928_s25 + $0x2e0] sm:$0xff]  ;;  %1781 = vst [vmem:[%s14936_s26 + $0xb0] sm:$0xff] %v1780_v22 }
  0x29   : > { %1783 = vst [vmem:[%s14936_s26 + $0xb8] sm:$0xff] %v1782_v23  ;;  %v1784_v24 = vld [vmem:[%s14928_s25 + $0x300] sm:$0xff] }
  0x2a   : > { %v1786_v25 = vld [vmem:[%s14928_s25 + $0x320] sm:$0xff]  ;;  %1785 = vst [vmem:[%s14936_s26 + $0xc0] sm:$0xff] %v1784_v24 }
  0x2b   : > { %v1788_v26 = vld [vmem:[%s14928_s25 + $0x340] sm:$0xff]  ;;  %1787 = vst [vmem:[%s14936_s26 + $0xc8] sm:$0xff] %v1786_v25 }
  0x2c   : > { %1789 = vst [vmem:[%s14936_s26 + $0xd0] sm:$0xff] %v1788_v26  ;;  %v1790_v27 = vld [vmem:[%s14928_s25 + $0x360] sm:$0xff] }
  0x2d   : > { %v1792_v28 = vld [vmem:[%s14928_s25 + $0x380] sm:$0xff]  ;;  %1791 = vst [vmem:[%s14936_s26 + $0xd8] sm:$0xff] %v1790_v27 }
  0x2e   : > { %v1794_v29 = vld [vmem:[%s14928_s25 + $0x3a0] sm:$0xff]  ;;  %1793 = vst [vmem:[%s14936_s26 + $0xe0] sm:$0xff] %v1792_v28 }
  0x2f   : > { %1795 = vst [vmem:[%s14936_s26 + $0xe8] sm:$0xff] %v1794_v29  ;;  %v1796_v30 = vld [vmem:[%s14928_s25 + $0x3c0] sm:$0xff] }
  0x30   : > { %v1798_v31 = vld [vmem:[%s14928_s25 + $0x3e0] sm:$0xff]  ;;  %1797 = vst [vmem:[%s14936_s26 + $0xf0] sm:$0xff] %v1796_v30 }
  0x31   : > { %v1800_v32 = vld [vmem:[%s14928_s25 + $0x400] sm:$0xff]  ;;  %1799 = vst [vmem:[%s14936_s26 + $0xf8] sm:$0xff] %v1798_v31 }
  0x32   : > { %1801 = vst [vmem:[%s14936_s26 + $0x100] sm:$0xff] %v1800_v32  ;;  %v1802_v33 = vld [vmem:[%s14928_s25 + $0x420] sm:$0xff] }
  0x33   : > { %v1804_v34 = vld [vmem:[%s14928_s25 + $0x440] sm:$0xff]  ;;  %1803 = vst [vmem:[%s14936_s26 + $0x108] sm:$0xff] %v1802_v33 }
  0x34   : > { %v1806_v35 = vld [vmem:[%s14928_s25 + $0x460] sm:$0xff]  ;;  %1805 = vst [vmem:[%s14936_s26 + $0x110] sm:$0xff] %v1804_v34 }
  0x35   : > { %1807 = vst [vmem:[%s14936_s26 + $0x118] sm:$0xff] %v1806_v35  ;;  %v1808_v36 = vld [vmem:[%s14928_s25 + $0x480] sm:$0xff] }
  0x36   : > { %v1810_v37 = vld [vmem:[%s14928_s25 + $0x4a0] sm:$0xff]  ;;  %1809 = vst [vmem:[%s14936_s26 + $0x120] sm:$0xff] %v1808_v36 }
  0x37   : > { %v1812_v38 = vld [vmem:[%s14928_s25 + $0x4c0] sm:$0xff]  ;;  %1811 = vst [vmem:[%s14936_s26 + $0x128] sm:$0xff] %v1810_v37 }
  0x38   : > { %1813 = vst [vmem:[%s14936_s26 + $0x130] sm:$0xff] %v1812_v38  ;;  %v1814_v39 = vld [vmem:[%s14928_s25 + $0x4e0] sm:$0xff] }
  0x39   : > { %v1816_v40 = vld [vmem:[%s14928_s25 + $0x500] sm:$0xff]  ;;  %1815 = vst [vmem:[%s14936_s26 + $0x138] sm:$0xff] %v1814_v39 }
  0x3a   : > { %v1818_v41 = vld [vmem:[%s14928_s25 + $0x520] sm:$0xff]  ;;  %1817 = vst [vmem:[%s14936_s26 + $0x140] sm:$0xff] %v1816_v40 }
  0x3b   : > { %1819 = vst [vmem:[%s14936_s26 + $0x148] sm:$0xff] %v1818_v41  ;;  %v1820_v42 = vld [vmem:[%s14928_s25 + $0x540] sm:$0xff] }
  0x3c   : > { %v1822_v43 = vld [vmem:[%s14928_s25 + $0x560] sm:$0xff]  ;;  %1821 = vst [vmem:[%s14936_s26 + $0x150] sm:$0xff] %v1820_v42 }
  0x3d   : > { %v1824_v44 = vld [vmem:[%s14928_s25 + $0x580] sm:$0xff]  ;;  %1823 = vst [vmem:[%s14936_s26 + $0x158] sm:$0xff] %v1822_v43 }
  0x3e   : > { %1825 = vst [vmem:[%s14936_s26 + $0x160] sm:$0xff] %v1824_v44  ;;  %v1826_v45 = vld [vmem:[%s14928_s25 + $0x5a0] sm:$0xff] }
  0x3f   : > { %v1828_v46 = vld [vmem:[%s14928_s25 + $0x5c0] sm:$0xff]  ;;  %1827 = vst [vmem:[%s14936_s26 + $0x168] sm:$0xff] %v1826_v45 }
  0x40   : > { %v1830_v47 = vld [vmem:[%s14928_s25 + $0x5e0] sm:$0xff]  ;;  %1829 = vst [vmem:[%s14936_s26 + $0x170] sm:$0xff] %v1828_v46 }
  0x41   : > { %1831 = vst [vmem:[%s14936_s26 + $0x178] sm:$0xff] %v1830_v47  ;;  %v1832_v48 = vld [vmem:[%s14928_s25 + $0x600] sm:$0xff] }
  0x42   : > { %v1834_v49 = vld [vmem:[%s14928_s25 + $0x620] sm:$0xff]  ;;  %1833 = vst [vmem:[%s14936_s26 + $0x180] sm:$0xff] %v1832_v48 }
  0x43   : > { %v1836_v50 = vld [vmem:[%s14928_s25 + $0x640] sm:$0xff]  ;;  %1835 = vst [vmem:[%s14936_s26 + $0x188] sm:$0xff] %v1834_v49 }
  0x44   : > { %1837 = vst [vmem:[%s14936_s26 + $0x190] sm:$0xff] %v1836_v50  ;;  %v1838_v51 = vld [vmem:[%s14928_s25 + $0x660] sm:$0xff] }
  0x45   : > { %v1840_v52 = vld [vmem:[%s14928_s25 + $0x680] sm:$0xff]  ;;  %1839 = vst [vmem:[%s14936_s26 + $0x198] sm:$0xff] %v1838_v51 }
  0x46   : > { %v1842_v53 = vld [vmem:[%s14928_s25 + $0x6a0] sm:$0xff]  ;;  %1841 = vst [vmem:[%s14936_s26 + $0x1a0] sm:$0xff] %v1840_v52 }
  0x47   : > { %1843 = vst [vmem:[%s14936_s26 + $0x1a8] sm:$0xff] %v1842_v53  ;;  %v1844_v54 = vld [vmem:[%s14928_s25 + $0x6c0] sm:$0xff] }
  0x48   : > { %v1846_v55 = vld [vmem:[%s14928_s25 + $0x6e0] sm:$0xff]  ;;  %1845 = vst [vmem:[%s14936_s26 + $0x1b0] sm:$0xff] %v1844_v54 }
  0x49   : > { %v1848_v56 = vld [vmem:[%s14928_s25 + $0x700] sm:$0xff]  ;;  %1847 = vst [vmem:[%s14936_s26 + $0x1b8] sm:$0xff] %v1846_v55 }
  0x4a   : > { %1849 = vst [vmem:[%s14936_s26 + $0x1c0] sm:$0xff] %v1848_v56  ;;  %v1850_v57 = vld [vmem:[%s14928_s25 + $0x720] sm:$0xff] }
  0x4b   : > { %v1852_v58 = vld [vmem:[%s14928_s25 + $0x740] sm:$0xff]  ;;  %1851 = vst [vmem:[%s14936_s26 + $0x1c8] sm:$0xff] %v1850_v57 }
  0x4c   : > { %v1854_v59 = vld [vmem:[%s14928_s25 + $0x760] sm:$0xff]  ;;  %1853 = vst [vmem:[%s14936_s26 + $0x1d0] sm:$0xff] %v1852_v58 }
  0x4d   : > { %1855 = vst [vmem:[%s14936_s26 + $0x1d8] sm:$0xff] %v1854_v59  ;;  %v1856_v60 = vld [vmem:[%s14928_s25 + $0x780] sm:$0xff] }
  0x4e   : > { %v1858_v61 = vld [vmem:[%s14928_s25 + $0x7a0] sm:$0xff]  ;;  %1857 = vst [vmem:[%s14936_s26 + $0x1e0] sm:$0xff] %v1856_v60 }
  0x4f   : > { %v1860_v62 = vld [vmem:[%s14928_s25 + $0x7c0] sm:$0xff]  ;;  %1859 = vst [vmem:[%s14936_s26 + $0x1e8] sm:$0xff] %v1858_v61 }
  0x50   : > { %1861 = vst [vmem:[%s14936_s26 + $0x1f0] sm:$0xff] %v1860_v62  ;;  %v1862_v63 = vld [vmem:[%s14928_s25 + $0x7e0] sm:$0xff] }
  0x51   : > { %v1864_v0 = vld [vmem:[%s14928_s25 + $0x800] sm:$0xff]  ;;  %1863 = vst [vmem:[%s14936_s26 + $0x1f8] sm:$0xff] %v1862_v63 }
  0x52   : > { %v1866_v1 = vld [vmem:[%s14928_s25 + $0x820] sm:$0xff]  ;;  %1865 = vst [vmem:[%s14936_s26 + $0x200] sm:$0xff] %v1864_v0 }
  0x53   : > { %1867 = vst [vmem:[%s14936_s26 + $0x208] sm:$0xff] %v1866_v1  ;;  %v1868_v2 = vld [vmem:[%s14928_s25 + $0x840] sm:$0xff] }
  0x54   : > { %v1870_v3 = vld [vmem:[%s14928_s25 + $0x860] sm:$0xff]  ;;  %1869 = vst [vmem:[%s14936_s26 + $0x210] sm:$0xff] %v1868_v2 }
  0x55   : > { %v1872_v4 = vld [vmem:[%s14928_s25 + $0x880] sm:$0xff]  ;;  %1871 = vst [vmem:[%s14936_s26 + $0x218] sm:$0xff] %v1870_v3 }
  0x56   : > { %1873 = vst [vmem:[%s14936_s26 + $0x220] sm:$0xff] %v1872_v4  ;;  %v1874_v5 = vld [vmem:[%s14928_s25 + $0x8a0] sm:$0xff] }
  0x57   : > { %v1876_v6 = vld [vmem:[%s14928_s25 + $0x8c0] sm:$0xff]  ;;  %1875 = vst [vmem:[%s14936_s26 + $0x228] sm:$0xff] %v1874_v5 }
  0x58   : > { %v1878_v7 = vld [vmem:[%s14928_s25 + $0x8e0] sm:$0xff]  ;;  %1877 = vst [vmem:[%s14936_s26 + $0x230] sm:$0xff] %v1876_v6 }
  0x59   : > { %1879 = vst [vmem:[%s14936_s26 + $0x238] sm:$0xff] %v1878_v7  ;;  %v1880_v8 = vld [vmem:[%s14928_s25 + $0x900] sm:$0xff] }
  0x5a   : > { %v1882_v9 = vld [vmem:[%s14928_s25 + $0x920] sm:$0xff]  ;;  %1881 = vst [vmem:[%s14936_s26 + $0x240] sm:$0xff] %v1880_v8 }
  0x5b   : > { %v1884_v10 = vld [vmem:[%s14928_s25 + $0x940] sm:$0xff]  ;;  %1883 = vst [vmem:[%s14936_s26 + $0x248] sm:$0xff] %v1882_v9 }
  0x5c   : > { %1885 = vst [vmem:[%s14936_s26 + $0x250] sm:$0xff] %v1884_v10  ;;  %v1886_v11 = vld [vmem:[%s14928_s25 + $0x960] sm:$0xff] }
  0x5d   : > { %v1888_v12 = vld [vmem:[%s14928_s25 + $0x980] sm:$0xff]  ;;  %1887 = vst [vmem:[%s14936_s26 + $0x258] sm:$0xff] %v1886_v11 }
  0x5e   : > { %v1890_v13 = vld [vmem:[%s14928_s25 + $0x9a0] sm:$0xff]  ;;  %1889 = vst [vmem:[%s14936_s26 + $0x260] sm:$0xff] %v1888_v12 }
  0x5f   : > { %1891 = vst [vmem:[%s14936_s26 + $0x268] sm:$0xff] %v1890_v13  ;;  %v1892_v14 = vld [vmem:[%s14928_s25 + $0x9c0] sm:$0xff] }
  0x60   : > { %v1894_v15 = vld [vmem:[%s14928_s25 + $0x9e0] sm:$0xff]  ;;  %1893 = vst [vmem:[%s14936_s26 + $0x270] sm:$0xff] %v1892_v14 }
  0x61   : > { %v1896_v16 = vld [vmem:[%s14928_s25 + $0xa00] sm:$0xff]  ;;  %1895 = vst [vmem:[%s14936_s26 + $0x278] sm:$0xff] %v1894_v15 }
  0x62   : > { %1897 = vst [vmem:[%s14936_s26 + $0x280] sm:$0xff] %v1896_v16  ;;  %v1898_v17 = vld [vmem:[%s14928_s25 + $0xa20] sm:$0xff] }
  0x63   : > { %v1900_v18 = vld [vmem:[%s14928_s25 + $0xa40] sm:$0xff]  ;;  %1899 = vst [vmem:[%s14936_s26 + $0x288] sm:$0xff] %v1898_v17 }
  0x64   : > { %v1902_v19 = vld [vmem:[%s14928_s25 + $0xa60] sm:$0xff]  ;;  %1901 = vst [vmem:[%s14936_s26 + $0x290] sm:$0xff] %v1900_v18 }
  0x65   : > { %1903 = vst [vmem:[%s14936_s26 + $0x298] sm:$0xff] %v1902_v19  ;;  %v1904_v20 = vld [vmem:[%s14928_s25 + $0xa80] sm:$0xff] }
  0x66   : > { %v1906_v21 = vld [vmem:[%s14928_s25 + $0xaa0] sm:$0xff]  ;;  %1905 = vst [vmem:[%s14936_s26 + $0x2a0] sm:$0xff] %v1904_v20 }
  0x67   : > { %v1908_v22 = vld [vmem:[%s14928_s25 + $0xac0] sm:$0xff]  ;;  %1907 = vst [vmem:[%s14936_s26 + $0x2a8] sm:$0xff] %v1906_v21 }
  0x68   : > { %1909 = vst [vmem:[%s14936_s26 + $0x2b0] sm:$0xff] %v1908_v22  ;;  %v1910_v23 = vld [vmem:[%s14928_s25 + $0xae0] sm:$0xff] }
  0x69   : > { %v1912_v24 = vld [vmem:[%s14928_s25 + $0xb00] sm:$0xff]  ;;  %1911 = vst [vmem:[%s14936_s26 + $0x2b8] sm:$0xff] %v1910_v23 }
  0x6a   : > { %v1914_v25 = vld [vmem:[%s14928_s25 + $0xb20] sm:$0xff]  ;;  %1913 = vst [vmem:[%s14936_s26 + $0x2c0] sm:$0xff] %v1912_v24 }
  0x6b   : > { %1915 = vst [vmem:[%s14936_s26 + $0x2c8] sm:$0xff] %v1914_v25  ;;  %v1916_v26 = vld [vmem:[%s14928_s25 + $0xb40] sm:$0xff] }
  0x6c   : > { %v1918_v27 = vld [vmem:[%s14928_s25 + $0xb60] sm:$0xff]  ;;  %1917 = vst [vmem:[%s14936_s26 + $0x2d0] sm:$0xff] %v1916_v26 }
  0x6d   : > { %v1920_v28 = vld [vmem:[%s14928_s25 + $0xb80] sm:$0xff]  ;;  %1919 = vst [vmem:[%s14936_s26 + $0x2d8] sm:$0xff] %v1918_v27 }
  0x6e   : > { %1921 = vst [vmem:[%s14936_s26 + $0x2e0] sm:$0xff] %v1920_v28  ;;  %v1922_v29 = vld [vmem:[%s14928_s25 + $0xba0] sm:$0xff] }
  0x6f   : > { %v1924_v30 = vld [vmem:[%s14928_s25 + $0xbc0] sm:$0xff]  ;;  %1923 = vst [vmem:[%s14936_s26 + $0x2e8] sm:$0xff] %v1922_v29 }
  0x70   : > { %v1926_v31 = vld [vmem:[%s14928_s25 + $0xbe0] sm:$0xff]  ;;  %1925 = vst [vmem:[%s14936_s26 + $0x2f0] sm:$0xff] %v1924_v30 }
  0x71   : > { %1927 = vst [vmem:[%s14936_s26 + $0x2f8] sm:$0xff] %v1926_v31  ;;  %v1928_v32 = vld [vmem:[%s14928_s25 + $0xc00] sm:$0xff] }
  0x72   : > { %v1930_v33 = vld [vmem:[%s14928_s25 + $0xc20] sm:$0xff]  ;;  %1929 = vst [vmem:[%s14936_s26 + $0x300] sm:$0xff] %v1928_v32 }
  0x73   : > { %v1932_v34 = vld [vmem:[%s14928_s25 + $0xc40] sm:$0xff]  ;;  %1931 = vst [vmem:[%s14936_s26 + $0x308] sm:$0xff] %v1930_v33 }
  0x74   : > { %1933 = vst [vmem:[%s14936_s26 + $0x310] sm:$0xff] %v1932_v34  ;;  %v1934_v35 = vld [vmem:[%s14928_s25 + $0xc60] sm:$0xff] }
  0x75   : > { %v1936_v36 = vld [vmem:[%s14928_s25 + $0xc80] sm:$0xff]  ;;  %1935 = vst [vmem:[%s14936_s26 + $0x318] sm:$0xff] %v1934_v35 }
  0x76   : > { %v1938_v37 = vld [vmem:[%s14928_s25 + $0xca0] sm:$0xff]  ;;  %1937 = vst [vmem:[%s14936_s26 + $0x320] sm:$0xff] %v1936_v36 }
  0x77   : > { %1939 = vst [vmem:[%s14936_s26 + $0x328] sm:$0xff] %v1938_v37  ;;  %v1940_v38 = vld [vmem:[%s14928_s25 + $0xcc0] sm:$0xff] }
  0x78   : > { %v1942_v39 = vld [vmem:[%s14928_s25 + $0xce0] sm:$0xff]  ;;  %1941 = vst [vmem:[%s14936_s26 + $0x330] sm:$0xff] %v1940_v38 }
  0x79   : > { %v1944_v40 = vld [vmem:[%s14928_s25 + $0xd00] sm:$0xff]  ;;  %1943 = vst [vmem:[%s14936_s26 + $0x338] sm:$0xff] %v1942_v39 }
  0x7a   : > { %1945 = vst [vmem:[%s14936_s26 + $0x340] sm:$0xff] %v1944_v40  ;;  %v1946_v41 = vld [vmem:[%s14928_s25 + $0xd20] sm:$0xff] }
  0x7b   : > { %v1948_v42 = vld [vmem:[%s14928_s25 + $0xd40] sm:$0xff]  ;;  %1947 = vst [vmem:[%s14936_s26 + $0x348] sm:$0xff] %v1946_v41 }
  0x7c   : > { %v1950_v43 = vld [vmem:[%s14928_s25 + $0xd60] sm:$0xff]  ;;  %1949 = vst [vmem:[%s14936_s26 + $0x350] sm:$0xff] %v1948_v42 }
  0x7d   : > { %1951 = vst [vmem:[%s14936_s26 + $0x358] sm:$0xff] %v1950_v43  ;;  %v1952_v44 = vld [vmem:[%s14928_s25 + $0xd80] sm:$0xff] }
  0x7e   : > { %v1954_v45 = vld [vmem:[%s14928_s25 + $0xda0] sm:$0xff]  ;;  %1953 = vst [vmem:[%s14936_s26 + $0x360] sm:$0xff] %v1952_v44 }
  0x7f   : > { %v1956_v46 = vld [vmem:[%s14928_s25 + $0xdc0] sm:$0xff]  ;;  %1955 = vst [vmem:[%s14936_s26 + $0x368] sm:$0xff] %v1954_v45 }
  0x80   : > { %1957 = vst [vmem:[%s14936_s26 + $0x370] sm:$0xff] %v1956_v46  ;;  %v1958_v47 = vld [vmem:[%s14928_s25 + $0xde0] sm:$0xff] }
  0x81   : > { %v1960_v48 = vld [vmem:[%s14928_s25 + $0xe00] sm:$0xff]  ;;  %1959 = vst [vmem:[%s14936_s26 + $0x378] sm:$0xff] %v1958_v47 }
  0x82   : > { %v1962_v49 = vld [vmem:[%s14928_s25 + $0xe20] sm:$0xff]  ;;  %1961 = vst [vmem:[%s14936_s26 + $0x380] sm:$0xff] %v1960_v48 }
  0x83   : > { %1963 = vst [vmem:[%s14936_s26 + $0x388] sm:$0xff] %v1962_v49  ;;  %v1964_v50 = vld [vmem:[%s14928_s25 + $0xe40] sm:$0xff] }
  0x84   : > { %v1966_v51 = vld [vmem:[%s14928_s25 + $0xe60] sm:$0xff]  ;;  %1965 = vst [vmem:[%s14936_s26 + $0x390] sm:$0xff] %v1964_v50 }
  0x85   : > { %v1968_v52 = vld [vmem:[%s14928_s25 + $0xe80] sm:$0xff]  ;;  %1967 = vst [vmem:[%s14936_s26 + $0x398] sm:$0xff] %v1966_v51 }
  0x86   : > { %1969 = vst [vmem:[%s14936_s26 + $0x3a0] sm:$0xff] %v1968_v52  ;;  %v1970_v53 = vld [vmem:[%s14928_s25 + $0xea0] sm:$0xff] }
  0x87   : > { %v1972_v54 = vld [vmem:[%s14928_s25 + $0xec0] sm:$0xff]  ;;  %1971 = vst [vmem:[%s14936_s26 + $0x3a8] sm:$0xff] %v1970_v53 }
  0x88   : > { %v1974_v55 = vld [vmem:[%s14928_s25 + $0xee0] sm:$0xff]  ;;  %1973 = vst [vmem:[%s14936_s26 + $0x3b0] sm:$0xff] %v1972_v54 }
  0x89   : > { %1975 = vst [vmem:[%s14936_s26 + $0x3b8] sm:$0xff] %v1974_v55  ;;  %v1976_v56 = vld [vmem:[%s14928_s25 + $0xf00] sm:$0xff] }
  0x8a   : > { %v1978_v57 = vld [vmem:[%s14928_s25 + $0xf20] sm:$0xff]  ;;  %1977 = vst [vmem:[%s14936_s26 + $0x3c0] sm:$0xff] %v1976_v56 }
  0x8b   : > { %v1980_v58 = vld [vmem:[%s14928_s25 + $0xf40] sm:$0xff]  ;;  %1979 = vst [vmem:[%s14936_s26 + $0x3c8] sm:$0xff] %v1978_v57 }
  0x8c   : > { %1981 = vst [vmem:[%s14936_s26 + $0x3d0] sm:$0xff] %v1980_v58  ;;  %v1982_v59 = vld [vmem:[%s14928_s25 + $0xf60] sm:$0xff] }
  0x8d   : > { %v1984_v60 = vld [vmem:[%s14928_s25 + $0xf80] sm:$0xff]  ;;  %1983 = vst [vmem:[%s14936_s26 + $0x3d8] sm:$0xff] %v1982_v59 }
  0x8e   : > { %v1986_v61 = vld [vmem:[%s14928_s25 + $0xfa0] sm:$0xff]  ;;  %1985 = vst [vmem:[%s14936_s26 + $0x3e0] sm:$0xff] %v1984_v60 }
  0x8f   : > { %1987 = vst [vmem:[%s14936_s26 + $0x3e8] sm:$0xff] %v1986_v61  ;;  %v1988_v62 = vld [vmem:[%s14928_s25 + $0xfc0] sm:$0xff] }
  0x90   : > { %v1990_v63 = vld [vmem:[%s14928_s25 + $0xfe0] sm:$0xff]  ;;  %1989 = vst [vmem:[%s14936_s26 + $0x3f0] sm:$0xff] %v1988_v62 }
  0x91   : > { %v1992_v0 = vld [vmem:[%s14928_s25 + $0x1000] sm:$0xff]  ;;  %1991 = vst [vmem:[%s14936_s26 + $0x3f8] sm:$0xff] %v1990_v63 }
  0x92   : > { %1993 = vst [vmem:[%s14936_s26 + $0x400] sm:$0xff] %v1992_v0  ;;  %v1994_v1 = vld [vmem:[%s14928_s25 + $0x1020] sm:$0xff] }
  0x93   : > { %v1996_v2 = vld [vmem:[%s14928_s25 + $0x1040] sm:$0xff]  ;;  %1995 = vst [vmem:[%s14936_s26 + $0x408] sm:$0xff] %v1994_v1 }
  0x94   : > { %v1998_v3 = vld [vmem:[%s14928_s25 + $0x1060] sm:$0xff]  ;;  %1997 = vst [vmem:[%s14936_s26 + $0x410] sm:$0xff] %v1996_v2 }
  0x95   : > { %1999 = vst [vmem:[%s14936_s26 + $0x418] sm:$0xff] %v1998_v3  ;;  %v2000_v4 = vld [vmem:[%s14928_s25 + $0x1080] sm:$0xff] }
  0x96   : > { %v2002_v5 = vld [vmem:[%s14928_s25 + $0x10a0] sm:$0xff]  ;;  %2001 = vst [vmem:[%s14936_s26 + $0x420] sm:$0xff] %v2000_v4 }
  0x97   : > { %v2004_v6 = vld [vmem:[%s14928_s25 + $0x10c0] sm:$0xff]  ;;  %2003 = vst [vmem:[%s14936_s26 + $0x428] sm:$0xff] %v2002_v5 }
  0x98   : > { %2005 = vst [vmem:[%s14936_s26 + $0x430] sm:$0xff] %v2004_v6  ;;  %v2006_v7 = vld [vmem:[%s14928_s25 + $0x10e0] sm:$0xff] }
  0x99   : > { %v2008_v8 = vld [vmem:[%s14928_s25 + $0x1100] sm:$0xff]  ;;  %2007 = vst [vmem:[%s14936_s26 + $0x438] sm:$0xff] %v2006_v7 }
  0x9a   : > { %v2010_v9 = vld [vmem:[%s14928_s25 + $0x1120] sm:$0xff]  ;;  %2009 = vst [vmem:[%s14936_s26 + $0x440] sm:$0xff] %v2008_v8 }
  0x9b   : > { %2011 = vst [vmem:[%s14936_s26 + $0x448] sm:$0xff] %v2010_v9  ;;  %v2012_v10 = vld [vmem:[%s14928_s25 + $0x1140] sm:$0xff] }
  0x9c   : > { %v2014_v11 = vld [vmem:[%s14928_s25 + $0x1160] sm:$0xff]  ;;  %2013 = vst [vmem:[%s14936_s26 + $0x450] sm:$0xff] %v2012_v10 }
  0x9d   : > { %v2016_v12 = vld [vmem:[%s14928_s25 + $0x1180] sm:$0xff]  ;;  %2015 = vst [vmem:[%s14936_s26 + $0x458] sm:$0xff] %v2014_v11 }
  0x9e   : > { %2017 = vst [vmem:[%s14936_s26 + $0x460] sm:$0xff] %v2016_v12  ;;  %v2018_v13 = vld [vmem:[%s14928_s25 + $0x11a0] sm:$0xff] }
  0x9f   : > { %v2020_v14 = vld [vmem:[%s14928_s25 + $0x11c0] sm:$0xff]  ;;  %2019 = vst [vmem:[%s14936_s26 + $0x468] sm:$0xff] %v2018_v13 }
  0xa0   : > { %v2022_v15 = vld [vmem:[%s14928_s25 + $0x11e0] sm:$0xff]  ;;  %2021 = vst [vmem:[%s14936_s26 + $0x470] sm:$0xff] %v2020_v14 }
  0xa1   : > { %2023 = vst [vmem:[%s14936_s26 + $0x478] sm:$0xff] %v2022_v15  ;;  %v2024_v16 = vld [vmem:[%s14928_s25 + $0x1200] sm:$0xff] }
  0xa2   : > { %v2026_v17 = vld [vmem:[%s14928_s25 + $0x1220] sm:$0xff]  ;;  %2025 = vst [vmem:[%s14936_s26 + $0x480] sm:$0xff] %v2024_v16 }
  0xa3   : > { %v2028_v18 = vld [vmem:[%s14928_s25 + $0x1240] sm:$0xff]  ;;  %2027 = vst [vmem:[%s14936_s26 + $0x488] sm:$0xff] %v2026_v17 }
  0xa4   : > { %2029 = vst [vmem:[%s14936_s26 + $0x490] sm:$0xff] %v2028_v18  ;;  %v2030_v19 = vld [vmem:[%s14928_s25 + $0x1260] sm:$0xff] }
  0xa5   : > { %v2032_v20 = vld [vmem:[%s14928_s25 + $0x1280] sm:$0xff]  ;;  %2031 = vst [vmem:[%s14936_s26 + $0x498] sm:$0xff] %v2030_v19 }
  0xa6   : > { %v2034_v21 = vld [vmem:[%s14928_s25 + $0x12a0] sm:$0xff]  ;;  %2033 = vst [vmem:[%s14936_s26 + $0x4a0] sm:$0xff] %v2032_v20 }
  0xa7   : > { %2035 = vst [vmem:[%s14936_s26 + $0x4a8] sm:$0xff] %v2034_v21  ;;  %v2036_v22 = vld [vmem:[%s14928_s25 + $0x12c0] sm:$0xff] }
  0xa8   : > { %v2038_v23 = vld [vmem:[%s14928_s25 + $0x12e0] sm:$0xff]  ;;  %2037 = vst [vmem:[%s14936_s26 + $0x4b0] sm:$0xff] %v2036_v22 }
  0xa9   : > { %v2040_v24 = vld [vmem:[%s14928_s25 + $0x1300] sm:$0xff]  ;;  %2039 = vst [vmem:[%s14936_s26 + $0x4b8] sm:$0xff] %v2038_v23 }
  0xaa   : > { %2041 = vst [vmem:[%s14936_s26 + $0x4c0] sm:$0xff] %v2040_v24  ;;  %v2042_v25 = vld [vmem:[%s14928_s25 + $0x1320] sm:$0xff] }
  0xab   : > { %v2044_v26 = vld [vmem:[%s14928_s25 + $0x1340] sm:$0xff]  ;;  %2043 = vst [vmem:[%s14936_s26 + $0x4c8] sm:$0xff] %v2042_v25 }
  0xac   : > { %v2046_v27 = vld [vmem:[%s14928_s25 + $0x1360] sm:$0xff]  ;;  %2045 = vst [vmem:[%s14936_s26 + $0x4d0] sm:$0xff] %v2044_v26 }
  0xad   : > { %2047 = vst [vmem:[%s14936_s26 + $0x4d8] sm:$0xff] %v2046_v27  ;;  %v2048_v28 = vld [vmem:[%s14928_s25 + $0x1380] sm:$0xff] }
  0xae   : > { %v2050_v29 = vld [vmem:[%s14928_s25 + $0x13a0] sm:$0xff]  ;;  %2049 = vst [vmem:[%s14936_s26 + $0x4e0] sm:$0xff] %v2048_v28 }
  0xaf   : > { %v2052_v30 = vld [vmem:[%s14928_s25 + $0x13c0] sm:$0xff]  ;;  %2051 = vst [vmem:[%s14936_s26 + $0x4e8] sm:$0xff] %v2050_v29 }
  0xb0   : > { %2053 = vst [vmem:[%s14936_s26 + $0x4f0] sm:$0xff] %v2052_v30  ;;  %v2054_v31 = vld [vmem:[%s14928_s25 + $0x13e0] sm:$0xff] }
  0xb1   : > { %v2056_v32 = vld [vmem:[%s14928_s25 + $0x1400] sm:$0xff]  ;;  %2055 = vst [vmem:[%s14936_s26 + $0x4f8] sm:$0xff] %v2054_v31 }
  0xb2   : > { %v2058_v33 = vld [vmem:[%s14928_s25 + $0x1420] sm:$0xff]  ;;  %2057 = vst [vmem:[%s14936_s26 + $0x500] sm:$0xff] %v2056_v32 }
  0xb3   : > { %2059 = vst [vmem:[%s14936_s26 + $0x508] sm:$0xff] %v2058_v33  ;;  %v2060_v34 = vld [vmem:[%s14928_s25 + $0x1440] sm:$0xff] }
  0xb4   : > { %v2062_v35 = vld [vmem:[%s14928_s25 + $0x1460] sm:$0xff]  ;;  %2061 = vst [vmem:[%s14936_s26 + $0x510] sm:$0xff] %v2060_v34 }
  0xb5   : > { %v2064_v36 = vld [vmem:[%s14928_s25 + $0x1480] sm:$0xff]  ;;  %2063 = vst [vmem:[%s14936_s26 + $0x518] sm:$0xff] %v2062_v35 }
  0xb6   : > { %2065 = vst [vmem:[%s14936_s26 + $0x520] sm:$0xff] %v2064_v36  ;;  %v2066_v37 = vld [vmem:[%s14928_s25 + $0x14a0] sm:$0xff] }
  0xb7   : > { %v2068_v38 = vld [vmem:[%s14928_s25 + $0x14c0] sm:$0xff]  ;;  %2067 = vst [vmem:[%s14936_s26 + $0x528] sm:$0xff] %v2066_v37 }
  0xb8   : > { %v2070_v39 = vld [vmem:[%s14928_s25 + $0x14e0] sm:$0xff]  ;;  %2069 = vst [vmem:[%s14936_s26 + $0x530] sm:$0xff] %v2068_v38 }
  0xb9   : > { %2071 = vst [vmem:[%s14936_s26 + $0x538] sm:$0xff] %v2070_v39  ;;  %v2072_v40 = vld [vmem:[%s14928_s25 + $0x1500] sm:$0xff] }
  0xba   : > { %v2074_v41 = vld [vmem:[%s14928_s25 + $0x1520] sm:$0xff]  ;;  %2073 = vst [vmem:[%s14936_s26 + $0x540] sm:$0xff] %v2072_v40 }
  0xbb   : > { %v2076_v42 = vld [vmem:[%s14928_s25 + $0x1540] sm:$0xff]  ;;  %2075 = vst [vmem:[%s14936_s26 + $0x548] sm:$0xff] %v2074_v41 }
  0xbc   : > { %2077 = vst [vmem:[%s14936_s26 + $0x550] sm:$0xff] %v2076_v42  ;;  %v2078_v43 = vld [vmem:[%s14928_s25 + $0x1560] sm:$0xff] }
  0xbd   : > { %v2080_v44 = vld [vmem:[%s14928_s25 + $0x1580] sm:$0xff]  ;;  %2079 = vst [vmem:[%s14936_s26 + $0x558] sm:$0xff] %v2078_v43 }
  0xbe   : > { %v2082_v45 = vld [vmem:[%s14928_s25 + $0x15a0] sm:$0xff]  ;;  %2081 = vst [vmem:[%s14936_s26 + $0x560] sm:$0xff] %v2080_v44 }
  0xbf   : > { %2083 = vst [vmem:[%s14936_s26 + $0x568] sm:$0xff] %v2082_v45  ;;  %v2084_v46 = vld [vmem:[%s14928_s25 + $0x15c0] sm:$0xff] }
  0xc0   : > { %v2086_v47 = vld [vmem:[%s14928_s25 + $0x15e0] sm:$0xff]  ;;  %2085 = vst [vmem:[%s14936_s26 + $0x570] sm:$0xff] %v2084_v46 }
  0xc1   : > { %v2088_v48 = vld [vmem:[%s14928_s25 + $0x1600] sm:$0xff]  ;;  %2087 = vst [vmem:[%s14936_s26 + $0x578] sm:$0xff] %v2086_v47 }
  0xc2   : > { %2089 = vst [vmem:[%s14936_s26 + $0x580] sm:$0xff] %v2088_v48  ;;  %v2090_v49 = vld [vmem:[%s14928_s25 + $0x1620] sm:$0xff] }
  0xc3   : > { %v2092_v50 = vld [vmem:[%s14928_s25 + $0x1640] sm:$0xff]  ;;  %2091 = vst [vmem:[%s14936_s26 + $0x588] sm:$0xff] %v2090_v49 }
  0xc4   : > { %v2094_v51 = vld [vmem:[%s14928_s25 + $0x1660] sm:$0xff]  ;;  %2093 = vst [vmem:[%s14936_s26 + $0x590] sm:$0xff] %v2092_v50 }
  0xc5   : > { %2095 = vst [vmem:[%s14936_s26 + $0x598] sm:$0xff] %v2094_v51  ;;  %v2096_v52 = vld [vmem:[%s14928_s25 + $0x1680] sm:$0xff] }
  0xc6   : > { %v2098_v53 = vld [vmem:[%s14928_s25 + $0x16a0] sm:$0xff]  ;;  %2097 = vst [vmem:[%s14936_s26 + $0x5a0] sm:$0xff] %v2096_v52 }
  0xc7   : > { %v2100_v54 = vld [vmem:[%s14928_s25 + $0x16c0] sm:$0xff]  ;;  %2099 = vst [vmem:[%s14936_s26 + $0x5a8] sm:$0xff] %v2098_v53 }
  0xc8   : > { %2101 = vst [vmem:[%s14936_s26 + $0x5b0] sm:$0xff] %v2100_v54  ;;  %v2102_v55 = vld [vmem:[%s14928_s25 + $0x16e0] sm:$0xff] }
  0xc9   : > { %v2104_v56 = vld [vmem:[%s14928_s25 + $0x1700] sm:$0xff]  ;;  %2103 = vst [vmem:[%s14936_s26 + $0x5b8] sm:$0xff] %v2102_v55 }
  0xca   : > { %v2106_v57 = vld [vmem:[%s14928_s25 + $0x1720] sm:$0xff]  ;;  %2105 = vst [vmem:[%s14936_s26 + $0x5c0] sm:$0xff] %v2104_v56 }
  0xcb   : > { %2107 = vst [vmem:[%s14936_s26 + $0x5c8] sm:$0xff] %v2106_v57  ;;  %v2108_v58 = vld [vmem:[%s14928_s25 + $0x1740] sm:$0xff] }
  0xcc   : > { %v2110_v59 = vld [vmem:[%s14928_s25 + $0x1760] sm:$0xff]  ;;  %2109 = vst [vmem:[%s14936_s26 + $0x5d0] sm:$0xff] %v2108_v58 }
  0xcd   : > { %v2112_v60 = vld [vmem:[%s14928_s25 + $0x1780] sm:$0xff]  ;;  %2111 = vst [vmem:[%s14936_s26 + $0x5d8] sm:$0xff] %v2110_v59 }
  0xce   : > { %2113 = vst [vmem:[%s14936_s26 + $0x5e0] sm:$0xff] %v2112_v60  ;;  %v2114_v61 = vld [vmem:[%s14928_s25 + $0x17a0] sm:$0xff] }
  0xcf   : > { %v2116_v62 = vld [vmem:[%s14928_s25 + $0x17c0] sm:$0xff]  ;;  %2115 = vst [vmem:[%s14936_s26 + $0x5e8] sm:$0xff] %v2114_v61 }
  0xd0   : > { %v2118_v63 = vld [vmem:[%s14928_s25 + $0x17e0] sm:$0xff]  ;;  %2117 = vst [vmem:[%s14936_s26 + $0x5f0] sm:$0xff] %v2116_v62 }
  0xd1   : > { %2119 = vst [vmem:[%s14936_s26 + $0x5f8] sm:$0xff] %v2118_v63  ;;  %v2120_v0 = vld [vmem:[%s14928_s25 + $0x1800] sm:$0xff] }
  0xd2   : > { %v2122_v1 = vld [vmem:[%s14928_s25 + $0x1820] sm:$0xff]  ;;  %2121 = vst [vmem:[%s14936_s26 + $0x600] sm:$0xff] %v2120_v0 }
  0xd3   : > { %v2124_v2 = vld [vmem:[%s14928_s25 + $0x1840] sm:$0xff]  ;;  %2123 = vst [vmem:[%s14936_s26 + $0x608] sm:$0xff] %v2122_v1 }
  0xd4   : > { %2125 = vst [vmem:[%s14936_s26 + $0x610] sm:$0xff] %v2124_v2  ;;  %v2126_v3 = vld [vmem:[%s14928_s25 + $0x1860] sm:$0xff] }
  0xd5   : > { %v2128_v4 = vld [vmem:[%s14928_s25 + $0x1880] sm:$0xff]  ;;  %2127 = vst [vmem:[%s14936_s26 + $0x618] sm:$0xff] %v2126_v3 }
  0xd6   : > { %v2130_v5 = vld [vmem:[%s14928_s25 + $0x18a0] sm:$0xff]  ;;  %2129 = vst [vmem:[%s14936_s26 + $0x620] sm:$0xff] %v2128_v4 }
  0xd7   : > { %2131 = vst [vmem:[%s14936_s26 + $0x628] sm:$0xff] %v2130_v5  ;;  %v2132_v6 = vld [vmem:[%s14928_s25 + $0x18c0] sm:$0xff] }
  0xd8   : > { %v2134_v7 = vld [vmem:[%s14928_s25 + $0x18e0] sm:$0xff]  ;;  %2133 = vst [vmem:[%s14936_s26 + $0x630] sm:$0xff] %v2132_v6 }
  0xd9   : > { %v2136_v8 = vld [vmem:[%s14928_s25 + $0x1900] sm:$0xff]  ;;  %2135 = vst [vmem:[%s14936_s26 + $0x638] sm:$0xff] %v2134_v7 }
  0xda   : > { %2137 = vst [vmem:[%s14936_s26 + $0x640] sm:$0xff] %v2136_v8  ;;  %v2138_v9 = vld [vmem:[%s14928_s25 + $0x1920] sm:$0xff] }
  0xdb   : > { %v2140_v10 = vld [vmem:[%s14928_s25 + $0x1940] sm:$0xff]  ;;  %2139 = vst [vmem:[%s14936_s26 + $0x648] sm:$0xff] %v2138_v9 }
  0xdc   : > { %v2142_v11 = vld [vmem:[%s14928_s25 + $0x1960] sm:$0xff]  ;;  %2141 = vst [vmem:[%s14936_s26 + $0x650] sm:$0xff] %v2140_v10 }
  0xdd   : > { %2143 = vst [vmem:[%s14936_s26 + $0x658] sm:$0xff] %v2142_v11  ;;  %v2144_v12 = vld [vmem:[%s14928_s25 + $0x1980] sm:$0xff] }
  0xde   : > { %v2146_v13 = vld [vmem:[%s14928_s25 + $0x19a0] sm:$0xff]  ;;  %2145 = vst [vmem:[%s14936_s26 + $0x660] sm:$0xff] %v2144_v12 }
  0xdf   : > { %v2148_v14 = vld [vmem:[%s14928_s25 + $0x19c0] sm:$0xff]  ;;  %2147 = vst [vmem:[%s14936_s26 + $0x668] sm:$0xff] %v2146_v13 }
  0xe0   : > { %2149 = vst [vmem:[%s14936_s26 + $0x670] sm:$0xff] %v2148_v14  ;;  %v2150_v15 = vld [vmem:[%s14928_s25 + $0x19e0] sm:$0xff] }
  0xe1   : > { %v2152_v16 = vld [vmem:[%s14928_s25 + $0x1a00] sm:$0xff]  ;;  %2151 = vst [vmem:[%s14936_s26 + $0x678] sm:$0xff] %v2150_v15 }
  0xe2   : > { %v2154_v17 = vld [vmem:[%s14928_s25 + $0x1a20] sm:$0xff]  ;;  %2153 = vst [vmem:[%s14936_s26 + $0x680] sm:$0xff] %v2152_v16 }
  0xe3   : > { %2155 = vst [vmem:[%s14936_s26 + $0x688] sm:$0xff] %v2154_v17  ;;  %v2156_v18 = vld [vmem:[%s14928_s25 + $0x1a40] sm:$0xff] }
  0xe4   : > { %v2158_v19 = vld [vmem:[%s14928_s25 + $0x1a60] sm:$0xff]  ;;  %2157 = vst [vmem:[%s14936_s26 + $0x690] sm:$0xff] %v2156_v18 }
  0xe5   : > { %v2160_v20 = vld [vmem:[%s14928_s25 + $0x1a80] sm:$0xff]  ;;  %2159 = vst [vmem:[%s14936_s26 + $0x698] sm:$0xff] %v2158_v19 }
  0xe6   : > { %2161 = vst [vmem:[%s14936_s26 + $0x6a0] sm:$0xff] %v2160_v20  ;;  %v2162_v21 = vld [vmem:[%s14928_s25 + $0x1aa0] sm:$0xff] }
  0xe7   : > { %v2164_v22 = vld [vmem:[%s14928_s25 + $0x1ac0] sm:$0xff]  ;;  %2163 = vst [vmem:[%s14936_s26 + $0x6a8] sm:$0xff] %v2162_v21 }
  0xe8   : > { %v2166_v23 = vld [vmem:[%s14928_s25 + $0x1ae0] sm:$0xff]  ;;  %2165 = vst [vmem:[%s14936_s26 + $0x6b0] sm:$0xff] %v2164_v22 }
  0xe9   : > { %2167 = vst [vmem:[%s14936_s26 + $0x6b8] sm:$0xff] %v2166_v23  ;;  %v2168_v24 = vld [vmem:[%s14928_s25 + $0x1b00] sm:$0xff] }
  0xea   : > { %v2170_v25 = vld [vmem:[%s14928_s25 + $0x1b20] sm:$0xff]  ;;  %2169 = vst [vmem:[%s14936_s26 + $0x6c0] sm:$0xff] %v2168_v24 }
  0xeb   : > { %v2172_v26 = vld [vmem:[%s14928_s25 + $0x1b40] sm:$0xff]  ;;  %2171 = vst [vmem:[%s14936_s26 + $0x6c8] sm:$0xff] %v2170_v25 }
  0xec   : > { %2173 = vst [vmem:[%s14936_s26 + $0x6d0] sm:$0xff] %v2172_v26  ;;  %v2174_v27 = vld [vmem:[%s14928_s25 + $0x1b60] sm:$0xff] }
  0xed   : > { %v2176_v28 = vld [vmem:[%s14928_s25 + $0x1b80] sm:$0xff]  ;;  %2175 = vst [vmem:[%s14936_s26 + $0x6d8] sm:$0xff] %v2174_v27 }
  0xee   : > { %v2178_v29 = vld [vmem:[%s14928_s25 + $0x1ba0] sm:$0xff]  ;;  %2177 = vst [vmem:[%s14936_s26 + $0x6e0] sm:$0xff] %v2176_v28 }
  0xef   : > { %2179 = vst [vmem:[%s14936_s26 + $0x6e8] sm:$0xff] %v2178_v29  ;;  %v2180_v30 = vld [vmem:[%s14928_s25 + $0x1bc0] sm:$0xff] }
  0xf0   : > { %v2182_v31 = vld [vmem:[%s14928_s25 + $0x1be0] sm:$0xff]  ;;  %2181 = vst [vmem:[%s14936_s26 + $0x6f0] sm:$0xff] %v2180_v30 }
  0xf1   : > { %v2184_v32 = vld [vmem:[%s14928_s25 + $0x1c00] sm:$0xff]  ;;  %2183 = vst [vmem:[%s14936_s26 + $0x6f8] sm:$0xff] %v2182_v31 }
  0xf2   : > { %2185 = vst [vmem:[%s14936_s26 + $0x700] sm:$0xff] %v2184_v32  ;;  %v2186_v33 = vld [vmem:[%s14928_s25 + $0x1c20] sm:$0xff] }
  0xf3   : > { %v2188_v34 = vld [vmem:[%s14928_s25 + $0x1c40] sm:$0xff]  ;;  %2187 = vst [vmem:[%s14936_s26 + $0x708] sm:$0xff] %v2186_v33 }
  0xf4   : > { %v2190_v35 = vld [vmem:[%s14928_s25 + $0x1c60] sm:$0xff]  ;;  %2189 = vst [vmem:[%s14936_s26 + $0x710] sm:$0xff] %v2188_v34 }
  0xf5   : > { %2191 = vst [vmem:[%s14936_s26 + $0x718] sm:$0xff] %v2190_v35  ;;  %v2192_v36 = vld [vmem:[%s14928_s25 + $0x1c80] sm:$0xff] }
  0xf6   : > { %v2194_v37 = vld [vmem:[%s14928_s25 + $0x1ca0] sm:$0xff]  ;;  %2193 = vst [vmem:[%s14936_s26 + $0x720] sm:$0xff] %v2192_v36 }
  0xf7   : > { %v2196_v38 = vld [vmem:[%s14928_s25 + $0x1cc0] sm:$0xff]  ;;  %2195 = vst [vmem:[%s14936_s26 + $0x728] sm:$0xff] %v2194_v37 }
  0xf8   : > { %2197 = vst [vmem:[%s14936_s26 + $0x730] sm:$0xff] %v2196_v38  ;;  %v2198_v39 = vld [vmem:[%s14928_s25 + $0x1ce0] sm:$0xff] }
  0xf9   : > { %v2200_v40 = vld [vmem:[%s14928_s25 + $0x1d00] sm:$0xff]  ;;  %2199 = vst [vmem:[%s14936_s26 + $0x738] sm:$0xff] %v2198_v39 }
  0xfa   : > { %v2202_v41 = vld [vmem:[%s14928_s25 + $0x1d20] sm:$0xff]  ;;  %2201 = vst [vmem:[%s14936_s26 + $0x740] sm:$0xff] %v2200_v40 }
  0xfb   : > { %2203 = vst [vmem:[%s14936_s26 + $0x748] sm:$0xff] %v2202_v41  ;;  %v2204_v42 = vld [vmem:[%s14928_s25 + $0x1d40] sm:$0xff] }
  0xfc   : > { %v2206_v43 = vld [vmem:[%s14928_s25 + $0x1d60] sm:$0xff]  ;;  %2205 = vst [vmem:[%s14936_s26 + $0x750] sm:$0xff] %v2204_v42 }
  0xfd   : > { %v2208_v44 = vld [vmem:[%s14928_s25 + $0x1d80] sm:$0xff]  ;;  %2207 = vst [vmem:[%s14936_s26 + $0x758] sm:$0xff] %v2206_v43 }
  0xfe   : > { %2209 = vst [vmem:[%s14936_s26 + $0x760] sm:$0xff] %v2208_v44  ;;  %v2210_v45 = vld [vmem:[%s14928_s25 + $0x1da0] sm:$0xff] }
  0xff   : > { %v2212_v46 = vld [vmem:[%s14928_s25 + $0x1dc0] sm:$0xff]  ;;  %2211 = vst [vmem:[%s14936_s26 + $0x768] sm:$0xff] %v2210_v45 }
 0x100   : > { %v2214_v47 = vld [vmem:[%s14928_s25 + $0x1de0] sm:$0xff]  ;;  %2213 = vst [vmem:[%s14936_s26 + $0x770] sm:$0xff] %v2212_v46 }
 0x101   : > { %2215 = vst [vmem:[%s14936_s26 + $0x778] sm:$0xff] %v2214_v47  ;;  %v2216_v48 = vld [vmem:[%s14928_s25 + $0x1e00] sm:$0xff] }
 0x102   : > { %v2218_v49 = vld [vmem:[%s14928_s25 + $0x1e20] sm:$0xff]  ;;  %2217 = vst [vmem:[%s14936_s26 + $0x780] sm:$0xff] %v2216_v48 }
 0x103   : > { %v2220_v50 = vld [vmem:[%s14928_s25 + $0x1e40] sm:$0xff]  ;;  %2219 = vst [vmem:[%s14936_s26 + $0x788] sm:$0xff] %v2218_v49 }
 0x104   : > { %2221 = vst [vmem:[%s14936_s26 + $0x790] sm:$0xff] %v2220_v50  ;;  %v2222_v51 = vld [vmem:[%s14928_s25 + $0x1e60] sm:$0xff] }
 0x105   : > { %v2224_v52 = vld [vmem:[%s14928_s25 + $0x1e80] sm:$0xff]  ;;  %2223 = vst [vmem:[%s14936_s26 + $0x798] sm:$0xff] %v2222_v51 }
 0x106   : > { %v2226_v53 = vld [vmem:[%s14928_s25 + $0x1ea0] sm:$0xff]  ;;  %2225 = vst [vmem:[%s14936_s26 + $0x7a0] sm:$0xff] %v2224_v52 }
 0x107   : > { %2227 = vst [vmem:[%s14936_s26 + $0x7a8] sm:$0xff] %v2226_v53  ;;  %v2228_v54 = vld [vmem:[%s14928_s25 + $0x1ec0] sm:$0xff] }
 0x108   : > { %v2230_v55 = vld [vmem:[%s14928_s25 + $0x1ee0] sm:$0xff]  ;;  %2229 = vst [vmem:[%s14936_s26 + $0x7b0] sm:$0xff] %v2228_v54 }
 0x109   : > { %v2232_v56 = vld [vmem:[%s14928_s25 + $0x1f00] sm:$0xff]  ;;  %2231 = vst [vmem:[%s14936_s26 + $0x7b8] sm:$0xff] %v2230_v55 }
 0x10a   : > { %2233 = vst [vmem:[%s14936_s26 + $0x7c0] sm:$0xff] %v2232_v56  ;;  %v2234_v57 = vld [vmem:[%s14928_s25 + $0x1f20] sm:$0xff] }
 0x10b   : > { %v2236_v58 = vld [vmem:[%s14928_s25 + $0x1f40] sm:$0xff]  ;;  %2235 = vst [vmem:[%s14936_s26 + $0x7c8] sm:$0xff] %v2234_v57 }
 0x10c   : > { %v2238_v59 = vld [vmem:[%s14928_s25 + $0x1f60] sm:$0xff]  ;;  %2237 = vst [vmem:[%s14936_s26 + $0x7d0] sm:$0xff] %v2236_v58 }
 0x10d   : > { %2239 = vst [vmem:[%s14936_s26 + $0x7d8] sm:$0xff] %v2238_v59  ;;  %v2240_v60 = vld [vmem:[%s14928_s25 + $0x1f80] sm:$0xff] }
 0x10e   : > { %v2242_v61 = vld [vmem:[%s14928_s25 + $0x1fa0] sm:$0xff]  ;;  %2241 = vst [vmem:[%s14936_s26 + $0x7e0] sm:$0xff] %v2240_v60 }
 0x10f   : > { %v2244_v62 = vld [vmem:[%s14928_s25 + $0x1fc0] sm:$0xff]  ;;  %2243 = vst [vmem:[%s14936_s26 + $0x7e8] sm:$0xff] %v2242_v61 }
 0x110   : > { %2245 = vst [vmem:[%s14936_s26 + $0x7f0] sm:$0xff] %v2244_v62  ;;  %v2246_v63 = vld [vmem:[%s14928_s25 + $0x1fe0] sm:$0xff] }
 0x111   : > { %v2248_v0 = vld [vmem:[%s14928_s25 + $0x2000] sm:$0xff]  ;;  %2247 = vst [vmem:[%s14936_s26 + $0x7f8] sm:$0xff] %v2246_v63 }
 0x112   : > { %v2250_v1 = vld [vmem:[%s14928_s25 + $0x2020] sm:$0xff]  ;;  %2249 = vst [vmem:[%s14936_s26 + $0x800] sm:$0xff] %v2248_v0 }
 0x113   : > { %2251 = vst [vmem:[%s14936_s26 + $0x808] sm:$0xff] %v2250_v1  ;;  %v2252_v2 = vld [vmem:[%s14928_s25 + $0x2040] sm:$0xff] }
 0x114   : > { %v2254_v3 = vld [vmem:[%s14928_s25 + $0x2060] sm:$0xff]  ;;  %2253 = vst [vmem:[%s14936_s26 + $0x810] sm:$0xff] %v2252_v2 }
 0x115   : > { %v2256_v4 = vld [vmem:[%s14928_s25 + $0x2080] sm:$0xff]  ;;  %2255 = vst [vmem:[%s14936_s26 + $0x818] sm:$0xff] %v2254_v3 }
 0x116   : > { %2257 = vst [vmem:[%s14936_s26 + $0x820] sm:$0xff] %v2256_v4  ;;  %v2258_v5 = vld [vmem:[%s14928_s25 + $0x20a0] sm:$0xff] }
 0x117   : > { %v2260_v6 = vld [vmem:[%s14928_s25 + $0x20c0] sm:$0xff]  ;;  %2259 = vst [vmem:[%s14936_s26 + $0x828] sm:$0xff] %v2258_v5 }
 0x118   : > { %v2262_v7 = vld [vmem:[%s14928_s25 + $0x20e0] sm:$0xff]  ;;  %2261 = vst [vmem:[%s14936_s26 + $0x830] sm:$0xff] %v2260_v6 }
 0x119   : > { %2263 = vst [vmem:[%s14936_s26 + $0x838] sm:$0xff] %v2262_v7  ;;  %v2264_v8 = vld [vmem:[%s14928_s25 + $0x2100] sm:$0xff] }
 0x11a   : > { %v2266_v9 = vld [vmem:[%s14928_s25 + $0x2120] sm:$0xff]  ;;  %2265 = vst [vmem:[%s14936_s26 + $0x840] sm:$0xff] %v2264_v8 }
 0x11b   : > { %v2268_v10 = vld [vmem:[%s14928_s25 + $0x2140] sm:$0xff]  ;;  %2267 = vst [vmem:[%s14936_s26 + $0x848] sm:$0xff] %v2266_v9 }
 0x11c   : > { %2269 = vst [vmem:[%s14936_s26 + $0x850] sm:$0xff] %v2268_v10  ;;  %v2270_v11 = vld [vmem:[%s14928_s25 + $0x2160] sm:$0xff] }
 0x11d   : > { %v2272_v12 = vld [vmem:[%s14928_s25 + $0x2180] sm:$0xff]  ;;  %2271 = vst [vmem:[%s14936_s26 + $0x858] sm:$0xff] %v2270_v11 }
 0x11e   : > { %v2274_v13 = vld [vmem:[%s14928_s25 + $0x21a0] sm:$0xff]  ;;  %2273 = vst [vmem:[%s14936_s26 + $0x860] sm:$0xff] %v2272_v12 }
 0x11f   : > { %2275 = vst [vmem:[%s14936_s26 + $0x868] sm:$0xff] %v2274_v13  ;;  %v2276_v14 = vld [vmem:[%s14928_s25 + $0x21c0] sm:$0xff] }
 0x120   : > { %v2278_v15 = vld [vmem:[%s14928_s25 + $0x21e0] sm:$0xff]  ;;  %2277 = vst [vmem:[%s14936_s26 + $0x870] sm:$0xff] %v2276_v14 }
 0x121   : > { %v2280_v16 = vld [vmem:[%s14928_s25 + $0x2200] sm:$0xff]  ;;  %2279 = vst [vmem:[%s14936_s26 + $0x878] sm:$0xff] %v2278_v15 }
 0x122   : > { %2281 = vst [vmem:[%s14936_s26 + $0x880] sm:$0xff] %v2280_v16  ;;  %v2282_v17 = vld [vmem:[%s14928_s25 + $0x2220] sm:$0xff] }
 0x123   : > { %v2284_v18 = vld [vmem:[%s14928_s25 + $0x2240] sm:$0xff]  ;;  %2283 = vst [vmem:[%s14936_s26 + $0x888] sm:$0xff] %v2282_v17 }
 0x124   : > { %v2286_v19 = vld [vmem:[%s14928_s25 + $0x2260] sm:$0xff]  ;;  %2285 = vst [vmem:[%s14936_s26 + $0x890] sm:$0xff] %v2284_v18 }
 0x125   : > { %2287 = vst [vmem:[%s14936_s26 + $0x898] sm:$0xff] %v2286_v19  ;;  %v2288_v20 = vld [vmem:[%s14928_s25 + $0x2280] sm:$0xff] }
 0x126   : > { %v2290_v21 = vld [vmem:[%s14928_s25 + $0x22a0] sm:$0xff]  ;;  %2289 = vst [vmem:[%s14936_s26 + $0x8a0] sm:$0xff] %v2288_v20 }
 0x127   : > { %v2292_v22 = vld [vmem:[%s14928_s25 + $0x22c0] sm:$0xff]  ;;  %2291 = vst [vmem:[%s14936_s26 + $0x8a8] sm:$0xff] %v2290_v21 }
 0x128   : > { %2293 = vst [vmem:[%s14936_s26 + $0x8b0] sm:$0xff] %v2292_v22  ;;  %v2294_v23 = vld [vmem:[%s14928_s25 + $0x22e0] sm:$0xff] }
 0x129   : > { %v2296_v24 = vld [vmem:[%s14928_s25 + $0x2300] sm:$0xff]  ;;  %2295 = vst [vmem:[%s14936_s26 + $0x8b8] sm:$0xff] %v2294_v23 }
 0x12a   : > { %v2298_v25 = vld [vmem:[%s14928_s25 + $0x2320] sm:$0xff]  ;;  %2297 = vst [vmem:[%s14936_s26 + $0x8c0] sm:$0xff] %v2296_v24 }
 0x12b   : > { %2299 = vst [vmem:[%s14936_s26 + $0x8c8] sm:$0xff] %v2298_v25  ;;  %v2300_v26 = vld [vmem:[%s14928_s25 + $0x2340] sm:$0xff] }
 0x12c   : > { %v2302_v27 = vld [vmem:[%s14928_s25 + $0x2360] sm:$0xff]  ;;  %2301 = vst [vmem:[%s14936_s26 + $0x8d0] sm:$0xff] %v2300_v26 }
 0x12d   : > { %v2304_v28 = vld [vmem:[%s14928_s25 + $0x2380] sm:$0xff]  ;;  %2303 = vst [vmem:[%s14936_s26 + $0x8d8] sm:$0xff] %v2302_v27 }
 0x12e   : > { %2305 = vst [vmem:[%s14936_s26 + $0x8e0] sm:$0xff] %v2304_v28  ;;  %v2306_v29 = vld [vmem:[%s14928_s25 + $0x23a0] sm:$0xff] }
 0x12f   : > { %v2308_v30 = vld [vmem:[%s14928_s25 + $0x23c0] sm:$0xff]  ;;  %2307 = vst [vmem:[%s14936_s26 + $0x8e8] sm:$0xff] %v2306_v29 }
 0x130   : > { %v2310_v31 = vld [vmem:[%s14928_s25 + $0x23e0] sm:$0xff]  ;;  %2309 = vst [vmem:[%s14936_s26 + $0x8f0] sm:$0xff] %v2308_v30 }
 0x131   : > { %2311 = vst [vmem:[%s14936_s26 + $0x8f8] sm:$0xff] %v2310_v31  ;;  %v2312_v32 = vld [vmem:[%s14928_s25 + $0x2400] sm:$0xff] }
 0x132   : > { %v2314_v33 = vld [vmem:[%s14928_s25 + $0x2420] sm:$0xff]  ;;  %2313 = vst [vmem:[%s14936_s26 + $0x900] sm:$0xff] %v2312_v32 }
 0x133   : > { %v2316_v34 = vld [vmem:[%s14928_s25 + $0x2440] sm:$0xff]  ;;  %2315 = vst [vmem:[%s14936_s26 + $0x908] sm:$0xff] %v2314_v33 }
 0x134   : > { %2317 = vst [vmem:[%s14936_s26 + $0x910] sm:$0xff] %v2316_v34  ;;  %v2318_v35 = vld [vmem:[%s14928_s25 + $0x2460] sm:$0xff] }
 0x135   : > { %v2320_v36 = vld [vmem:[%s14928_s25 + $0x2480] sm:$0xff]  ;;  %2319 = vst [vmem:[%s14936_s26 + $0x918] sm:$0xff] %v2318_v35 }
 0x136   : > { %v2322_v37 = vld [vmem:[%s14928_s25 + $0x24a0] sm:$0xff]  ;;  %2321 = vst [vmem:[%s14936_s26 + $0x920] sm:$0xff] %v2320_v36 }
 0x137   : > { %2323 = vst [vmem:[%s14936_s26 + $0x928] sm:$0xff] %v2322_v37  ;;  %v2324_v38 = vld [vmem:[%s14928_s25 + $0x24c0] sm:$0xff] }
 0x138   : > { %v2326_v39 = vld [vmem:[%s14928_s25 + $0x24e0] sm:$0xff]  ;;  %2325 = vst [vmem:[%s14936_s26 + $0x930] sm:$0xff] %v2324_v38 }
 0x139   : > { %v2328_v40 = vld [vmem:[%s14928_s25 + $0x2500] sm:$0xff]  ;;  %2327 = vst [vmem:[%s14936_s26 + $0x938] sm:$0xff] %v2326_v39 }
 0x13a   : > { %2329 = vst [vmem:[%s14936_s26 + $0x940] sm:$0xff] %v2328_v40  ;;  %v2330_v41 = vld [vmem:[%s14928_s25 + $0x2520] sm:$0xff] }
 0x13b   : > { %v2332_v42 = vld [vmem:[%s14928_s25 + $0x2540] sm:$0xff]  ;;  %2331 = vst [vmem:[%s14936_s26 + $0x948] sm:$0xff] %v2330_v41 }
 0x13c   : > { %v2334_v43 = vld [vmem:[%s14928_s25 + $0x2560] sm:$0xff]  ;;  %2333 = vst [vmem:[%s14936_s26 + $0x950] sm:$0xff] %v2332_v42 }
 0x13d   : > { %2335 = vst [vmem:[%s14936_s26 + $0x958] sm:$0xff] %v2334_v43  ;;  %v2336_v44 = vld [vmem:[%s14928_s25 + $0x2580] sm:$0xff] }
 0x13e   : > { %v2338_v45 = vld [vmem:[%s14928_s25 + $0x25a0] sm:$0xff]  ;;  %2337 = vst [vmem:[%s14936_s26 + $0x960] sm:$0xff] %v2336_v44 }
 0x13f   : > { %v2340_v46 = vld [vmem:[%s14928_s25 + $0x25c0] sm:$0xff]  ;;  %2339 = vst [vmem:[%s14936_s26 + $0x968] sm:$0xff] %v2338_v45 }
 0x140   : > { %2341 = vst [vmem:[%s14936_s26 + $0x970] sm:$0xff] %v2340_v46  ;;  %v2342_v47 = vld [vmem:[%s14928_s25 + $0x25e0] sm:$0xff] }
 0x141   : > { %v2344_v48 = vld [vmem:[%s14928_s25 + $0x2600] sm:$0xff]  ;;  %2343 = vst [vmem:[%s14936_s26 + $0x978] sm:$0xff] %v2342_v47 }
 0x142   : > { %v2346_v49 = vld [vmem:[%s14928_s25 + $0x2620] sm:$0xff]  ;;  %2345 = vst [vmem:[%s14936_s26 + $0x980] sm:$0xff] %v2344_v48 }
 0x143   : > { %2347 = vst [vmem:[%s14936_s26 + $0x988] sm:$0xff] %v2346_v49  ;;  %v2348_v50 = vld [vmem:[%s14928_s25 + $0x2640] sm:$0xff] }
 0x144   : > { %v2350_v51 = vld [vmem:[%s14928_s25 + $0x2660] sm:$0xff]  ;;  %2349 = vst [vmem:[%s14936_s26 + $0x990] sm:$0xff] %v2348_v50 }
 0x145   : > { %v2352_v52 = vld [vmem:[%s14928_s25 + $0x2680] sm:$0xff]  ;;  %2351 = vst [vmem:[%s14936_s26 + $0x998] sm:$0xff] %v2350_v51 }
 0x146   : > { %2353 = vst [vmem:[%s14936_s26 + $0x9a0] sm:$0xff] %v2352_v52  ;;  %v2354_v53 = vld [vmem:[%s14928_s25 + $0x26a0] sm:$0xff] }
 0x147   : > { %v2356_v54 = vld [vmem:[%s14928_s25 + $0x26c0] sm:$0xff]  ;;  %2355 = vst [vmem:[%s14936_s26 + $0x9a8] sm:$0xff] %v2354_v53 }
 0x148   : > { %v2358_v55 = vld [vmem:[%s14928_s25 + $0x26e0] sm:$0xff]  ;;  %2357 = vst [vmem:[%s14936_s26 + $0x9b0] sm:$0xff] %v2356_v54 }
 0x149   : > { %2359 = vst [vmem:[%s14936_s26 + $0x9b8] sm:$0xff] %v2358_v55  ;;  %v2360_v56 = vld [vmem:[%s14928_s25 + $0x2700] sm:$0xff] }
 0x14a   : > { %v2362_v57 = vld [vmem:[%s14928_s25 + $0x2720] sm:$0xff]  ;;  %2361 = vst [vmem:[%s14936_s26 + $0x9c0] sm:$0xff] %v2360_v56 }
 0x14b   : > { %v2364_v58 = vld [vmem:[%s14928_s25 + $0x2740] sm:$0xff]  ;;  %2363 = vst [vmem:[%s14936_s26 + $0x9c8] sm:$0xff] %v2362_v57 }
 0x14c   : > { %2365 = vst [vmem:[%s14936_s26 + $0x9d0] sm:$0xff] %v2364_v58  ;;  %v2366_v59 = vld [vmem:[%s14928_s25 + $0x2760] sm:$0xff] }
 0x14d   : > { %v2368_v60 = vld [vmem:[%s14928_s25 + $0x2780] sm:$0xff]  ;;  %2367 = vst [vmem:[%s14936_s26 + $0x9d8] sm:$0xff] %v2366_v59 }
 0x14e   : > { %v2370_v61 = vld [vmem:[%s14928_s25 + $0x27a0] sm:$0xff]  ;;  %2369 = vst [vmem:[%s14936_s26 + $0x9e0] sm:$0xff] %v2368_v60 }
 0x14f   : > { %2371 = vst [vmem:[%s14936_s26 + $0x9e8] sm:$0xff] %v2370_v61  ;;  %v2372_v62 = vld [vmem:[%s14928_s25 + $0x27c0] sm:$0xff] }
 0x150   : > { %v2374_v63 = vld [vmem:[%s14928_s25 + $0x27e0] sm:$0xff]  ;;  %2373 = vst [vmem:[%s14936_s26 + $0x9f0] sm:$0xff] %v2372_v62 }
 0x151   : > { %v2376_v0 = vld [vmem:[%s14928_s25 + $0x2800] sm:$0xff]  ;;  %2375 = vst [vmem:[%s14936_s26 + $0x9f8] sm:$0xff] %v2374_v63 }
 0x152   : > { %2377 = vst [vmem:[%s14936_s26 + $0xa00] sm:$0xff] %v2376_v0  ;;  %v2378_v1 = vld [vmem:[%s14928_s25 + $0x2820] sm:$0xff] }
 0x153   : > { %v2380_v2 = vld [vmem:[%s14928_s25 + $0x2840] sm:$0xff]  ;;  %2379 = vst [vmem:[%s14936_s26 + $0xa08] sm:$0xff] %v2378_v1 }
 0x154   : > { %v2382_v3 = vld [vmem:[%s14928_s25 + $0x2860] sm:$0xff]  ;;  %2381 = vst [vmem:[%s14936_s26 + $0xa10] sm:$0xff] %v2380_v2 }
 0x155   : > { %2383 = vst [vmem:[%s14936_s26 + $0xa18] sm:$0xff] %v2382_v3  ;;  %v2384_v4 = vld [vmem:[%s14928_s25 + $0x2880] sm:$0xff] }
 0x156   : > { %v2386_v5 = vld [vmem:[%s14928_s25 + $0x28a0] sm:$0xff]  ;;  %2385 = vst [vmem:[%s14936_s26 + $0xa20] sm:$0xff] %v2384_v4 }
 0x157   : > { %v2388_v6 = vld [vmem:[%s14928_s25 + $0x28c0] sm:$0xff]  ;;  %2387 = vst [vmem:[%s14936_s26 + $0xa28] sm:$0xff] %v2386_v5 }
 0x158   : > { %2389 = vst [vmem:[%s14936_s26 + $0xa30] sm:$0xff] %v2388_v6  ;;  %v2390_v7 = vld [vmem:[%s14928_s25 + $0x28e0] sm:$0xff] }
 0x159   : > { %v2392_v8 = vld [vmem:[%s14928_s25 + $0x2900] sm:$0xff]  ;;  %2391 = vst [vmem:[%s14936_s26 + $0xa38] sm:$0xff] %v2390_v7 }
 0x15a   : > { %v2394_v9 = vld [vmem:[%s14928_s25 + $0x2920] sm:$0xff]  ;;  %2393 = vst [vmem:[%s14936_s26 + $0xa40] sm:$0xff] %v2392_v8 }
 0x15b   : > { %2395 = vst [vmem:[%s14936_s26 + $0xa48] sm:$0xff] %v2394_v9  ;;  %v2396_v10 = vld [vmem:[%s14928_s25 + $0x2940] sm:$0xff] }
 0x15c   : > { %v2398_v11 = vld [vmem:[%s14928_s25 + $0x2960] sm:$0xff]  ;;  %2397 = vst [vmem:[%s14936_s26 + $0xa50] sm:$0xff] %v2396_v10 }
 0x15d   : > { %v2400_v12 = vld [vmem:[%s14928_s25 + $0x2980] sm:$0xff]  ;;  %2399 = vst [vmem:[%s14936_s26 + $0xa58] sm:$0xff] %v2398_v11 }
 0x15e   : > { %2401 = vst [vmem:[%s14936_s26 + $0xa60] sm:$0xff] %v2400_v12  ;;  %v2402_v13 = vld [vmem:[%s14928_s25 + $0x29a0] sm:$0xff] }
 0x15f   : > { %v2404_v14 = vld [vmem:[%s14928_s25 + $0x29c0] sm:$0xff]  ;;  %2403 = vst [vmem:[%s14936_s26 + $0xa68] sm:$0xff] %v2402_v13 }
 0x160   : > { %v2406_v15 = vld [vmem:[%s14928_s25 + $0x29e0] sm:$0xff]  ;;  %2405 = vst [vmem:[%s14936_s26 + $0xa70] sm:$0xff] %v2404_v14 }
 0x161   : > { %2407 = vst [vmem:[%s14936_s26 + $0xa78] sm:$0xff] %v2406_v15  ;;  %v2408_v16 = vld [vmem:[%s14928_s25 + $0x2a00] sm:$0xff] }
 0x162   : > { %v2410_v17 = vld [vmem:[%s14928_s25 + $0x2a20] sm:$0xff]  ;;  %2409 = vst [vmem:[%s14936_s26 + $0xa80] sm:$0xff] %v2408_v16 }
 0x163   : > { %v2412_v18 = vld [vmem:[%s14928_s25 + $0x2a40] sm:$0xff]  ;;  %2411 = vst [vmem:[%s14936_s26 + $0xa88] sm:$0xff] %v2410_v17 }
 0x164   : > { %2413 = vst [vmem:[%s14936_s26 + $0xa90] sm:$0xff] %v2412_v18  ;;  %v2414_v19 = vld [vmem:[%s14928_s25 + $0x2a60] sm:$0xff] }
 0x165   : > { %v2416_v20 = vld [vmem:[%s14928_s25 + $0x2a80] sm:$0xff]  ;;  %2415 = vst [vmem:[%s14936_s26 + $0xa98] sm:$0xff] %v2414_v19 }
 0x166   : > { %v2418_v21 = vld [vmem:[%s14928_s25 + $0x2aa0] sm:$0xff]  ;;  %2417 = vst [vmem:[%s14936_s26 + $0xaa0] sm:$0xff] %v2416_v20 }
 0x167   : > { %2419 = vst [vmem:[%s14936_s26 + $0xaa8] sm:$0xff] %v2418_v21  ;;  %v2420_v22 = vld [vmem:[%s14928_s25 + $0x2ac0] sm:$0xff] }
 0x168   : > { %v2422_v23 = vld [vmem:[%s14928_s25 + $0x2ae0] sm:$0xff]  ;;  %2421 = vst [vmem:[%s14936_s26 + $0xab0] sm:$0xff] %v2420_v22 }
 0x169   : > { %v2424_v24 = vld [vmem:[%s14928_s25 + $0x2b00] sm:$0xff]  ;;  %2423 = vst [vmem:[%s14936_s26 + $0xab8] sm:$0xff] %v2422_v23 }
 0x16a   : > { %2425 = vst [vmem:[%s14936_s26 + $0xac0] sm:$0xff] %v2424_v24  ;;  %v2426_v25 = vld [vmem:[%s14928_s25 + $0x2b20] sm:$0xff] }
 0x16b   : > { %v2428_v26 = vld [vmem:[%s14928_s25 + $0x2b40] sm:$0xff]  ;;  %2427 = vst [vmem:[%s14936_s26 + $0xac8] sm:$0xff] %v2426_v25 }
 0x16c   : > { %v2430_v27 = vld [vmem:[%s14928_s25 + $0x2b60] sm:$0xff]  ;;  %2429 = vst [vmem:[%s14936_s26 + $0xad0] sm:$0xff] %v2428_v26 }
 0x16d   : > { %2431 = vst [vmem:[%s14936_s26 + $0xad8] sm:$0xff] %v2430_v27  ;;  %v2432_v28 = vld [vmem:[%s14928_s25 + $0x2b80] sm:$0xff] }
 0x16e   : > { %v2434_v29 = vld [vmem:[%s14928_s25 + $0x2ba0] sm:$0xff]  ;;  %2433 = vst [vmem:[%s14936_s26 + $0xae0] sm:$0xff] %v2432_v28 }
 0x16f   : > { %v2436_v30 = vld [vmem:[%s14928_s25 + $0x2bc0] sm:$0xff]  ;;  %2435 = vst [vmem:[%s14936_s26 + $0xae8] sm:$0xff] %v2434_v29 }
 0x170   : > { %2437 = vst [vmem:[%s14936_s26 + $0xaf0] sm:$0xff] %v2436_v30  ;;  %v2438_v31 = vld [vmem:[%s14928_s25 + $0x2be0] sm:$0xff] }
 0x171   : > { %v2440_v32 = vld [vmem:[%s14928_s25 + $0x2c00] sm:$0xff]  ;;  %2439 = vst [vmem:[%s14936_s26 + $0xaf8] sm:$0xff] %v2438_v31 }
 0x172   : > { %v2442_v33 = vld [vmem:[%s14928_s25 + $0x2c20] sm:$0xff]  ;;  %2441 = vst [vmem:[%s14936_s26 + $0xb00] sm:$0xff] %v2440_v32 }
 0x173   : > { %2443 = vst [vmem:[%s14936_s26 + $0xb08] sm:$0xff] %v2442_v33  ;;  %v2444_v34 = vld [vmem:[%s14928_s25 + $0x2c40] sm:$0xff] }
 0x174   : > { %v2446_v35 = vld [vmem:[%s14928_s25 + $0x2c60] sm:$0xff]  ;;  %2445 = vst [vmem:[%s14936_s26 + $0xb10] sm:$0xff] %v2444_v34 }
 0x175   : > { %v2448_v36 = vld [vmem:[%s14928_s25 + $0x2c80] sm:$0xff]  ;;  %2447 = vst [vmem:[%s14936_s26 + $0xb18] sm:$0xff] %v2446_v35 }
 0x176   : > { %2449 = vst [vmem:[%s14936_s26 + $0xb20] sm:$0xff] %v2448_v36  ;;  %v2450_v37 = vld [vmem:[%s14928_s25 + $0x2ca0] sm:$0xff] }
 0x177   : > { %v2452_v38 = vld [vmem:[%s14928_s25 + $0x2cc0] sm:$0xff]  ;;  %2451 = vst [vmem:[%s14936_s26 + $0xb28] sm:$0xff] %v2450_v37 }
 0x178   : > { %v2454_v39 = vld [vmem:[%s14928_s25 + $0x2ce0] sm:$0xff]  ;;  %2453 = vst [vmem:[%s14936_s26 + $0xb30] sm:$0xff] %v2452_v38 }
 0x179   : > { %2455 = vst [vmem:[%s14936_s26 + $0xb38] sm:$0xff] %v2454_v39  ;;  %v2456_v40 = vld [vmem:[%s14928_s25 + $0x2d00] sm:$0xff] }
 0x17a   : > { %v2458_v41 = vld [vmem:[%s14928_s25 + $0x2d20] sm:$0xff]  ;;  %2457 = vst [vmem:[%s14936_s26 + $0xb40] sm:$0xff] %v2456_v40 }
 0x17b   : > { %v2460_v42 = vld [vmem:[%s14928_s25 + $0x2d40] sm:$0xff]  ;;  %2459 = vst [vmem:[%s14936_s26 + $0xb48] sm:$0xff] %v2458_v41 }
 0x17c   : > { %2461 = vst [vmem:[%s14936_s26 + $0xb50] sm:$0xff] %v2460_v42  ;;  %v2462_v43 = vld [vmem:[%s14928_s25 + $0x2d60] sm:$0xff] }
 0x17d   : > { %v2464_v44 = vld [vmem:[%s14928_s25 + $0x2d80] sm:$0xff]  ;;  %2463 = vst [vmem:[%s14936_s26 + $0xb58] sm:$0xff] %v2462_v43 }
 0x17e   : > { %v2466_v45 = vld [vmem:[%s14928_s25 + $0x2da0] sm:$0xff]  ;;  %2465 = vst [vmem:[%s14936_s26 + $0xb60] sm:$0xff] %v2464_v44 }
 0x17f   : > { %2467 = vst [vmem:[%s14936_s26 + $0xb68] sm:$0xff] %v2466_v45  ;;  %v2468_v46 = vld [vmem:[%s14928_s25 + $0x2dc0] sm:$0xff] }
 0x180   : > { %v2470_v47 = vld [vmem:[%s14928_s25 + $0x2de0] sm:$0xff]  ;;  %2469 = vst [vmem:[%s14936_s26 + $0xb70] sm:$0xff] %v2468_v46 }
 0x181   : > { %v2472_v48 = vld [vmem:[%s14928_s25 + $0x2e00] sm:$0xff]  ;;  %2471 = vst [vmem:[%s14936_s26 + $0xb78] sm:$0xff] %v2470_v47 }
 0x182   : > { %2473 = vst [vmem:[%s14936_s26 + $0xb80] sm:$0xff] %v2472_v48  ;;  %v2474_v49 = vld [vmem:[%s14928_s25 + $0x2e20] sm:$0xff] }
 0x183   : > { %v2476_v50 = vld [vmem:[%s14928_s25 + $0x2e40] sm:$0xff]  ;;  %2475 = vst [vmem:[%s14936_s26 + $0xb88] sm:$0xff] %v2474_v49 }
 0x184   : > { %v2478_v51 = vld [vmem:[%s14928_s25 + $0x2e60] sm:$0xff]  ;;  %2477 = vst [vmem:[%s14936_s26 + $0xb90] sm:$0xff] %v2476_v50 }
 0x185   : > { %2479 = vst [vmem:[%s14936_s26 + $0xb98] sm:$0xff] %v2478_v51  ;;  %v2480_v52 = vld [vmem:[%s14928_s25 + $0x2e80] sm:$0xff] }
 0x186   : > { %v2482_v53 = vld [vmem:[%s14928_s25 + $0x2ea0] sm:$0xff]  ;;  %2481 = vst [vmem:[%s14936_s26 + $0xba0] sm:$0xff] %v2480_v52 }
 0x187   : > { %v2484_v54 = vld [vmem:[%s14928_s25 + $0x2ec0] sm:$0xff]  ;;  %2483 = vst [vmem:[%s14936_s26 + $0xba8] sm:$0xff] %v2482_v53 }
 0x188   : > { %2485 = vst [vmem:[%s14936_s26 + $0xbb0] sm:$0xff] %v2484_v54  ;;  %v2486_v55 = vld [vmem:[%s14928_s25 + $0x2ee0] sm:$0xff] }
 0x189   : > { %v2488_v56 = vld [vmem:[%s14928_s25 + $0x2f00] sm:$0xff]  ;;  %2487 = vst [vmem:[%s14936_s26 + $0xbb8] sm:$0xff] %v2486_v55 }
 0x18a   : > { %v2490_v57 = vld [vmem:[%s14928_s25 + $0x2f20] sm:$0xff]  ;;  %2489 = vst [vmem:[%s14936_s26 + $0xbc0] sm:$0xff] %v2488_v56 }
 0x18b   : > { %2491 = vst [vmem:[%s14936_s26 + $0xbc8] sm:$0xff] %v2490_v57  ;;  %v2492_v58 = vld [vmem:[%s14928_s25 + $0x2f40] sm:$0xff] }
 0x18c   : > { %v2494_v59 = vld [vmem:[%s14928_s25 + $0x2f60] sm:$0xff]  ;;  %2493 = vst [vmem:[%s14936_s26 + $0xbd0] sm:$0xff] %v2492_v58 }
 0x18d   : > { %v2496_v60 = vld [vmem:[%s14928_s25 + $0x2f80] sm:$0xff]  ;;  %2495 = vst [vmem:[%s14936_s26 + $0xbd8] sm:$0xff] %v2494_v59 }
 0x18e   : > { %2497 = vst [vmem:[%s14936_s26 + $0xbe0] sm:$0xff] %v2496_v60  ;;  %v2498_v61 = vld [vmem:[%s14928_s25 + $0x2fa0] sm:$0xff] }
 0x18f   : > { %v2500_v62 = vld [vmem:[%s14928_s25 + $0x2fc0] sm:$0xff]  ;;  %2499 = vst [vmem:[%s14936_s26 + $0xbe8] sm:$0xff] %v2498_v61 }
 0x190   : > { %v2502_v63 = vld [vmem:[%s14928_s25 + $0x2fe0] sm:$0xff]  ;;  %2501 = vst [vmem:[%s14936_s26 + $0xbf0] sm:$0xff] %v2500_v62 }
 0x191   : > { %2503 = vst [vmem:[%s14936_s26 + $0xbf8] sm:$0xff] %v2502_v63  ;;  %v2504_v0 = vld [vmem:[%s14928_s25 + $0x3000] sm:$0xff] }
 0x192   : > { %v2506_v1 = vld [vmem:[%s14928_s25 + $0x3020] sm:$0xff]  ;;  %2505 = vst [vmem:[%s14936_s26 + $0xc00] sm:$0xff] %v2504_v0 }
 0x193   : > { %v2508_v2 = vld [vmem:[%s14928_s25 + $0x3040] sm:$0xff]  ;;  %2507 = vst [vmem:[%s14936_s26 + $0xc08] sm:$0xff] %v2506_v1 }
 0x194   : > { %2509 = vst [vmem:[%s14936_s26 + $0xc10] sm:$0xff] %v2508_v2  ;;  %v2510_v3 = vld [vmem:[%s14928_s25 + $0x3060] sm:$0xff] }
 0x195   : > { %v2512_v4 = vld [vmem:[%s14928_s25 + $0x3080] sm:$0xff]  ;;  %2511 = vst [vmem:[%s14936_s26 + $0xc18] sm:$0xff] %v2510_v3 }
 0x196   : > { %v2514_v5 = vld [vmem:[%s14928_s25 + $0x30a0] sm:$0xff]  ;;  %2513 = vst [vmem:[%s14936_s26 + $0xc20] sm:$0xff] %v2512_v4 }
 0x197   : > { %2515 = vst [vmem:[%s14936_s26 + $0xc28] sm:$0xff] %v2514_v5  ;;  %v2516_v6 = vld [vmem:[%s14928_s25 + $0x30c0] sm:$0xff] }
 0x198   : > { %v2518_v7 = vld [vmem:[%s14928_s25 + $0x30e0] sm:$0xff]  ;;  %2517 = vst [vmem:[%s14936_s26 + $0xc30] sm:$0xff] %v2516_v6 }
 0x199   : > { %v2520_v8 = vld [vmem:[%s14928_s25 + $0x3100] sm:$0xff]  ;;  %2519 = vst [vmem:[%s14936_s26 + $0xc38] sm:$0xff] %v2518_v7 }
 0x19a   : > { %2521 = vst [vmem:[%s14936_s26 + $0xc40] sm:$0xff] %v2520_v8  ;;  %v2522_v9 = vld [vmem:[%s14928_s25 + $0x3120] sm:$0xff] }
 0x19b   : > { %v2524_v10 = vld [vmem:[%s14928_s25 + $0x3140] sm:$0xff]  ;;  %2523 = vst [vmem:[%s14936_s26 + $0xc48] sm:$0xff] %v2522_v9 }
 0x19c   : > { %v2526_v11 = vld [vmem:[%s14928_s25 + $0x3160] sm:$0xff]  ;;  %2525 = vst [vmem:[%s14936_s26 + $0xc50] sm:$0xff] %v2524_v10 }
 0x19d   : > { %2527 = vst [vmem:[%s14936_s26 + $0xc58] sm:$0xff] %v2526_v11  ;;  %v2528_v12 = vld [vmem:[%s14928_s25 + $0x3180] sm:$0xff] }
 0x19e   : > { %v2530_v13 = vld [vmem:[%s14928_s25 + $0x31a0] sm:$0xff]  ;;  %2529 = vst [vmem:[%s14936_s26 + $0xc60] sm:$0xff] %v2528_v12 }
 0x19f   : > { %v2532_v14 = vld [vmem:[%s14928_s25 + $0x31c0] sm:$0xff]  ;;  %2531 = vst [vmem:[%s14936_s26 + $0xc68] sm:$0xff] %v2530_v13 }
 0x1a0   : > { %2533 = vst [vmem:[%s14936_s26 + $0xc70] sm:$0xff] %v2532_v14  ;;  %v2534_v15 = vld [vmem:[%s14928_s25 + $0x31e0] sm:$0xff] }
 0x1a1   : > { %v2536_v16 = vld [vmem:[%s14928_s25 + $0x3200] sm:$0xff]  ;;  %2535 = vst [vmem:[%s14936_s26 + $0xc78] sm:$0xff] %v2534_v15 }
 0x1a2   : > { %v2538_v17 = vld [vmem:[%s14928_s25 + $0x3220] sm:$0xff]  ;;  %2537 = vst [vmem:[%s14936_s26 + $0xc80] sm:$0xff] %v2536_v16 }
 0x1a3   : > { %2539 = vst [vmem:[%s14936_s26 + $0xc88] sm:$0xff] %v2538_v17  ;;  %v2540_v18 = vld [vmem:[%s14928_s25 + $0x3240] sm:$0xff] }
 0x1a4   : > { %v2542_v19 = vld [vmem:[%s14928_s25 + $0x3260] sm:$0xff]  ;;  %2541 = vst [vmem:[%s14936_s26 + $0xc90] sm:$0xff] %v2540_v18 }
 0x1a5   : > { %v2544_v20 = vld [vmem:[%s14928_s25 + $0x3280] sm:$0xff]  ;;  %2543 = vst [vmem:[%s14936_s26 + $0xc98] sm:$0xff] %v2542_v19 }
 0x1a6   : > { %2545 = vst [vmem:[%s14936_s26 + $0xca0] sm:$0xff] %v2544_v20  ;;  %v2546_v21 = vld [vmem:[%s14928_s25 + $0x32a0] sm:$0xff] }
 0x1a7   : > { %v2548_v22 = vld [vmem:[%s14928_s25 + $0x32c0] sm:$0xff]  ;;  %2547 = vst [vmem:[%s14936_s26 + $0xca8] sm:$0xff] %v2546_v21 }
 0x1a8   : > { %v2550_v23 = vld [vmem:[%s14928_s25 + $0x32e0] sm:$0xff]  ;;  %2549 = vst [vmem:[%s14936_s26 + $0xcb0] sm:$0xff] %v2548_v22 }
 0x1a9   : > { %2551 = vst [vmem:[%s14936_s26 + $0xcb8] sm:$0xff] %v2550_v23  ;;  %v2552_v24 = vld [vmem:[%s14928_s25 + $0x3300] sm:$0xff] }
 0x1aa   : > { %v2554_v25 = vld [vmem:[%s14928_s25 + $0x3320] sm:$0xff]  ;;  %2553 = vst [vmem:[%s14936_s26 + $0xcc0] sm:$0xff] %v2552_v24 }
 0x1ab   : > { %v2556_v26 = vld [vmem:[%s14928_s25 + $0x3340] sm:$0xff]  ;;  %2555 = vst [vmem:[%s14936_s26 + $0xcc8] sm:$0xff] %v2554_v25 }
 0x1ac   : > { %2557 = vst [vmem:[%s14936_s26 + $0xcd0] sm:$0xff] %v2556_v26  ;;  %v2558_v27 = vld [vmem:[%s14928_s25 + $0x3360] sm:$0xff] }
 0x1ad   : > { %v2560_v28 = vld [vmem:[%s14928_s25 + $0x3380] sm:$0xff]  ;;  %2559 = vst [vmem:[%s14936_s26 + $0xcd8] sm:$0xff] %v2558_v27 }
 0x1ae   : > { %v2562_v29 = vld [vmem:[%s14928_s25 + $0x33a0] sm:$0xff]  ;;  %2561 = vst [vmem:[%s14936_s26 + $0xce0] sm:$0xff] %v2560_v28 }
 0x1af   : > { %2563 = vst [vmem:[%s14936_s26 + $0xce8] sm:$0xff] %v2562_v29  ;;  %v2564_v30 = vld [vmem:[%s14928_s25 + $0x33c0] sm:$0xff] }
 0x1b0   : > { %v2566_v31 = vld [vmem:[%s14928_s25 + $0x33e0] sm:$0xff]  ;;  %2565 = vst [vmem:[%s14936_s26 + $0xcf0] sm:$0xff] %v2564_v30 }
 0x1b1   : > { %v2568_v32 = vld [vmem:[%s14928_s25 + $0x3400] sm:$0xff]  ;;  %2567 = vst [vmem:[%s14936_s26 + $0xcf8] sm:$0xff] %v2566_v31 }
 0x1b2   : > { %2569 = vst [vmem:[%s14936_s26 + $0xd00] sm:$0xff] %v2568_v32  ;;  %v2570_v33 = vld [vmem:[%s14928_s25 + $0x3420] sm:$0xff] }
 0x1b3   : > { %v2572_v34 = vld [vmem:[%s14928_s25 + $0x3440] sm:$0xff]  ;;  %2571 = vst [vmem:[%s14936_s26 + $0xd08] sm:$0xff] %v2570_v33 }
 0x1b4   : > { %v2574_v35 = vld [vmem:[%s14928_s25 + $0x3460] sm:$0xff]  ;;  %2573 = vst [vmem:[%s14936_s26 + $0xd10] sm:$0xff] %v2572_v34 }
 0x1b5   : > { %2575 = vst [vmem:[%s14936_s26 + $0xd18] sm:$0xff] %v2574_v35  ;;  %v2576_v36 = vld [vmem:[%s14928_s25 + $0x3480] sm:$0xff] }
 0x1b6   : > { %v2578_v37 = vld [vmem:[%s14928_s25 + $0x34a0] sm:$0xff]  ;;  %2577 = vst [vmem:[%s14936_s26 + $0xd20] sm:$0xff] %v2576_v36 }
 0x1b7   : > { %v2580_v38 = vld [vmem:[%s14928_s25 + $0x34c0] sm:$0xff]  ;;  %2579 = vst [vmem:[%s14936_s26 + $0xd28] sm:$0xff] %v2578_v37 }
 0x1b8   : > { %2581 = vst [vmem:[%s14936_s26 + $0xd30] sm:$0xff] %v2580_v38  ;;  %v2582_v39 = vld [vmem:[%s14928_s25 + $0x34e0] sm:$0xff] }
 0x1b9   : > { %v2584_v40 = vld [vmem:[%s14928_s25 + $0x3500] sm:$0xff]  ;;  %2583 = vst [vmem:[%s14936_s26 + $0xd38] sm:$0xff] %v2582_v39 }
 0x1ba   : > { %v2586_v41 = vld [vmem:[%s14928_s25 + $0x3520] sm:$0xff]  ;;  %2585 = vst [vmem:[%s14936_s26 + $0xd40] sm:$0xff] %v2584_v40 }
 0x1bb   : > { %2587 = vst [vmem:[%s14936_s26 + $0xd48] sm:$0xff] %v2586_v41  ;;  %v2588_v42 = vld [vmem:[%s14928_s25 + $0x3540] sm:$0xff] }
 0x1bc   : > { %v2590_v43 = vld [vmem:[%s14928_s25 + $0x3560] sm:$0xff]  ;;  %2589 = vst [vmem:[%s14936_s26 + $0xd50] sm:$0xff] %v2588_v42 }
 0x1bd   : > { %v2592_v44 = vld [vmem:[%s14928_s25 + $0x3580] sm:$0xff]  ;;  %2591 = vst [vmem:[%s14936_s26 + $0xd58] sm:$0xff] %v2590_v43 }
 0x1be   : > { %2593 = vst [vmem:[%s14936_s26 + $0xd60] sm:$0xff] %v2592_v44  ;;  %v2594_v45 = vld [vmem:[%s14928_s25 + $0x35a0] sm:$0xff] }
 0x1bf   : > { %v2596_v46 = vld [vmem:[%s14928_s25 + $0x35c0] sm:$0xff]  ;;  %2595 = vst [vmem:[%s14936_s26 + $0xd68] sm:$0xff] %v2594_v45 }
 0x1c0   : > { %v2598_v47 = vld [vmem:[%s14928_s25 + $0x35e0] sm:$0xff]  ;;  %2597 = vst [vmem:[%s14936_s26 + $0xd70] sm:$0xff] %v2596_v46 }
 0x1c1   : > { %2599 = vst [vmem:[%s14936_s26 + $0xd78] sm:$0xff] %v2598_v47  ;;  %v2600_v48 = vld [vmem:[%s14928_s25 + $0x3600] sm:$0xff] }
 0x1c2   : > { %v2602_v49 = vld [vmem:[%s14928_s25 + $0x3620] sm:$0xff]  ;;  %2601 = vst [vmem:[%s14936_s26 + $0xd80] sm:$0xff] %v2600_v48 }
 0x1c3   : > { %v2604_v50 = vld [vmem:[%s14928_s25 + $0x3640] sm:$0xff]  ;;  %2603 = vst [vmem:[%s14936_s26 + $0xd88] sm:$0xff] %v2602_v49 }
 0x1c4   : > { %2605 = vst [vmem:[%s14936_s26 + $0xd90] sm:$0xff] %v2604_v50  ;;  %v2606_v51 = vld [vmem:[%s14928_s25 + $0x3660] sm:$0xff] }
 0x1c5   : > { %v2608_v52 = vld [vmem:[%s14928_s25 + $0x3680] sm:$0xff]  ;;  %2607 = vst [vmem:[%s14936_s26 + $0xd98] sm:$0xff] %v2606_v51 }
 0x1c6   : > { %v2610_v53 = vld [vmem:[%s14928_s25 + $0x36a0] sm:$0xff]  ;;  %2609 = vst [vmem:[%s14936_s26 + $0xda0] sm:$0xff] %v2608_v52 }
 0x1c7   : > { %2611 = vst [vmem:[%s14936_s26 + $0xda8] sm:$0xff] %v2610_v53  ;;  %v2612_v54 = vld [vmem:[%s14928_s25 + $0x36c0] sm:$0xff] }
 0x1c8   : > { %v2614_v55 = vld [vmem:[%s14928_s25 + $0x36e0] sm:$0xff]  ;;  %2613 = vst [vmem:[%s14936_s26 + $0xdb0] sm:$0xff] %v2612_v54 }
 0x1c9   : > { %v2616_v56 = vld [vmem:[%s14928_s25 + $0x3700] sm:$0xff]  ;;  %2615 = vst [vmem:[%s14936_s26 + $0xdb8] sm:$0xff] %v2614_v55 }
 0x1ca   : > { %2617 = vst [vmem:[%s14936_s26 + $0xdc0] sm:$0xff] %v2616_v56  ;;  %v2618_v57 = vld [vmem:[%s14928_s25 + $0x3720] sm:$0xff] }
 0x1cb   : > { %v2620_v58 = vld [vmem:[%s14928_s25 + $0x3740] sm:$0xff]  ;;  %2619 = vst [vmem:[%s14936_s26 + $0xdc8] sm:$0xff] %v2618_v57 }
 0x1cc   : > { %v2622_v59 = vld [vmem:[%s14928_s25 + $0x3760] sm:$0xff]  ;;  %2621 = vst [vmem:[%s14936_s26 + $0xdd0] sm:$0xff] %v2620_v58 }
 0x1cd   : > { %2623 = vst [vmem:[%s14936_s26 + $0xdd8] sm:$0xff] %v2622_v59  ;;  %v2624_v60 = vld [vmem:[%s14928_s25 + $0x3780] sm:$0xff] }
 0x1ce   : > { %v2626_v61 = vld [vmem:[%s14928_s25 + $0x37a0] sm:$0xff]  ;;  %2625 = vst [vmem:[%s14936_s26 + $0xde0] sm:$0xff] %v2624_v60 }
 0x1cf   : > { %v2628_v62 = vld [vmem:[%s14928_s25 + $0x37c0] sm:$0xff]  ;;  %2627 = vst [vmem:[%s14936_s26 + $0xde8] sm:$0xff] %v2626_v61 }
 0x1d0   : > { %2629 = vst [vmem:[%s14936_s26 + $0xdf0] sm:$0xff] %v2628_v62  ;;  %v2630_v63 = vld [vmem:[%s14928_s25 + $0x37e0] sm:$0xff] }
 0x1d1   : > { %v2632_v0 = vld [vmem:[%s14928_s25 + $0x3800] sm:$0xff]  ;;  %2631 = vst [vmem:[%s14936_s26 + $0xdf8] sm:$0xff] %v2630_v63 }
 0x1d2   : > { %v2634_v1 = vld [vmem:[%s14928_s25 + $0x3820] sm:$0xff]  ;;  %2633 = vst [vmem:[%s14936_s26 + $0xe00] sm:$0xff] %v2632_v0 }
 0x1d3   : > { %2635 = vst [vmem:[%s14936_s26 + $0xe08] sm:$0xff] %v2634_v1  ;;  %v2636_v2 = vld [vmem:[%s14928_s25 + $0x3840] sm:$0xff] }
 0x1d4   : > { %v2638_v3 = vld [vmem:[%s14928_s25 + $0x3860] sm:$0xff]  ;;  %2637 = vst [vmem:[%s14936_s26 + $0xe10] sm:$0xff] %v2636_v2 }
 0x1d5   : > { %v2640_v4 = vld [vmem:[%s14928_s25 + $0x3880] sm:$0xff]  ;;  %2639 = vst [vmem:[%s14936_s26 + $0xe18] sm:$0xff] %v2638_v3 }
 0x1d6   : > { %2641 = vst [vmem:[%s14936_s26 + $0xe20] sm:$0xff] %v2640_v4  ;;  %v2642_v5 = vld [vmem:[%s14928_s25 + $0x38a0] sm:$0xff] }
 0x1d7   : > { %v2644_v6 = vld [vmem:[%s14928_s25 + $0x38c0] sm:$0xff]  ;;  %2643 = vst [vmem:[%s14936_s26 + $0xe28] sm:$0xff] %v2642_v5 }
 0x1d8   : > { %v2646_v7 = vld [vmem:[%s14928_s25 + $0x38e0] sm:$0xff]  ;;  %2645 = vst [vmem:[%s14936_s26 + $0xe30] sm:$0xff] %v2644_v6 }
 0x1d9   : > { %2647 = vst [vmem:[%s14936_s26 + $0xe38] sm:$0xff] %v2646_v7  ;;  %v2648_v8 = vld [vmem:[%s14928_s25 + $0x3900] sm:$0xff] }
 0x1da   : > { %v2650_v9 = vld [vmem:[%s14928_s25 + $0x3920] sm:$0xff]  ;;  %2649 = vst [vmem:[%s14936_s26 + $0xe40] sm:$0xff] %v2648_v8 }
 0x1db   : > { %v2652_v10 = vld [vmem:[%s14928_s25 + $0x3940] sm:$0xff]  ;;  %2651 = vst [vmem:[%s14936_s26 + $0xe48] sm:$0xff] %v2650_v9 }
 0x1dc   : > { %2653 = vst [vmem:[%s14936_s26 + $0xe50] sm:$0xff] %v2652_v10  ;;  %v2654_v11 = vld [vmem:[%s14928_s25 + $0x3960] sm:$0xff] }
 0x1dd   : > { %v2656_v12 = vld [vmem:[%s14928_s25 + $0x3980] sm:$0xff]  ;;  %2655 = vst [vmem:[%s14936_s26 + $0xe58] sm:$0xff] %v2654_v11 }
 0x1de   : > { %v2658_v13 = vld [vmem:[%s14928_s25 + $0x39a0] sm:$0xff]  ;;  %2657 = vst [vmem:[%s14936_s26 + $0xe60] sm:$0xff] %v2656_v12 }
 0x1df   : > { %2659 = vst [vmem:[%s14936_s26 + $0xe68] sm:$0xff] %v2658_v13  ;;  %v2660_v14 = vld [vmem:[%s14928_s25 + $0x39c0] sm:$0xff] }
 0x1e0   : > { %v2662_v15 = vld [vmem:[%s14928_s25 + $0x39e0] sm:$0xff]  ;;  %2661 = vst [vmem:[%s14936_s26 + $0xe70] sm:$0xff] %v2660_v14 }
 0x1e1   : > { %v2664_v16 = vld [vmem:[%s14928_s25 + $0x3a00] sm:$0xff]  ;;  %2663 = vst [vmem:[%s14936_s26 + $0xe78] sm:$0xff] %v2662_v15 }
 0x1e2   : > { %2665 = vst [vmem:[%s14936_s26 + $0xe80] sm:$0xff] %v2664_v16  ;;  %v2666_v17 = vld [vmem:[%s14928_s25 + $0x3a20] sm:$0xff] }
 0x1e3   : > { %v2668_v18 = vld [vmem:[%s14928_s25 + $0x3a40] sm:$0xff]  ;;  %2667 = vst [vmem:[%s14936_s26 + $0xe88] sm:$0xff] %v2666_v17 }
 0x1e4   : > { %v2670_v19 = vld [vmem:[%s14928_s25 + $0x3a60] sm:$0xff]  ;;  %2669 = vst [vmem:[%s14936_s26 + $0xe90] sm:$0xff] %v2668_v18 }
 0x1e5   : > { %2671 = vst [vmem:[%s14936_s26 + $0xe98] sm:$0xff] %v2670_v19  ;;  %v2672_v20 = vld [vmem:[%s14928_s25 + $0x3a80] sm:$0xff] }
 0x1e6   : > { %v2674_v21 = vld [vmem:[%s14928_s25 + $0x3aa0] sm:$0xff]  ;;  %2673 = vst [vmem:[%s14936_s26 + $0xea0] sm:$0xff] %v2672_v20 }
 0x1e7   : > { %v2676_v22 = vld [vmem:[%s14928_s25 + $0x3ac0] sm:$0xff]  ;;  %2675 = vst [vmem:[%s14936_s26 + $0xea8] sm:$0xff] %v2674_v21 }
 0x1e8   : > { %2677 = vst [vmem:[%s14936_s26 + $0xeb0] sm:$0xff] %v2676_v22  ;;  %v2678_v23 = vld [vmem:[%s14928_s25 + $0x3ae0] sm:$0xff] }
 0x1e9   : > { %v2680_v24 = vld [vmem:[%s14928_s25 + $0x3b00] sm:$0xff]  ;;  %2679 = vst [vmem:[%s14936_s26 + $0xeb8] sm:$0xff] %v2678_v23 }
 0x1ea   : > { %v2682_v25 = vld [vmem:[%s14928_s25 + $0x3b20] sm:$0xff]  ;;  %2681 = vst [vmem:[%s14936_s26 + $0xec0] sm:$0xff] %v2680_v24 }
 0x1eb   : > { %2683 = vst [vmem:[%s14936_s26 + $0xec8] sm:$0xff] %v2682_v25  ;;  %v2684_v26 = vld [vmem:[%s14928_s25 + $0x3b40] sm:$0xff] }
 0x1ec   : > { %v2686_v27 = vld [vmem:[%s14928_s25 + $0x3b60] sm:$0xff]  ;;  %2685 = vst [vmem:[%s14936_s26 + $0xed0] sm:$0xff] %v2684_v26 }
 0x1ed   : > { %v2688_v28 = vld [vmem:[%s14928_s25 + $0x3b80] sm:$0xff]  ;;  %2687 = vst [vmem:[%s14936_s26 + $0xed8] sm:$0xff] %v2686_v27 }
 0x1ee   : > { %2689 = vst [vmem:[%s14936_s26 + $0xee0] sm:$0xff] %v2688_v28  ;;  %v2690_v29 = vld [vmem:[%s14928_s25 + $0x3ba0] sm:$0xff] }
 0x1ef   : > { %v2692_v30 = vld [vmem:[%s14928_s25 + $0x3bc0] sm:$0xff]  ;;  %2691 = vst [vmem:[%s14936_s26 + $0xee8] sm:$0xff] %v2690_v29 }
 0x1f0   : > { %v2694_v31 = vld [vmem:[%s14928_s25 + $0x3be0] sm:$0xff]  ;;  %2693 = vst [vmem:[%s14936_s26 + $0xef0] sm:$0xff] %v2692_v30 }
 0x1f1   : > { %2695 = vst [vmem:[%s14936_s26 + $0xef8] sm:$0xff] %v2694_v31  ;;  %v2696_v32 = vld [vmem:[%s14928_s25 + $0x3c00] sm:$0xff] }
 0x1f2   : > { %v2698_v33 = vld [vmem:[%s14928_s25 + $0x3c20] sm:$0xff]  ;;  %2697 = vst [vmem:[%s14936_s26 + $0xf00] sm:$0xff] %v2696_v32 }
 0x1f3   : > { %v2700_v34 = vld [vmem:[%s14928_s25 + $0x3c40] sm:$0xff]  ;;  %2699 = vst [vmem:[%s14936_s26 + $0xf08] sm:$0xff] %v2698_v33 }
 0x1f4   : > { %2701 = vst [vmem:[%s14936_s26 + $0xf10] sm:$0xff] %v2700_v34  ;;  %v2702_v35 = vld [vmem:[%s14928_s25 + $0x3c60] sm:$0xff] }
 0x1f5   : > { %v2704_v36 = vld [vmem:[%s14928_s25 + $0x3c80] sm:$0xff]  ;;  %2703 = vst [vmem:[%s14936_s26 + $0xf18] sm:$0xff] %v2702_v35 }
 0x1f6   : > { %v2706_v37 = vld [vmem:[%s14928_s25 + $0x3ca0] sm:$0xff]  ;;  %2705 = vst [vmem:[%s14936_s26 + $0xf20] sm:$0xff] %v2704_v36 }
 0x1f7   : > { %2707 = vst [vmem:[%s14936_s26 + $0xf28] sm:$0xff] %v2706_v37  ;;  %v2708_v38 = vld [vmem:[%s14928_s25 + $0x3cc0] sm:$0xff] }
 0x1f8   : > { %v2710_v39 = vld [vmem:[%s14928_s25 + $0x3ce0] sm:$0xff]  ;;  %2709 = vst [vmem:[%s14936_s26 + $0xf30] sm:$0xff] %v2708_v38 }
 0x1f9   : > { %v2712_v40 = vld [vmem:[%s14928_s25 + $0x3d00] sm:$0xff]  ;;  %2711 = vst [vmem:[%s14936_s26 + $0xf38] sm:$0xff] %v2710_v39 }
 0x1fa   : > { %2713 = vst [vmem:[%s14936_s26 + $0xf40] sm:$0xff] %v2712_v40  ;;  %v2714_v41 = vld [vmem:[%s14928_s25 + $0x3d20] sm:$0xff] }
 0x1fb   : > { %v2716_v42 = vld [vmem:[%s14928_s25 + $0x3d40] sm:$0xff]  ;;  %2715 = vst [vmem:[%s14936_s26 + $0xf48] sm:$0xff] %v2714_v41 }
 0x1fc   : > { %v2718_v43 = vld [vmem:[%s14928_s25 + $0x3d60] sm:$0xff]  ;;  %2717 = vst [vmem:[%s14936_s26 + $0xf50] sm:$0xff] %v2716_v42 }
 0x1fd   : > { %2719 = vst [vmem:[%s14936_s26 + $0xf58] sm:$0xff] %v2718_v43  ;;  %v2720_v44 = vld [vmem:[%s14928_s25 + $0x3d80] sm:$0xff] }
 0x1fe   : > { %v2722_v45 = vld [vmem:[%s14928_s25 + $0x3da0] sm:$0xff]  ;;  %2721 = vst [vmem:[%s14936_s26 + $0xf60] sm:$0xff] %v2720_v44 }
 0x1ff   : > { %v2724_v46 = vld [vmem:[%s14928_s25 + $0x3dc0] sm:$0xff]  ;;  %2723 = vst [vmem:[%s14936_s26 + $0xf68] sm:$0xff] %v2722_v45 }
 0x200   : > { %2725 = vst [vmem:[%s14936_s26 + $0xf70] sm:$0xff] %v2724_v46  ;;  %v2726_v47 = vld [vmem:[%s14928_s25 + $0x3de0] sm:$0xff] }
 0x201   : > { %v2728_v48 = vld [vmem:[%s14928_s25 + $0x3e00] sm:$0xff]  ;;  %2727 = vst [vmem:[%s14936_s26 + $0xf78] sm:$0xff] %v2726_v47 }
 0x202   : > { %v2730_v49 = vld [vmem:[%s14928_s25 + $0x3e20] sm:$0xff]  ;;  %2729 = vst [vmem:[%s14936_s26 + $0xf80] sm:$0xff] %v2728_v48 }
 0x203   : > { %2731 = vst [vmem:[%s14936_s26 + $0xf88] sm:$0xff] %v2730_v49  ;;  %v2732_v50 = vld [vmem:[%s14928_s25 + $0x3e40] sm:$0xff] }
 0x204   : > { %v2734_v51 = vld [vmem:[%s14928_s25 + $0x3e60] sm:$0xff]  ;;  %2733 = vst [vmem:[%s14936_s26 + $0xf90] sm:$0xff] %v2732_v50 }
 0x205   : > { %v2736_v52 = vld [vmem:[%s14928_s25 + $0x3e80] sm:$0xff]  ;;  %2735 = vst [vmem:[%s14936_s26 + $0xf98] sm:$0xff] %v2734_v51 }
 0x206   : > { %2737 = vst [vmem:[%s14936_s26 + $0xfa0] sm:$0xff] %v2736_v52  ;;  %v2738_v53 = vld [vmem:[%s14928_s25 + $0x3ea0] sm:$0xff] }
 0x207   : > { %v2740_v54 = vld [vmem:[%s14928_s25 + $0x3ec0] sm:$0xff]  ;;  %2739 = vst [vmem:[%s14936_s26 + $0xfa8] sm:$0xff] %v2738_v53 }
 0x208   : > { %v2742_v55 = vld [vmem:[%s14928_s25 + $0x3ee0] sm:$0xff]  ;;  %2741 = vst [vmem:[%s14936_s26 + $0xfb0] sm:$0xff] %v2740_v54 }
 0x209   : > { %2743 = vst [vmem:[%s14936_s26 + $0xfb8] sm:$0xff] %v2742_v55  ;;  %v2744_v56 = vld [vmem:[%s14928_s25 + $0x3f00] sm:$0xff] }
 0x20a   : > { %v2746_v57 = vld [vmem:[%s14928_s25 + $0x3f20] sm:$0xff]  ;;  %2745 = vst [vmem:[%s14936_s26 + $0xfc0] sm:$0xff] %v2744_v56 }
 0x20b   : > { %v2748_v58 = vld [vmem:[%s14928_s25 + $0x3f40] sm:$0xff]  ;;  %2747 = vst [vmem:[%s14936_s26 + $0xfc8] sm:$0xff] %v2746_v57 }
 0x20c   : > { %2749 = vst [vmem:[%s14936_s26 + $0xfd0] sm:$0xff] %v2748_v58  ;;  %v2750_v59 = vld [vmem:[%s14928_s25 + $0x3f60] sm:$0xff] }
 0x20d   : > { %v2752_v60 = vld [vmem:[%s14928_s25 + $0x3f80] sm:$0xff]  ;;  %2751 = vst [vmem:[%s14936_s26 + $0xfd8] sm:$0xff] %v2750_v59 }
 0x20e   : > { %v2754_v61 = vld [vmem:[%s14928_s25 + $0x3fa0] sm:$0xff]  ;;  %2753 = vst [vmem:[%s14936_s26 + $0xfe0] sm:$0xff] %v2752_v60 }
 0x20f   : > { %2755 = vst [vmem:[%s14936_s26 + $0xfe8] sm:$0xff] %v2754_v61  ;;  %v2756_v62 = vld [vmem:[%s14928_s25 + $0x3fc0] sm:$0xff] }
 0x210   : > { %v2758_v63 = vld [vmem:[%s14928_s25 + $0x3fe0] sm:$0xff]  ;;  %2757 = vst [vmem:[%s14936_s26 + $0xff0] sm:$0xff] %v2756_v62 }
 0x211   : > { %v2760_v0 = vld [vmem:[%s14928_s25 + $0x4000] sm:$0xff]  ;;  %2759 = vst [vmem:[%s14936_s26 + $0xff8] sm:$0xff] %v2758_v63 }
 0x212   : > { %2761 = vst [vmem:[%s14936_s26 + $0x1000] sm:$0xff] %v2760_v0  ;;  %v2762_v1 = vld [vmem:[%s14928_s25 + $0x4020] sm:$0xff] }
 0x213   : > { %v2764_v2 = vld [vmem:[%s14928_s25 + $0x4040] sm:$0xff]  ;;  %2763 = vst [vmem:[%s14936_s26 + $0x1008] sm:$0xff] %v2762_v1 }
 0x214   : > { %v2766_v3 = vld [vmem:[%s14928_s25 + $0x4060] sm:$0xff]  ;;  %2765 = vst [vmem:[%s14936_s26 + $0x1010] sm:$0xff] %v2764_v2 }
 0x215   : > { %2767 = vst [vmem:[%s14936_s26 + $0x1018] sm:$0xff] %v2766_v3  ;;  %v2768_v4 = vld [vmem:[%s14928_s25 + $0x4080] sm:$0xff] }
 0x216   : > { %v2770_v5 = vld [vmem:[%s14928_s25 + $0x40a0] sm:$0xff]  ;;  %2769 = vst [vmem:[%s14936_s26 + $0x1020] sm:$0xff] %v2768_v4 }
 0x217   : > { %v2772_v6 = vld [vmem:[%s14928_s25 + $0x40c0] sm:$0xff]  ;;  %2771 = vst [vmem:[%s14936_s26 + $0x1028] sm:$0xff] %v2770_v5 }
 0x218   : > { %2773 = vst [vmem:[%s14936_s26 + $0x1030] sm:$0xff] %v2772_v6  ;;  %v2774_v7 = vld [vmem:[%s14928_s25 + $0x40e0] sm:$0xff] }
 0x219   : > { %v2776_v8 = vld [vmem:[%s14928_s25 + $0x4100] sm:$0xff]  ;;  %2775 = vst [vmem:[%s14936_s26 + $0x1038] sm:$0xff] %v2774_v7 }
 0x21a   : > { %v2778_v9 = vld [vmem:[%s14928_s25 + $0x4120] sm:$0xff]  ;;  %2777 = vst [vmem:[%s14936_s26 + $0x1040] sm:$0xff] %v2776_v8 }
 0x21b   : > { %2779 = vst [vmem:[%s14936_s26 + $0x1048] sm:$0xff] %v2778_v9  ;;  %v2780_v10 = vld [vmem:[%s14928_s25 + $0x4140] sm:$0xff] }
 0x21c   : > { %v2782_v11 = vld [vmem:[%s14928_s25 + $0x4160] sm:$0xff]  ;;  %2781 = vst [vmem:[%s14936_s26 + $0x1050] sm:$0xff] %v2780_v10 }
 0x21d   : > { %v2784_v12 = vld [vmem:[%s14928_s25 + $0x4180] sm:$0xff]  ;;  %2783 = vst [vmem:[%s14936_s26 + $0x1058] sm:$0xff] %v2782_v11 }
 0x21e   : > { %2785 = vst [vmem:[%s14936_s26 + $0x1060] sm:$0xff] %v2784_v12  ;;  %v2786_v13 = vld [vmem:[%s14928_s25 + $0x41a0] sm:$0xff] }
 0x21f   : > { %v2788_v14 = vld [vmem:[%s14928_s25 + $0x41c0] sm:$0xff]  ;;  %2787 = vst [vmem:[%s14936_s26 + $0x1068] sm:$0xff] %v2786_v13 }
 0x220   : > { %v2790_v15 = vld [vmem:[%s14928_s25 + $0x41e0] sm:$0xff]  ;;  %2789 = vst [vmem:[%s14936_s26 + $0x1070] sm:$0xff] %v2788_v14 }
 0x221   : > { %2791 = vst [vmem:[%s14936_s26 + $0x1078] sm:$0xff] %v2790_v15  ;;  %v2792_v16 = vld [vmem:[%s14928_s25 + $0x4200] sm:$0xff] }
 0x222   : > { %v2794_v17 = vld [vmem:[%s14928_s25 + $0x4220] sm:$0xff]  ;;  %2793 = vst [vmem:[%s14936_s26 + $0x1080] sm:$0xff] %v2792_v16 }
 0x223   : > { %v2796_v18 = vld [vmem:[%s14928_s25 + $0x4240] sm:$0xff]  ;;  %2795 = vst [vmem:[%s14936_s26 + $0x1088] sm:$0xff] %v2794_v17 }
 0x224   : > { %2797 = vst [vmem:[%s14936_s26 + $0x1090] sm:$0xff] %v2796_v18  ;;  %v2798_v19 = vld [vmem:[%s14928_s25 + $0x4260] sm:$0xff] }
 0x225   : > { %v2800_v20 = vld [vmem:[%s14928_s25 + $0x4280] sm:$0xff]  ;;  %2799 = vst [vmem:[%s14936_s26 + $0x1098] sm:$0xff] %v2798_v19 }
 0x226   : > { %v2802_v21 = vld [vmem:[%s14928_s25 + $0x42a0] sm:$0xff]  ;;  %2801 = vst [vmem:[%s14936_s26 + $0x10a0] sm:$0xff] %v2800_v20 }
 0x227   : > { %2803 = vst [vmem:[%s14936_s26 + $0x10a8] sm:$0xff] %v2802_v21  ;;  %v2804_v22 = vld [vmem:[%s14928_s25 + $0x42c0] sm:$0xff] }
 0x228   : > { %v2806_v23 = vld [vmem:[%s14928_s25 + $0x42e0] sm:$0xff]  ;;  %2805 = vst [vmem:[%s14936_s26 + $0x10b0] sm:$0xff] %v2804_v22 }
 0x229   : > { %v2808_v24 = vld [vmem:[%s14928_s25 + $0x4300] sm:$0xff]  ;;  %2807 = vst [vmem:[%s14936_s26 + $0x10b8] sm:$0xff] %v2806_v23 }
 0x22a   : > { %2809 = vst [vmem:[%s14936_s26 + $0x10c0] sm:$0xff] %v2808_v24  ;;  %v2810_v25 = vld [vmem:[%s14928_s25 + $0x4320] sm:$0xff] }
 0x22b   : > { %v2812_v26 = vld [vmem:[%s14928_s25 + $0x4340] sm:$0xff]  ;;  %2811 = vst [vmem:[%s14936_s26 + $0x10c8] sm:$0xff] %v2810_v25 }
 0x22c   : > { %v2814_v27 = vld [vmem:[%s14928_s25 + $0x4360] sm:$0xff]  ;;  %2813 = vst [vmem:[%s14936_s26 + $0x10d0] sm:$0xff] %v2812_v26 }
 0x22d   : > { %2815 = vst [vmem:[%s14936_s26 + $0x10d8] sm:$0xff] %v2814_v27  ;;  %v2816_v28 = vld [vmem:[%s14928_s25 + $0x4380] sm:$0xff] }
 0x22e   : > { %v2818_v29 = vld [vmem:[%s14928_s25 + $0x43a0] sm:$0xff]  ;;  %2817 = vst [vmem:[%s14936_s26 + $0x10e0] sm:$0xff] %v2816_v28 }
 0x22f   : > { %v2820_v30 = vld [vmem:[%s14928_s25 + $0x43c0] sm:$0xff]  ;;  %2819 = vst [vmem:[%s14936_s26 + $0x10e8] sm:$0xff] %v2818_v29 }
 0x230   : > { %2821 = vst [vmem:[%s14936_s26 + $0x10f0] sm:$0xff] %v2820_v30  ;;  %v2822_v31 = vld [vmem:[%s14928_s25 + $0x43e0] sm:$0xff] }
 0x231   : > { %v2824_v32 = vld [vmem:[%s14928_s25 + $0x4400] sm:$0xff]  ;;  %2823 = vst [vmem:[%s14936_s26 + $0x10f8] sm:$0xff] %v2822_v31 }
 0x232   : > { %v2826_v33 = vld [vmem:[%s14928_s25 + $0x4420] sm:$0xff]  ;;  %2825 = vst [vmem:[%s14936_s26 + $0x1100] sm:$0xff] %v2824_v32 }
 0x233   : > { %2827 = vst [vmem:[%s14936_s26 + $0x1108] sm:$0xff] %v2826_v33  ;;  %v2828_v34 = vld [vmem:[%s14928_s25 + $0x4440] sm:$0xff] }
 0x234   : > { %v2830_v35 = vld [vmem:[%s14928_s25 + $0x4460] sm:$0xff]  ;;  %2829 = vst [vmem:[%s14936_s26 + $0x1110] sm:$0xff] %v2828_v34 }
 0x235   : > { %v2832_v36 = vld [vmem:[%s14928_s25 + $0x4480] sm:$0xff]  ;;  %2831 = vst [vmem:[%s14936_s26 + $0x1118] sm:$0xff] %v2830_v35 }
 0x236   : > { %2833 = vst [vmem:[%s14936_s26 + $0x1120] sm:$0xff] %v2832_v36  ;;  %v2834_v37 = vld [vmem:[%s14928_s25 + $0x44a0] sm:$0xff] }
 0x237   : > { %v2836_v38 = vld [vmem:[%s14928_s25 + $0x44c0] sm:$0xff]  ;;  %2835 = vst [vmem:[%s14936_s26 + $0x1128] sm:$0xff] %v2834_v37 }
 0x238   : > { %v2838_v39 = vld [vmem:[%s14928_s25 + $0x44e0] sm:$0xff]  ;;  %2837 = vst [vmem:[%s14936_s26 + $0x1130] sm:$0xff] %v2836_v38 }
 0x239   : > { %2839 = vst [vmem:[%s14936_s26 + $0x1138] sm:$0xff] %v2838_v39  ;;  %v2840_v40 = vld [vmem:[%s14928_s25 + $0x4500] sm:$0xff] }
 0x23a   : > { %v2842_v41 = vld [vmem:[%s14928_s25 + $0x4520] sm:$0xff]  ;;  %2841 = vst [vmem:[%s14936_s26 + $0x1140] sm:$0xff] %v2840_v40 }
 0x23b   : > { %v2844_v42 = vld [vmem:[%s14928_s25 + $0x4540] sm:$0xff]  ;;  %2843 = vst [vmem:[%s14936_s26 + $0x1148] sm:$0xff] %v2842_v41 }
 0x23c   : > { %2845 = vst [vmem:[%s14936_s26 + $0x1150] sm:$0xff] %v2844_v42  ;;  %v2846_v43 = vld [vmem:[%s14928_s25 + $0x4560] sm:$0xff] }
 0x23d   : > { %v2848_v44 = vld [vmem:[%s14928_s25 + $0x4580] sm:$0xff]  ;;  %2847 = vst [vmem:[%s14936_s26 + $0x1158] sm:$0xff] %v2846_v43 }
 0x23e   : > { %v2850_v45 = vld [vmem:[%s14928_s25 + $0x45a0] sm:$0xff]  ;;  %2849 = vst [vmem:[%s14936_s26 + $0x1160] sm:$0xff] %v2848_v44 }
 0x23f   : > { %2851 = vst [vmem:[%s14936_s26 + $0x1168] sm:$0xff] %v2850_v45  ;;  %v2852_v46 = vld [vmem:[%s14928_s25 + $0x45c0] sm:$0xff] }
 0x240   : > { %v2854_v47 = vld [vmem:[%s14928_s25 + $0x45e0] sm:$0xff]  ;;  %2853 = vst [vmem:[%s14936_s26 + $0x1170] sm:$0xff] %v2852_v46 }
 0x241   : > { %v2856_v48 = vld [vmem:[%s14928_s25 + $0x4600] sm:$0xff]  ;;  %2855 = vst [vmem:[%s14936_s26 + $0x1178] sm:$0xff] %v2854_v47 }
 0x242   : > { %2857 = vst [vmem:[%s14936_s26 + $0x1180] sm:$0xff] %v2856_v48  ;;  %v2858_v49 = vld [vmem:[%s14928_s25 + $0x4620] sm:$0xff] }
 0x243   : > { %v2860_v50 = vld [vmem:[%s14928_s25 + $0x4640] sm:$0xff]  ;;  %2859 = vst [vmem:[%s14936_s26 + $0x1188] sm:$0xff] %v2858_v49 }
 0x244   : > { %v2862_v51 = vld [vmem:[%s14928_s25 + $0x4660] sm:$0xff]  ;;  %2861 = vst [vmem:[%s14936_s26 + $0x1190] sm:$0xff] %v2860_v50 }
 0x245   : > { %2863 = vst [vmem:[%s14936_s26 + $0x1198] sm:$0xff] %v2862_v51  ;;  %v2864_v52 = vld [vmem:[%s14928_s25 + $0x4680] sm:$0xff] }
 0x246   : > { %v2866_v53 = vld [vmem:[%s14928_s25 + $0x46a0] sm:$0xff]  ;;  %2865 = vst [vmem:[%s14936_s26 + $0x11a0] sm:$0xff] %v2864_v52 }
 0x247   : > { %v2868_v54 = vld [vmem:[%s14928_s25 + $0x46c0] sm:$0xff]  ;;  %2867 = vst [vmem:[%s14936_s26 + $0x11a8] sm:$0xff] %v2866_v53 }
 0x248   : > { %2869 = vst [vmem:[%s14936_s26 + $0x11b0] sm:$0xff] %v2868_v54  ;;  %v2870_v55 = vld [vmem:[%s14928_s25 + $0x46e0] sm:$0xff] }
 0x249   : > { %v2872_v56 = vld [vmem:[%s14928_s25 + $0x4700] sm:$0xff]  ;;  %2871 = vst [vmem:[%s14936_s26 + $0x11b8] sm:$0xff] %v2870_v55 }
 0x24a   : > { %v2874_v57 = vld [vmem:[%s14928_s25 + $0x4720] sm:$0xff]  ;;  %2873 = vst [vmem:[%s14936_s26 + $0x11c0] sm:$0xff] %v2872_v56 }
 0x24b   : > { %2875 = vst [vmem:[%s14936_s26 + $0x11c8] sm:$0xff] %v2874_v57  ;;  %v2876_v58 = vld [vmem:[%s14928_s25 + $0x4740] sm:$0xff] }
 0x24c   : > { %v2878_v59 = vld [vmem:[%s14928_s25 + $0x4760] sm:$0xff]  ;;  %2877 = vst [vmem:[%s14936_s26 + $0x11d0] sm:$0xff] %v2876_v58 }
 0x24d   : > { %v2880_v60 = vld [vmem:[%s14928_s25 + $0x4780] sm:$0xff]  ;;  %2879 = vst [vmem:[%s14936_s26 + $0x11d8] sm:$0xff] %v2878_v59 }
 0x24e   : > { %2881 = vst [vmem:[%s14936_s26 + $0x11e0] sm:$0xff] %v2880_v60  ;;  %v2882_v61 = vld [vmem:[%s14928_s25 + $0x47a0] sm:$0xff] }
 0x24f   : > { %v2884_v62 = vld [vmem:[%s14928_s25 + $0x47c0] sm:$0xff]  ;;  %2883 = vst [vmem:[%s14936_s26 + $0x11e8] sm:$0xff] %v2882_v61 }
 0x250   : > { %v2886_v63 = vld [vmem:[%s14928_s25 + $0x47e0] sm:$0xff]  ;;  %2885 = vst [vmem:[%s14936_s26 + $0x11f0] sm:$0xff] %v2884_v62 }
 0x251   : > { %2887 = vst [vmem:[%s14936_s26 + $0x11f8] sm:$0xff] %v2886_v63  ;;  %v2888_v0 = vld [vmem:[%s14928_s25 + $0x4800] sm:$0xff] }
 0x252   : > { %v2890_v1 = vld [vmem:[%s14928_s25 + $0x4820] sm:$0xff]  ;;  %2889 = vst [vmem:[%s14936_s26 + $0x1200] sm:$0xff] %v2888_v0 }
 0x253   : > { %v2892_v2 = vld [vmem:[%s14928_s25 + $0x4840] sm:$0xff]  ;;  %2891 = vst [vmem:[%s14936_s26 + $0x1208] sm:$0xff] %v2890_v1 }
 0x254   : > { %2893 = vst [vmem:[%s14936_s26 + $0x1210] sm:$0xff] %v2892_v2  ;;  %v2894_v3 = vld [vmem:[%s14928_s25 + $0x4860] sm:$0xff] }
 0x255   : > { %v2896_v4 = vld [vmem:[%s14928_s25 + $0x4880] sm:$0xff]  ;;  %2895 = vst [vmem:[%s14936_s26 + $0x1218] sm:$0xff] %v2894_v3 }
 0x256   : > { %v2898_v5 = vld [vmem:[%s14928_s25 + $0x48a0] sm:$0xff]  ;;  %2897 = vst [vmem:[%s14936_s26 + $0x1220] sm:$0xff] %v2896_v4 }
 0x257   : > { %2899 = vst [vmem:[%s14936_s26 + $0x1228] sm:$0xff] %v2898_v5  ;;  %v2900_v6 = vld [vmem:[%s14928_s25 + $0x48c0] sm:$0xff] }
 0x258   : > { %v2902_v7 = vld [vmem:[%s14928_s25 + $0x48e0] sm:$0xff]  ;;  %2901 = vst [vmem:[%s14936_s26 + $0x1230] sm:$0xff] %v2900_v6 }
 0x259   : > { %v2904_v8 = vld [vmem:[%s14928_s25 + $0x4900] sm:$0xff]  ;;  %2903 = vst [vmem:[%s14936_s26 + $0x1238] sm:$0xff] %v2902_v7 }
 0x25a   : > { %2905 = vst [vmem:[%s14936_s26 + $0x1240] sm:$0xff] %v2904_v8  ;;  %v2906_v9 = vld [vmem:[%s14928_s25 + $0x4920] sm:$0xff] }
 0x25b   : > { %v2908_v10 = vld [vmem:[%s14928_s25 + $0x4940] sm:$0xff]  ;;  %2907 = vst [vmem:[%s14936_s26 + $0x1248] sm:$0xff] %v2906_v9 }
 0x25c   : > { %v2910_v11 = vld [vmem:[%s14928_s25 + $0x4960] sm:$0xff]  ;;  %2909 = vst [vmem:[%s14936_s26 + $0x1250] sm:$0xff] %v2908_v10 }
 0x25d   : > { %2911 = vst [vmem:[%s14936_s26 + $0x1258] sm:$0xff] %v2910_v11  ;;  %v2912_v12 = vld [vmem:[%s14928_s25 + $0x4980] sm:$0xff] }
 0x25e   : > { %v2914_v13 = vld [vmem:[%s14928_s25 + $0x49a0] sm:$0xff]  ;;  %2913 = vst [vmem:[%s14936_s26 + $0x1260] sm:$0xff] %v2912_v12 }
 0x25f   : > { %v2916_v14 = vld [vmem:[%s14928_s25 + $0x49c0] sm:$0xff]  ;;  %2915 = vst [vmem:[%s14936_s26 + $0x1268] sm:$0xff] %v2914_v13 }
 0x260   : > { %2917 = vst [vmem:[%s14936_s26 + $0x1270] sm:$0xff] %v2916_v14  ;;  %v2918_v15 = vld [vmem:[%s14928_s25 + $0x49e0] sm:$0xff] }
 0x261   : > { %v2920_v16 = vld [vmem:[%s14928_s25 + $0x4a00] sm:$0xff]  ;;  %2919 = vst [vmem:[%s14936_s26 + $0x1278] sm:$0xff] %v2918_v15 }
 0x262   : > { %v2922_v17 = vld [vmem:[%s14928_s25 + $0x4a20] sm:$0xff]  ;;  %2921 = vst [vmem:[%s14936_s26 + $0x1280] sm:$0xff] %v2920_v16 }
 0x263   : > { %2923 = vst [vmem:[%s14936_s26 + $0x1288] sm:$0xff] %v2922_v17  ;;  %v2924_v18 = vld [vmem:[%s14928_s25 + $0x4a40] sm:$0xff] }
 0x264   : > { %v2926_v19 = vld [vmem:[%s14928_s25 + $0x4a60] sm:$0xff]  ;;  %2925 = vst [vmem:[%s14936_s26 + $0x1290] sm:$0xff] %v2924_v18 }
 0x265   : > { %v2928_v20 = vld [vmem:[%s14928_s25 + $0x4a80] sm:$0xff]  ;;  %2927 = vst [vmem:[%s14936_s26 + $0x1298] sm:$0xff] %v2926_v19 }
 0x266   : > { %2929 = vst [vmem:[%s14936_s26 + $0x12a0] sm:$0xff] %v2928_v20  ;;  %v2930_v21 = vld [vmem:[%s14928_s25 + $0x4aa0] sm:$0xff] }
 0x267   : > { %v2932_v22 = vld [vmem:[%s14928_s25 + $0x4ac0] sm:$0xff]  ;;  %2931 = vst [vmem:[%s14936_s26 + $0x12a8] sm:$0xff] %v2930_v21 }
 0x268   : > { %v2934_v23 = vld [vmem:[%s14928_s25 + $0x4ae0] sm:$0xff]  ;;  %2933 = vst [vmem:[%s14936_s26 + $0x12b0] sm:$0xff] %v2932_v22 }
 0x269   : > { %2935 = vst [vmem:[%s14936_s26 + $0x12b8] sm:$0xff] %v2934_v23  ;;  %v2936_v24 = vld [vmem:[%s14928_s25 + $0x4b00] sm:$0xff] }
 0x26a   : > { %v2938_v25 = vld [vmem:[%s14928_s25 + $0x4b20] sm:$0xff]  ;;  %2937 = vst [vmem:[%s14936_s26 + $0x12c0] sm:$0xff] %v2936_v24 }
 0x26b   : > { %v2940_v26 = vld [vmem:[%s14928_s25 + $0x4b40] sm:$0xff]  ;;  %2939 = vst [vmem:[%s14936_s26 + $0x12c8] sm:$0xff] %v2938_v25 }
 0x26c   : > { %2941 = vst [vmem:[%s14936_s26 + $0x12d0] sm:$0xff] %v2940_v26  ;;  %v2942_v27 = vld [vmem:[%s14928_s25 + $0x4b60] sm:$0xff] }
 0x26d   : > { %v2944_v28 = vld [vmem:[%s14928_s25 + $0x4b80] sm:$0xff]  ;;  %2943 = vst [vmem:[%s14936_s26 + $0x12d8] sm:$0xff] %v2942_v27 }
 0x26e   : > { %v2946_v29 = vld [vmem:[%s14928_s25 + $0x4ba0] sm:$0xff]  ;;  %2945 = vst [vmem:[%s14936_s26 + $0x12e0] sm:$0xff] %v2944_v28 }
 0x26f   : > { %2947 = vst [vmem:[%s14936_s26 + $0x12e8] sm:$0xff] %v2946_v29  ;;  %v2948_v30 = vld [vmem:[%s14928_s25 + $0x4bc0] sm:$0xff] }
 0x270   : > { %v2950_v31 = vld [vmem:[%s14928_s25 + $0x4be0] sm:$0xff]  ;;  %2949 = vst [vmem:[%s14936_s26 + $0x12f0] sm:$0xff] %v2948_v30 }
 0x271   : > { %v2952_v32 = vld [vmem:[%s14928_s25 + $0x4c00] sm:$0xff]  ;;  %2951 = vst [vmem:[%s14936_s26 + $0x12f8] sm:$0xff] %v2950_v31 }
 0x272   : > { %2953 = vst [vmem:[%s14936_s26 + $0x1300] sm:$0xff] %v2952_v32  ;;  %v2954_v33 = vld [vmem:[%s14928_s25 + $0x4c20] sm:$0xff] }
 0x273   : > { %v2956_v34 = vld [vmem:[%s14928_s25 + $0x4c40] sm:$0xff]  ;;  %2955 = vst [vmem:[%s14936_s26 + $0x1308] sm:$0xff] %v2954_v33 }
 0x274   : > { %v2958_v35 = vld [vmem:[%s14928_s25 + $0x4c60] sm:$0xff]  ;;  %2957 = vst [vmem:[%s14936_s26 + $0x1310] sm:$0xff] %v2956_v34 }
 0x275   : > { %2959 = vst [vmem:[%s14936_s26 + $0x1318] sm:$0xff] %v2958_v35  ;;  %v2960_v36 = vld [vmem:[%s14928_s25 + $0x4c80] sm:$0xff] }
 0x276   : > { %v2962_v37 = vld [vmem:[%s14928_s25 + $0x4ca0] sm:$0xff]  ;;  %2961 = vst [vmem:[%s14936_s26 + $0x1320] sm:$0xff] %v2960_v36 }
 0x277   : > { %v2964_v38 = vld [vmem:[%s14928_s25 + $0x4cc0] sm:$0xff]  ;;  %2963 = vst [vmem:[%s14936_s26 + $0x1328] sm:$0xff] %v2962_v37 }
 0x278   : > { %2965 = vst [vmem:[%s14936_s26 + $0x1330] sm:$0xff] %v2964_v38  ;;  %v2966_v39 = vld [vmem:[%s14928_s25 + $0x4ce0] sm:$0xff] }
 0x279   : > { %v2968_v40 = vld [vmem:[%s14928_s25 + $0x4d00] sm:$0xff]  ;;  %2967 = vst [vmem:[%s14936_s26 + $0x1338] sm:$0xff] %v2966_v39 }
 0x27a   : > { %v2970_v41 = vld [vmem:[%s14928_s25 + $0x4d20] sm:$0xff]  ;;  %2969 = vst [vmem:[%s14936_s26 + $0x1340] sm:$0xff] %v2968_v40 }
 0x27b   : > { %2971 = vst [vmem:[%s14936_s26 + $0x1348] sm:$0xff] %v2970_v41  ;;  %v2972_v42 = vld [vmem:[%s14928_s25 + $0x4d40] sm:$0xff] }
 0x27c   : > { %v2974_v43 = vld [vmem:[%s14928_s25 + $0x4d60] sm:$0xff]  ;;  %2973 = vst [vmem:[%s14936_s26 + $0x1350] sm:$0xff] %v2972_v42 }
 0x27d   : > { %v2976_v44 = vld [vmem:[%s14928_s25 + $0x4d80] sm:$0xff]  ;;  %2975 = vst [vmem:[%s14936_s26 + $0x1358] sm:$0xff] %v2974_v43 }
 0x27e   : > { %2977 = vst [vmem:[%s14936_s26 + $0x1360] sm:$0xff] %v2976_v44  ;;  %v2978_v45 = vld [vmem:[%s14928_s25 + $0x4da0] sm:$0xff] }
 0x27f   : > { %v2980_v46 = vld [vmem:[%s14928_s25 + $0x4dc0] sm:$0xff]  ;;  %2979 = vst [vmem:[%s14936_s26 + $0x1368] sm:$0xff] %v2978_v45 }
 0x280   : > { %v2982_v47 = vld [vmem:[%s14928_s25 + $0x4de0] sm:$0xff]  ;;  %2981 = vst [vmem:[%s14936_s26 + $0x1370] sm:$0xff] %v2980_v46 }
 0x281   : > { %2983 = vst [vmem:[%s14936_s26 + $0x1378] sm:$0xff] %v2982_v47  ;;  %v2984_v48 = vld [vmem:[%s14928_s25 + $0x4e00] sm:$0xff] }
 0x282   : > { %v2986_v49 = vld [vmem:[%s14928_s25 + $0x4e20] sm:$0xff]  ;;  %2985 = vst [vmem:[%s14936_s26 + $0x1380] sm:$0xff] %v2984_v48 }
 0x283   : > { %v2988_v50 = vld [vmem:[%s14928_s25 + $0x4e40] sm:$0xff]  ;;  %2987 = vst [vmem:[%s14936_s26 + $0x1388] sm:$0xff] %v2986_v49 }
 0x284   : > { %2989 = vst [vmem:[%s14936_s26 + $0x1390] sm:$0xff] %v2988_v50  ;;  %v2990_v51 = vld [vmem:[%s14928_s25 + $0x4e60] sm:$0xff] }
 0x285   : > { %v2992_v52 = vld [vmem:[%s14928_s25 + $0x4e80] sm:$0xff]  ;;  %2991 = vst [vmem:[%s14936_s26 + $0x1398] sm:$0xff] %v2990_v51 }
 0x286   : > { %v2994_v53 = vld [vmem:[%s14928_s25 + $0x4ea0] sm:$0xff]  ;;  %2993 = vst [vmem:[%s14936_s26 + $0x13a0] sm:$0xff] %v2992_v52 }
 0x287   : > { %2995 = vst [vmem:[%s14936_s26 + $0x13a8] sm:$0xff] %v2994_v53  ;;  %v2996_v54 = vld [vmem:[%s14928_s25 + $0x4ec0] sm:$0xff] }
 0x288   : > { %v2998_v55 = vld [vmem:[%s14928_s25 + $0x4ee0] sm:$0xff]  ;;  %2997 = vst [vmem:[%s14936_s26 + $0x13b0] sm:$0xff] %v2996_v54 }
 0x289   : > { %v3000_v56 = vld [vmem:[%s14928_s25 + $0x4f00] sm:$0xff]  ;;  %2999 = vst [vmem:[%s14936_s26 + $0x13b8] sm:$0xff] %v2998_v55 }
 0x28a   : > { %3001 = vst [vmem:[%s14936_s26 + $0x13c0] sm:$0xff] %v3000_v56  ;;  %v3002_v57 = vld [vmem:[%s14928_s25 + $0x4f20] sm:$0xff] }
 0x28b   : > { %v3004_v58 = vld [vmem:[%s14928_s25 + $0x4f40] sm:$0xff]  ;;  %3003 = vst [vmem:[%s14936_s26 + $0x13c8] sm:$0xff] %v3002_v57 }
 0x28c   : > { %v3006_v59 = vld [vmem:[%s14928_s25 + $0x4f60] sm:$0xff]  ;;  %3005 = vst [vmem:[%s14936_s26 + $0x13d0] sm:$0xff] %v3004_v58 }
 0x28d   : > { %3007 = vst [vmem:[%s14936_s26 + $0x13d8] sm:$0xff] %v3006_v59  ;;  %v3008_v60 = vld [vmem:[%s14928_s25 + $0x4f80] sm:$0xff] }
 0x28e   : > { %v3010_v61 = vld [vmem:[%s14928_s25 + $0x4fa0] sm:$0xff]  ;;  %3009 = vst [vmem:[%s14936_s26 + $0x13e0] sm:$0xff] %v3008_v60 }
 0x28f   : > { %v3012_v62 = vld [vmem:[%s14928_s25 + $0x4fc0] sm:$0xff]  ;;  %3011 = vst [vmem:[%s14936_s26 + $0x13e8] sm:$0xff] %v3010_v61 }
 0x290   : > { %3013 = vst [vmem:[%s14936_s26 + $0x13f0] sm:$0xff] %v3012_v62  ;;  %v3014_v63 = vld [vmem:[%s14928_s25 + $0x4fe0] sm:$0xff] }
 0x291   : > { %v3016_v0 = vld [vmem:[%s14928_s25 + $0x5000] sm:$0xff]  ;;  %3015 = vst [vmem:[%s14936_s26 + $0x13f8] sm:$0xff] %v3014_v63 }
 0x292   : > { %v3018_v1 = vld [vmem:[%s14928_s25 + $0x5020] sm:$0xff]  ;;  %3017 = vst [vmem:[%s14936_s26 + $0x1400] sm:$0xff] %v3016_v0 }
 0x293   : > { %3019 = vst [vmem:[%s14936_s26 + $0x1408] sm:$0xff] %v3018_v1  ;;  %v3020_v2 = vld [vmem:[%s14928_s25 + $0x5040] sm:$0xff] }
 0x294   : > { %v3022_v3 = vld [vmem:[%s14928_s25 + $0x5060] sm:$0xff]  ;;  %3021 = vst [vmem:[%s14936_s26 + $0x1410] sm:$0xff] %v3020_v2 }
 0x295   : > { %v3024_v4 = vld [vmem:[%s14928_s25 + $0x5080] sm:$0xff]  ;;  %3023 = vst [vmem:[%s14936_s26 + $0x1418] sm:$0xff] %v3022_v3 }
 0x296   : > { %3025 = vst [vmem:[%s14936_s26 + $0x1420] sm:$0xff] %v3024_v4  ;;  %v3026_v5 = vld [vmem:[%s14928_s25 + $0x50a0] sm:$0xff] }
 0x297   : > { %v3028_v6 = vld [vmem:[%s14928_s25 + $0x50c0] sm:$0xff]  ;;  %3027 = vst [vmem:[%s14936_s26 + $0x1428] sm:$0xff] %v3026_v5 }
 0x298   : > { %v3030_v7 = vld [vmem:[%s14928_s25 + $0x50e0] sm:$0xff]  ;;  %3029 = vst [vmem:[%s14936_s26 + $0x1430] sm:$0xff] %v3028_v6 }
 0x299   : > { %3031 = vst [vmem:[%s14936_s26 + $0x1438] sm:$0xff] %v3030_v7  ;;  %v3032_v8 = vld [vmem:[%s14928_s25 + $0x5100] sm:$0xff] }
 0x29a   : > { %v3034_v9 = vld [vmem:[%s14928_s25 + $0x5120] sm:$0xff]  ;;  %3033 = vst [vmem:[%s14936_s26 + $0x1440] sm:$0xff] %v3032_v8 }
 0x29b   : > { %v3036_v10 = vld [vmem:[%s14928_s25 + $0x5140] sm:$0xff]  ;;  %3035 = vst [vmem:[%s14936_s26 + $0x1448] sm:$0xff] %v3034_v9 }
 0x29c   : > { %3037 = vst [vmem:[%s14936_s26 + $0x1450] sm:$0xff] %v3036_v10  ;;  %v3038_v11 = vld [vmem:[%s14928_s25 + $0x5160] sm:$0xff] }
 0x29d   : > { %v3040_v12 = vld [vmem:[%s14928_s25 + $0x5180] sm:$0xff]  ;;  %3039 = vst [vmem:[%s14936_s26 + $0x1458] sm:$0xff] %v3038_v11 }
 0x29e   : > { %v3042_v13 = vld [vmem:[%s14928_s25 + $0x51a0] sm:$0xff]  ;;  %3041 = vst [vmem:[%s14936_s26 + $0x1460] sm:$0xff] %v3040_v12 }
 0x29f   : > { %3043 = vst [vmem:[%s14936_s26 + $0x1468] sm:$0xff] %v3042_v13  ;;  %v3044_v14 = vld [vmem:[%s14928_s25 + $0x51c0] sm:$0xff] }
 0x2a0   : > { %v3046_v15 = vld [vmem:[%s14928_s25 + $0x51e0] sm:$0xff]  ;;  %3045 = vst [vmem:[%s14936_s26 + $0x1470] sm:$0xff] %v3044_v14 }
 0x2a1   : > { %v3048_v16 = vld [vmem:[%s14928_s25 + $0x5200] sm:$0xff]  ;;  %3047 = vst [vmem:[%s14936_s26 + $0x1478] sm:$0xff] %v3046_v15 }
 0x2a2   : > { %3049 = vst [vmem:[%s14936_s26 + $0x1480] sm:$0xff] %v3048_v16  ;;  %v3050_v17 = vld [vmem:[%s14928_s25 + $0x5220] sm:$0xff] }
 0x2a3   : > { %v3052_v18 = vld [vmem:[%s14928_s25 + $0x5240] sm:$0xff]  ;;  %3051 = vst [vmem:[%s14936_s26 + $0x1488] sm:$0xff] %v3050_v17 }
 0x2a4   : > { %v3054_v19 = vld [vmem:[%s14928_s25 + $0x5260] sm:$0xff]  ;;  %3053 = vst [vmem:[%s14936_s26 + $0x1490] sm:$0xff] %v3052_v18 }
 0x2a5   : > { %3055 = vst [vmem:[%s14936_s26 + $0x1498] sm:$0xff] %v3054_v19  ;;  %v3056_v20 = vld [vmem:[%s14928_s25 + $0x5280] sm:$0xff] }
 0x2a6   : > { %v3058_v21 = vld [vmem:[%s14928_s25 + $0x52a0] sm:$0xff]  ;;  %3057 = vst [vmem:[%s14936_s26 + $0x14a0] sm:$0xff] %v3056_v20 }
 0x2a7   : > { %v3060_v22 = vld [vmem:[%s14928_s25 + $0x52c0] sm:$0xff]  ;;  %3059 = vst [vmem:[%s14936_s26 + $0x14a8] sm:$0xff] %v3058_v21 }
 0x2a8   : > { %3061 = vst [vmem:[%s14936_s26 + $0x14b0] sm:$0xff] %v3060_v22  ;;  %v3062_v23 = vld [vmem:[%s14928_s25 + $0x52e0] sm:$0xff] }
 0x2a9   : > { %v3064_v24 = vld [vmem:[%s14928_s25 + $0x5300] sm:$0xff]  ;;  %3063 = vst [vmem:[%s14936_s26 + $0x14b8] sm:$0xff] %v3062_v23 }
 0x2aa   : > { %v3066_v25 = vld [vmem:[%s14928_s25 + $0x5320] sm:$0xff]  ;;  %3065 = vst [vmem:[%s14936_s26 + $0x14c0] sm:$0xff] %v3064_v24 }
 0x2ab   : > { %3067 = vst [vmem:[%s14936_s26 + $0x14c8] sm:$0xff] %v3066_v25  ;;  %v3068_v26 = vld [vmem:[%s14928_s25 + $0x5340] sm:$0xff] }
 0x2ac   : > { %v3070_v27 = vld [vmem:[%s14928_s25 + $0x5360] sm:$0xff]  ;;  %3069 = vst [vmem:[%s14936_s26 + $0x14d0] sm:$0xff] %v3068_v26 }
 0x2ad   : > { %v3072_v28 = vld [vmem:[%s14928_s25 + $0x5380] sm:$0xff]  ;;  %3071 = vst [vmem:[%s14936_s26 + $0x14d8] sm:$0xff] %v3070_v27 }
 0x2ae   : > { %3073 = vst [vmem:[%s14936_s26 + $0x14e0] sm:$0xff] %v3072_v28  ;;  %v3074_v29 = vld [vmem:[%s14928_s25 + $0x53a0] sm:$0xff] }
 0x2af   : > { %v3076_v30 = vld [vmem:[%s14928_s25 + $0x53c0] sm:$0xff]  ;;  %3075 = vst [vmem:[%s14936_s26 + $0x14e8] sm:$0xff] %v3074_v29 }
 0x2b0   : > { %v3078_v31 = vld [vmem:[%s14928_s25 + $0x53e0] sm:$0xff]  ;;  %3077 = vst [vmem:[%s14936_s26 + $0x14f0] sm:$0xff] %v3076_v30 }
 0x2b1   : > { %3079 = vst [vmem:[%s14936_s26 + $0x14f8] sm:$0xff] %v3078_v31  ;;  %v3080_v32 = vld [vmem:[%s14928_s25 + $0x5400] sm:$0xff] }
 0x2b2   : > { %v3082_v33 = vld [vmem:[%s14928_s25 + $0x5420] sm:$0xff]  ;;  %3081 = vst [vmem:[%s14936_s26 + $0x1500] sm:$0xff] %v3080_v32 }
 0x2b3   : > { %v3084_v34 = vld [vmem:[%s14928_s25 + $0x5440] sm:$0xff]  ;;  %3083 = vst [vmem:[%s14936_s26 + $0x1508] sm:$0xff] %v3082_v33 }
 0x2b4   : > { %3085 = vst [vmem:[%s14936_s26 + $0x1510] sm:$0xff] %v3084_v34  ;;  %v3086_v35 = vld [vmem:[%s14928_s25 + $0x5460] sm:$0xff] }
 0x2b5   : > { %v3088_v36 = vld [vmem:[%s14928_s25 + $0x5480] sm:$0xff]  ;;  %3087 = vst [vmem:[%s14936_s26 + $0x1518] sm:$0xff] %v3086_v35 }
 0x2b6   : > { %v3090_v37 = vld [vmem:[%s14928_s25 + $0x54a0] sm:$0xff]  ;;  %3089 = vst [vmem:[%s14936_s26 + $0x1520] sm:$0xff] %v3088_v36 }
 0x2b7   : > { %3091 = vst [vmem:[%s14936_s26 + $0x1528] sm:$0xff] %v3090_v37  ;;  %v3092_v38 = vld [vmem:[%s14928_s25 + $0x54c0] sm:$0xff] }
 0x2b8   : > { %v3094_v39 = vld [vmem:[%s14928_s25 + $0x54e0] sm:$0xff]  ;;  %3093 = vst [vmem:[%s14936_s26 + $0x1530] sm:$0xff] %v3092_v38 }
 0x2b9   : > { %v3096_v40 = vld [vmem:[%s14928_s25 + $0x5500] sm:$0xff]  ;;  %3095 = vst [vmem:[%s14936_s26 + $0x1538] sm:$0xff] %v3094_v39 }
 0x2ba   : > { %3097 = vst [vmem:[%s14936_s26 + $0x1540] sm:$0xff] %v3096_v40  ;;  %v3098_v41 = vld [vmem:[%s14928_s25 + $0x5520] sm:$0xff] }
 0x2bb   : > { %v3100_v42 = vld [vmem:[%s14928_s25 + $0x5540] sm:$0xff]  ;;  %3099 = vst [vmem:[%s14936_s26 + $0x1548] sm:$0xff] %v3098_v41 }
 0x2bc   : > { %v3102_v43 = vld [vmem:[%s14928_s25 + $0x5560] sm:$0xff]  ;;  %3101 = vst [vmem:[%s14936_s26 + $0x1550] sm:$0xff] %v3100_v42 }
 0x2bd   : > { %3103 = vst [vmem:[%s14936_s26 + $0x1558] sm:$0xff] %v3102_v43  ;;  %v3104_v44 = vld [vmem:[%s14928_s25 + $0x5580] sm:$0xff] }
 0x2be   : > { %v3106_v45 = vld [vmem:[%s14928_s25 + $0x55a0] sm:$0xff]  ;;  %3105 = vst [vmem:[%s14936_s26 + $0x1560] sm:$0xff] %v3104_v44 }
 0x2bf   : > { %v3108_v46 = vld [vmem:[%s14928_s25 + $0x55c0] sm:$0xff]  ;;  %3107 = vst [vmem:[%s14936_s26 + $0x1568] sm:$0xff] %v3106_v45 }
 0x2c0   : > { %3109 = vst [vmem:[%s14936_s26 + $0x1570] sm:$0xff] %v3108_v46  ;;  %v3110_v47 = vld [vmem:[%s14928_s25 + $0x55e0] sm:$0xff] }
 0x2c1   : > { %v3112_v48 = vld [vmem:[%s14928_s25 + $0x5600] sm:$0xff]  ;;  %3111 = vst [vmem:[%s14936_s26 + $0x1578] sm:$0xff] %v3110_v47 }
 0x2c2   : > { %v3114_v49 = vld [vmem:[%s14928_s25 + $0x5620] sm:$0xff]  ;;  %3113 = vst [vmem:[%s14936_s26 + $0x1580] sm:$0xff] %v3112_v48 }
 0x2c3   : > { %3115 = vst [vmem:[%s14936_s26 + $0x1588] sm:$0xff] %v3114_v49  ;;  %v3116_v50 = vld [vmem:[%s14928_s25 + $0x5640] sm:$0xff] }
 0x2c4   : > { %v3118_v51 = vld [vmem:[%s14928_s25 + $0x5660] sm:$0xff]  ;;  %3117 = vst [vmem:[%s14936_s26 + $0x1590] sm:$0xff] %v3116_v50 }
 0x2c5   : > { %v3120_v52 = vld [vmem:[%s14928_s25 + $0x5680] sm:$0xff]  ;;  %3119 = vst [vmem:[%s14936_s26 + $0x1598] sm:$0xff] %v3118_v51 }
 0x2c6   : > { %3121 = vst [vmem:[%s14936_s26 + $0x15a0] sm:$0xff] %v3120_v52  ;;  %v3122_v53 = vld [vmem:[%s14928_s25 + $0x56a0] sm:$0xff] }
 0x2c7   : > { %v3124_v54 = vld [vmem:[%s14928_s25 + $0x56c0] sm:$0xff]  ;;  %3123 = vst [vmem:[%s14936_s26 + $0x15a8] sm:$0xff] %v3122_v53 }
 0x2c8   : > { %v3126_v55 = vld [vmem:[%s14928_s25 + $0x56e0] sm:$0xff]  ;;  %3125 = vst [vmem:[%s14936_s26 + $0x15b0] sm:$0xff] %v3124_v54 }
 0x2c9   : > { %3127 = vst [vmem:[%s14936_s26 + $0x15b8] sm:$0xff] %v3126_v55  ;;  %v3128_v56 = vld [vmem:[%s14928_s25 + $0x5700] sm:$0xff] }
 0x2ca   : > { %v3130_v57 = vld [vmem:[%s14928_s25 + $0x5720] sm:$0xff]  ;;  %3129 = vst [vmem:[%s14936_s26 + $0x15c0] sm:$0xff] %v3128_v56 }
 0x2cb   : > { %v3132_v58 = vld [vmem:[%s14928_s25 + $0x5740] sm:$0xff]  ;;  %3131 = vst [vmem:[%s14936_s26 + $0x15c8] sm:$0xff] %v3130_v57 }
 0x2cc   : > { %3133 = vst [vmem:[%s14936_s26 + $0x15d0] sm:$0xff] %v3132_v58  ;;  %v3134_v59 = vld [vmem:[%s14928_s25 + $0x5760] sm:$0xff] }
 0x2cd   : > { %v3136_v60 = vld [vmem:[%s14928_s25 + $0x5780] sm:$0xff]  ;;  %3135 = vst [vmem:[%s14936_s26 + $0x15d8] sm:$0xff] %v3134_v59 }
 0x2ce   : > { %v3138_v61 = vld [vmem:[%s14928_s25 + $0x57a0] sm:$0xff]  ;;  %3137 = vst [vmem:[%s14936_s26 + $0x15e0] sm:$0xff] %v3136_v60 }
 0x2cf   : > { %3139 = vst [vmem:[%s14936_s26 + $0x15e8] sm:$0xff] %v3138_v61  ;;  %v3140_v62 = vld [vmem:[%s14928_s25 + $0x57c0] sm:$0xff] }
 0x2d0   : > { %v3142_v63 = vld [vmem:[%s14928_s25 + $0x57e0] sm:$0xff]  ;;  %3141 = vst [vmem:[%s14936_s26 + $0x15f0] sm:$0xff] %v3140_v62 }
 0x2d1   : > { %v3144_v0 = vld [vmem:[%s14928_s25 + $0x5800] sm:$0xff]  ;;  %3143 = vst [vmem:[%s14936_s26 + $0x15f8] sm:$0xff] %v3142_v63 }
 0x2d2   : > { %3145 = vst [vmem:[%s14936_s26 + $0x1600] sm:$0xff] %v3144_v0  ;;  %v3146_v1 = vld [vmem:[%s14928_s25 + $0x5820] sm:$0xff] }
 0x2d3   : > { %v3148_v2 = vld [vmem:[%s14928_s25 + $0x5840] sm:$0xff]  ;;  %3147 = vst [vmem:[%s14936_s26 + $0x1608] sm:$0xff] %v3146_v1 }
 0x2d4   : > { %v3150_v3 = vld [vmem:[%s14928_s25 + $0x5860] sm:$0xff]  ;;  %3149 = vst [vmem:[%s14936_s26 + $0x1610] sm:$0xff] %v3148_v2 }
 0x2d5   : > { %3151 = vst [vmem:[%s14936_s26 + $0x1618] sm:$0xff] %v3150_v3  ;;  %v3152_v4 = vld [vmem:[%s14928_s25 + $0x5880] sm:$0xff] }
 0x2d6   : > { %v3154_v5 = vld [vmem:[%s14928_s25 + $0x58a0] sm:$0xff]  ;;  %3153 = vst [vmem:[%s14936_s26 + $0x1620] sm:$0xff] %v3152_v4 }
 0x2d7   : > { %v3156_v6 = vld [vmem:[%s14928_s25 + $0x58c0] sm:$0xff]  ;;  %3155 = vst [vmem:[%s14936_s26 + $0x1628] sm:$0xff] %v3154_v5 }
 0x2d8   : > { %3157 = vst [vmem:[%s14936_s26 + $0x1630] sm:$0xff] %v3156_v6  ;;  %v3158_v7 = vld [vmem:[%s14928_s25 + $0x58e0] sm:$0xff] }
 0x2d9   : > { %v3160_v8 = vld [vmem:[%s14928_s25 + $0x5900] sm:$0xff]  ;;  %3159 = vst [vmem:[%s14936_s26 + $0x1638] sm:$0xff] %v3158_v7 }
 0x2da   : > { %v3162_v9 = vld [vmem:[%s14928_s25 + $0x5920] sm:$0xff]  ;;  %3161 = vst [vmem:[%s14936_s26 + $0x1640] sm:$0xff] %v3160_v8 }
 0x2db   : > { %3163 = vst [vmem:[%s14936_s26 + $0x1648] sm:$0xff] %v3162_v9  ;;  %v3164_v10 = vld [vmem:[%s14928_s25 + $0x5940] sm:$0xff] }
 0x2dc   : > { %v3166_v11 = vld [vmem:[%s14928_s25 + $0x5960] sm:$0xff]  ;;  %3165 = vst [vmem:[%s14936_s26 + $0x1650] sm:$0xff] %v3164_v10 }
 0x2dd   : > { %v3168_v12 = vld [vmem:[%s14928_s25 + $0x5980] sm:$0xff]  ;;  %3167 = vst [vmem:[%s14936_s26 + $0x1658] sm:$0xff] %v3166_v11 }
 0x2de   : > { %3169 = vst [vmem:[%s14936_s26 + $0x1660] sm:$0xff] %v3168_v12  ;;  %v3170_v13 = vld [vmem:[%s14928_s25 + $0x59a0] sm:$0xff] }
 0x2df   : > { %v3172_v14 = vld [vmem:[%s14928_s25 + $0x59c0] sm:$0xff]  ;;  %3171 = vst [vmem:[%s14936_s26 + $0x1668] sm:$0xff] %v3170_v13 }
 0x2e0   : > { %v3174_v15 = vld [vmem:[%s14928_s25 + $0x59e0] sm:$0xff]  ;;  %3173 = vst [vmem:[%s14936_s26 + $0x1670] sm:$0xff] %v3172_v14 }
 0x2e1   : > { %3175 = vst [vmem:[%s14936_s26 + $0x1678] sm:$0xff] %v3174_v15  ;;  %v3176_v16 = vld [vmem:[%s14928_s25 + $0x5a00] sm:$0xff] }
 0x2e2   : > { %v3178_v17 = vld [vmem:[%s14928_s25 + $0x5a20] sm:$0xff]  ;;  %3177 = vst [vmem:[%s14936_s26 + $0x1680] sm:$0xff] %v3176_v16 }
 0x2e3   : > { %v3180_v18 = vld [vmem:[%s14928_s25 + $0x5a40] sm:$0xff]  ;;  %3179 = vst [vmem:[%s14936_s26 + $0x1688] sm:$0xff] %v3178_v17 }
 0x2e4   : > { %3181 = vst [vmem:[%s14936_s26 + $0x1690] sm:$0xff] %v3180_v18  ;;  %v3182_v19 = vld [vmem:[%s14928_s25 + $0x5a60] sm:$0xff] }
 0x2e5   : > { %v3184_v20 = vld [vmem:[%s14928_s25 + $0x5a80] sm:$0xff]  ;;  %3183 = vst [vmem:[%s14936_s26 + $0x1698] sm:$0xff] %v3182_v19 }
 0x2e6   : > { %v3186_v21 = vld [vmem:[%s14928_s25 + $0x5aa0] sm:$0xff]  ;;  %3185 = vst [vmem:[%s14936_s26 + $0x16a0] sm:$0xff] %v3184_v20 }
 0x2e7   : > { %3187 = vst [vmem:[%s14936_s26 + $0x16a8] sm:$0xff] %v3186_v21  ;;  %v3188_v22 = vld [vmem:[%s14928_s25 + $0x5ac0] sm:$0xff] }
 0x2e8   : > { %v3190_v23 = vld [vmem:[%s14928_s25 + $0x5ae0] sm:$0xff]  ;;  %3189 = vst [vmem:[%s14936_s26 + $0x16b0] sm:$0xff] %v3188_v22 }
 0x2e9   : > { %v3192_v24 = vld [vmem:[%s14928_s25 + $0x5b00] sm:$0xff]  ;;  %3191 = vst [vmem:[%s14936_s26 + $0x16b8] sm:$0xff] %v3190_v23 }
 0x2ea   : > { %3193 = vst [vmem:[%s14936_s26 + $0x16c0] sm:$0xff] %v3192_v24  ;;  %v3194_v25 = vld [vmem:[%s14928_s25 + $0x5b20] sm:$0xff] }
 0x2eb   : > { %v3196_v26 = vld [vmem:[%s14928_s25 + $0x5b40] sm:$0xff]  ;;  %3195 = vst [vmem:[%s14936_s26 + $0x16c8] sm:$0xff] %v3194_v25 }
 0x2ec   : > { %v3198_v27 = vld [vmem:[%s14928_s25 + $0x5b60] sm:$0xff]  ;;  %3197 = vst [vmem:[%s14936_s26 + $0x16d0] sm:$0xff] %v3196_v26 }
 0x2ed   : > { %3199 = vst [vmem:[%s14936_s26 + $0x16d8] sm:$0xff] %v3198_v27  ;;  %v3200_v28 = vld [vmem:[%s14928_s25 + $0x5b80] sm:$0xff] }
 0x2ee   : > { %v3202_v29 = vld [vmem:[%s14928_s25 + $0x5ba0] sm:$0xff]  ;;  %3201 = vst [vmem:[%s14936_s26 + $0x16e0] sm:$0xff] %v3200_v28 }
 0x2ef   : > { %v3204_v30 = vld [vmem:[%s14928_s25 + $0x5bc0] sm:$0xff]  ;;  %3203 = vst [vmem:[%s14936_s26 + $0x16e8] sm:$0xff] %v3202_v29 }
 0x2f0   : > { %3205 = vst [vmem:[%s14936_s26 + $0x16f0] sm:$0xff] %v3204_v30  ;;  %v3206_v31 = vld [vmem:[%s14928_s25 + $0x5be0] sm:$0xff] }
 0x2f1   : > { %v3208_v32 = vld [vmem:[%s14928_s25 + $0x5c00] sm:$0xff]  ;;  %3207 = vst [vmem:[%s14936_s26 + $0x16f8] sm:$0xff] %v3206_v31 }
 0x2f2   : > { %v3210_v33 = vld [vmem:[%s14928_s25 + $0x5c20] sm:$0xff]  ;;  %3209 = vst [vmem:[%s14936_s26 + $0x1700] sm:$0xff] %v3208_v32 }
 0x2f3   : > { %3211 = vst [vmem:[%s14936_s26 + $0x1708] sm:$0xff] %v3210_v33  ;;  %v3212_v34 = vld [vmem:[%s14928_s25 + $0x5c40] sm:$0xff] }
 0x2f4   : > { %v3214_v35 = vld [vmem:[%s14928_s25 + $0x5c60] sm:$0xff]  ;;  %3213 = vst [vmem:[%s14936_s26 + $0x1710] sm:$0xff] %v3212_v34 }
 0x2f5   : > { %v3216_v36 = vld [vmem:[%s14928_s25 + $0x5c80] sm:$0xff]  ;;  %3215 = vst [vmem:[%s14936_s26 + $0x1718] sm:$0xff] %v3214_v35 }
 0x2f6   : > { %3217 = vst [vmem:[%s14936_s26 + $0x1720] sm:$0xff] %v3216_v36  ;;  %v3218_v37 = vld [vmem:[%s14928_s25 + $0x5ca0] sm:$0xff] }
 0x2f7   : > { %v3220_v38 = vld [vmem:[%s14928_s25 + $0x5cc0] sm:$0xff]  ;;  %3219 = vst [vmem:[%s14936_s26 + $0x1728] sm:$0xff] %v3218_v37 }
 0x2f8   : > { %v3222_v39 = vld [vmem:[%s14928_s25 + $0x5ce0] sm:$0xff]  ;;  %3221 = vst [vmem:[%s14936_s26 + $0x1730] sm:$0xff] %v3220_v38 }
 0x2f9   : > { %3223 = vst [vmem:[%s14936_s26 + $0x1738] sm:$0xff] %v3222_v39  ;;  %v3224_v40 = vld [vmem:[%s14928_s25 + $0x5d00] sm:$0xff] }
 0x2fa   : > { %v3226_v41 = vld [vmem:[%s14928_s25 + $0x5d20] sm:$0xff]  ;;  %3225 = vst [vmem:[%s14936_s26 + $0x1740] sm:$0xff] %v3224_v40 }
 0x2fb   : > { %v3228_v42 = vld [vmem:[%s14928_s25 + $0x5d40] sm:$0xff]  ;;  %3227 = vst [vmem:[%s14936_s26 + $0x1748] sm:$0xff] %v3226_v41 }
 0x2fc   : > { %3229 = vst [vmem:[%s14936_s26 + $0x1750] sm:$0xff] %v3228_v42  ;;  %v3230_v43 = vld [vmem:[%s14928_s25 + $0x5d60] sm:$0xff] }
 0x2fd   : > { %v3232_v44 = vld [vmem:[%s14928_s25 + $0x5d80] sm:$0xff]  ;;  %3231 = vst [vmem:[%s14936_s26 + $0x1758] sm:$0xff] %v3230_v43 }
 0x2fe   : > { %v3234_v45 = vld [vmem:[%s14928_s25 + $0x5da0] sm:$0xff]  ;;  %3233 = vst [vmem:[%s14936_s26 + $0x1760] sm:$0xff] %v3232_v44 }
 0x2ff   : > { %3235 = vst [vmem:[%s14936_s26 + $0x1768] sm:$0xff] %v3234_v45  ;;  %v3236_v46 = vld [vmem:[%s14928_s25 + $0x5dc0] sm:$0xff] }
 0x300   : > { %v3238_v47 = vld [vmem:[%s14928_s25 + $0x5de0] sm:$0xff]  ;;  %3237 = vst [vmem:[%s14936_s26 + $0x1770] sm:$0xff] %v3236_v46 }
 0x301   : > { %v3240_v48 = vld [vmem:[%s14928_s25 + $0x5e00] sm:$0xff]  ;;  %3239 = vst [vmem:[%s14936_s26 + $0x1778] sm:$0xff] %v3238_v47 }
 0x302   : > { %3241 = vst [vmem:[%s14936_s26 + $0x1780] sm:$0xff] %v3240_v48  ;;  %v3242_v49 = vld [vmem:[%s14928_s25 + $0x5e20] sm:$0xff] }
 0x303   : > { %v3244_v50 = vld [vmem:[%s14928_s25 + $0x5e40] sm:$0xff]  ;;  %3243 = vst [vmem:[%s14936_s26 + $0x1788] sm:$0xff] %v3242_v49 }
 0x304   : > { %v3246_v51 = vld [vmem:[%s14928_s25 + $0x5e60] sm:$0xff]  ;;  %3245 = vst [vmem:[%s14936_s26 + $0x1790] sm:$0xff] %v3244_v50 }
 0x305   : > { %3247 = vst [vmem:[%s14936_s26 + $0x1798] sm:$0xff] %v3246_v51  ;;  %v3248_v52 = vld [vmem:[%s14928_s25 + $0x5e80] sm:$0xff] }
 0x306   : > { %v3250_v53 = vld [vmem:[%s14928_s25 + $0x5ea0] sm:$0xff]  ;;  %3249 = vst [vmem:[%s14936_s26 + $0x17a0] sm:$0xff] %v3248_v52 }
 0x307   : > { %v3252_v54 = vld [vmem:[%s14928_s25 + $0x5ec0] sm:$0xff]  ;;  %3251 = vst [vmem:[%s14936_s26 + $0x17a8] sm:$0xff] %v3250_v53 }
 0x308   : > { %3253 = vst [vmem:[%s14936_s26 + $0x17b0] sm:$0xff] %v3252_v54  ;;  %v3254_v55 = vld [vmem:[%s14928_s25 + $0x5ee0] sm:$0xff] }
 0x309   : > { %v3256_v56 = vld [vmem:[%s14928_s25 + $0x5f00] sm:$0xff]  ;;  %3255 = vst [vmem:[%s14936_s26 + $0x17b8] sm:$0xff] %v3254_v55 }
 0x30a   : > { %v3258_v57 = vld [vmem:[%s14928_s25 + $0x5f20] sm:$0xff]  ;;  %3257 = vst [vmem:[%s14936_s26 + $0x17c0] sm:$0xff] %v3256_v56 }
 0x30b   : > { %3259 = vst [vmem:[%s14936_s26 + $0x17c8] sm:$0xff] %v3258_v57  ;;  %v3260_v58 = vld [vmem:[%s14928_s25 + $0x5f40] sm:$0xff] }
 0x30c   : > { %v3262_v59 = vld [vmem:[%s14928_s25 + $0x5f60] sm:$0xff]  ;;  %3261 = vst [vmem:[%s14936_s26 + $0x17d0] sm:$0xff] %v3260_v58 }
 0x30d   : > { %v3264_v60 = vld [vmem:[%s14928_s25 + $0x5f80] sm:$0xff]  ;;  %3263 = vst [vmem:[%s14936_s26 + $0x17d8] sm:$0xff] %v3262_v59 }
 0x30e   : > { %3265 = vst [vmem:[%s14936_s26 + $0x17e0] sm:$0xff] %v3264_v60  ;;  %v3266_v61 = vld [vmem:[%s14928_s25 + $0x5fa0] sm:$0xff] }
 0x30f   : > { %v3268_v62 = vld [vmem:[%s14928_s25 + $0x5fc0] sm:$0xff]  ;;  %3267 = vst [vmem:[%s14936_s26 + $0x17e8] sm:$0xff] %v3266_v61 }
 0x310   : > { %v3270_v63 = vld [vmem:[%s14928_s25 + $0x5fe0] sm:$0xff]  ;;  %3269 = vst [vmem:[%s14936_s26 + $0x17f0] sm:$0xff] %v3268_v62 }
 0x311   : > { %3271 = vst [vmem:[%s14936_s26 + $0x17f8] sm:$0xff] %v3270_v63  ;;  %v3272_v0 = vld [vmem:[%s14928_s25 + $0x6000] sm:$0xff] }
 0x312   : > { %v3274_v1 = vld [vmem:[%s14928_s25 + $0x6020] sm:$0xff]  ;;  %3273 = vst [vmem:[%s14936_s26 + $0x1800] sm:$0xff] %v3272_v0 }
 0x313   : > { %v3276_v2 = vld [vmem:[%s14928_s25 + $0x6040] sm:$0xff]  ;;  %3275 = vst [vmem:[%s14936_s26 + $0x1808] sm:$0xff] %v3274_v1 }
 0x314   : > { %3277 = vst [vmem:[%s14936_s26 + $0x1810] sm:$0xff] %v3276_v2  ;;  %v3278_v3 = vld [vmem:[%s14928_s25 + $0x6060] sm:$0xff] }
 0x315   : > { %v3280_v4 = vld [vmem:[%s14928_s25 + $0x6080] sm:$0xff]  ;;  %3279 = vst [vmem:[%s14936_s26 + $0x1818] sm:$0xff] %v3278_v3 }
 0x316   : > { %v3282_v5 = vld [vmem:[%s14928_s25 + $0x60a0] sm:$0xff]  ;;  %3281 = vst [vmem:[%s14936_s26 + $0x1820] sm:$0xff] %v3280_v4 }
 0x317   : > { %3283 = vst [vmem:[%s14936_s26 + $0x1828] sm:$0xff] %v3282_v5  ;;  %v3284_v6 = vld [vmem:[%s14928_s25 + $0x60c0] sm:$0xff] }
 0x318   : > { %v3286_v7 = vld [vmem:[%s14928_s25 + $0x60e0] sm:$0xff]  ;;  %3285 = vst [vmem:[%s14936_s26 + $0x1830] sm:$0xff] %v3284_v6 }
 0x319   : > { %v3288_v8 = vld [vmem:[%s14928_s25 + $0x6100] sm:$0xff]  ;;  %3287 = vst [vmem:[%s14936_s26 + $0x1838] sm:$0xff] %v3286_v7 }
 0x31a   : > { %3289 = vst [vmem:[%s14936_s26 + $0x1840] sm:$0xff] %v3288_v8  ;;  %v3290_v9 = vld [vmem:[%s14928_s25 + $0x6120] sm:$0xff] }
 0x31b   : > { %v3292_v10 = vld [vmem:[%s14928_s25 + $0x6140] sm:$0xff]  ;;  %3291 = vst [vmem:[%s14936_s26 + $0x1848] sm:$0xff] %v3290_v9 }
 0x31c   : > { %v3294_v11 = vld [vmem:[%s14928_s25 + $0x6160] sm:$0xff]  ;;  %3293 = vst [vmem:[%s14936_s26 + $0x1850] sm:$0xff] %v3292_v10 }
 0x31d   : > { %3295 = vst [vmem:[%s14936_s26 + $0x1858] sm:$0xff] %v3294_v11  ;;  %v3296_v12 = vld [vmem:[%s14928_s25 + $0x6180] sm:$0xff] }
 0x31e   : > { %v3298_v13 = vld [vmem:[%s14928_s25 + $0x61a0] sm:$0xff]  ;;  %3297 = vst [vmem:[%s14936_s26 + $0x1860] sm:$0xff] %v3296_v12 }
 0x31f   : > { %v3300_v14 = vld [vmem:[%s14928_s25 + $0x61c0] sm:$0xff]  ;;  %3299 = vst [vmem:[%s14936_s26 + $0x1868] sm:$0xff] %v3298_v13 }
 0x320   : > { %3301 = vst [vmem:[%s14936_s26 + $0x1870] sm:$0xff] %v3300_v14  ;;  %v3302_v15 = vld [vmem:[%s14928_s25 + $0x61e0] sm:$0xff] }
 0x321   : > { %3303 = vst [vmem:[%s14936_s26 + $0x1878] sm:$0xff] %v3302_v15 }
 0x322 PF: > { %p12745_p5 = scmp.ge.s32.totalorder %s14870_s14, 1  ;;  %p6488_p6 = scmp.lt.s32.totalorder %s14870_s14, 5 }
 0x324   : > { %p6489_p7 = pnand %p12745_p5, %p6488_p6 }
 0x325   : > { %s6495_s27 = sand.u32 (!%p6489_p7), 1, %s14862_s12   ;;  %v7328_v16 = vlaneseq (!%p6489_p7)  ;;  %v14872_v17 = vmov (!%p6489_p7), 1966171168   ;;  %v16508_v20 = vld [vmem:[%s17576_s0] sm:$0xff] (!%p6489_p7)  ;;  %v16513_v22 = vld [vmem:[%s17576_s0 + $0x18] sm:$0xff] (!%p6489_p7)  ;;  %s12746_s26 = sshll.u32 (!%p6489_p7), %s12739_s15, 1 }
 0x326   : > { %6492 = sbr.rel (%p6489_p7) target bundleno = 1830 (0x726), region = 80  ;;  %v7347_v18 = vunpack.c.l.s4 (!%p6489_p7), %v14872_v17  ;;  %p6524_p8 = scmp.lt.s32.totalorder (!%p6489_p7), %s12746_s26, 7 }
 0x327   : > { %s13635_s28 = smul.u32 (!%p6489_p7), 6272, %s6495_s27  ;;  %v16503_v19 = vshrl.u32 (!%p6489_p7), %v7328_v16, 7 }
 0x328   : > { %v7348_v21 = vunpack.c.0.s8 (!%p6489_p7), %v7347_v18 }
 0x329   : > { %s16515_s6 = scalar_lea.vmem (!%p6489_p7), [#allocation2], %s13635_s28 }
 0x32a   : > { %v13662_v23 = vld [vmem:[%s16515_s6 + $0x4] ss:$8 sps:$4 sm:$0xff] (!%p6489_p7)   ;;  %v16520_v25 = vsub.s32 (!%p6489_p7), %v7348_v21, %v16503_v19  ;;  %v13666_v26 = vld [vmem:[%s16515_s6] ss:$8 sps:$4 sm:$0xff] (!%p6489_p7)   ;;  %v13668_v28 = vld [vmem:[%s16515_s6 + $0x14] ss:$8 sps:$4 sm:$0xff] (!%p6489_p7)  }
 0x32b   : > { %v13664_v24 = vld [vmem:[%s16515_s6 + $0xc04] ss:$8 sps:$4 sm:$0xff] (!%p6489_p7)   ;;  %11622 = vmatprep.subr.bf16.mxu1 (!%p6489_p7), %v13662_v23  ;;  %v13667_v27 = vld [vmem:[%s16515_s6 + $0xc00] ss:$8 sps:$4 sm:$0xff] (!%p6489_p7)   ;;  %v13670_v31 = vld [vmem:[%s16515_s6 + $0xc14] ss:$8 sps:$4 sm:$0xff] (!%p6489_p7)  }
 0x32c   : > { %12114 = vmatprep.subr.bf16.mxu0 (!%p6489_p7), %v13664_v24  ;;  %v16527_v29 = vrot.slane (!%p6489_p7), %v16508_v20, %v16520_v25  ;;  %v16531_v30 = vrot.slane (!%p6489_p7), %v16513_v22, %v16520_v25  ;;  %11623 = vmatpush1.bf16.msra.mxu1 (!%p6489_p7), %v13666_v26  ;;  %v13672_v32 = vld [vmem:[%s16515_s6 + $0x10] ss:$8 sps:$4 sm:$0xff] (!%p6489_p7)   ;;  %v13674_v36 = vld [vmem:[%s16515_s6 + $0x24] ss:$8 sps:$4 sm:$0xff] (!%p6489_p7)   ;;  %v13678_v38 = vld [vmem:[%s16515_s6 + $0x20] ss:$8 sps:$4 sm:$0xff] (!%p6489_p7)  }
 0x32d   : > { %12115 = vmatpush1.bf16.msra.mxu0 %v13667_v27  ;;  %11624 = vmatprep.subr.bf16.mxu1 %v13668_v28  ;;  %v13673_v33 = vld [vmem:[%s16515_s6 + $0xc10] ss:$8 sps:$4 sm:$0xff]   ;;  %v13676_v37 = vld [vmem:[%s16515_s6 + $0xc24] ss:$8 sps:$4 sm:$0xff]   ;;  %v13679_v39 = vld [vmem:[%s16515_s6 + $0xc20] ss:$8 sps:$4 sm:$0xff]  }
 0x32e   : > { %v7360_v34 = vcombine.high %v16527_v29, %v16527_v29  ;;  %v7507_v35 = vcombine.high %v16531_v30, %v16531_v30  ;;  %12116 = vmatprep.subr.bf16.mxu0 %v13670_v31  ;;  %v13680_v42 = vld [vmem:[%s16515_s6 + $0x34] ss:$8 sps:$4 sm:$0xff]   ;;  %v13684_v44 = vld [vmem:[%s16515_s6 + $0x30] ss:$8 sps:$4 sm:$0xff]   ;;  %v13686_v46 = vld [vmem:[%s16515_s6 + $0x44] ss:$8 sps:$4 sm:$0xff]  }
 0x32f   : > { %v13682_v43 = vld [vmem:[%s16515_s6 + $0xc34] ss:$8 sps:$4 sm:$0xff]   ;;  %v13685_v45 = vld [vmem:[%s16515_s6 + $0xc30] ss:$8 sps:$4 sm:$0xff]   ;;  %v13688_v47 = vld [vmem:[%s16515_s6 + $0xc44] ss:$8 sps:$4 sm:$0xff]  }
 0x330   : > { %v16545_v40 = vrot.slane %v7360_v34, %v16520_v25  ;;  %v16548_v41 = vrot.slane %v7507_v35, %v16520_v25  ;;  %11625 = vmatpush1.bf16.msra.mxu1 %v13672_v32  ;;  %v13690_v48 = vld [vmem:[%s16515_s6 + $0x40] ss:$8 sps:$4 sm:$0xff]   ;;  %v13692_v50 = vld [vmem:[%s16515_s6 + $0x54] ss:$8 sps:$4 sm:$0xff]   ;;  %v13696_v52 = vld [vmem:[%s16515_s6 + $0x50] ss:$8 sps:$4 sm:$0xff]  }
 0x331   : > { %12117 = vmatpush1.bf16.msra.mxu0 %v13673_v33  ;;  %11626 = vmatprep.subr.bf16.mxu1 %v13674_v36  ;;  %v13691_v49 = vld [vmem:[%s16515_s6 + $0xc40] ss:$8 sps:$4 sm:$0xff]   ;;  %v13694_v51 = vld [vmem:[%s16515_s6 + $0xc54] ss:$8 sps:$4 sm:$0xff]   ;;  %v13697_v53 = vld [vmem:[%s16515_s6 + $0xc50] ss:$8 sps:$4 sm:$0xff]  }
 0x332   : > { %12118 = vmatprep.subr.bf16.mxu0 %v13676_v37  ;;  %11654 = vmatprep.mubr.bf16.mxu1 %v16545_v40  ;;  %v13698_v54 = vld [vmem:[%s16515_s6 + $0x64] ss:$8 sps:$4 sm:$0xff]   ;;  %v13702_v56 = vld [vmem:[%s16515_s6 + $0x60] ss:$8 sps:$4 sm:$0xff]   ;;  %v13704_v58 = vld [vmem:[%s16515_s6 + $0x74] ss:$8 sps:$4 sm:$0xff]  }
 0x333   : > { %12146 = vmatprep.mubr.bf16.mxu0 %v16548_v41  ;;  %v13700_v55 = vld [vmem:[%s16515_s6 + $0xc64] ss:$8 sps:$4 sm:$0xff]   ;;  %v13703_v57 = vld [vmem:[%s16515_s6 + $0xc60] ss:$8 sps:$4 sm:$0xff]   ;;  %v13706_v59 = vld [vmem:[%s16515_s6 + $0xc74] ss:$8 sps:$4 sm:$0xff]  }
 0x334   : > { %11627 = vmatpush1.bf16.msra.mxu1 %v13678_v38  ;;  %v13708_v60 = vld [vmem:[%s16515_s6 + $0x70] ss:$8 sps:$4 sm:$0xff]   ;;  %v13710_v62 = vld [vmem:[%s16515_s6 + $0x84] ss:$8 sps:$4 sm:$0xff]   ;;  %v13714_v0 = vld [vmem:[%s16515_s6 + $0x80] ss:$8 sps:$4 sm:$0xff]  }
 0x335   : > { %12119 = vmatpush1.bf16.msra.mxu0 %v13679_v39  ;;  %11628 = vmatprep.subr.bf16.mxu1 %v13680_v42  ;;  %v13709_v61 = vld [vmem:[%s16515_s6 + $0xc70] ss:$8 sps:$4 sm:$0xff]   ;;  %v13712_v63 = vld [vmem:[%s16515_s6 + $0xc84] ss:$8 sps:$4 sm:$0xff]   ;;  %v13715_v1 = vld [vmem:[%s16515_s6 + $0xc80] ss:$8 sps:$4 sm:$0xff]   ;;  %v16610_v42 = vrot.slane %v16527_v29, %v16520_v25  ;;  %v7539_v29 = vcombine.high %v16548_v41, %v16548_v41 }
 0x336   : > { %12120 = vmatprep.subr.bf16.mxu0 %v13682_v43  ;;  %v13716_v2 = vld [vmem:[%s16515_s6 + $0x94] ss:$8 sps:$4 sm:$0xff]   ;;  %v13720_v4 = vld [vmem:[%s16515_s6 + $0x90] ss:$8 sps:$4 sm:$0xff]   ;;  %v13722_v6 = vld [vmem:[%s16515_s6 + $0xa4] ss:$8 sps:$4 sm:$0xff]   ;;  %v16614_v43 = vrot.slane %v16531_v30, %v16520_v25 }
 0x337   : > { %v13718_v3 = vld [vmem:[%s16515_s6 + $0xc94] ss:$8 sps:$4 sm:$0xff]   ;;  %v13721_v5 = vld [vmem:[%s16515_s6 + $0xc90] ss:$8 sps:$4 sm:$0xff]   ;;  %v13724_v7 = vld [vmem:[%s16515_s6 + $0xca4] ss:$8 sps:$4 sm:$0xff]  }
 0x338   : > { %11629 = vmatpush1.bf16.msra.mxu1 %v13684_v44  ;;  %v13726_v8 = vld [vmem:[%s16515_s6 + $0xa0] ss:$8 sps:$4 sm:$0xff]   ;;  %v13728_v10 = vld [vmem:[%s16515_s6 + $0xb4] ss:$8 sps:$4 sm:$0xff]   ;;  %v13732_v12 = vld [vmem:[%s16515_s6 + $0xb0] ss:$8 sps:$4 sm:$0xff]  }
 0x339   : > { %12121 = vmatpush1.bf16.msra.mxu0 %v13685_v45  ;;  %11630 = vmatprep.subr.bf16.mxu1 %v13686_v46  ;;  %v13727_v9 = vld [vmem:[%s16515_s6 + $0xca0] ss:$8 sps:$4 sm:$0xff]   ;;  %v13730_v11 = vld [vmem:[%s16515_s6 + $0xcb4] ss:$8 sps:$4 sm:$0xff]   ;;  %v13733_v13 = vld [vmem:[%s16515_s6 + $0xcb0] ss:$8 sps:$4 sm:$0xff]   ;;  %v7392_v46 = vcombine.high %v16545_v40, %v16545_v40 }
 0x33a   : > { %12122 = vmatprep.subr.bf16.mxu0 %v13688_v47  ;;  %v13734_v14 = vld [vmem:[%s16515_s6 + $0xc4] ss:$8 sps:$4 sm:$0xff]   ;;  %v13738_v16 = vld [vmem:[%s16515_s6 + $0xc0] ss:$8 sps:$4 sm:$0xff]   ;;  %v13740_v18 = vld [vmem:[%s16515_s6 + $0xd4] ss:$8 sps:$4 sm:$0xff]  }
 0x33b   : > { %v13736_v15 = vld [vmem:[%s16515_s6 + $0xcc4] ss:$8 sps:$4 sm:$0xff]   ;;  %v13739_v17 = vld [vmem:[%s16515_s6 + $0xcc0] ss:$8 sps:$4 sm:$0xff]   ;;  %v13742_v21 = vld [vmem:[%s16515_s6 + $0xcd4] ss:$8 sps:$4 sm:$0xff]  }
 0x33c   : > { %11631 = vmatpush1.bf16.msra.mxu1 %v13690_v48  ;;  %v13744_v23 = vld [vmem:[%s16515_s6 + $0xd0] ss:$8 sps:$4 sm:$0xff]   ;;  %v13746_v26 = vld [vmem:[%s16515_s6 + $0xe4] ss:$8 sps:$4 sm:$0xff]   ;;  %v13750_v28 = vld [vmem:[%s16515_s6 + $0xe0] ss:$8 sps:$4 sm:$0xff]  }
 0x33d   : > { %12123 = vmatpush1.bf16.msra.mxu0 %v13691_v49  ;;  %11632 = vmatprep.subr.bf16.mxu1 %v13692_v50  ;;  %v13745_v24 = vld [vmem:[%s16515_s6 + $0xcd0] ss:$8 sps:$4 sm:$0xff]   ;;  %v13748_v27 = vld [vmem:[%s16515_s6 + $0xce4] ss:$8 sps:$4 sm:$0xff]   ;;  %v13751_v31 = vld [vmem:[%s16515_s6 + $0xce0] ss:$8 sps:$4 sm:$0xff]  }
 0x33e   : > { %12124 = vmatprep.subr.bf16.mxu0 %v13694_v51  ;;  %v13752_v32 = vld [vmem:[%s16515_s6 + $0xf4] ss:$8 sps:$4 sm:$0xff]   ;;  %v13756_v34 = vld [vmem:[%s16515_s6 + $0xf0] ss:$8 sps:$4 sm:$0xff]   ;;  %v13761_v36 = vld [vmem:[%s16515_s6 + $0x104] ss:$8 sps:$4 sm:$0xff]  }
 0x33f   : > { %v13754_v33 = vld [vmem:[%s16515_s6 + $0xcf4] ss:$8 sps:$4 sm:$0xff]   ;;  %v13757_v35 = vld [vmem:[%s16515_s6 + $0xcf0] ss:$8 sps:$4 sm:$0xff]   ;;  %v13765_v37 = vld [vmem:[%s16515_s6 + $0xd04] ss:$8 sps:$4 sm:$0xff]  }
 0x340   : > { %11633 = vmatpush1.bf16.msra.mxu1 %v13696_v52  ;;  %v13759_v38 = vld [vmem:[%s16515_s6 + $0x100] ss:$8 sps:$4 sm:$0xff]   ;;  %v13768_v44 = vld [vmem:[%s16515_s6 + $0x114] ss:$8 sps:$4 sm:$0xff]   ;;  %v13766_v30 = vld [vmem:[%s16515_s6 + $0x110] ss:$8 sps:$4 sm:$0xff]  }
 0x341   : > { %12125 = vmatpush1.bf16.msra.mxu0 %v13697_v53  ;;  %11634 = vmatprep.subr.bf16.mxu1 %v13698_v54  ;;  %v13763_v39 = vld [vmem:[%s16515_s6 + $0xd00] ss:$8 sps:$4 sm:$0xff]   ;;  %v13771_v45 = vld [vmem:[%s16515_s6 + $0xd14] ss:$8 sps:$4 sm:$0xff]   ;;  %v13769_v47 = vld [vmem:[%s16515_s6 + $0xd10] ss:$8 sps:$4 sm:$0xff]  }
 0x342   : > { %12126 = vmatprep.subr.bf16.mxu0 %v13700_v55  ;;  %v13774_v48 = vld [vmem:[%s16515_s6 + $0x124] ss:$8 sps:$4 sm:$0xff]   ;;  %v13772_v41 = vld [vmem:[%s16515_s6 + $0x120] ss:$8 sps:$4 sm:$0xff]   ;;  %v13780_v50 = vld [vmem:[%s16515_s6 + $0x134] ss:$8 sps:$4 sm:$0xff]  }
 0x343   : > { %v13777_v40 = vld [vmem:[%s16515_s6 + $0xd24] ss:$8 sps:$4 sm:$0xff]   ;;  %v13775_v49 = vld [vmem:[%s16515_s6 + $0xd20] ss:$8 sps:$4 sm:$0xff]   ;;  %v13783_v51 = vld [vmem:[%s16515_s6 + $0xd34] ss:$8 sps:$4 sm:$0xff]  }
 0x344   : > { %11635 = vmatpush1.bf16.msra.mxu1 %v13702_v56  ;;  %v13778_v52 = vld [vmem:[%s16515_s6 + $0x130] ss:$8 sps:$4 sm:$0xff]   ;;  %v13786_v54 = vld [vmem:[%s16515_s6 + $0x144] ss:$8 sps:$4 sm:$0xff]   ;;  %v13784_v56 = vld [vmem:[%s16515_s6 + $0x140] ss:$8 sps:$4 sm:$0xff]  }
 0x345   : > { %12127 = vmatpush1.bf16.msra.mxu0 %v13703_v57  ;;  %11636 = vmatprep.subr.bf16.mxu1 %v13704_v58  ;;  %v13781_v53 = vld [vmem:[%s16515_s6 + $0xd30] ss:$8 sps:$4 sm:$0xff]   ;;  %v13789_v55 = vld [vmem:[%s16515_s6 + $0xd44] ss:$8 sps:$4 sm:$0xff]   ;;  %v13787_v57 = vld [vmem:[%s16515_s6 + $0xd40] ss:$8 sps:$4 sm:$0xff]  }
 0x346   : > { %12128 = vmatprep.subr.bf16.mxu0 %v13706_v59  ;;  %v13792_v58 = vld [vmem:[%s16515_s6 + $0x154] ss:$8 sps:$4 sm:$0xff]   ;;  %s17584_s26 = smov (!%p6524_p8, %s12746_s26), 7 }
 0x347   : > { %v13795_v59 = vld [vmem:[%s16515_s6 + $0xd54] ss:$8 sps:$4 sm:$0xff]   ;;  %s6526_s29 = scalar_lea.vmem %s17578_s2, %s17584_s26  ;;  %s12748_s30 = sshll.u32 %s17584_s26, 1 }
 0x348   : > { %11637 = vmatpush1.bf16.msra.mxu1 %v13708_v60  ;;  %v13790_v60 = vld [vmem:[%s16515_s6 + $0x150] ss:$8 sps:$4 sm:$0xff]   ;;  %s6532_s4 = scalar_lea.vmem %s17579_s3, %s12748_s30 }
 0x349   : > { %12129 = vmatpush1.bf16.msra.mxu0 %v13709_v61  ;;  %11638 = vmatprep.subr.bf16.mxu1 %v13710_v62  ;;  %v13793_v61 = vld [vmem:[%s16515_s6 + $0xd50] ss:$8 sps:$4 sm:$0xff]   ;;  %v13798_v62 = vld [vmem:[%s16515_s6 + $0x164] ss:$8 sps:$4 sm:$0xff]  }
 0x34a   : > { %12130 = vmatprep.subr.bf16.mxu0 %v13712_v63  ;;  %v13801_v63 = vld [vmem:[%s16515_s6 + $0xd64] ss:$8 sps:$4 sm:$0xff]  }
 0x34c   : > { %11639 = vmatpush1.bf16.msra.mxu1 %v13714_v0  ;;  %v13796_v0 = vld [vmem:[%s16515_s6 + $0x160] ss:$8 sps:$4 sm:$0xff]  }
 0x34d   : > { %12131 = vmatpush1.bf16.msra.mxu0 %v13715_v1  ;;  %11640 = vmatprep.subr.bf16.mxu1 %v13716_v2  ;;  %v13799_v1 = vld [vmem:[%s16515_s6 + $0xd60] ss:$8 sps:$4 sm:$0xff]   ;;  %v13804_v2 = vld [vmem:[%s16515_s6 + $0x174] ss:$8 sps:$4 sm:$0xff]  }
 0x34e   : > { %12132 = vmatprep.subr.bf16.mxu0 %v13718_v3  ;;  %v13807_v3 = vld [vmem:[%s16515_s6 + $0xd74] ss:$8 sps:$4 sm:$0xff]  }
 0x350   : > { %11641 = vmatpush1.bf16.msra.mxu1 %v13720_v4  ;;  %v13802_v4 = vld [vmem:[%s16515_s6 + $0x170] ss:$8 sps:$4 sm:$0xff]  }
 0x351   : > { %12133 = vmatpush1.bf16.msra.mxu0 %v13721_v5  ;;  %11642 = vmatprep.subr.bf16.mxu1 %v13722_v6  ;;  %v13805_v5 = vld [vmem:[%s16515_s6 + $0xd70] ss:$8 sps:$4 sm:$0xff]   ;;  %v13810_v6 = vld [vmem:[%s16515_s6 + $0x184] ss:$8 sps:$4 sm:$0xff]  }
 0x352   : > { %12134 = vmatprep.subr.bf16.mxu0 %v13724_v7  ;;  %v13813_v7 = vld [vmem:[%s16515_s6 + $0xd84] ss:$8 sps:$4 sm:$0xff]  }
 0x354   : > { %11643 = vmatpush1.bf16.msra.mxu1 %v13726_v8  ;;  %v13808_v8 = vld [vmem:[%s16515_s6 + $0x180] ss:$8 sps:$4 sm:$0xff]  }
 0x355   : > { %12135 = vmatpush1.bf16.msra.mxu0 %v13727_v9  ;;  %11644 = vmatprep.subr.bf16.mxu1 %v13728_v10  ;;  %v13811_v9 = vld [vmem:[%s16515_s6 + $0xd80] ss:$8 sps:$4 sm:$0xff]   ;;  %v13816_v10 = vld [vmem:[%s16515_s6 + $0x194] ss:$8 sps:$4 sm:$0xff]  }
 0x356   : > { %12136 = vmatprep.subr.bf16.mxu0 %v13730_v11  ;;  %v13819_v11 = vld [vmem:[%s16515_s6 + $0xd94] ss:$8 sps:$4 sm:$0xff]  }
 0x358   : > { %11645 = vmatpush1.bf16.msra.mxu1 %v13732_v12  ;;  %v13814_v12 = vld [vmem:[%s16515_s6 + $0x190] ss:$8 sps:$4 sm:$0xff]  }
 0x359   : > { %12137 = vmatpush1.bf16.msra.mxu0 %v13733_v13  ;;  %11646 = vmatprep.subr.bf16.mxu1 %v13734_v14  ;;  %v13817_v13 = vld [vmem:[%s16515_s6 + $0xd90] ss:$8 sps:$4 sm:$0xff]   ;;  %v13822_v14 = vld [vmem:[%s16515_s6 + $0x1a4] ss:$8 sps:$4 sm:$0xff]  }
 0x35a   : > { %12138 = vmatprep.subr.bf16.mxu0 %v13736_v15  ;;  %v13825_v15 = vld [vmem:[%s16515_s6 + $0xda4] ss:$8 sps:$4 sm:$0xff]  }
 0x35c   : > { %11647 = vmatpush1.bf16.msra.mxu1 %v13738_v16  ;;  %v13820_v16 = vld [vmem:[%s16515_s6 + $0x1a0] ss:$8 sps:$4 sm:$0xff]  }
 0x35d   : > { %12139 = vmatpush1.bf16.msra.mxu0 %v13739_v17  ;;  %11648 = vmatprep.subr.bf16.mxu1 %v13740_v18  ;;  %v13823_v17 = vld [vmem:[%s16515_s6 + $0xda0] ss:$8 sps:$4 sm:$0xff]   ;;  %v13828_v18 = vld [vmem:[%s16515_s6 + $0x1b4] ss:$8 sps:$4 sm:$0xff]  }
 0x35e   : > { %12140 = vmatprep.subr.bf16.mxu0 %v13742_v21  ;;  %v13831_v21 = vld [vmem:[%s16515_s6 + $0xdb4] ss:$8 sps:$4 sm:$0xff]  }
 0x360   : > { %11649 = vmatpush1.bf16.msra.mxu1 %v13744_v23  ;;  %v13826_v23 = vld [vmem:[%s16515_s6 + $0x1b0] ss:$8 sps:$4 sm:$0xff]  }
 0x361   : > { %12141 = vmatpush1.bf16.msra.mxu0 %v13745_v24  ;;  %11650 = vmatprep.subr.bf16.mxu1 %v13746_v26  ;;  %v13829_v24 = vld [vmem:[%s16515_s6 + $0xdb0] ss:$8 sps:$4 sm:$0xff]   ;;  %v13834_v26 = vld [vmem:[%s16515_s6 + $0x1c4] ss:$8 sps:$4 sm:$0xff]  }
 0x362   : > { %12142 = vmatprep.subr.bf16.mxu0 %v13748_v27  ;;  %v13837_v27 = vld [vmem:[%s16515_s6 + $0xdc4] ss:$8 sps:$4 sm:$0xff]  }
 0x364   : > { %11651 = vmatpush1.bf16.msra.mxu1 %v13750_v28  ;;  %v13832_v28 = vld [vmem:[%s16515_s6 + $0x1c0] ss:$8 sps:$4 sm:$0xff]  }
 0x365   : > { %12143 = vmatpush1.bf16.msra.mxu0 %v13751_v31  ;;  %11652 = vmatprep.subr.bf16.mxu1 %v13752_v32  ;;  %v13835_v31 = vld [vmem:[%s16515_s6 + $0xdc0] ss:$8 sps:$4 sm:$0xff]   ;;  %v13840_v32 = vld [vmem:[%s16515_s6 + $0x1d4] ss:$8 sps:$4 sm:$0xff]  }
 0x366   : > { %12144 = vmatprep.subr.bf16.mxu0 %v13754_v33  ;;  %v13843_v33 = vld [vmem:[%s16515_s6 + $0xdd4] ss:$8 sps:$4 sm:$0xff]  }
 0x368   : > { %11653 = vmatpush1.bf16.msra.mxu1 %v13756_v34  ;;  %v13838_v34 = vld [vmem:[%s16515_s6 + $0x1d0] ss:$8 sps:$4 sm:$0xff]  }
 0x369   : > { %12145 = vmatpush1.bf16.msra.mxu0 %v13757_v35  ;;  %11663 = vmatprep.subr.bf16.mxu1 %v13761_v36  ;;  %v13841_v35 = vld [vmem:[%s16515_s6 + $0xdd0] ss:$8 sps:$4 sm:$0xff]   ;;  %v13846_v36 = vld [vmem:[%s16515_s6 + $0x1e4] ss:$8 sps:$4 sm:$0xff]  }
 0x36a   : > { %12155 = vmatprep.subr.bf16.mxu0 %v13765_v37  ;;  %v13849_v37 = vld [vmem:[%s16515_s6 + $0xde4] ss:$8 sps:$4 sm:$0xff]  }
 0x36b   : > { %11655 = vmatmul.mubr.bf16.vlgmr.msra.gmra.mrb[0].mxu1 %v16610_v42 }
 0x36c   : > { %12147 = vmatmul.mubr.bf16.vlgmr.msra.gmra.mrb[0].mxu0 %v16614_v43  ;;  %11664 = vmatpush1.bf16.msra.mxu1 %v13759_v38  ;;  %v7345_v38 = vcombine.high %v16508_v20, %v16508_v20 }
 0x36d   : > { %12156 = vmatpush1.bf16.msra.mxu0 %v13763_v39  ;;  %11665 = vmatprep.subr.bf16.mxu1 %v13768_v44  ;;  %v7492_v39 = vcombine.high %v16513_v22, %v16513_v22  ;;  %v13844_v44 = vld [vmem:[%s16515_s6 + $0x1e0] ss:$8 sps:$4 sm:$0xff]   ;;  %v13853_v22 = vld [vmem:[%s16515_s6 + $0xdf0] ss:$8 sps:$4 sm:$0xff]  }
 0x36e   : > { %12157 = vmatprep.subr.bf16.mxu0 %v13771_v45  ;;  %11695 = vmatprep.mubr.bf16.mxu1 %v7392_v46  ;;  %v13847_v45 = vld [vmem:[%s16515_s6 + $0xde0] ss:$8 sps:$4 sm:$0xff]   ;;  %v13852_v46 = vld [vmem:[%s16515_s6 + $0x1f4] ss:$8 sps:$4 sm:$0xff]  }
 0x36f   : > { %12187 = vmatprep.mubr.bf16.mxu0 %v7539_v29  ;;  %v13855_v29 = vld [vmem:[%s16515_s6 + $0xdf4] ss:$8 sps:$4 sm:$0xff]   ;;  %v16688_v20 = vrot.slane %v7492_v39, %v16520_v25  ;;  %v13925_v39 = vld [vmem:[%s16515_s6 + $0xeb0] ss:$8 sps:$4 sm:$0xff]  }
 0x370   : > { %11666 = vmatpush1.bf16.msra.mxu1 %v13766_v30  ;;  %v16685_v30 = vrot.slane %v7345_v38, %v16520_v25  ;;  %v13922_v38 = vld [vmem:[%s16515_s6 + $0x2b0] ss:$8 sps:$4 sm:$0xff]  }
 0x371   : > { %12158 = vmatpush1.bf16.msra.mxu0 %v13769_v47  ;;  %11667 = vmatprep.subr.bf16.mxu1 %v13774_v48  ;;  %v13850_v47 = vld [vmem:[%s16515_s6 + $0x1f0] ss:$8 sps:$4 sm:$0xff]   ;;  %v13858_v48 = vld [vmem:[%s16515_s6 + $0x204] ss:$8 sps:$4 sm:$0xff]  }
 0x372   : > { %12159 = vmatprep.subr.bf16.mxu0 %v13777_v40  ;;  %v13861_v40 = vld [vmem:[%s16515_s6 + $0xe04] ss:$8 sps:$4 sm:$0xff]  }
 0x374   : > { %11668 = vmatpush1.bf16.msra.mxu1 %v13772_v41  ;;  %v7361_v41 = vcombine.high %v16685_v30, %v16685_v30 }
 0x375   : > { %12160 = vmatpush1.bf16.msra.mxu0 %v13775_v49  ;;  %11669 = vmatprep.subr.bf16.mxu1 %v13780_v50  ;;  %v7508_v49 = vcombine.high %v16688_v20, %v16688_v20  ;;  %v7390_v50 = vcombine.high %v16610_v42, %v16610_v42 }
 0x376   : > { %12161 = vmatprep.subr.bf16.mxu0 %v13783_v51  ;;  %v7537_v51 = vcombine.high %v16614_v43, %v16614_v43  ;;  %v13862_v43 = vld [vmem:[%s16515_s6 + $0x210] ss:$8 sps:$4 sm:$0xff]  }
 0x377   : > { %v16710_v42 = vrot.slane %v7508_v49, %v16520_v25  ;;  %v13945_v49 = vld [vmem:[%s16515_s6 + $0xee4] ss:$8 sps:$4 sm:$0xff]  }
 0x378   : > { %11670 = vmatpush1.bf16.msra.mxu1 %v13778_v52  ;;  %v13856_v52 = vld [vmem:[%s16515_s6 + $0x200] ss:$8 sps:$4 sm:$0xff]  }
 0x379   : > { %12162 = vmatpush1.bf16.msra.mxu0 %v13781_v53  ;;  %11671 = vmatprep.subr.bf16.mxu1 %v13786_v54  ;;  %v13859_v53 = vld [vmem:[%s16515_s6 + $0xe00] ss:$8 sps:$4 sm:$0xff]   ;;  %v13864_v54 = vld [vmem:[%s16515_s6 + $0x214] ss:$8 sps:$4 sm:$0xff]  }
 0x37a   : > { %12163 = vmatprep.subr.bf16.mxu0 %v13789_v55  ;;  %v13867_v55 = vld [vmem:[%s16515_s6 + $0xe14] ss:$8 sps:$4 sm:$0xff]  }
 0x37c   : > { %11672 = vmatpush1.bf16.msra.mxu1 %v13784_v56  ;;  %v16707_v56 = vrot.slane %v7361_v41, %v16520_v25  ;;  %v13942_v41 = vld [vmem:[%s16515_s6 + $0x2e4] ss:$8 sps:$4 sm:$0xff]  }
 0x37d   : > { %12164 = vmatpush1.bf16.msra.mxu0 %v13787_v57  ;;  %11673 = vmatprep.subr.bf16.mxu1 %v13792_v58  ;;  %v13865_v57 = vld [vmem:[%s16515_s6 + $0xe10] ss:$8 sps:$4 sm:$0xff]   ;;  %v13870_v58 = vld [vmem:[%s16515_s6 + $0x224] ss:$8 sps:$4 sm:$0xff]  }
 0x37e   : > { %12165 = vmatprep.subr.bf16.mxu0 %v13795_v59  ;;  %v13873_v59 = vld [vmem:[%s16515_s6 + $0xe24] ss:$8 sps:$4 sm:$0xff]  }
 0x380   : > { %11674 = vmatpush1.bf16.msra.mxu1 %v13790_v60  ;;  %v13868_v60 = vld [vmem:[%s16515_s6 + $0x220] ss:$8 sps:$4 sm:$0xff]  }
 0x381   : > { %12166 = vmatpush1.bf16.msra.mxu0 %v13793_v61  ;;  %11675 = vmatprep.subr.bf16.mxu1 %v13798_v62  ;;  %v13871_v61 = vld [vmem:[%s16515_s6 + $0xe20] ss:$8 sps:$4 sm:$0xff]   ;;  %v13876_v62 = vld [vmem:[%s16515_s6 + $0x234] ss:$8 sps:$4 sm:$0xff]  }
 0x382   : > { %12167 = vmatprep.subr.bf16.mxu0 %v13801_v63  ;;  %v13879_v63 = vld [vmem:[%s16515_s6 + $0xe34] ss:$8 sps:$4 sm:$0xff]  }
 0x384   : > { %11676 = vmatpush1.bf16.msra.mxu1 %v13796_v0  ;;  %v13874_v0 = vld [vmem:[%s16515_s6 + $0x230] ss:$8 sps:$4 sm:$0xff]  }
 0x385   : > { %12168 = vmatpush1.bf16.msra.mxu0 %v13799_v1  ;;  %11677 = vmatprep.subr.bf16.mxu1 %v13804_v2  ;;  %v13877_v1 = vld [vmem:[%s16515_s6 + $0xe30] ss:$8 sps:$4 sm:$0xff]   ;;  %v13882_v2 = vld [vmem:[%s16515_s6 + $0x244] ss:$8 sps:$4 sm:$0xff]  }
 0x386   : > { %12169 = vmatprep.subr.bf16.mxu0 %v13807_v3  ;;  %v13885_v3 = vld [vmem:[%s16515_s6 + $0xe44] ss:$8 sps:$4 sm:$0xff]  }
 0x388   : > { %11678 = vmatpush1.bf16.msra.mxu1 %v13802_v4  ;;  %v13880_v4 = vld [vmem:[%s16515_s6 + $0x240] ss:$8 sps:$4 sm:$0xff]  }
 0x389   : > { %12170 = vmatpush1.bf16.msra.mxu0 %v13805_v5  ;;  %11679 = vmatprep.subr.bf16.mxu1 %v13810_v6  ;;  %v13883_v5 = vld [vmem:[%s16515_s6 + $0xe40] ss:$8 sps:$4 sm:$0xff]   ;;  %v13888_v6 = vld [vmem:[%s16515_s6 + $0x254] ss:$8 sps:$4 sm:$0xff]  }
 0x38a   : > { %12171 = vmatprep.subr.bf16.mxu0 %v13813_v7  ;;  %v13891_v7 = vld [vmem:[%s16515_s6 + $0xe54] ss:$8 sps:$4 sm:$0xff]  }
 0x38c   : > { %11680 = vmatpush1.bf16.msra.mxu1 %v13808_v8  ;;  %v13886_v8 = vld [vmem:[%s16515_s6 + $0x250] ss:$8 sps:$4 sm:$0xff]  }
 0x38d   : > { %12172 = vmatpush1.bf16.msra.mxu0 %v13811_v9  ;;  %11681 = vmatprep.subr.bf16.mxu1 %v13816_v10  ;;  %v13889_v9 = vld [vmem:[%s16515_s6 + $0xe50] ss:$8 sps:$4 sm:$0xff]   ;;  %v13894_v10 = vld [vmem:[%s16515_s6 + $0x264] ss:$8 sps:$4 sm:$0xff]  }
 0x38e   : > { %12173 = vmatprep.subr.bf16.mxu0 %v13819_v11  ;;  %v13897_v11 = vld [vmem:[%s16515_s6 + $0xe64] ss:$8 sps:$4 sm:$0xff]  }
 0x390   : > { %11682 = vmatpush1.bf16.msra.mxu1 %v13814_v12  ;;  %v13892_v12 = vld [vmem:[%s16515_s6 + $0x260] ss:$8 sps:$4 sm:$0xff]  }
 0x391   : > { %12174 = vmatpush1.bf16.msra.mxu0 %v13817_v13  ;;  %11683 = vmatprep.subr.bf16.mxu1 %v13822_v14  ;;  %v13895_v13 = vld [vmem:[%s16515_s6 + $0xe60] ss:$8 sps:$4 sm:$0xff]   ;;  %v13900_v14 = vld [vmem:[%s16515_s6 + $0x274] ss:$8 sps:$4 sm:$0xff]  }
 0x392   : > { %12175 = vmatprep.subr.bf16.mxu0 %v13825_v15  ;;  %v13903_v15 = vld [vmem:[%s16515_s6 + $0xe74] ss:$8 sps:$4 sm:$0xff]  }
 0x394   : > { %11684 = vmatpush1.bf16.msra.mxu1 %v13820_v16  ;;  %v13898_v16 = vld [vmem:[%s16515_s6 + $0x270] ss:$8 sps:$4 sm:$0xff]  }
 0x395   : > { %12176 = vmatpush1.bf16.msra.mxu0 %v13823_v17  ;;  %11685 = vmatprep.subr.bf16.mxu1 %v13828_v18  ;;  %v13901_v17 = vld [vmem:[%s16515_s6 + $0xe70] ss:$8 sps:$4 sm:$0xff]   ;;  %v13906_v18 = vld [vmem:[%s16515_s6 + $0x284] ss:$8 sps:$4 sm:$0xff]  }
 0x396   : > { %12177 = vmatprep.subr.bf16.mxu0 %v13831_v21  ;;  %v13909_v21 = vld [vmem:[%s16515_s6 + $0xe84] ss:$8 sps:$4 sm:$0xff]  }
 0x398   : > { %11686 = vmatpush1.bf16.msra.mxu1 %v13826_v23  ;;  %v13904_v23 = vld [vmem:[%s16515_s6 + $0x280] ss:$8 sps:$4 sm:$0xff]  }
 0x399   : > { %12178 = vmatpush1.bf16.msra.mxu0 %v13829_v24  ;;  %11687 = vmatprep.subr.bf16.mxu1 %v13834_v26  ;;  %v13907_v24 = vld [vmem:[%s16515_s6 + $0xe80] ss:$8 sps:$4 sm:$0xff]   ;;  %v13912_v26 = vld [vmem:[%s16515_s6 + $0x294] ss:$8 sps:$4 sm:$0xff]  }
 0x39a   : > { %12179 = vmatprep.subr.bf16.mxu0 %v13837_v27  ;;  %v13915_v27 = vld [vmem:[%s16515_s6 + $0xe94] ss:$8 sps:$4 sm:$0xff]  }
 0x39c   : > { %11688 = vmatpush1.bf16.msra.mxu1 %v13832_v28  ;;  %v13910_v28 = vld [vmem:[%s16515_s6 + $0x290] ss:$8 sps:$4 sm:$0xff]  }
 0x39d   : > { %12180 = vmatpush1.bf16.msra.mxu0 %v13835_v31  ;;  %11689 = vmatprep.subr.bf16.mxu1 %v13840_v32  ;;  %v13913_v31 = vld [vmem:[%s16515_s6 + $0xe90] ss:$8 sps:$4 sm:$0xff]   ;;  %v13918_v32 = vld [vmem:[%s16515_s6 + $0x2a4] ss:$8 sps:$4 sm:$0xff]  }
 0x39e   : > { %12181 = vmatprep.subr.bf16.mxu0 %v13843_v33  ;;  %v13921_v33 = vld [vmem:[%s16515_s6 + $0xea4] ss:$8 sps:$4 sm:$0xff]  }
 0x3a0   : > { %11690 = vmatpush1.bf16.msra.mxu1 %v13838_v34  ;;  %v13916_v34 = vld [vmem:[%s16515_s6 + $0x2a0] ss:$8 sps:$4 sm:$0xff]  }
 0x3a1   : > { %12182 = vmatpush1.bf16.msra.mxu0 %v13841_v35  ;;  %11691 = vmatprep.subr.bf16.mxu1 %v13846_v36  ;;  %v13919_v35 = vld [vmem:[%s16515_s6 + $0xea0] ss:$8 sps:$4 sm:$0xff]   ;;  %v13924_v36 = vld [vmem:[%s16515_s6 + $0x2b4] ss:$8 sps:$4 sm:$0xff]  }
 0x3a2   : > { %12183 = vmatprep.subr.bf16.mxu0 %v13849_v37  ;;  %v13927_v37 = vld [vmem:[%s16515_s6 + $0xeb4] ss:$8 sps:$4 sm:$0xff]  }
 0x3a4   : > { %11692 = vmatpush1.bf16.msra.mxu1 %v13844_v44  ;;  %v13930_v44 = vld [vmem:[%s16515_s6 + $0x2c4] ss:$8 sps:$4 sm:$0xff]  }
 0x3a5   : > { %12184 = vmatpush1.bf16.msra.mxu0 %v13847_v45  ;;  %11693 = vmatprep.subr.bf16.mxu1 %v13852_v46  ;;  %v13933_v45 = vld [vmem:[%s16515_s6 + $0xec4] ss:$8 sps:$4 sm:$0xff]   ;;  %v13928_v46 = vld [vmem:[%s16515_s6 + $0x2c0] ss:$8 sps:$4 sm:$0xff]  }
 0x3a6   : > { %12185 = vmatprep.subr.bf16.mxu0 %v13855_v29  ;;  %v13931_v29 = vld [vmem:[%s16515_s6 + $0xec0] ss:$8 sps:$4 sm:$0xff]  }
 0x3a8   : > { %11694 = vmatpush1.bf16.msra.mxu1 %v13850_v47  ;;  %v13936_v47 = vld [vmem:[%s16515_s6 + $0x2d4] ss:$8 sps:$4 sm:$0xff]  }
 0x3a9   : > { %12186 = vmatpush1.bf16.msra.mxu0 %v13853_v22  ;;  %11704 = vmatprep.subr.bf16.mxu1 %v13858_v48  ;;  %v13939_v22 = vld [vmem:[%s16515_s6 + $0xed4] ss:$8 sps:$4 sm:$0xff]   ;;  %v13934_v48 = vld [vmem:[%s16515_s6 + $0x2d0] ss:$8 sps:$4 sm:$0xff]  }
 0x3aa   : > { %12196 = vmatprep.subr.bf16.mxu0 %v13861_v40  ;;  %v13937_v40 = vld [vmem:[%s16515_s6 + $0xed0] ss:$8 sps:$4 sm:$0xff]  }
 0x3ab   : > { %11696 = vmatmul.mubr.bf16.vlgmr.msra.gmra.mrb[0].mxu1 %v7390_v50  ;;  %v13940_v50 = vld [vmem:[%s16515_s6 + $0x2e0] ss:$8 sps:$4 sm:$0xff]  }
 0x3ac   : > { %12188 = vmatmul.mubr.bf16.vlgmr.msra.gmra.mrb[0].mxu0 %v7537_v51  ;;  %11705 = vmatpush1.bf16.msra.mxu1 %v13856_v52  ;;  %v13943_v51 = vld [vmem:[%s16515_s6 + $0xee0] ss:$8 sps:$4 sm:$0xff]   ;;  %v13948_v52 = vld [vmem:[%s16515_s6 + $0x2f4] ss:$8 sps:$4 sm:$0xff]  }
 0x3ad   : > { %12197 = vmatpush1.bf16.msra.mxu0 %v13859_v53  ;;  %11706 = vmatprep.subr.bf16.mxu1 %v13864_v54  ;;  %v13951_v53 = vld [vmem:[%s16515_s6 + $0xef4] ss:$8 sps:$4 sm:$0xff]   ;;  %v13946_v54 = vld [vmem:[%s16515_s6 + $0x2f0] ss:$8 sps:$4 sm:$0xff]  }
 0x3ae   : > { %12198 = vmatprep.subr.bf16.mxu0 %v13867_v55  ;;  %11736 = vmatprep.mubr.bf16.mxu1 %v16707_v56  ;;  %v13949_v55 = vld [vmem:[%s16515_s6 + $0xef0] ss:$8 sps:$4 sm:$0xff]  }
 0x3af   : > { %12228 = vmatprep.mubr.bf16.mxu0 %v16710_v42 }
 0x3b0   : > { %11707 = vmatpush1.bf16.msra.mxu1 %v13862_v43  ;;  %v13954_v43 = vld [vmem:[%s16515_s6 + $0x304] ss:$8 sps:$4 sm:$0xff]  }
 0x3b1   : > { %12199 = vmatpush1.bf16.msra.mxu0 %v13865_v57  ;;  %11708 = vmatprep.subr.bf16.mxu1 %v13870_v58  ;;  %v13957_v57 = vld [vmem:[%s16515_s6 + $0xf04] ss:$8 sps:$4 sm:$0xff]   ;;  %v13952_v58 = vld [vmem:[%s16515_s6 + $0x300] ss:$8 sps:$4 sm:$0xff]  }
 0x3b2   : > { %12200 = vmatprep.subr.bf16.mxu0 %v13873_v59  ;;  %v13955_v59 = vld [vmem:[%s16515_s6 + $0xf00] ss:$8 sps:$4 sm:$0xff]  }
 0x3b4   : > { %11709 = vmatpush1.bf16.msra.mxu1 %v13868_v60  ;;  %v16778_v60 = vrot.slane %v16685_v30, %v16520_v25  ;;  %v7540_v30 = vcombine.high %v16710_v42, %v16710_v42  ;;  %v13964_v42 = vld [vmem:[%s16515_s6 + $0x320] ss:$8 sps:$4 sm:$0xff]  }
 0x3b5   : > { %12201 = vmatpush1.bf16.msra.mxu0 %v13871_v61  ;;  %11710 = vmatprep.subr.bf16.mxu1 %v13876_v62  ;;  %v16782_v61 = vrot.slane %v16688_v20, %v16520_v25  ;;  %v13960_v62 = vld [vmem:[%s16515_s6 + $0x314] ss:$8 sps:$4 sm:$0xff]   ;;  %v13958_v20 = vld [vmem:[%s16515_s6 + $0x310] ss:$8 sps:$4 sm:$0xff]  }
 0x3b6   : > { %12202 = vmatprep.subr.bf16.mxu0 %v13879_v63  ;;  %v13963_v63 = vld [vmem:[%s16515_s6 + $0xf14] ss:$8 sps:$4 sm:$0xff]  }
 0x3b8   : > { %11711 = vmatpush1.bf16.msra.mxu1 %v13874_v0  ;;  %v7393_v0 = vcombine.high %v16707_v56, %v16707_v56  ;;  %v13969_v56 = vld [vmem:[%s16515_s6 + $0xf24] ss:$8 sps:$4 sm:$0xff]  }
 0x3b9   : > { %12203 = vmatpush1.bf16.msra.mxu0 %v13877_v1  ;;  %11712 = vmatprep.subr.bf16.mxu1 %v13882_v2  ;;  %v13961_v1 = vld [vmem:[%s16515_s6 + $0xf10] ss:$8 sps:$4 sm:$0xff]   ;;  %v13966_v2 = vld [vmem:[%s16515_s6 + $0x324] ss:$8 sps:$4 sm:$0xff]  }
 0x3ba   : > { %12204 = vmatprep.subr.bf16.mxu0 %v13885_v3  ;;  %v13967_v3 = vld [vmem:[%s16515_s6 + $0xf20] ss:$8 sps:$4 sm:$0xff]  }
 0x3bc   : > { %11713 = vmatpush1.bf16.msra.mxu1 %v13880_v4  ;;  %v13972_v4 = vld [vmem:[%s16515_s6 + $0x334] ss:$8 sps:$4 sm:$0xff]  }
 0x3bd   : > { %12205 = vmatpush1.bf16.msra.mxu0 %v13883_v5  ;;  %11714 = vmatprep.subr.bf16.mxu1 %v13888_v6  ;;  %v13975_v5 = vld [vmem:[%s16515_s6 + $0xf34] ss:$8 sps:$4 sm:$0xff]   ;;  %v13970_v6 = vld [vmem:[%s16515_s6 + $0x330] ss:$8 sps:$4 sm:$0xff]  }
 0x3be   : > { %12206 = vmatprep.subr.bf16.mxu0 %v13891_v7  ;;  %v13973_v7 = vld [vmem:[%s16515_s6 + $0xf30] ss:$8 sps:$4 sm:$0xff]  }
 0x3c0   : > { %11715 = vmatpush1.bf16.msra.mxu1 %v13886_v8  ;;  %v13978_v8 = vld [vmem:[%s16515_s6 + $0x344] ss:$8 sps:$4 sm:$0xff]  }
 0x3c1   : > { %12207 = vmatpush1.bf16.msra.mxu0 %v13889_v9  ;;  %11716 = vmatprep.subr.bf16.mxu1 %v13894_v10  ;;  %v13981_v9 = vld [vmem:[%s16515_s6 + $0xf44] ss:$8 sps:$4 sm:$0xff]   ;;  %v13976_v10 = vld [vmem:[%s16515_s6 + $0x340] ss:$8 sps:$4 sm:$0xff]  }
 0x3c2   : > { %12208 = vmatprep.subr.bf16.mxu0 %v13897_v11  ;;  %v13979_v11 = vld [vmem:[%s16515_s6 + $0xf40] ss:$8 sps:$4 sm:$0xff]  }
 0x3c4   : > { %11717 = vmatpush1.bf16.msra.mxu1 %v13892_v12  ;;  %v13984_v12 = vld [vmem:[%s16515_s6 + $0x354] ss:$8 sps:$4 sm:$0xff]  }
 0x3c5   : > { %12209 = vmatpush1.bf16.msra.mxu0 %v13895_v13  ;;  %11718 = vmatprep.subr.bf16.mxu1 %v13900_v14  ;;  %v13987_v13 = vld [vmem:[%s16515_s6 + $0xf54] ss:$8 sps:$4 sm:$0xff]   ;;  %v13982_v14 = vld [vmem:[%s16515_s6 + $0x350] ss:$8 sps:$4 sm:$0xff]  }
 0x3c6   : > { %12210 = vmatprep.subr.bf16.mxu0 %v13903_v15  ;;  %v13985_v15 = vld [vmem:[%s16515_s6 + $0xf50] ss:$8 sps:$4 sm:$0xff]  }
 0x3c8   : > { %11719 = vmatpush1.bf16.msra.mxu1 %v13898_v16  ;;  %v13990_v16 = vld [vmem:[%s16515_s6 + $0x364] ss:$8 sps:$4 sm:$0xff]  }
 0x3c9   : > { %12211 = vmatpush1.bf16.msra.mxu0 %v13901_v17  ;;  %11720 = vmatprep.subr.bf16.mxu1 %v13906_v18  ;;  %v13993_v17 = vld [vmem:[%s16515_s6 + $0xf64] ss:$8 sps:$4 sm:$0xff]   ;;  %v13988_v18 = vld [vmem:[%s16515_s6 + $0x360] ss:$8 sps:$4 sm:$0xff]  }
 0x3ca   : > { %12212 = vmatprep.subr.bf16.mxu0 %v13909_v21  ;;  %v13991_v21 = vld [vmem:[%s16515_s6 + $0xf60] ss:$8 sps:$4 sm:$0xff]  }
 0x3cc   : > { %11721 = vmatpush1.bf16.msra.mxu1 %v13904_v23  ;;  %v13996_v23 = vld [vmem:[%s16515_s6 + $0x374] ss:$8 sps:$4 sm:$0xff]  }
 0x3cd   : > { %12213 = vmatpush1.bf16.msra.mxu0 %v13907_v24  ;;  %11722 = vmatprep.subr.bf16.mxu1 %v13912_v26  ;;  %v13999_v24 = vld [vmem:[%s16515_s6 + $0xf74] ss:$8 sps:$4 sm:$0xff]   ;;  %v13994_v26 = vld [vmem:[%s16515_s6 + $0x370] ss:$8 sps:$4 sm:$0xff]  }
 0x3ce   : > { %12214 = vmatprep.subr.bf16.mxu0 %v13915_v27  ;;  %v13997_v27 = vld [vmem:[%s16515_s6 + $0xf70] ss:$8 sps:$4 sm:$0xff]  }
 0x3d0   : > { %11723 = vmatpush1.bf16.msra.mxu1 %v13910_v28  ;;  %v14002_v28 = vld [vmem:[%s16515_s6 + $0x384] ss:$8 sps:$4 sm:$0xff]  }
 0x3d1   : > { %12215 = vmatpush1.bf16.msra.mxu0 %v13913_v31  ;;  %11724 = vmatprep.subr.bf16.mxu1 %v13918_v32  ;;  %v14005_v31 = vld [vmem:[%s16515_s6 + $0xf84] ss:$8 sps:$4 sm:$0xff]   ;;  %v14000_v32 = vld [vmem:[%s16515_s6 + $0x380] ss:$8 sps:$4 sm:$0xff]  }
 0x3d2   : > { %12216 = vmatprep.subr.bf16.mxu0 %v13921_v33  ;;  %v14003_v33 = vld [vmem:[%s16515_s6 + $0xf80] ss:$8 sps:$4 sm:$0xff]  }
 0x3d4   : > { %11725 = vmatpush1.bf16.msra.mxu1 %v13916_v34  ;;  %v14008_v34 = vld [vmem:[%s16515_s6 + $0x394] ss:$8 sps:$4 sm:$0xff]  }
 0x3d5   : > { %12217 = vmatpush1.bf16.msra.mxu0 %v13919_v35  ;;  %11726 = vmatprep.subr.bf16.mxu1 %v13924_v36  ;;  %v14011_v35 = vld [vmem:[%s16515_s6 + $0xf94] ss:$8 sps:$4 sm:$0xff]   ;;  %v14006_v36 = vld [vmem:[%s16515_s6 + $0x390] ss:$8 sps:$4 sm:$0xff]  }
 0x3d6   : > { %12218 = vmatprep.subr.bf16.mxu0 %v13927_v37  ;;  %v14009_v37 = vld [vmem:[%s16515_s6 + $0xf90] ss:$8 sps:$4 sm:$0xff]  }
 0x3d8   : > { %11727 = vmatpush1.bf16.msra.mxu1 %v13922_v38  ;;  %v14014_v38 = vld [vmem:[%s16515_s6 + $0x3a4] ss:$8 sps:$4 sm:$0xff]  }
 0x3d9   : > { %12219 = vmatpush1.bf16.msra.mxu0 %v13925_v39  ;;  %11728 = vmatprep.subr.bf16.mxu1 %v13930_v44  ;;  %v14017_v39 = vld [vmem:[%s16515_s6 + $0xfa4] ss:$8 sps:$4 sm:$0xff]   ;;  %v14012_v44 = vld [vmem:[%s16515_s6 + $0x3a0] ss:$8 sps:$4 sm:$0xff]  }
 0x3da   : > { %12220 = vmatprep.subr.bf16.mxu0 %v13933_v45  ;;  %v14015_v45 = vld [vmem:[%s16515_s6 + $0xfa0] ss:$8 sps:$4 sm:$0xff]  }
 0x3dc   : > { %11729 = vmatpush1.bf16.msra.mxu1 %v13928_v46  ;;  %v14020_v46 = vld [vmem:[%s16515_s6 + $0x3b4] ss:$8 sps:$4 sm:$0xff]  }
 0x3dd   : > { %12221 = vmatpush1.bf16.msra.mxu0 %v13931_v29  ;;  %11730 = vmatprep.subr.bf16.mxu1 %v13936_v47  ;;  %v14023_v29 = vld [vmem:[%s16515_s6 + $0xfb4] ss:$8 sps:$4 sm:$0xff]   ;;  %v14018_v47 = vld [vmem:[%s16515_s6 + $0x3b0] ss:$8 sps:$4 sm:$0xff]  }
 0x3de   : > { %12222 = vmatprep.subr.bf16.mxu0 %v13939_v22  ;;  %v14021_v22 = vld [vmem:[%s16515_s6 + $0xfb0] ss:$8 sps:$4 sm:$0xff]  }
 0x3e0   : > { %11731 = vmatpush1.bf16.msra.mxu1 %v13934_v48  ;;  %v14026_v48 = vld [vmem:[%s16515_s6 + $0x3c4] ss:$8 sps:$4 sm:$0xff]  }
 0x3e1   : > { %12223 = vmatpush1.bf16.msra.mxu0 %v13937_v40  ;;  %11732 = vmatprep.subr.bf16.mxu1 %v13942_v41  ;;  %v14029_v40 = vld [vmem:[%s16515_s6 + $0xfc4] ss:$8 sps:$4 sm:$0xff]   ;;  %v14024_v41 = vld [vmem:[%s16515_s6 + $0x3c0] ss:$8 sps:$4 sm:$0xff]  }
 0x3e2   : > { %12224 = vmatprep.subr.bf16.mxu0 %v13945_v49  ;;  %v14027_v49 = vld [vmem:[%s16515_s6 + $0xfc0] ss:$8 sps:$4 sm:$0xff]  }
 0x3e4   : > { %11733 = vmatpush1.bf16.msra.mxu1 %v13940_v50  ;;  %v14032_v50 = vld [vmem:[%s16515_s6 + $0x3d4] ss:$8 sps:$4 sm:$0xff]  }
 0x3e5   : > { %12225 = vmatpush1.bf16.msra.mxu0 %v13943_v51  ;;  %11734 = vmatprep.subr.bf16.mxu1 %v13948_v52  ;;  %v14035_v51 = vld [vmem:[%s16515_s6 + $0xfd4] ss:$8 sps:$4 sm:$0xff]   ;;  %v14030_v52 = vld [vmem:[%s16515_s6 + $0x3d0] ss:$8 sps:$4 sm:$0xff]  }
 0x3e6   : > { %12226 = vmatprep.subr.bf16.mxu0 %v13951_v53  ;;  %v14033_v53 = vld [vmem:[%s16515_s6 + $0xfd0] ss:$8 sps:$4 sm:$0xff]  }
 0x3e8   : > { %11735 = vmatpush1.bf16.msra.mxu1 %v13946_v54  ;;  %v14038_v54 = vld [vmem:[%s16515_s6 + $0x3e4] ss:$8 sps:$4 sm:$0xff]  }
 0x3e9   : > { %12227 = vmatpush1.bf16.msra.mxu0 %v13949_v55  ;;  %11745 = vmatprep.subr.bf16.mxu1 %v13954_v43  ;;  %v14041_v55 = vld [vmem:[%s16515_s6 + $0xfe4] ss:$8 sps:$4 sm:$0xff]  }
 0x3ea   : > { %12237 = vmatprep.subr.bf16.mxu0 %v13957_v57  ;;  %v16847_v43 = vld.sshfl [vmem:[%s17576_s0 + $0x8] sm:$0xff pattern:$0x75316420]  ;;  %v16852_v57 = vld.sshfl [vmem:[%s17576_s0 + $0x20] sm:$0xff pattern:$0x75316420] }
 0x3eb   : > { %11737 = vmatmul.mubr.bf16.vlgmr.msra.gmra.mrb[0].mxu1 %v16778_v60 }
 0x3ec   : > { %12229 = vmatmul.mubr.bf16.vlgmr.msra.gmra.mrb[0].mxu0 %v16782_v61  ;;  %11746 = vmatpush1.bf16.msra.mxu1 %v13952_v58  ;;  %v14036_v58 = vld [vmem:[%s16515_s6 + $0x3e0] ss:$8 sps:$4 sm:$0xff]  }
 0x3ed   : > { %12238 = vmatpush1.bf16.msra.mxu0 %v13955_v59  ;;  %11747 = vmatprep.subr.bf16.mxu1 %v13960_v62  ;;  %v14039_v59 = vld [vmem:[%s16515_s6 + $0xfe0] ss:$8 sps:$4 sm:$0xff]   ;;  %v14044_v62 = vld [vmem:[%s16515_s6 + $0x3f4] ss:$8 sps:$4 sm:$0xff]  }
 0x3ee   : > { %12239 = vmatprep.subr.bf16.mxu0 %v13963_v63  ;;  %11777 = vmatprep.mubr.bf16.mxu1 %v7393_v0  ;;  %v14047_v63 = vld [vmem:[%s16515_s6 + $0xff4] ss:$8 sps:$4 sm:$0xff]   ;;  %v14042_v0 = vld [vmem:[%s16515_s6 + $0x3f0] ss:$8 sps:$4 sm:$0xff]  }
 0x3ef   : > { %12269 = vmatprep.mubr.bf16.mxu0 %v7540_v30  ;;  %v14045_v30 = vld [vmem:[%s16515_s6 + $0xff0] ss:$8 sps:$4 sm:$0xff]  }
 0x3f0   : > { %11748 = vmatpush1.bf16.msra.mxu1 %v13958_v20  ;;  %v14050_v20 = vld [vmem:[%s16515_s6 + $0x404] ss:$8 sps:$4 sm:$0xff]  }
 0x3f1   : > { %12240 = vmatpush1.bf16.msra.mxu0 %v13961_v1  ;;  %11749 = vmatprep.subr.bf16.mxu1 %v13966_v2  ;;  %v14053_v1 = vld [vmem:[%s16515_s6 + $0x1004] ss:$8 sps:$4 sm:$0xff]   ;;  %v7409_v2 = vcombine.high %v16847_v43, %v16847_v43 }
 0x3f2   : > { %12241 = vmatprep.subr.bf16.mxu0 %v13969_v56  ;;  %v7556_v56 = vcombine.high %v16852_v57, %v16852_v57 }
 0x3f4   : > { %11750 = vmatpush1.bf16.msra.mxu1 %v13964_v42  ;;  %v7391_v42 = vcombine.high %v16778_v60, %v16778_v60  ;;  %v16878_v60 = vrot.slane %v7556_v56, %v16520_v25  ;;  %v14137_v56 = vld [vmem:[%s16515_s6 + $0x10e4] ss:$8 sps:$4 sm:$0xff]  }
 0x3f5   : > { %12242 = vmatpush1.bf16.msra.mxu0 %v13967_v3  ;;  %11751 = vmatprep.subr.bf16.mxu1 %v13972_v4  ;;  %v7538_v3 = vcombine.high %v16782_v61, %v16782_v61  ;;  %v14048_v4 = vld [vmem:[%s16515_s6 + $0x400] ss:$8 sps:$4 sm:$0xff]   ;;  %v14054_v61 = vld [vmem:[%s16515_s6 + $0x410] ss:$8 sps:$4 sm:$0xff]  }
 0x3f6   : > { %12243 = vmatprep.subr.bf16.mxu0 %v13975_v5  ;;  %v14051_v5 = vld [vmem:[%s16515_s6 + $0x1000] ss:$8 sps:$4 sm:$0xff]  }
 0x3f8   : > { %11752 = vmatpush1.bf16.msra.mxu1 %v13970_v6  ;;  %v14056_v6 = vld [vmem:[%s16515_s6 + $0x414] ss:$8 sps:$4 sm:$0xff]  }
 0x3f9   : > { %12244 = vmatpush1.bf16.msra.mxu0 %v13973_v7  ;;  %11753 = vmatprep.subr.bf16.mxu1 %v13978_v8  ;;  %v14059_v7 = vld [vmem:[%s16515_s6 + $0x1014] ss:$8 sps:$4 sm:$0xff]   ;;  %v16875_v8 = vrot.slane %v7409_v2, %v16520_v25  ;;  %v14134_v2 = vld [vmem:[%s16515_s6 + $0x4e4] ss:$8 sps:$4 sm:$0xff]  }
 0x3fa   : > { %12245 = vmatprep.subr.bf16.mxu0 %v13981_v9  ;;  %v14057_v9 = vld [vmem:[%s16515_s6 + $0x1010] ss:$8 sps:$4 sm:$0xff]  }
 0x3fc   : > { %11754 = vmatpush1.bf16.msra.mxu1 %v13976_v10  ;;  %v14062_v10 = vld [vmem:[%s16515_s6 + $0x424] ss:$8 sps:$4 sm:$0xff]  }
 0x3fd   : > { %12246 = vmatpush1.bf16.msra.mxu0 %v13979_v11  ;;  %11755 = vmatprep.subr.bf16.mxu1 %v13984_v12  ;;  %v14065_v11 = vld [vmem:[%s16515_s6 + $0x1024] ss:$8 sps:$4 sm:$0xff]   ;;  %v14060_v12 = vld [vmem:[%s16515_s6 + $0x420] ss:$8 sps:$4 sm:$0xff]  }
 0x3fe   : > { %12247 = vmatprep.subr.bf16.mxu0 %v13987_v13  ;;  %v14063_v13 = vld [vmem:[%s16515_s6 + $0x1020] ss:$8 sps:$4 sm:$0xff]  }
 0x400   : > { %11756 = vmatpush1.bf16.msra.mxu1 %v13982_v14  ;;  %v14068_v14 = vld [vmem:[%s16515_s6 + $0x434] ss:$8 sps:$4 sm:$0xff]  }
 0x401   : > { %12248 = vmatpush1.bf16.msra.mxu0 %v13985_v15  ;;  %11757 = vmatprep.subr.bf16.mxu1 %v13990_v16  ;;  %v14071_v15 = vld [vmem:[%s16515_s6 + $0x1034] ss:$8 sps:$4 sm:$0xff]   ;;  %v14066_v16 = vld [vmem:[%s16515_s6 + $0x430] ss:$8 sps:$4 sm:$0xff]  }
 0x402   : > { %12249 = vmatprep.subr.bf16.mxu0 %v13993_v17  ;;  %v14069_v17 = vld [vmem:[%s16515_s6 + $0x1030] ss:$8 sps:$4 sm:$0xff]  }
 0x404   : > { %11758 = vmatpush1.bf16.msra.mxu1 %v13988_v18  ;;  %v14074_v18 = vld [vmem:[%s16515_s6 + $0x444] ss:$8 sps:$4 sm:$0xff]  }
 0x405   : > { %12250 = vmatpush1.bf16.msra.mxu0 %v13991_v21  ;;  %11759 = vmatprep.subr.bf16.mxu1 %v13996_v23  ;;  %v14077_v21 = vld [vmem:[%s16515_s6 + $0x1044] ss:$8 sps:$4 sm:$0xff]   ;;  %v14072_v23 = vld [vmem:[%s16515_s6 + $0x440] ss:$8 sps:$4 sm:$0xff]  }
 0x406   : > { %12251 = vmatprep.subr.bf16.mxu0 %v13999_v24  ;;  %v14075_v24 = vld [vmem:[%s16515_s6 + $0x1040] ss:$8 sps:$4 sm:$0xff]  }
 0x408   : > { %11760 = vmatpush1.bf16.msra.mxu1 %v13994_v26  ;;  %v14080_v26 = vld [vmem:[%s16515_s6 + $0x454] ss:$8 sps:$4 sm:$0xff]  }
 0x409   : > { %12252 = vmatpush1.bf16.msra.mxu0 %v13997_v27  ;;  %11761 = vmatprep.subr.bf16.mxu1 %v14002_v28  ;;  %v14083_v27 = vld [vmem:[%s16515_s6 + $0x1054] ss:$8 sps:$4 sm:$0xff]   ;;  %v14078_v28 = vld [vmem:[%s16515_s6 + $0x450] ss:$8 sps:$4 sm:$0xff]  }
 0x40a   : > { %12253 = vmatprep.subr.bf16.mxu0 %v14005_v31  ;;  %v14081_v31 = vld [vmem:[%s16515_s6 + $0x1050] ss:$8 sps:$4 sm:$0xff]  }
 0x40c   : > { %11762 = vmatpush1.bf16.msra.mxu1 %v14000_v32  ;;  %v14086_v32 = vld [vmem:[%s16515_s6 + $0x464] ss:$8 sps:$4 sm:$0xff]  }
 0x40d   : > { %12254 = vmatpush1.bf16.msra.mxu0 %v14003_v33  ;;  %11763 = vmatprep.subr.bf16.mxu1 %v14008_v34  ;;  %v14089_v33 = vld [vmem:[%s16515_s6 + $0x1064] ss:$8 sps:$4 sm:$0xff]   ;;  %v14084_v34 = vld [vmem:[%s16515_s6 + $0x460] ss:$8 sps:$4 sm:$0xff]  }
 0x40e   : > { %12255 = vmatprep.subr.bf16.mxu0 %v14011_v35  ;;  %v14087_v35 = vld [vmem:[%s16515_s6 + $0x1060] ss:$8 sps:$4 sm:$0xff]  }
 0x410   : > { %11764 = vmatpush1.bf16.msra.mxu1 %v14006_v36  ;;  %v14092_v36 = vld [vmem:[%s16515_s6 + $0x474] ss:$8 sps:$4 sm:$0xff]  }
 0x411   : > { %12256 = vmatpush1.bf16.msra.mxu0 %v14009_v37  ;;  %11765 = vmatprep.subr.bf16.mxu1 %v14014_v38  ;;  %v14095_v37 = vld [vmem:[%s16515_s6 + $0x1074] ss:$8 sps:$4 sm:$0xff]   ;;  %v14090_v38 = vld [vmem:[%s16515_s6 + $0x470] ss:$8 sps:$4 sm:$0xff]  }
 0x412   : > { %12257 = vmatprep.subr.bf16.mxu0 %v14017_v39  ;;  %v14093_v39 = vld [vmem:[%s16515_s6 + $0x1070] ss:$8 sps:$4 sm:$0xff]  }
 0x414   : > { %11766 = vmatpush1.bf16.msra.mxu1 %v14012_v44  ;;  %v14098_v44 = vld [vmem:[%s16515_s6 + $0x484] ss:$8 sps:$4 sm:$0xff]  }
 0x415   : > { %12258 = vmatpush1.bf16.msra.mxu0 %v14015_v45  ;;  %11767 = vmatprep.subr.bf16.mxu1 %v14020_v46  ;;  %v14101_v45 = vld [vmem:[%s16515_s6 + $0x1084] ss:$8 sps:$4 sm:$0xff]   ;;  %v14096_v46 = vld [vmem:[%s16515_s6 + $0x480] ss:$8 sps:$4 sm:$0xff]  }
 0x416   : > { %12259 = vmatprep.subr.bf16.mxu0 %v14023_v29  ;;  %v14099_v29 = vld [vmem:[%s16515_s6 + $0x1080] ss:$8 sps:$4 sm:$0xff]  }
 0x418   : > { %11768 = vmatpush1.bf16.msra.mxu1 %v14018_v47  ;;  %v14104_v47 = vld [vmem:[%s16515_s6 + $0x494] ss:$8 sps:$4 sm:$0xff]  }
 0x419   : > { %12260 = vmatpush1.bf16.msra.mxu0 %v14021_v22  ;;  %11769 = vmatprep.subr.bf16.mxu1 %v14026_v48  ;;  %v14107_v22 = vld [vmem:[%s16515_s6 + $0x1094] ss:$8 sps:$4 sm:$0xff]   ;;  %v14102_v48 = vld [vmem:[%s16515_s6 + $0x490] ss:$8 sps:$4 sm:$0xff]  }
 0x41a   : > { %12261 = vmatprep.subr.bf16.mxu0 %v14029_v40  ;;  %v14105_v40 = vld [vmem:[%s16515_s6 + $0x1090] ss:$8 sps:$4 sm:$0xff]  }
 0x41c   : > { %11770 = vmatpush1.bf16.msra.mxu1 %v14024_v41  ;;  %v14110_v41 = vld [vmem:[%s16515_s6 + $0x4a4] ss:$8 sps:$4 sm:$0xff]  }
 0x41d   : > { %12262 = vmatpush1.bf16.msra.mxu0 %v14027_v49  ;;  %11771 = vmatprep.subr.bf16.mxu1 %v14032_v50  ;;  %v14113_v49 = vld [vmem:[%s16515_s6 + $0x10a4] ss:$8 sps:$4 sm:$0xff]   ;;  %v14108_v50 = vld [vmem:[%s16515_s6 + $0x4a0] ss:$8 sps:$4 sm:$0xff]  }
 0x41e   : > { %12263 = vmatprep.subr.bf16.mxu0 %v14035_v51  ;;  %v14111_v51 = vld [vmem:[%s16515_s6 + $0x10a0] ss:$8 sps:$4 sm:$0xff]  }
 0x420   : > { %11772 = vmatpush1.bf16.msra.mxu1 %v14030_v52  ;;  %v14116_v52 = vld [vmem:[%s16515_s6 + $0x4b4] ss:$8 sps:$4 sm:$0xff]  }
 0x421   : > { %12264 = vmatpush1.bf16.msra.mxu0 %v14033_v53  ;;  %11773 = vmatprep.subr.bf16.mxu1 %v14038_v54  ;;  %v14119_v53 = vld [vmem:[%s16515_s6 + $0x10b4] ss:$8 sps:$4 sm:$0xff]   ;;  %v14114_v54 = vld [vmem:[%s16515_s6 + $0x4b0] ss:$8 sps:$4 sm:$0xff]  }
 0x422   : > { %12265 = vmatprep.subr.bf16.mxu0 %v14041_v55  ;;  %v14117_v55 = vld [vmem:[%s16515_s6 + $0x10b0] ss:$8 sps:$4 sm:$0xff]  }
 0x424   : > { %11774 = vmatpush1.bf16.msra.mxu1 %v14036_v58  ;;  %v14122_v58 = vld [vmem:[%s16515_s6 + $0x4c4] ss:$8 sps:$4 sm:$0xff]  }
 0x425   : > { %12266 = vmatpush1.bf16.msra.mxu0 %v14039_v59  ;;  %11775 = vmatprep.subr.bf16.mxu1 %v14044_v62  ;;  %v14125_v59 = vld [vmem:[%s16515_s6 + $0x10c4] ss:$8 sps:$4 sm:$0xff]   ;;  %v14120_v62 = vld [vmem:[%s16515_s6 + $0x4c0] ss:$8 sps:$4 sm:$0xff]  }
 0x426   : > { %12267 = vmatprep.subr.bf16.mxu0 %v14047_v63  ;;  %v14123_v63 = vld [vmem:[%s16515_s6 + $0x10c0] ss:$8 sps:$4 sm:$0xff]  }
 0x428   : > { %11776 = vmatpush1.bf16.msra.mxu1 %v14042_v0  ;;  %v14128_v0 = vld [vmem:[%s16515_s6 + $0x4d4] ss:$8 sps:$4 sm:$0xff]  }
 0x429   : > { %12268 = vmatpush1.bf16.msra.mxu0 %v14045_v30  ;;  %11786 = vmatprep.subr.bf16.mxu1 %v14050_v20  ;;  %v14131_v30 = vld [vmem:[%s16515_s6 + $0x10d4] ss:$8 sps:$4 sm:$0xff]   ;;  %v14126_v20 = vld [vmem:[%s16515_s6 + $0x4d0] ss:$8 sps:$4 sm:$0xff]  }
 0x42a   : > { %12278 = vmatprep.subr.bf16.mxu0 %v14053_v1  ;;  %v14129_v1 = vld [vmem:[%s16515_s6 + $0x10d0] ss:$8 sps:$4 sm:$0xff]  }
 0x42b   : > { %11778 = vmatmul.mubr.bf16.vlgmr.msra.gmra.mrb[0].mxu1 %v7391_v42  ;;  %v14132_v42 = vld [vmem:[%s16515_s6 + $0x4e0] ss:$8 sps:$4 sm:$0xff]  }
 0x42c   : > { %12270 = vmatmul.mubr.bf16.vlgmr.msra.gmra.mrb[0].mxu0 %v7538_v3  ;;  %11787 = vmatpush1.bf16.msra.mxu1 %v14048_v4  ;;  %v14135_v3 = vld [vmem:[%s16515_s6 + $0x10e0] ss:$8 sps:$4 sm:$0xff]   ;;  %v14140_v4 = vld [vmem:[%s16515_s6 + $0x4f4] ss:$8 sps:$4 sm:$0xff]  }
 0x42d   : > { %12279 = vmatpush1.bf16.msra.mxu0 %v14051_v5  ;;  %11788 = vmatprep.subr.bf16.mxu1 %v14056_v6  ;;  %v14143_v5 = vld [vmem:[%s16515_s6 + $0x10f4] ss:$8 sps:$4 sm:$0xff]   ;;  %v14138_v6 = vld [vmem:[%s16515_s6 + $0x4f0] ss:$8 sps:$4 sm:$0xff]  }
 0x42e   : > { %12280 = vmatprep.subr.bf16.mxu0 %v14059_v7  ;;  %11818 = vmatprep.mubr.bf16.mxu1 %v16875_v8  ;;  %v14141_v7 = vld [vmem:[%s16515_s6 + $0x10f0] ss:$8 sps:$4 sm:$0xff]  }
 0x42f   : > { %12310 = vmatprep.mubr.bf16.mxu0 %v16878_v60 }
 0x430   : > { %11789 = vmatpush1.bf16.msra.mxu1 %v14054_v61  ;;  %v14146_v61 = vld [vmem:[%s16515_s6 + $0x504] ss:$8 sps:$4 sm:$0xff]  }
 0x431   : > { %12281 = vmatpush1.bf16.msra.mxu0 %v14057_v9  ;;  %11790 = vmatprep.subr.bf16.mxu1 %v14062_v10  ;;  %v14149_v9 = vld [vmem:[%s16515_s6 + $0x1104] ss:$8 sps:$4 sm:$0xff]   ;;  %v16944_v10 = vrot.slane %v16847_v43, %v16520_v25  ;;  %v7441_v43 = vcombine.high %v16875_v8, %v16875_v8 }
 0x432   : > { %12282 = vmatprep.subr.bf16.mxu0 %v14065_v11  ;;  %v16948_v11 = vrot.slane %v16852_v57, %v16520_v25  ;;  %v14150_v57 = vld [vmem:[%s16515_s6 + $0x510] ss:$8 sps:$4 sm:$0xff]   ;;  %v14158_v8 = vld [vmem:[%s16515_s6 + $0x524] ss:$8 sps:$4 sm:$0xff]  }
 0x434   : > { %11791 = vmatpush1.bf16.msra.mxu1 %v14060_v12  ;;  %v14144_v12 = vld [vmem:[%s16515_s6 + $0x500] ss:$8 sps:$4 sm:$0xff]  }
 0x435   : > { %12283 = vmatpush1.bf16.msra.mxu0 %v14063_v13  ;;  %11792 = vmatprep.subr.bf16.mxu1 %v14068_v14  ;;  %v14147_v13 = vld [vmem:[%s16515_s6 + $0x1100] ss:$8 sps:$4 sm:$0xff]   ;;  %v14152_v14 = vld [vmem:[%s16515_s6 + $0x514] ss:$8 sps:$4 sm:$0xff]  }
 0x436   : > { %12284 = vmatprep.subr.bf16.mxu0 %v14071_v15  ;;  %v14155_v15 = vld [vmem:[%s16515_s6 + $0x1114] ss:$8 sps:$4 sm:$0xff]  }
 0x438   : > { %11793 = vmatpush1.bf16.msra.mxu1 %v14066_v16  ;;  %v7588_v16 = vcombine.high %v16878_v60, %v16878_v60  ;;  %v14156_v60 = vld [vmem:[%s16515_s6 + $0x520] ss:$8 sps:$4 sm:$0xff]  }
 0x439   : > { %12285 = vmatpush1.bf16.msra.mxu0 %v14069_v17  ;;  %11794 = vmatprep.subr.bf16.mxu1 %v14074_v18  ;;  %v14153_v17 = vld [vmem:[%s16515_s6 + $0x1110] ss:$8 sps:$4 sm:$0xff]   ;;  %v14161_v18 = vld [vmem:[%s16515_s6 + $0x1124] ss:$8 sps:$4 sm:$0xff]  }
 0x43a   : > { %12286 = vmatprep.subr.bf16.mxu0 %v14077_v21  ;;  %v14159_v21 = vld [vmem:[%s16515_s6 + $0x1120] ss:$8 sps:$4 sm:$0xff]  }
 0x43c   : > { %11795 = vmatpush1.bf16.msra.mxu1 %v14072_v23  ;;  %v14164_v23 = vld [vmem:[%s16515_s6 + $0x534] ss:$8 sps:$4 sm:$0xff]  }
 0x43d   : > { %12287 = vmatpush1.bf16.msra.mxu0 %v14075_v24  ;;  %11796 = vmatprep.subr.bf16.mxu1 %v14080_v26  ;;  %v14167_v24 = vld [vmem:[%s16515_s6 + $0x1134] ss:$8 sps:$4 sm:$0xff]   ;;  %v14162_v26 = vld [vmem:[%s16515_s6 + $0x530] ss:$8 sps:$4 sm:$0xff]  }
 0x43e   : > { %12288 = vmatprep.subr.bf16.mxu0 %v14083_v27  ;;  %v14165_v27 = vld [vmem:[%s16515_s6 + $0x1130] ss:$8 sps:$4 sm:$0xff]  }
 0x440   : > { %11797 = vmatpush1.bf16.msra.mxu1 %v14078_v28  ;;  %v14170_v28 = vld [vmem:[%s16515_s6 + $0x544] ss:$8 sps:$4 sm:$0xff]  }
 0x441   : > { %12289 = vmatpush1.bf16.msra.mxu0 %v14081_v31  ;;  %11798 = vmatprep.subr.bf16.mxu1 %v14086_v32  ;;  %v14173_v31 = vld [vmem:[%s16515_s6 + $0x1144] ss:$8 sps:$4 sm:$0xff]   ;;  %v14168_v32 = vld [vmem:[%s16515_s6 + $0x540] ss:$8 sps:$4 sm:$0xff]  }
 0x442   : > { %12290 = vmatprep.subr.bf16.mxu0 %v14089_v33  ;;  %v14171_v33 = vld [vmem:[%s16515_s6 + $0x1140] ss:$8 sps:$4 sm:$0xff]  }
 0x444   : > { %11799 = vmatpush1.bf16.msra.mxu1 %v14084_v34  ;;  %v14176_v34 = vld [vmem:[%s16515_s6 + $0x554] ss:$8 sps:$4 sm:$0xff]  }
 0x445   : > { %12291 = vmatpush1.bf16.msra.mxu0 %v14087_v35  ;;  %11800 = vmatprep.subr.bf16.mxu1 %v14092_v36  ;;  %v14179_v35 = vld [vmem:[%s16515_s6 + $0x1154] ss:$8 sps:$4 sm:$0xff]   ;;  %v14174_v36 = vld [vmem:[%s16515_s6 + $0x550] ss:$8 sps:$4 sm:$0xff]  }
 0x446   : > { %12292 = vmatprep.subr.bf16.mxu0 %v14095_v37  ;;  %v14177_v37 = vld [vmem:[%s16515_s6 + $0x1150] ss:$8 sps:$4 sm:$0xff]  }
 0x448   : > { %11801 = vmatpush1.bf16.msra.mxu1 %v14090_v38  ;;  %v14182_v38 = vld [vmem:[%s16515_s6 + $0x564] ss:$8 sps:$4 sm:$0xff]  }
 0x449   : > { %12293 = vmatpush1.bf16.msra.mxu0 %v14093_v39  ;;  %11802 = vmatprep.subr.bf16.mxu1 %v14098_v44  ;;  %v14185_v39 = vld [vmem:[%s16515_s6 + $0x1164] ss:$8 sps:$4 sm:$0xff]   ;;  %v14180_v44 = vld [vmem:[%s16515_s6 + $0x560] ss:$8 sps:$4 sm:$0xff]  }
 0x44a   : > { %12294 = vmatprep.subr.bf16.mxu0 %v14101_v45  ;;  %v14183_v45 = vld [vmem:[%s16515_s6 + $0x1160] ss:$8 sps:$4 sm:$0xff]  }
 0x44c   : > { %11803 = vmatpush1.bf16.msra.mxu1 %v14096_v46  ;;  %v14188_v46 = vld [vmem:[%s16515_s6 + $0x574] ss:$8 sps:$4 sm:$0xff]  }
 0x44d   : > { %12295 = vmatpush1.bf16.msra.mxu0 %v14099_v29  ;;  %11804 = vmatprep.subr.bf16.mxu1 %v14104_v47  ;;  %v14191_v29 = vld [vmem:[%s16515_s6 + $0x1174] ss:$8 sps:$4 sm:$0xff]   ;;  %v14186_v47 = vld [vmem:[%s16515_s6 + $0x570] ss:$8 sps:$4 sm:$0xff]  }
 0x44e   : > { %12296 = vmatprep.subr.bf16.mxu0 %v14107_v22  ;;  %v14189_v22 = vld [vmem:[%s16515_s6 + $0x1170] ss:$8 sps:$4 sm:$0xff]  }
 0x450   : > { %11805 = vmatpush1.bf16.msra.mxu1 %v14102_v48  ;;  %v14194_v48 = vld [vmem:[%s16515_s6 + $0x584] ss:$8 sps:$4 sm:$0xff]  }
 0x451   : > { %12297 = vmatpush1.bf16.msra.mxu0 %v14105_v40  ;;  %11806 = vmatprep.subr.bf16.mxu1 %v14110_v41  ;;  %v14197_v40 = vld [vmem:[%s16515_s6 + $0x1184] ss:$8 sps:$4 sm:$0xff]   ;;  %v14192_v41 = vld [vmem:[%s16515_s6 + $0x580] ss:$8 sps:$4 sm:$0xff]  }
 0x452   : > { %12298 = vmatprep.subr.bf16.mxu0 %v14113_v49  ;;  %v14195_v49 = vld [vmem:[%s16515_s6 + $0x1180] ss:$8 sps:$4 sm:$0xff]  }
 0x454   : > { %11807 = vmatpush1.bf16.msra.mxu1 %v14108_v50  ;;  %v14200_v50 = vld [vmem:[%s16515_s6 + $0x594] ss:$8 sps:$4 sm:$0xff]  }
 0x455   : > { %12299 = vmatpush1.bf16.msra.mxu0 %v14111_v51  ;;  %11808 = vmatprep.subr.bf16.mxu1 %v14116_v52  ;;  %v14203_v51 = vld [vmem:[%s16515_s6 + $0x1194] ss:$8 sps:$4 sm:$0xff]   ;;  %v14198_v52 = vld [vmem:[%s16515_s6 + $0x590] ss:$8 sps:$4 sm:$0xff]  }
 0x456   : > { %12300 = vmatprep.subr.bf16.mxu0 %v14119_v53  ;;  %v14201_v53 = vld [vmem:[%s16515_s6 + $0x1190] ss:$8 sps:$4 sm:$0xff]  }
 0x458   : > { %11809 = vmatpush1.bf16.msra.mxu1 %v14114_v54  ;;  %v14206_v54 = vld [vmem:[%s16515_s6 + $0x5a4] ss:$8 sps:$4 sm:$0xff]  }
 0x459   : > { %12301 = vmatpush1.bf16.msra.mxu0 %v14117_v55  ;;  %11810 = vmatprep.subr.bf16.mxu1 %v14122_v58  ;;  %v14209_v55 = vld [vmem:[%s16515_s6 + $0x11a4] ss:$8 sps:$4 sm:$0xff]   ;;  %v14204_v58 = vld [vmem:[%s16515_s6 + $0x5a0] ss:$8 sps:$4 sm:$0xff]  }
 0x45a   : > { %12302 = vmatprep.subr.bf16.mxu0 %v14125_v59  ;;  %v14207_v59 = vld [vmem:[%s16515_s6 + $0x11a0] ss:$8 sps:$4 sm:$0xff]  }
 0x45c   : > { %11811 = vmatpush1.bf16.msra.mxu1 %v14120_v62  ;;  %v14212_v62 = vld [vmem:[%s16515_s6 + $0x5b4] ss:$8 sps:$4 sm:$0xff]  }
 0x45d   : > { %12303 = vmatpush1.bf16.msra.mxu0 %v14123_v63  ;;  %11812 = vmatprep.subr.bf16.mxu1 %v14128_v0  ;;  %v14215_v63 = vld [vmem:[%s16515_s6 + $0x11b4] ss:$8 sps:$4 sm:$0xff]   ;;  %v14210_v0 = vld [vmem:[%s16515_s6 + $0x5b0] ss:$8 sps:$4 sm:$0xff]  }
 0x45e   : > { %12304 = vmatprep.subr.bf16.mxu0 %v14131_v30  ;;  %v14213_v30 = vld [vmem:[%s16515_s6 + $0x11b0] ss:$8 sps:$4 sm:$0xff]  }
 0x460   : > { %11813 = vmatpush1.bf16.msra.mxu1 %v14126_v20  ;;  %v14218_v20 = vld [vmem:[%s16515_s6 + $0x5c4] ss:$8 sps:$4 sm:$0xff]  }
 0x461   : > { %12305 = vmatpush1.bf16.msra.mxu0 %v14129_v1  ;;  %11814 = vmatprep.subr.bf16.mxu1 %v14134_v2  ;;  %v14221_v1 = vld [vmem:[%s16515_s6 + $0x11c4] ss:$8 sps:$4 sm:$0xff]   ;;  %v14216_v2 = vld [vmem:[%s16515_s6 + $0x5c0] ss:$8 sps:$4 sm:$0xff]  }
 0x462   : > { %12306 = vmatprep.subr.bf16.mxu0 %v14137_v56  ;;  %v14219_v56 = vld [vmem:[%s16515_s6 + $0x11c0] ss:$8 sps:$4 sm:$0xff]  }
 0x464   : > { %11815 = vmatpush1.bf16.msra.mxu1 %v14132_v42  ;;  %v14224_v42 = vld [vmem:[%s16515_s6 + $0x5d4] ss:$8 sps:$4 sm:$0xff]  }
 0x465   : > { %12307 = vmatpush1.bf16.msra.mxu0 %v14135_v3  ;;  %11816 = vmatprep.subr.bf16.mxu1 %v14140_v4  ;;  %v14227_v3 = vld [vmem:[%s16515_s6 + $0x11d4] ss:$8 sps:$4 sm:$0xff]   ;;  %v14222_v4 = vld [vmem:[%s16515_s6 + $0x5d0] ss:$8 sps:$4 sm:$0xff]  }
 0x466   : > { %12308 = vmatprep.subr.bf16.mxu0 %v14143_v5  ;;  %v14225_v5 = vld [vmem:[%s16515_s6 + $0x11d0] ss:$8 sps:$4 sm:$0xff]  }
 0x468   : > { %11817 = vmatpush1.bf16.msra.mxu1 %v14138_v6  ;;  %v14230_v6 = vld [vmem:[%s16515_s6 + $0x5e4] ss:$8 sps:$4 sm:$0xff]  }
 0x469   : > { %12309 = vmatpush1.bf16.msra.mxu0 %v14141_v7  ;;  %11827 = vmatprep.subr.bf16.mxu1 %v14146_v61  ;;  %v14233_v7 = vld [vmem:[%s16515_s6 + $0x11e4] ss:$8 sps:$4 sm:$0xff]  }
 0x46a   : > { %12319 = vmatprep.subr.bf16.mxu0 %v14149_v9  ;;  %v14844_v61 = vld [vmem:[%s17576_s0 + $0x8] sm:$0xff] }
 0x46b   : > { %11819 = vmatmul.mubr.bf16.vlgmr.msra.gmra.mrb[0].mxu1 %v16944_v10  ;;  %v7394_v9 = vcombine.high %v14844_v61, %v14844_v61  ;;  %v14308_v61 = vld [vmem:[%s16515_s6 + $0x6b4] ss:$8 sps:$4 sm:$0xff]  }
 0x46c   : > { %12311 = vmatmul.mubr.bf16.vlgmr.msra.gmra.mrb[0].mxu0 %v16948_v11  ;;  %11828 = vmatpush1.bf16.msra.mxu1 %v14144_v12  ;;  %v14845_v12 = vld [vmem:[%s17576_s0 + $0x20] sm:$0xff] }
 0x46d   : > { %12320 = vmatpush1.bf16.msra.mxu0 %v14147_v13  ;;  %11829 = vmatprep.subr.bf16.mxu1 %v14152_v14  ;;  %v7541_v13 = vcombine.high %v14845_v12, %v14845_v12  ;;  %v14228_v14 = vld [vmem:[%s16515_s6 + $0x5e0] ss:$8 sps:$4 sm:$0xff]   ;;  %v14306_v12 = vld [vmem:[%s16515_s6 + $0x6b0] ss:$8 sps:$4 sm:$0xff]  }
 0x46e   : > { %12321 = vmatprep.subr.bf16.mxu0 %v14155_v15  ;;  %11859 = vmatprep.mubr.bf16.mxu1 %v7441_v43  ;;  %v14231_v15 = vld [vmem:[%s16515_s6 + $0x11e0] ss:$8 sps:$4 sm:$0xff]   ;;  %v14236_v43 = vld [vmem:[%s16515_s6 + $0x5f4] ss:$8 sps:$4 sm:$0xff]  }
 0x46f   : > { %12351 = vmatprep.mubr.bf16.mxu0 %v7588_v16  ;;  %v14239_v16 = vld [vmem:[%s16515_s6 + $0x11f4] ss:$8 sps:$4 sm:$0xff]  }
 0x470   : > { %11830 = vmatpush1.bf16.msra.mxu1 %v14150_v57  ;;  %v17023_v57 = vrot.slane %v7394_v9, %v16520_v25  ;;  %v14311_v9 = vld [vmem:[%s16515_s6 + $0x12b4] ss:$8 sps:$4 sm:$0xff]  }
 0x471   : > { %12322 = vmatpush1.bf16.msra.mxu0 %v14153_v17  ;;  %11831 = vmatprep.subr.bf16.mxu1 %v14158_v8  ;;  %v17026_v17 = vrot.slane %v7541_v13, %v16520_v25  ;;  %v14234_v8 = vld [vmem:[%s16515_s6 + $0x5f0] ss:$8 sps:$4 sm:$0xff]  }
 0x472   : > { %12323 = vmatprep.subr.bf16.mxu0 %v14161_v18  ;;  %v14237_v18 = vld [vmem:[%s16515_s6 + $0x11f0] ss:$8 sps:$4 sm:$0xff]  }
 0x473   : > { %v14309_v13 = vld [vmem:[%s16515_s6 + $0x12b0] ss:$8 sps:$4 sm:$0xff]  }
 0x474   : > { %11832 = vmatpush1.bf16.msra.mxu1 %v14156_v60  ;;  %v14242_v60 = vld [vmem:[%s16515_s6 + $0x604] ss:$8 sps:$4 sm:$0xff]  }
 0x475   : > { %12324 = vmatpush1.bf16.msra.mxu0 %v14159_v21  ;;  %11833 = vmatprep.subr.bf16.mxu1 %v14164_v23  ;;  %v14245_v21 = vld [vmem:[%s16515_s6 + $0x1204] ss:$8 sps:$4 sm:$0xff]   ;;  %v7410_v23 = vcombine.high %v17023_v57, %v17023_v57 }
 0x476   : > { %12325 = vmatprep.subr.bf16.mxu0 %v14167_v24  ;;  %v7557_v24 = vcombine.high %v17026_v17, %v17026_v17 }
 0x478   : > { %11834 = vmatpush1.bf16.msra.mxu1 %v14162_v26  ;;  %v7439_v26 = vcombine.high %v16944_v10, %v16944_v10  ;;  %v17048_v10 = vrot.slane %v7557_v24, %v16520_v25  ;;  %v14329_v24 = vld [vmem:[%s16515_s6 + $0x12e4] ss:$8 sps:$4 sm:$0xff]  }
 0x479   : > { %12326 = vmatpush1.bf16.msra.mxu0 %v14165_v27  ;;  %11835 = vmatprep.subr.bf16.mxu1 %v14170_v28  ;;  %v7586_v27 = vcombine.high %v16948_v11, %v16948_v11  ;;  %v14240_v28 = vld [vmem:[%s16515_s6 + $0x600] ss:$8 sps:$4 sm:$0xff]   ;;  %v14246_v11 = vld [vmem:[%s16515_s6 + $0x610] ss:$8 sps:$4 sm:$0xff]  }
 0x47a   : > { %12327 = vmatprep.subr.bf16.mxu0 %v14173_v31  ;;  %v14243_v31 = vld [vmem:[%s16515_s6 + $0x1200] ss:$8 sps:$4 sm:$0xff]  }
 0x47c   : > { %11836 = vmatpush1.bf16.msra.mxu1 %v14168_v32  ;;  %v14248_v32 = vld [vmem:[%s16515_s6 + $0x614] ss:$8 sps:$4 sm:$0xff]  }
 0x47d   : > { %12328 = vmatpush1.bf16.msra.mxu0 %v14171_v33  ;;  %11837 = vmatprep.subr.bf16.mxu1 %v14176_v34  ;;  %v14251_v33 = vld [vmem:[%s16515_s6 + $0x1214] ss:$8 sps:$4 sm:$0xff]   ;;  %v17045_v34 = vrot.slane %v7410_v23, %v16520_v25  ;;  %v14326_v23 = vld [vmem:[%s16515_s6 + $0x6e4] ss:$8 sps:$4 sm:$0xff]  }
 0x47e   : > { %12329 = vmatprep.subr.bf16.mxu0 %v14179_v35  ;;  %v14249_v35 = vld [vmem:[%s16515_s6 + $0x1210] ss:$8 sps:$4 sm:$0xff]  }
 0x480   : > { %11838 = vmatpush1.bf16.msra.mxu1 %v14174_v36  ;;  %v14254_v36 = vld [vmem:[%s16515_s6 + $0x624] ss:$8 sps:$4 sm:$0xff]  }
 0x481   : > { %12330 = vmatpush1.bf16.msra.mxu0 %v14177_v37  ;;  %11839 = vmatprep.subr.bf16.mxu1 %v14182_v38  ;;  %v14257_v37 = vld [vmem:[%s16515_s6 + $0x1224] ss:$8 sps:$4 sm:$0xff]   ;;  %v14252_v38 = vld [vmem:[%s16515_s6 + $0x620] ss:$8 sps:$4 sm:$0xff]  }
 0x482   : > { %12331 = vmatprep.subr.bf16.mxu0 %v14185_v39  ;;  %v14255_v39 = vld [vmem:[%s16515_s6 + $0x1220] ss:$8 sps:$4 sm:$0xff]  }
 0x484   : > { %11840 = vmatpush1.bf16.msra.mxu1 %v14180_v44  ;;  %v14260_v44 = vld [vmem:[%s16515_s6 + $0x634] ss:$8 sps:$4 sm:$0xff]  }
 0x485   : > { %12332 = vmatpush1.bf16.msra.mxu0 %v14183_v45  ;;  %11841 = vmatprep.subr.bf16.mxu1 %v14188_v46  ;;  %v14263_v45 = vld [vmem:[%s16515_s6 + $0x1234] ss:$8 sps:$4 sm:$0xff]   ;;  %v14258_v46 = vld [vmem:[%s16515_s6 + $0x630] ss:$8 sps:$4 sm:$0xff]  }
 0x486   : > { %12333 = vmatprep.subr.bf16.mxu0 %v14191_v29  ;;  %v14261_v29 = vld [vmem:[%s16515_s6 + $0x1230] ss:$8 sps:$4 sm:$0xff]  }
 0x488   : > { %11842 = vmatpush1.bf16.msra.mxu1 %v14186_v47  ;;  %v14266_v47 = vld [vmem:[%s16515_s6 + $0x644] ss:$8 sps:$4 sm:$0xff]  }
 0x489   : > { %12334 = vmatpush1.bf16.msra.mxu0 %v14189_v22  ;;  %11843 = vmatprep.subr.bf16.mxu1 %v14194_v48  ;;  %v14269_v22 = vld [vmem:[%s16515_s6 + $0x1244] ss:$8 sps:$4 sm:$0xff]   ;;  %v14264_v48 = vld [vmem:[%s16515_s6 + $0x640] ss:$8 sps:$4 sm:$0xff]  }
 0x48a   : > { %12335 = vmatprep.subr.bf16.mxu0 %v14197_v40  ;;  %v14267_v40 = vld [vmem:[%s16515_s6 + $0x1240] ss:$8 sps:$4 sm:$0xff]  }
 0x48c   : > { %11844 = vmatpush1.bf16.msra.mxu1 %v14192_v41  ;;  %v14272_v41 = vld [vmem:[%s16515_s6 + $0x654] ss:$8 sps:$4 sm:$0xff]  }
 0x48d   : > { %12336 = vmatpush1.bf16.msra.mxu0 %v14195_v49  ;;  %11845 = vmatprep.subr.bf16.mxu1 %v14200_v50  ;;  %v14275_v49 = vld [vmem:[%s16515_s6 + $0x1254] ss:$8 sps:$4 sm:$0xff]   ;;  %v14270_v50 = vld [vmem:[%s16515_s6 + $0x650] ss:$8 sps:$4 sm:$0xff]  }
 0x48e   : > { %12337 = vmatprep.subr.bf16.mxu0 %v14203_v51  ;;  %v14273_v51 = vld [vmem:[%s16515_s6 + $0x1250] ss:$8 sps:$4 sm:$0xff]  }
 0x490   : > { %11846 = vmatpush1.bf16.msra.mxu1 %v14198_v52  ;;  %v14278_v52 = vld [vmem:[%s16515_s6 + $0x664] ss:$8 sps:$4 sm:$0xff]  }
 0x491   : > { %12338 = vmatpush1.bf16.msra.mxu0 %v14201_v53  ;;  %11847 = vmatprep.subr.bf16.mxu1 %v14206_v54  ;;  %v14281_v53 = vld [vmem:[%s16515_s6 + $0x1264] ss:$8 sps:$4 sm:$0xff]   ;;  %v14276_v54 = vld [vmem:[%s16515_s6 + $0x660] ss:$8 sps:$4 sm:$0xff]  }
 0x492   : > { %12339 = vmatprep.subr.bf16.mxu0 %v14209_v55  ;;  %v14279_v55 = vld [vmem:[%s16515_s6 + $0x1260] ss:$8 sps:$4 sm:$0xff]  }
 0x494   : > { %11848 = vmatpush1.bf16.msra.mxu1 %v14204_v58  ;;  %v14284_v58 = vld [vmem:[%s16515_s6 + $0x674] ss:$8 sps:$4 sm:$0xff]  }
 0x495   : > { %12340 = vmatpush1.bf16.msra.mxu0 %v14207_v59  ;;  %11849 = vmatprep.subr.bf16.mxu1 %v14212_v62  ;;  %v14287_v59 = vld [vmem:[%s16515_s6 + $0x1274] ss:$8 sps:$4 sm:$0xff]   ;;  %v14282_v62 = vld [vmem:[%s16515_s6 + $0x670] ss:$8 sps:$4 sm:$0xff]  }
 0x496   : > { %12341 = vmatprep.subr.bf16.mxu0 %v14215_v63  ;;  %v14285_v63 = vld [vmem:[%s16515_s6 + $0x1270] ss:$8 sps:$4 sm:$0xff]  }
 0x498   : > { %11850 = vmatpush1.bf16.msra.mxu1 %v14210_v0  ;;  %v14290_v0 = vld [vmem:[%s16515_s6 + $0x684] ss:$8 sps:$4 sm:$0xff]  }
 0x499   : > { %12342 = vmatpush1.bf16.msra.mxu0 %v14213_v30  ;;  %11851 = vmatprep.subr.bf16.mxu1 %v14218_v20  ;;  %v14293_v30 = vld [vmem:[%s16515_s6 + $0x1284] ss:$8 sps:$4 sm:$0xff]   ;;  %v14288_v20 = vld [vmem:[%s16515_s6 + $0x680] ss:$8 sps:$4 sm:$0xff]  }
 0x49a   : > { %12343 = vmatprep.subr.bf16.mxu0 %v14221_v1  ;;  %v14291_v1 = vld [vmem:[%s16515_s6 + $0x1280] ss:$8 sps:$4 sm:$0xff]  }
 0x49c   : > { %11852 = vmatpush1.bf16.msra.mxu1 %v14216_v2  ;;  %v14296_v2 = vld [vmem:[%s16515_s6 + $0x694] ss:$8 sps:$4 sm:$0xff]  }
 0x49d   : > { %12344 = vmatpush1.bf16.msra.mxu0 %v14219_v56  ;;  %11853 = vmatprep.subr.bf16.mxu1 %v14224_v42  ;;  %v14299_v56 = vld [vmem:[%s16515_s6 + $0x1294] ss:$8 sps:$4 sm:$0xff]   ;;  %v14294_v42 = vld [vmem:[%s16515_s6 + $0x690] ss:$8 sps:$4 sm:$0xff]  }
 0x49e   : > { %12345 = vmatprep.subr.bf16.mxu0 %v14227_v3  ;;  %v14297_v3 = vld [vmem:[%s16515_s6 + $0x1290] ss:$8 sps:$4 sm:$0xff]  }
 0x4a0   : > { %11854 = vmatpush1.bf16.msra.mxu1 %v14222_v4  ;;  %v14302_v4 = vld [vmem:[%s16515_s6 + $0x6a4] ss:$8 sps:$4 sm:$0xff]  }
 0x4a1   : > { %12346 = vmatpush1.bf16.msra.mxu0 %v14225_v5  ;;  %11855 = vmatprep.subr.bf16.mxu1 %v14230_v6  ;;  %v14305_v5 = vld [vmem:[%s16515_s6 + $0x12a4] ss:$8 sps:$4 sm:$0xff]   ;;  %v14300_v6 = vld [vmem:[%s16515_s6 + $0x6a0] ss:$8 sps:$4 sm:$0xff]  }
 0x4a2   : > { %12347 = vmatprep.subr.bf16.mxu0 %v14233_v7  ;;  %v14303_v7 = vld [vmem:[%s16515_s6 + $0x12a0] ss:$8 sps:$4 sm:$0xff]  }
 0x4a4   : > { %11856 = vmatpush1.bf16.msra.mxu1 %v14228_v14  ;;  %v14314_v14 = vld [vmem:[%s16515_s6 + $0x6c4] ss:$8 sps:$4 sm:$0xff]  }
 0x4a5   : > { %12348 = vmatpush1.bf16.msra.mxu0 %v14231_v15  ;;  %11857 = vmatprep.subr.bf16.mxu1 %v14236_v43  ;;  %v14317_v15 = vld [vmem:[%s16515_s6 + $0x12c4] ss:$8 sps:$4 sm:$0xff]   ;;  %v14312_v43 = vld [vmem:[%s16515_s6 + $0x6c0] ss:$8 sps:$4 sm:$0xff]  }
 0x4a6   : > { %12349 = vmatprep.subr.bf16.mxu0 %v14239_v16  ;;  %v14315_v16 = vld [vmem:[%s16515_s6 + $0x12c0] ss:$8 sps:$4 sm:$0xff]  }
 0x4a8   : > { %11858 = vmatpush1.bf16.msra.mxu1 %v14234_v8  ;;  %v14320_v8 = vld [vmem:[%s16515_s6 + $0x6d4] ss:$8 sps:$4 sm:$0xff]  }
 0x4a9   : > { %12350 = vmatpush1.bf16.msra.mxu0 %v14237_v18  ;;  %11868 = vmatprep.subr.bf16.mxu1 %v14242_v60  ;;  %v14323_v18 = vld [vmem:[%s16515_s6 + $0x12d4] ss:$8 sps:$4 sm:$0xff]   ;;  %v14318_v60 = vld [vmem:[%s16515_s6 + $0x6d0] ss:$8 sps:$4 sm:$0xff]  }
 0x4aa   : > { %12360 = vmatprep.subr.bf16.mxu0 %v14245_v21  ;;  %v14321_v21 = vld [vmem:[%s16515_s6 + $0x12d0] ss:$8 sps:$4 sm:$0xff]  }
 0x4ab   : > { %11860 = vmatmul.mubr.bf16.vlgmr.msra.gmra.mrb[0].mxu1 %v7439_v26  ;;  %v14324_v26 = vld [vmem:[%s16515_s6 + $0x6e0] ss:$8 sps:$4 sm:$0xff]  }
 0x4ac   : > { %12352 = vmatmul.mubr.bf16.vlgmr.msra.gmra.mrb[0].mxu0 %v7586_v27  ;;  %11869 = vmatpush1.bf16.msra.mxu1 %v14240_v28  ;;  %v14327_v27 = vld [vmem:[%s16515_s6 + $0x12e0] ss:$8 sps:$4 sm:$0xff]   ;;  %v14332_v28 = vld [vmem:[%s16515_s6 + $0x6f4] ss:$8 sps:$4 sm:$0xff]  }
 0x4ad   : > { %12361 = vmatpush1.bf16.msra.mxu0 %v14243_v31  ;;  %11870 = vmatprep.subr.bf16.mxu1 %v14248_v32  ;;  %v14335_v31 = vld [vmem:[%s16515_s6 + $0x12f4] ss:$8 sps:$4 sm:$0xff]   ;;  %v14330_v32 = vld [vmem:[%s16515_s6 + $0x6f0] ss:$8 sps:$4 sm:$0xff]  }
 0x4ae   : > { %12362 = vmatprep.subr.bf16.mxu0 %v14251_v33  ;;  %11900 = vmatprep.mubr.bf16.mxu1 %v17045_v34  ;;  %v14333_v33 = vld [vmem:[%s16515_s6 + $0x12f0] ss:$8 sps:$4 sm:$0xff]  }
 0x4af   : > { %12392 = vmatprep.mubr.bf16.mxu0 %v17048_v10 }
 0x4b0   : > { %11871 = vmatpush1.bf16.msra.mxu1 %v14246_v11  ;;  %v14339_v11 = vld [vmem:[%s16515_s6 + $0x704] ss:$8 sps:$4 sm:$0xff]  }
 0x4b1   : > { %12363 = vmatpush1.bf16.msra.mxu0 %v14249_v35  ;;  %11872 = vmatprep.subr.bf16.mxu1 %v14254_v36  ;;  %v14343_v35 = vld [vmem:[%s16515_s6 + $0x1304] ss:$8 sps:$4 sm:$0xff]   ;;  %v17114_v36 = vrot.slane %v17023_v57, %v16520_v25  ;;  %v7442_v57 = vcombine.high %v17045_v34, %v17045_v34 }
 0x4b2   : > { %12364 = vmatprep.subr.bf16.mxu0 %v14257_v37  ;;  %v17118_v37 = vrot.slane %v17026_v17, %v16520_v25  ;;  %v14344_v17 = vld [vmem:[%s16515_s6 + $0x710] ss:$8 sps:$4 sm:$0xff]   ;;  %v14352_v34 = vld [vmem:[%s16515_s6 + $0x724] ss:$8 sps:$4 sm:$0xff]  }
 0x4b4   : > { %11873 = vmatpush1.bf16.msra.mxu1 %v14252_v38  ;;  %v14337_v38 = vld [vmem:[%s16515_s6 + $0x700] ss:$8 sps:$4 sm:$0xff]  }
 0x4b5   : > { %12365 = vmatpush1.bf16.msra.mxu0 %v14255_v39  ;;  %11874 = vmatprep.subr.bf16.mxu1 %v14260_v44  ;;  %v14341_v39 = vld [vmem:[%s16515_s6 + $0x1300] ss:$8 sps:$4 sm:$0xff]   ;;  %v14346_v44 = vld [vmem:[%s16515_s6 + $0x714] ss:$8 sps:$4 sm:$0xff]  }
 0x4b6   : > { %12366 = vmatprep.subr.bf16.mxu0 %v14263_v45  ;;  %v14349_v45 = vld [vmem:[%s16515_s6 + $0x1314] ss:$8 sps:$4 sm:$0xff]  }
 0x4b8   : > { %11875 = vmatpush1.bf16.msra.mxu1 %v14258_v46  ;;  %v7589_v46 = vcombine.high %v17048_v10, %v17048_v10  ;;  %v14350_v10 = vld [vmem:[%s16515_s6 + $0x720] ss:$8 sps:$4 sm:$0xff]  }
 0x4b9   : > { %12367 = vmatpush1.bf16.msra.mxu0 %v14261_v29  ;;  %11876 = vmatprep.subr.bf16.mxu1 %v14266_v47  ;;  %v14347_v29 = vld [vmem:[%s16515_s6 + $0x1310] ss:$8 sps:$4 sm:$0xff]   ;;  %v14355_v47 = vld [vmem:[%s16515_s6 + $0x1324] ss:$8 sps:$4 sm:$0xff]  }
 0x4ba   : > { %12368 = vmatprep.subr.bf16.mxu0 %v14269_v22  ;;  %v14353_v22 = vld [vmem:[%s16515_s6 + $0x1320] ss:$8 sps:$4 sm:$0xff]  }
 0x4bc   : > { %11877 = vmatpush1.bf16.msra.mxu1 %v14264_v48  ;;  %v14358_v48 = vld [vmem:[%s16515_s6 + $0x734] ss:$8 sps:$4 sm:$0xff]  }
 0x4bd   : > { %12369 = vmatpush1.bf16.msra.mxu0 %v14267_v40  ;;  %11878 = vmatprep.subr.bf16.mxu1 %v14272_v41  ;;  %v14361_v40 = vld [vmem:[%s16515_s6 + $0x1334] ss:$8 sps:$4 sm:$0xff]   ;;  %v14356_v41 = vld [vmem:[%s16515_s6 + $0x730] ss:$8 sps:$4 sm:$0xff]  }
 0x4be   : > { %12370 = vmatprep.subr.bf16.mxu0 %v14275_v49  ;;  %v14359_v49 = vld [vmem:[%s16515_s6 + $0x1330] ss:$8 sps:$4 sm:$0xff]  }
 0x4c0   : > { %11879 = vmatpush1.bf16.msra.mxu1 %v14270_v50  ;;  %v14364_v50 = vld [vmem:[%s16515_s6 + $0x744] ss:$8 sps:$4 sm:$0xff]  }
 0x4c1   : > { %12371 = vmatpush1.bf16.msra.mxu0 %v14273_v51  ;;  %11880 = vmatprep.subr.bf16.mxu1 %v14278_v52  ;;  %v14367_v51 = vld [vmem:[%s16515_s6 + $0x1344] ss:$8 sps:$4 sm:$0xff]   ;;  %v14362_v52 = vld [vmem:[%s16515_s6 + $0x740] ss:$8 sps:$4 sm:$0xff]  }
 0x4c2   : > { %12372 = vmatprep.subr.bf16.mxu0 %v14281_v53  ;;  %v14365_v53 = vld [vmem:[%s16515_s6 + $0x1340] ss:$8 sps:$4 sm:$0xff]  }
 0x4c4   : > { %11881 = vmatpush1.bf16.msra.mxu1 %v14276_v54  ;;  %v14370_v54 = vld [vmem:[%s16515_s6 + $0x754] ss:$8 sps:$4 sm:$0xff]  }
 0x4c5   : > { %12373 = vmatpush1.bf16.msra.mxu0 %v14279_v55  ;;  %11882 = vmatprep.subr.bf16.mxu1 %v14284_v58  ;;  %v14373_v55 = vld [vmem:[%s16515_s6 + $0x1354] ss:$8 sps:$4 sm:$0xff]   ;;  %v14368_v58 = vld [vmem:[%s16515_s6 + $0x750] ss:$8 sps:$4 sm:$0xff]  }
 0x4c6   : > { %12374 = vmatprep.subr.bf16.mxu0 %v14287_v59  ;;  %v14371_v59 = vld [vmem:[%s16515_s6 + $0x1350] ss:$8 sps:$4 sm:$0xff]  }
 0x4c8   : > { %11883 = vmatpush1.bf16.msra.mxu1 %v14282_v62  ;;  %v14376_v62 = vld [vmem:[%s16515_s6 + $0x764] ss:$8 sps:$4 sm:$0xff]  }
 0x4c9   : > { %12375 = vmatpush1.bf16.msra.mxu0 %v14285_v63  ;;  %11884 = vmatprep.subr.bf16.mxu1 %v14290_v0  ;;  %v14379_v63 = vld [vmem:[%s16515_s6 + $0x1364] ss:$8 sps:$4 sm:$0xff]   ;;  %v14374_v0 = vld [vmem:[%s16515_s6 + $0x760] ss:$8 sps:$4 sm:$0xff]  }
 0x4ca   : > { %12376 = vmatprep.subr.bf16.mxu0 %v14293_v30  ;;  %v14377_v30 = vld [vmem:[%s16515_s6 + $0x1360] ss:$8 sps:$4 sm:$0xff]  }
 0x4cc   : > { %11885 = vmatpush1.bf16.msra.mxu1 %v14288_v20  ;;  %v14382_v20 = vld [vmem:[%s16515_s6 + $0x774] ss:$8 sps:$4 sm:$0xff]  }
 0x4cd   : > { %12377 = vmatpush1.bf16.msra.mxu0 %v14291_v1  ;;  %11886 = vmatprep.subr.bf16.mxu1 %v14296_v2  ;;  %v14385_v1 = vld [vmem:[%s16515_s6 + $0x1374] ss:$8 sps:$4 sm:$0xff]   ;;  %v14380_v2 = vld [vmem:[%s16515_s6 + $0x770] ss:$8 sps:$4 sm:$0xff]  }
 0x4ce   : > { %12378 = vmatprep.subr.bf16.mxu0 %v14299_v56  ;;  %v14383_v56 = vld [vmem:[%s16515_s6 + $0x1370] ss:$8 sps:$4 sm:$0xff]  }
 0x4d0   : > { %11887 = vmatpush1.bf16.msra.mxu1 %v14294_v42  ;;  %v14388_v42 = vld [vmem:[%s16515_s6 + $0x784] ss:$8 sps:$4 sm:$0xff]  }
 0x4d1   : > { %12379 = vmatpush1.bf16.msra.mxu0 %v14297_v3  ;;  %11888 = vmatprep.subr.bf16.mxu1 %v14302_v4  ;;  %v14391_v3 = vld [vmem:[%s16515_s6 + $0x1384] ss:$8 sps:$4 sm:$0xff]   ;;  %v14386_v4 = vld [vmem:[%s16515_s6 + $0x780] ss:$8 sps:$4 sm:$0xff]  }
 0x4d2   : > { %12380 = vmatprep.subr.bf16.mxu0 %v14305_v5  ;;  %v14389_v5 = vld [vmem:[%s16515_s6 + $0x1380] ss:$8 sps:$4 sm:$0xff]  }
 0x4d4   : > { %11889 = vmatpush1.bf16.msra.mxu1 %v14300_v6  ;;  %v14394_v6 = vld [vmem:[%s16515_s6 + $0x794] ss:$8 sps:$4 sm:$0xff]  }
 0x4d5   : > { %12381 = vmatpush1.bf16.msra.mxu0 %v14303_v7  ;;  %11890 = vmatprep.subr.bf16.mxu1 %v14308_v61  ;;  %v14397_v7 = vld [vmem:[%s16515_s6 + $0x1394] ss:$8 sps:$4 sm:$0xff]   ;;  %v14392_v61 = vld [vmem:[%s16515_s6 + $0x790] ss:$8 sps:$4 sm:$0xff]  }
 0x4d6   : > { %12382 = vmatprep.subr.bf16.mxu0 %v14311_v9  ;;  %v14395_v9 = vld [vmem:[%s16515_s6 + $0x1390] ss:$8 sps:$4 sm:$0xff]  }
 0x4d8   : > { %11891 = vmatpush1.bf16.msra.mxu1 %v14306_v12  ;;  %v14400_v12 = vld [vmem:[%s16515_s6 + $0x7a4] ss:$8 sps:$4 sm:$0xff]  }
 0x4d9   : > { %12383 = vmatpush1.bf16.msra.mxu0 %v14309_v13  ;;  %11892 = vmatprep.subr.bf16.mxu1 %v14314_v14  ;;  %v14403_v13 = vld [vmem:[%s16515_s6 + $0x13a4] ss:$8 sps:$4 sm:$0xff]   ;;  %v14398_v14 = vld [vmem:[%s16515_s6 + $0x7a0] ss:$8 sps:$4 sm:$0xff]  }
 0x4da   : > { %12384 = vmatprep.subr.bf16.mxu0 %v14317_v15  ;;  %v14401_v15 = vld [vmem:[%s16515_s6 + $0x13a0] ss:$8 sps:$4 sm:$0xff]  }
 0x4dc   : > { %11893 = vmatpush1.bf16.msra.mxu1 %v14312_v43  ;;  %v14406_v43 = vld [vmem:[%s16515_s6 + $0x7b4] ss:$8 sps:$4 sm:$0xff]  }
 0x4dd   : > { %12385 = vmatpush1.bf16.msra.mxu0 %v14315_v16  ;;  %11894 = vmatprep.subr.bf16.mxu1 %v14320_v8  ;;  %v14409_v16 = vld [vmem:[%s16515_s6 + $0x13b4] ss:$8 sps:$4 sm:$0xff]   ;;  %v14404_v8 = vld [vmem:[%s16515_s6 + $0x7b0] ss:$8 sps:$4 sm:$0xff]  }
 0x4de   : > { %12386 = vmatprep.subr.bf16.mxu0 %v14323_v18  ;;  %v14407_v18 = vld [vmem:[%s16515_s6 + $0x13b0] ss:$8 sps:$4 sm:$0xff]  }
 0x4e0   : > { %11895 = vmatpush1.bf16.msra.mxu1 %v14318_v60  ;;  %v14412_v60 = vld [vmem:[%s16515_s6 + $0x7c4] ss:$8 sps:$4 sm:$0xff]  }
 0x4e1   : > { %12387 = vmatpush1.bf16.msra.mxu0 %v14321_v21  ;;  %11896 = vmatprep.subr.bf16.mxu1 %v14326_v23  ;;  %v14415_v21 = vld [vmem:[%s16515_s6 + $0x13c4] ss:$8 sps:$4 sm:$0xff]   ;;  %v14410_v23 = vld [vmem:[%s16515_s6 + $0x7c0] ss:$8 sps:$4 sm:$0xff]  }
 0x4e2   : > { %12388 = vmatprep.subr.bf16.mxu0 %v14329_v24  ;;  %v14413_v24 = vld [vmem:[%s16515_s6 + $0x13c0] ss:$8 sps:$4 sm:$0xff]  }
 0x4e4   : > { %11897 = vmatpush1.bf16.msra.mxu1 %v14324_v26  ;;  %v14418_v26 = vld [vmem:[%s16515_s6 + $0x7d4] ss:$8 sps:$4 sm:$0xff]  }
 0x4e5   : > { %12389 = vmatpush1.bf16.msra.mxu0 %v14327_v27  ;;  %11898 = vmatprep.subr.bf16.mxu1 %v14332_v28  ;;  %v14421_v27 = vld [vmem:[%s16515_s6 + $0x13d4] ss:$8 sps:$4 sm:$0xff]   ;;  %v14416_v28 = vld [vmem:[%s16515_s6 + $0x7d0] ss:$8 sps:$4 sm:$0xff]  }
 0x4e6   : > { %12390 = vmatprep.subr.bf16.mxu0 %v14335_v31  ;;  %v14419_v31 = vld [vmem:[%s16515_s6 + $0x13d0] ss:$8 sps:$4 sm:$0xff]  }
 0x4e8   : > { %11899 = vmatpush1.bf16.msra.mxu1 %v14330_v32  ;;  %v14424_v32 = vld [vmem:[%s16515_s6 + $0x7e4] ss:$8 sps:$4 sm:$0xff]  }
 0x4e9   : > { %12391 = vmatpush1.bf16.msra.mxu0 %v14333_v33  ;;  %11909 = vmatprep.subr.bf16.mxu1 %v14339_v11  ;;  %v14427_v33 = vld [vmem:[%s16515_s6 + $0x13e4] ss:$8 sps:$4 sm:$0xff]   ;;  %v17185_v11 = vld [vmem:[%s17576_s0 + $0x10] sm:$0xff] }
 0x4ea   : > { %12401 = vmatprep.subr.bf16.mxu0 %v14343_v35  ;;  %v17190_v35 = vld [vmem:[%s17576_s0 + $0x28] sm:$0xff] }
 0x4eb   : > { %11901 = vmatmul.mubr.bf16.vlgmr.msra.gmra.mrb[0].mxu1 %v17114_v36 }
 0x4ec   : > { %12393 = vmatmul.mubr.bf16.vlgmr.msra.gmra.mrb[0].mxu0 %v17118_v37  ;;  %11910 = vmatpush1.bf16.msra.mxu1 %v14337_v38  ;;  %v14422_v38 = vld [vmem:[%s16515_s6 + $0x7e0] ss:$8 sps:$4 sm:$0xff]  }
 0x4ed   : > { %12402 = vmatpush1.bf16.msra.mxu0 %v14341_v39  ;;  %11911 = vmatprep.subr.bf16.mxu1 %v14346_v44  ;;  %v14425_v39 = vld [vmem:[%s16515_s6 + $0x13e0] ss:$8 sps:$4 sm:$0xff]   ;;  %v14430_v44 = vld [vmem:[%s16515_s6 + $0x7f4] ss:$8 sps:$4 sm:$0xff]  }
 0x4ee   : > { %12403 = vmatprep.subr.bf16.mxu0 %v14349_v45  ;;  %11941 = vmatprep.mubr.bf16.mxu1 %v7442_v57  ;;  %v14433_v45 = vld [vmem:[%s16515_s6 + $0x13f4] ss:$8 sps:$4 sm:$0xff]   ;;  %v17198_v57 = vrot.slane %v17185_v11, %v16520_v25 }
 0x4ef   : > { %12433 = vmatprep.mubr.bf16.mxu0 %v7589_v46  ;;  %v17202_v46 = vrot.slane %v17190_v35, %v16520_v25 }
 0x4f0   : > { %11912 = vmatpush1.bf16.msra.mxu1 %v14344_v17  ;;  %v14428_v17 = vld [vmem:[%s16515_s6 + $0x7f0] ss:$8 sps:$4 sm:$0xff]  }
 0x4f1   : > { %12404 = vmatpush1.bf16.msra.mxu0 %v14347_v29  ;;  %11913 = vmatprep.subr.bf16.mxu1 %v14352_v34  ;;  %v14431_v29 = vld [vmem:[%s16515_s6 + $0x13f0] ss:$8 sps:$4 sm:$0xff]   ;;  %v14436_v34 = vld [vmem:[%s16515_s6 + $0x804] ss:$8 sps:$4 sm:$0xff]  }
 0x4f2   : > { %12405 = vmatprep.subr.bf16.mxu0 %v14355_v47  ;;  %v14439_v47 = vld [vmem:[%s16515_s6 + $0x1404] ss:$8 sps:$4 sm:$0xff]  }
 0x4f4   : > { %11914 = vmatpush1.bf16.msra.mxu1 %v14350_v10  ;;  %v7458_v10 = vcombine.high %v17198_v57, %v17198_v57 }
 0x4f5   : > { %12406 = vmatpush1.bf16.msra.mxu0 %v14353_v22  ;;  %11915 = vmatprep.subr.bf16.mxu1 %v14358_v48  ;;  %v7605_v22 = vcombine.high %v17202_v46, %v17202_v46  ;;  %v7440_v48 = vcombine.high %v17114_v36, %v17114_v36 }
 0x4f6   : > { %12407 = vmatprep.subr.bf16.mxu0 %v14361_v40  ;;  %v7587_v40 = vcombine.high %v17118_v37, %v17118_v37  ;;  %v14440_v37 = vld [vmem:[%s16515_s6 + $0x810] ss:$8 sps:$4 sm:$0xff]  }
 0x4f7   : > { %v17224_v36 = vrot.slane %v7605_v22, %v16520_v25  ;;  %v14515_v22 = vld [vmem:[%s16515_s6 + $0x14d0] ss:$8 sps:$4 sm:$0xff]  }
 0x4f8   : > { %11916 = vmatpush1.bf16.msra.mxu1 %v14356_v41  ;;  %v14434_v41 = vld [vmem:[%s16515_s6 + $0x800] ss:$8 sps:$4 sm:$0xff]  }
 0x4f9   : > { %12408 = vmatpush1.bf16.msra.mxu0 %v14359_v49  ;;  %11917 = vmatprep.subr.bf16.mxu1 %v14364_v50  ;;  %v14437_v49 = vld [vmem:[%s16515_s6 + $0x1400] ss:$8 sps:$4 sm:$0xff]   ;;  %v14442_v50 = vld [vmem:[%s16515_s6 + $0x814] ss:$8 sps:$4 sm:$0xff]  }
 0x4fa   : > { %12409 = vmatprep.subr.bf16.mxu0 %v14367_v51  ;;  %v14445_v51 = vld [vmem:[%s16515_s6 + $0x1414] ss:$8 sps:$4 sm:$0xff]  }
 0x4fc   : > { %11918 = vmatpush1.bf16.msra.mxu1 %v14362_v52  ;;  %v17221_v52 = vrot.slane %v7458_v10, %v16520_v25  ;;  %v14512_v10 = vld [vmem:[%s16515_s6 + $0x8d0] ss:$8 sps:$4 sm:$0xff]  }
 0x4fd   : > { %12410 = vmatpush1.bf16.msra.mxu0 %v14365_v53  ;;  %11919 = vmatprep.subr.bf16.mxu1 %v14370_v54  ;;  %v14443_v53 = vld [vmem:[%s16515_s6 + $0x1410] ss:$8 sps:$4 sm:$0xff]   ;;  %v14448_v54 = vld [vmem:[%s16515_s6 + $0x824] ss:$8 sps:$4 sm:$0xff]  }
 0x4fe   : > { %12411 = vmatprep.subr.bf16.mxu0 %v14373_v55  ;;  %v14451_v55 = vld [vmem:[%s16515_s6 + $0x1424] ss:$8 sps:$4 sm:$0xff]  }
 0x500   : > { %11920 = vmatpush1.bf16.msra.mxu1 %v14368_v58  ;;  %v14446_v58 = vld [vmem:[%s16515_s6 + $0x820] ss:$8 sps:$4 sm:$0xff]  }
 0x501   : > { %12412 = vmatpush1.bf16.msra.mxu0 %v14371_v59  ;;  %11921 = vmatprep.subr.bf16.mxu1 %v14376_v62  ;;  %v14449_v59 = vld [vmem:[%s16515_s6 + $0x1420] ss:$8 sps:$4 sm:$0xff]   ;;  %v14454_v62 = vld [vmem:[%s16515_s6 + $0x834] ss:$8 sps:$4 sm:$0xff]  }
 0x502   : > { %12413 = vmatprep.subr.bf16.mxu0 %v14379_v63  ;;  %v14457_v63 = vld [vmem:[%s16515_s6 + $0x1434] ss:$8 sps:$4 sm:$0xff]  }
 0x504   : > { %11922 = vmatpush1.bf16.msra.mxu1 %v14374_v0  ;;  %v14452_v0 = vld [vmem:[%s16515_s6 + $0x830] ss:$8 sps:$4 sm:$0xff]  }
 0x505   : > { %12414 = vmatpush1.bf16.msra.mxu0 %v14377_v30  ;;  %11923 = vmatprep.subr.bf16.mxu1 %v14382_v20  ;;  %v14455_v30 = vld [vmem:[%s16515_s6 + $0x1430] ss:$8 sps:$4 sm:$0xff]   ;;  %v14460_v20 = vld [vmem:[%s16515_s6 + $0x844] ss:$8 sps:$4 sm:$0xff]  }
 0x506   : > { %12415 = vmatprep.subr.bf16.mxu0 %v14385_v1  ;;  %v14463_v1 = vld [vmem:[%s16515_s6 + $0x1444] ss:$8 sps:$4 sm:$0xff]  }
 0x508   : > { %11924 = vmatpush1.bf16.msra.mxu1 %v14380_v2  ;;  %v14458_v2 = vld [vmem:[%s16515_s6 + $0x840] ss:$8 sps:$4 sm:$0xff]  }
 0x509   : > { %12416 = vmatpush1.bf16.msra.mxu0 %v14383_v56  ;;  %11925 = vmatprep.subr.bf16.mxu1 %v14388_v42  ;;  %v14461_v56 = vld [vmem:[%s16515_s6 + $0x1440] ss:$8 sps:$4 sm:$0xff]   ;;  %v14466_v42 = vld [vmem:[%s16515_s6 + $0x854] ss:$8 sps:$4 sm:$0xff]  }
 0x50a   : > { %12417 = vmatprep.subr.bf16.mxu0 %v14391_v3  ;;  %v14469_v3 = vld [vmem:[%s16515_s6 + $0x1454] ss:$8 sps:$4 sm:$0xff]  }
 0x50c   : > { %11926 = vmatpush1.bf16.msra.mxu1 %v14386_v4  ;;  %v14464_v4 = vld [vmem:[%s16515_s6 + $0x850] ss:$8 sps:$4 sm:$0xff]  }
 0x50d   : > { %12418 = vmatpush1.bf16.msra.mxu0 %v14389_v5  ;;  %11927 = vmatprep.subr.bf16.mxu1 %v14394_v6  ;;  %v14467_v5 = vld [vmem:[%s16515_s6 + $0x1450] ss:$8 sps:$4 sm:$0xff]   ;;  %v14472_v6 = vld [vmem:[%s16515_s6 + $0x864] ss:$8 sps:$4 sm:$0xff]  }
 0x50e   : > { %12419 = vmatprep.subr.bf16.mxu0 %v14397_v7  ;;  %v14475_v7 = vld [vmem:[%s16515_s6 + $0x1464] ss:$8 sps:$4 sm:$0xff]  }
 0x510   : > { %11928 = vmatpush1.bf16.msra.mxu1 %v14392_v61  ;;  %v14470_v61 = vld [vmem:[%s16515_s6 + $0x860] ss:$8 sps:$4 sm:$0xff]  }
 0x511   : > { %12420 = vmatpush1.bf16.msra.mxu0 %v14395_v9  ;;  %11929 = vmatprep.subr.bf16.mxu1 %v14400_v12  ;;  %v14473_v9 = vld [vmem:[%s16515_s6 + $0x1460] ss:$8 sps:$4 sm:$0xff]   ;;  %v14478_v12 = vld [vmem:[%s16515_s6 + $0x874] ss:$8 sps:$4 sm:$0xff]  }
 0x512   : > { %12421 = vmatprep.subr.bf16.mxu0 %v14403_v13  ;;  %v14481_v13 = vld [vmem:[%s16515_s6 + $0x1474] ss:$8 sps:$4 sm:$0xff]  }
 0x514   : > { %11930 = vmatpush1.bf16.msra.mxu1 %v14398_v14  ;;  %v14476_v14 = vld [vmem:[%s16515_s6 + $0x870] ss:$8 sps:$4 sm:$0xff]  }
 0x515   : > { %12422 = vmatpush1.bf16.msra.mxu0 %v14401_v15  ;;  %11931 = vmatprep.subr.bf16.mxu1 %v14406_v43  ;;  %v14479_v15 = vld [vmem:[%s16515_s6 + $0x1470] ss:$8 sps:$4 sm:$0xff]   ;;  %v14484_v43 = vld [vmem:[%s16515_s6 + $0x884] ss:$8 sps:$4 sm:$0xff]  }
 0x516   : > { %12423 = vmatprep.subr.bf16.mxu0 %v14409_v16  ;;  %v14487_v16 = vld [vmem:[%s16515_s6 + $0x1484] ss:$8 sps:$4 sm:$0xff]  }
 0x518   : > { %11932 = vmatpush1.bf16.msra.mxu1 %v14404_v8  ;;  %v14482_v8 = vld [vmem:[%s16515_s6 + $0x880] ss:$8 sps:$4 sm:$0xff]  }
 0x519   : > { %12424 = vmatpush1.bf16.msra.mxu0 %v14407_v18  ;;  %11933 = vmatprep.subr.bf16.mxu1 %v14412_v60  ;;  %v14485_v18 = vld [vmem:[%s16515_s6 + $0x1480] ss:$8 sps:$4 sm:$0xff]   ;;  %v14490_v60 = vld [vmem:[%s16515_s6 + $0x894] ss:$8 sps:$4 sm:$0xff]  }
 0x51a   : > { %12425 = vmatprep.subr.bf16.mxu0 %v14415_v21  ;;  %v14493_v21 = vld [vmem:[%s16515_s6 + $0x1494] ss:$8 sps:$4 sm:$0xff]  }
 0x51c   : > { %11934 = vmatpush1.bf16.msra.mxu1 %v14410_v23  ;;  %v14488_v23 = vld [vmem:[%s16515_s6 + $0x890] ss:$8 sps:$4 sm:$0xff]  }
 0x51d   : > { %12426 = vmatpush1.bf16.msra.mxu0 %v14413_v24  ;;  %11935 = vmatprep.subr.bf16.mxu1 %v14418_v26  ;;  %v14491_v24 = vld [vmem:[%s16515_s6 + $0x1490] ss:$8 sps:$4 sm:$0xff]   ;;  %v14496_v26 = vld [vmem:[%s16515_s6 + $0x8a4] ss:$8 sps:$4 sm:$0xff]  }
 0x51e   : > { %12427 = vmatprep.subr.bf16.mxu0 %v14421_v27  ;;  %v14499_v27 = vld [vmem:[%s16515_s6 + $0x14a4] ss:$8 sps:$4 sm:$0xff]  }
 0x520   : > { %11936 = vmatpush1.bf16.msra.mxu1 %v14416_v28  ;;  %v14494_v28 = vld [vmem:[%s16515_s6 + $0x8a0] ss:$8 sps:$4 sm:$0xff]  }
 0x521   : > { %12428 = vmatpush1.bf16.msra.mxu0 %v14419_v31  ;;  %11937 = vmatprep.subr.bf16.mxu1 %v14424_v32  ;;  %v14497_v31 = vld [vmem:[%s16515_s6 + $0x14a0] ss:$8 sps:$4 sm:$0xff]   ;;  %v14502_v32 = vld [vmem:[%s16515_s6 + $0x8b4] ss:$8 sps:$4 sm:$0xff]  }
 0x522   : > { %12429 = vmatprep.subr.bf16.mxu0 %v14427_v33  ;;  %v14505_v33 = vld [vmem:[%s16515_s6 + $0x14b4] ss:$8 sps:$4 sm:$0xff]  }
 0x524   : > { %11938 = vmatpush1.bf16.msra.mxu1 %v14422_v38  ;;  %v14500_v38 = vld [vmem:[%s16515_s6 + $0x8b0] ss:$8 sps:$4 sm:$0xff]  }
 0x525   : > { %12430 = vmatpush1.bf16.msra.mxu0 %v14425_v39  ;;  %11939 = vmatprep.subr.bf16.mxu1 %v14430_v44  ;;  %v14503_v39 = vld [vmem:[%s16515_s6 + $0x14b0] ss:$8 sps:$4 sm:$0xff]   ;;  %v14508_v44 = vld [vmem:[%s16515_s6 + $0x8c4] ss:$8 sps:$4 sm:$0xff]  }
 0x526   : > { %12431 = vmatprep.subr.bf16.mxu0 %v14433_v45  ;;  %v14511_v45 = vld [vmem:[%s16515_s6 + $0x14c4] ss:$8 sps:$4 sm:$0xff]  }
 0x528   : > { %11940 = vmatpush1.bf16.msra.mxu1 %v14428_v17  ;;  %v14506_v17 = vld [vmem:[%s16515_s6 + $0x8c0] ss:$8 sps:$4 sm:$0xff]  }
 0x529   : > { %12432 = vmatpush1.bf16.msra.mxu0 %v14431_v29  ;;  %11950 = vmatprep.subr.bf16.mxu1 %v14436_v34  ;;  %v14509_v29 = vld [vmem:[%s16515_s6 + $0x14c0] ss:$8 sps:$4 sm:$0xff]   ;;  %v14514_v34 = vld [vmem:[%s16515_s6 + $0x8d4] ss:$8 sps:$4 sm:$0xff]  }
 0x52a   : > { %12442 = vmatprep.subr.bf16.mxu0 %v14439_v47  ;;  %v14517_v47 = vld [vmem:[%s16515_s6 + $0x14d4] ss:$8 sps:$4 sm:$0xff]  }
 0x52b   : > { %11942 = vmatmul.mubr.bf16.vlgmr.msra.gmra.mrb[0].mxu1 %v7440_v48  ;;  %v14520_v48 = vld [vmem:[%s16515_s6 + $0x8e4] ss:$8 sps:$4 sm:$0xff]  }
 0x52c   : > { %12434 = vmatmul.mubr.bf16.vlgmr.msra.gmra.mrb[0].mxu0 %v7587_v40  ;;  %11951 = vmatpush1.bf16.msra.mxu1 %v14434_v41  ;;  %v14523_v40 = vld [vmem:[%s16515_s6 + $0x14e4] ss:$8 sps:$4 sm:$0xff]   ;;  %v14518_v41 = vld [vmem:[%s16515_s6 + $0x8e0] ss:$8 sps:$4 sm:$0xff]  }
 0x52d   : > { %12443 = vmatpush1.bf16.msra.mxu0 %v14437_v49  ;;  %11952 = vmatprep.subr.bf16.mxu1 %v14442_v50  ;;  %v14521_v49 = vld [vmem:[%s16515_s6 + $0x14e0] ss:$8 sps:$4 sm:$0xff]   ;;  %v14526_v50 = vld [vmem:[%s16515_s6 + $0x8f4] ss:$8 sps:$4 sm:$0xff]  }
 0x52e   : > { %12444 = vmatprep.subr.bf16.mxu0 %v14445_v51  ;;  %11982 = vmatprep.mubr.bf16.mxu1 %v17221_v52  ;;  %v14529_v51 = vld [vmem:[%s16515_s6 + $0x14f4] ss:$8 sps:$4 sm:$0xff]  }
 0x52f   : > { %12474 = vmatprep.mubr.bf16.mxu0 %v17224_v36 }
 0x530   : > { %11953 = vmatpush1.bf16.msra.mxu1 %v14440_v37  ;;  %v14524_v37 = vld [vmem:[%s16515_s6 + $0x8f0] ss:$8 sps:$4 sm:$0xff]  }
 0x531   : > { %12445 = vmatpush1.bf16.msra.mxu0 %v14443_v53  ;;  %11954 = vmatprep.subr.bf16.mxu1 %v14448_v54  ;;  %v14527_v53 = vld [vmem:[%s16515_s6 + $0x14f0] ss:$8 sps:$4 sm:$0xff]   ;;  %v14532_v54 = vld [vmem:[%s16515_s6 + $0x904] ss:$8 sps:$4 sm:$0xff]  }
 0x532   : > { %12446 = vmatprep.subr.bf16.mxu0 %v14451_v55  ;;  %v14535_v55 = vld [vmem:[%s16515_s6 + $0x1504] ss:$8 sps:$4 sm:$0xff]  }
 0x534   : > { %11955 = vmatpush1.bf16.msra.mxu1 %v14446_v58  ;;  %v17290_v58 = vrot.slane %v17198_v57, %v16520_v25  ;;  %v7490_v57 = vcombine.high %v17221_v52, %v17221_v52  ;;  %v14544_v52 = vld [vmem:[%s16515_s6 + $0x924] ss:$8 sps:$4 sm:$0xff]  }
 0x535   : > { %12447 = vmatpush1.bf16.msra.mxu0 %v14449_v59  ;;  %11956 = vmatprep.subr.bf16.mxu1 %v14454_v62  ;;  %v17294_v59 = vrot.slane %v17202_v46, %v16520_v25  ;;  %v14530_v62 = vld [vmem:[%s16515_s6 + $0x900] ss:$8 sps:$4 sm:$0xff]   ;;  %v14536_v46 = vld [vmem:[%s16515_s6 + $0x910] ss:$8 sps:$4 sm:$0xff]  }
 0x536   : > { %12448 = vmatprep.subr.bf16.mxu0 %v14457_v63  ;;  %v14533_v63 = vld [vmem:[%s16515_s6 + $0x1500] ss:$8 sps:$4 sm:$0xff]  }
 0x538   : > { %11957 = vmatpush1.bf16.msra.mxu1 %v14452_v0  ;;  %v14538_v0 = vld [vmem:[%s16515_s6 + $0x914] ss:$8 sps:$4 sm:$0xff]  }
 0x539   : > { %12449 = vmatpush1.bf16.msra.mxu0 %v14455_v30  ;;  %11958 = vmatprep.subr.bf16.mxu1 %v14460_v20  ;;  %v14541_v30 = vld [vmem:[%s16515_s6 + $0x1514] ss:$8 sps:$4 sm:$0xff]   ;;  %v7637_v20 = vcombine.high %v17224_v36, %v17224_v36  ;;  %v14542_v36 = vld [vmem:[%s16515_s6 + $0x920] ss:$8 sps:$4 sm:$0xff]  }
 0x53a   : > { %12450 = vmatprep.subr.bf16.mxu0 %v14463_v1  ;;  %v14539_v1 = vld [vmem:[%s16515_s6 + $0x1510] ss:$8 sps:$4 sm:$0xff]  }
 0x53c   : > { %11959 = vmatpush1.bf16.msra.mxu1 %v14458_v2  ;;  %v14547_v2 = vld [vmem:[%s16515_s6 + $0x1524] ss:$8 sps:$4 sm:$0xff]  }
 0x53d   : > { %12451 = vmatpush1.bf16.msra.mxu0 %v14461_v56  ;;  %11960 = vmatprep.subr.bf16.mxu1 %v14466_v42  ;;  %v14545_v56 = vld [vmem:[%s16515_s6 + $0x1520] ss:$8 sps:$4 sm:$0xff]   ;;  %v14550_v42 = vld [vmem:[%s16515_s6 + $0x934] ss:$8 sps:$4 sm:$0xff]  }
 0x53e   : > { %12452 = vmatprep.subr.bf16.mxu0 %v14469_v3  ;;  %v14553_v3 = vld [vmem:[%s16515_s6 + $0x1534] ss:$8 sps:$4 sm:$0xff]  }
 0x540   : > { %11961 = vmatpush1.bf16.msra.mxu1 %v14464_v4  ;;  %v14548_v4 = vld [vmem:[%s16515_s6 + $0x930] ss:$8 sps:$4 sm:$0xff]  }
 0x541   : > { %12453 = vmatpush1.bf16.msra.mxu0 %v14467_v5  ;;  %11962 = vmatprep.subr.bf16.mxu1 %v14472_v6  ;;  %v14551_v5 = vld [vmem:[%s16515_s6 + $0x1530] ss:$8 sps:$4 sm:$0xff]   ;;  %v14556_v6 = vld [vmem:[%s16515_s6 + $0x944] ss:$8 sps:$4 sm:$0xff]  }
 0x542   : > { %12454 = vmatprep.subr.bf16.mxu0 %v14475_v7  ;;  %v14559_v7 = vld [vmem:[%s16515_s6 + $0x1544] ss:$8 sps:$4 sm:$0xff]  }
 0x544   : > { %11963 = vmatpush1.bf16.msra.mxu1 %v14470_v61  ;;  %v14554_v61 = vld [vmem:[%s16515_s6 + $0x940] ss:$8 sps:$4 sm:$0xff]  }
 0x545   : > { %12455 = vmatpush1.bf16.msra.mxu0 %v14473_v9  ;;  %11964 = vmatprep.subr.bf16.mxu1 %v14478_v12  ;;  %v14557_v9 = vld [vmem:[%s16515_s6 + $0x1540] ss:$8 sps:$4 sm:$0xff]   ;;  %v14562_v12 = vld [vmem:[%s16515_s6 + $0x954] ss:$8 sps:$4 sm:$0xff]  }
 0x546   : > { %12456 = vmatprep.subr.bf16.mxu0 %v14481_v13  ;;  %v14565_v13 = vld [vmem:[%s16515_s6 + $0x1554] ss:$8 sps:$4 sm:$0xff]  }
 0x548   : > { %11965 = vmatpush1.bf16.msra.mxu1 %v14476_v14  ;;  %v14560_v14 = vld [vmem:[%s16515_s6 + $0x950] ss:$8 sps:$4 sm:$0xff]  }
 0x549   : > { %12457 = vmatpush1.bf16.msra.mxu0 %v14479_v15  ;;  %11966 = vmatprep.subr.bf16.mxu1 %v14484_v43  ;;  %v14563_v15 = vld [vmem:[%s16515_s6 + $0x1550] ss:$8 sps:$4 sm:$0xff]   ;;  %v14568_v43 = vld [vmem:[%s16515_s6 + $0x964] ss:$8 sps:$4 sm:$0xff]  }
 0x54a   : > { %12458 = vmatprep.subr.bf16.mxu0 %v14487_v16  ;;  %v14571_v16 = vld [vmem:[%s16515_s6 + $0x1564] ss:$8 sps:$4 sm:$0xff]  }
 0x54c   : > { %11967 = vmatpush1.bf16.msra.mxu1 %v14482_v8  ;;  %v14566_v8 = vld [vmem:[%s16515_s6 + $0x960] ss:$8 sps:$4 sm:$0xff]  }
 0x54d   : > { %12459 = vmatpush1.bf16.msra.mxu0 %v14485_v18  ;;  %11968 = vmatprep.subr.bf16.mxu1 %v14490_v60  ;;  %v14569_v18 = vld [vmem:[%s16515_s6 + $0x1560] ss:$8 sps:$4 sm:$0xff]   ;;  %v14574_v60 = vld [vmem:[%s16515_s6 + $0x974] ss:$8 sps:$4 sm:$0xff]  }
 0x54e   : > { %12460 = vmatprep.subr.bf16.mxu0 %v14493_v21  ;;  %v14577_v21 = vld [vmem:[%s16515_s6 + $0x1574] ss:$8 sps:$4 sm:$0xff]  }
 0x550   : > { %11969 = vmatpush1.bf16.msra.mxu1 %v14488_v23  ;;  %v14572_v23 = vld [vmem:[%s16515_s6 + $0x970] ss:$8 sps:$4 sm:$0xff]  }
 0x551   : > { %12461 = vmatpush1.bf16.msra.mxu0 %v14491_v24  ;;  %11970 = vmatprep.subr.bf16.mxu1 %v14496_v26  ;;  %v14575_v24 = vld [vmem:[%s16515_s6 + $0x1570] ss:$8 sps:$4 sm:$0xff]   ;;  %v14580_v26 = vld [vmem:[%s16515_s6 + $0x984] ss:$8 sps:$4 sm:$0xff]  }
 0x552   : > { %12462 = vmatprep.subr.bf16.mxu0 %v14499_v27  ;;  %v14583_v27 = vld [vmem:[%s16515_s6 + $0x1584] ss:$8 sps:$4 sm:$0xff]  }
 0x554   : > { %11971 = vmatpush1.bf16.msra.mxu1 %v14494_v28  ;;  %v14578_v28 = vld [vmem:[%s16515_s6 + $0x980] ss:$8 sps:$4 sm:$0xff]  }
 0x555   : > { %12463 = vmatpush1.bf16.msra.mxu0 %v14497_v31  ;;  %11972 = vmatprep.subr.bf16.mxu1 %v14502_v32  ;;  %v14581_v31 = vld [vmem:[%s16515_s6 + $0x1580] ss:$8 sps:$4 sm:$0xff]   ;;  %v14586_v32 = vld [vmem:[%s16515_s6 + $0x994] ss:$8 sps:$4 sm:$0xff]  }
 0x556   : > { %12464 = vmatprep.subr.bf16.mxu0 %v14505_v33  ;;  %v14589_v33 = vld [vmem:[%s16515_s6 + $0x1594] ss:$8 sps:$4 sm:$0xff]  }
 0x558   : > { %11973 = vmatpush1.bf16.msra.mxu1 %v14500_v38  ;;  %v14584_v38 = vld [vmem:[%s16515_s6 + $0x990] ss:$8 sps:$4 sm:$0xff]  }
 0x559   : > { %12465 = vmatpush1.bf16.msra.mxu0 %v14503_v39  ;;  %11974 = vmatprep.subr.bf16.mxu1 %v14508_v44  ;;  %v14587_v39 = vld [vmem:[%s16515_s6 + $0x1590] ss:$8 sps:$4 sm:$0xff]   ;;  %v14592_v44 = vld [vmem:[%s16515_s6 + $0x9a4] ss:$8 sps:$4 sm:$0xff]  }
 0x55a   : > { %12466 = vmatprep.subr.bf16.mxu0 %v14511_v45  ;;  %v14595_v45 = vld [vmem:[%s16515_s6 + $0x15a4] ss:$8 sps:$4 sm:$0xff]  }
 0x55c   : > { %11975 = vmatpush1.bf16.msra.mxu1 %v14506_v17  ;;  %v14590_v17 = vld [vmem:[%s16515_s6 + $0x9a0] ss:$8 sps:$4 sm:$0xff]  }
 0x55d   : > { %12467 = vmatpush1.bf16.msra.mxu0 %v14509_v29  ;;  %11976 = vmatprep.subr.bf16.mxu1 %v14514_v34  ;;  %v14593_v29 = vld [vmem:[%s16515_s6 + $0x15a0] ss:$8 sps:$4 sm:$0xff]   ;;  %v14598_v34 = vld [vmem:[%s16515_s6 + $0x9b4] ss:$8 sps:$4 sm:$0xff]  }
 0x55e   : > { %12468 = vmatprep.subr.bf16.mxu0 %v14517_v47  ;;  %v14601_v47 = vld [vmem:[%s16515_s6 + $0x15b4] ss:$8 sps:$4 sm:$0xff]  }
 0x560   : > { %11977 = vmatpush1.bf16.msra.mxu1 %v14512_v10  ;;  %v14596_v10 = vld [vmem:[%s16515_s6 + $0x9b0] ss:$8 sps:$4 sm:$0xff]  }
 0x561   : > { %12469 = vmatpush1.bf16.msra.mxu0 %v14515_v22  ;;  %11978 = vmatprep.subr.bf16.mxu1 %v14520_v48  ;;  %v14599_v22 = vld [vmem:[%s16515_s6 + $0x15b0] ss:$8 sps:$4 sm:$0xff]   ;;  %v14604_v48 = vld [vmem:[%s16515_s6 + $0x9c4] ss:$8 sps:$4 sm:$0xff]  }
 0x562   : > { %12470 = vmatprep.subr.bf16.mxu0 %v14523_v40  ;;  %v14607_v40 = vld [vmem:[%s16515_s6 + $0x15c4] ss:$8 sps:$4 sm:$0xff]  }
 0x564   : > { %11979 = vmatpush1.bf16.msra.mxu1 %v14518_v41  ;;  %v14602_v41 = vld [vmem:[%s16515_s6 + $0x9c0] ss:$8 sps:$4 sm:$0xff]  }
 0x565   : > { %12471 = vmatpush1.bf16.msra.mxu0 %v14521_v49  ;;  %11980 = vmatprep.subr.bf16.mxu1 %v14526_v50  ;;  %v14605_v49 = vld [vmem:[%s16515_s6 + $0x15c0] ss:$8 sps:$4 sm:$0xff]   ;;  %v14610_v50 = vld [vmem:[%s16515_s6 + $0x9d4] ss:$8 sps:$4 sm:$0xff]  }
 0x566   : > { %12472 = vmatprep.subr.bf16.mxu0 %v14529_v51  ;;  %v14613_v51 = vld [vmem:[%s16515_s6 + $0x15d4] ss:$8 sps:$4 sm:$0xff]  }
 0x568   : > { %11981 = vmatpush1.bf16.msra.mxu1 %v14524_v37  ;;  %v14608_v37 = vld [vmem:[%s16515_s6 + $0x9d0] ss:$8 sps:$4 sm:$0xff]  }
 0x569   : > { %12473 = vmatpush1.bf16.msra.mxu0 %v14527_v53  ;;  %11991 = vmatprep.subr.bf16.mxu1 %v14532_v54  ;;  %v14611_v53 = vld [vmem:[%s16515_s6 + $0x15d0] ss:$8 sps:$4 sm:$0xff]   ;;  %v14616_v54 = vld [vmem:[%s16515_s6 + $0x9e4] ss:$8 sps:$4 sm:$0xff]  }
 0x56a   : > { %12483 = vmatprep.subr.bf16.mxu0 %v14535_v55  ;;  %v14619_v55 = vld [vmem:[%s16515_s6 + $0x15e4] ss:$8 sps:$4 sm:$0xff]  }
 0x56b   : > { %11983 = vmatmul.mubr.bf16.vlgmr.msra.gmra.mrb[0].mxu1 %v17290_v58 }
 0x56c   : > { %12475 = vmatmul.mubr.bf16.vlgmr.msra.gmra.mrb[0].mxu0 %v17294_v59  ;;  %11992 = vmatpush1.bf16.msra.mxu1 %v14530_v62  ;;  %v7443_v62 = vcombine.high %v17185_v11, %v17185_v11  ;;  %v14620_v11 = vld [vmem:[%s16515_s6 + $0x9f0] ss:$8 sps:$4 sm:$0xff]  }
 0x56d   : > { %12484 = vmatpush1.bf16.msra.mxu0 %v14533_v63  ;;  %11993 = vmatprep.subr.bf16.mxu1 %v14538_v0  ;;  %v7590_v63 = vcombine.high %v17190_v35, %v17190_v35  ;;  %v14614_v0 = vld [vmem:[%s16515_s6 + $0x9e0] ss:$8 sps:$4 sm:$0xff]   ;;  %v14623_v35 = vld [vmem:[%s16515_s6 + $0x15f0] ss:$8 sps:$4 sm:$0xff]  }
 0x56e   : > { %12485 = vmatprep.subr.bf16.mxu0 %v14541_v30  ;;  %12023 = vmatprep.mubr.bf16.mxu1 %v7490_v57  ;;  %v14617_v30 = vld [vmem:[%s16515_s6 + $0x15e0] ss:$8 sps:$4 sm:$0xff]   ;;  %v14622_v57 = vld [vmem:[%s16515_s6 + $0x9f4] ss:$8 sps:$4 sm:$0xff]  }
 0x56f   : > { %12515 = vmatprep.mubr.bf16.mxu0 %v7637_v20  ;;  %v14625_v20 = vld [vmem:[%s16515_s6 + $0x15f4] ss:$8 sps:$4 sm:$0xff]  }
 0x570   : > { %11994 = vmatpush1.bf16.msra.mxu1 %v14536_v46  ;;  %v17367_v46 = vrot.slane %v7443_v62, %v16520_v25  ;;  %v14692_v62 = vld [vmem:[%s16515_s6 + $0xab0] ss:$8 sps:$4 sm:$0xff]  }
 0x571   : > { %12486 = vmatpush1.bf16.msra.mxu0 %v14539_v1  ;;  %11995 = vmatprep.subr.bf16.mxu1 %v14544_v52  ;;  %v17370_v1 = vrot.slane %v7590_v63, %v16520_v25  ;;  %v14628_v52 = vld [vmem:[%s16515_s6 + $0xa04] ss:$8 sps:$4 sm:$0xff]   ;;  %v14695_v63 = vld [vmem:[%s16515_s6 + $0x16b0] ss:$8 sps:$4 sm:$0xff]  }
 0x572   : > { %12487 = vmatprep.subr.bf16.mxu0 %v14547_v2  ;;  %v14631_v2 = vld [vmem:[%s16515_s6 + $0x1604] ss:$8 sps:$4 sm:$0xff]  }
 0x574   : > { %11996 = vmatpush1.bf16.msra.mxu1 %v14542_v36  ;;  %v7459_v36 = vcombine.high %v17367_v46, %v17367_v46 }
 0x575   : > { %12488 = vmatpush1.bf16.msra.mxu0 %v14545_v56  ;;  %11997 = vmatprep.subr.bf16.mxu1 %v14550_v42  ;;  %v7606_v56 = vcombine.high %v17370_v1, %v17370_v1  ;;  %v7488_v42 = vcombine.high %v17290_v58, %v17290_v58 }
 0x576   : > { %12489 = vmatprep.subr.bf16.mxu0 %v14553_v3  ;;  %v7635_v3 = vcombine.high %v17294_v59, %v17294_v59  ;;  %v14632_v59 = vld [vmem:[%s16515_s6 + $0xa10] ss:$8 sps:$4 sm:$0xff]  }
 0x577   : > { %v17392_v58 = vrot.slane %v7606_v56, %v16520_v25  ;;  %v14715_v56 = vld [vmem:[%s16515_s6 + $0x16e4] ss:$8 sps:$4 sm:$0xff]  }
 0x578   : > { %11998 = vmatpush1.bf16.msra.mxu1 %v14548_v4  ;;  %v14626_v4 = vld [vmem:[%s16515_s6 + $0xa00] ss:$8 sps:$4 sm:$0xff]  }
 0x579   : > { %12490 = vmatpush1.bf16.msra.mxu0 %v14551_v5  ;;  %11999 = vmatprep.subr.bf16.mxu1 %v14556_v6  ;;  %v14629_v5 = vld [vmem:[%s16515_s6 + $0x1600] ss:$8 sps:$4 sm:$0xff]   ;;  %v14634_v6 = vld [vmem:[%s16515_s6 + $0xa14] ss:$8 sps:$4 sm:$0xff]  }
 0x57a   : > { %12491 = vmatprep.subr.bf16.mxu0 %v14559_v7  ;;  %v14637_v7 = vld [vmem:[%s16515_s6 + $0x1614] ss:$8 sps:$4 sm:$0xff]  }
 0x57c   : > { %12000 = vmatpush1.bf16.msra.mxu1 %v14554_v61  ;;  %v17389_v61 = vrot.slane %v7459_v36, %v16520_v25  ;;  %v14712_v36 = vld [vmem:[%s16515_s6 + $0xae4] ss:$8 sps:$4 sm:$0xff]  }
 0x57d   : > { %12492 = vmatpush1.bf16.msra.mxu0 %v14557_v9  ;;  %12001 = vmatprep.subr.bf16.mxu1 %v14562_v12  ;;  %v14635_v9 = vld [vmem:[%s16515_s6 + $0x1610] ss:$8 sps:$4 sm:$0xff]   ;;  %v14640_v12 = vld [vmem:[%s16515_s6 + $0xa24] ss:$8 sps:$4 sm:$0xff]  }
 0x57e   : > { %12493 = vmatprep.subr.bf16.mxu0 %v14565_v13  ;;  %v14643_v13 = vld [vmem:[%s16515_s6 + $0x1624] ss:$8 sps:$4 sm:$0xff]  }
 0x580   : > { %12002 = vmatpush1.bf16.msra.mxu1 %v14560_v14  ;;  %v14638_v14 = vld [vmem:[%s16515_s6 + $0xa20] ss:$8 sps:$4 sm:$0xff]  }
 0x581   : > { %12494 = vmatpush1.bf16.msra.mxu0 %v14563_v15  ;;  %12003 = vmatprep.subr.bf16.mxu1 %v14568_v43  ;;  %v14641_v15 = vld [vmem:[%s16515_s6 + $0x1620] ss:$8 sps:$4 sm:$0xff]   ;;  %v14646_v43 = vld [vmem:[%s16515_s6 + $0xa34] ss:$8 sps:$4 sm:$0xff]  }
 0x582   : > { %12495 = vmatprep.subr.bf16.mxu0 %v14571_v16  ;;  %v14649_v16 = vld [vmem:[%s16515_s6 + $0x1634] ss:$8 sps:$4 sm:$0xff]  }
 0x584   : > { %12004 = vmatpush1.bf16.msra.mxu1 %v14566_v8  ;;  %v14644_v8 = vld [vmem:[%s16515_s6 + $0xa30] ss:$8 sps:$4 sm:$0xff]  }
 0x585   : > { %12496 = vmatpush1.bf16.msra.mxu0 %v14569_v18  ;;  %12005 = vmatprep.subr.bf16.mxu1 %v14574_v60  ;;  %v14647_v18 = vld [vmem:[%s16515_s6 + $0x1630] ss:$8 sps:$4 sm:$0xff]   ;;  %v14652_v60 = vld [vmem:[%s16515_s6 + $0xa44] ss:$8 sps:$4 sm:$0xff]  }
 0x586   : > { %12497 = vmatprep.subr.bf16.mxu0 %v14577_v21  ;;  %v14655_v21 = vld [vmem:[%s16515_s6 + $0x1644] ss:$8 sps:$4 sm:$0xff]  }
 0x588   : > { %12006 = vmatpush1.bf16.msra.mxu1 %v14572_v23  ;;  %v14650_v23 = vld [vmem:[%s16515_s6 + $0xa40] ss:$8 sps:$4 sm:$0xff]  }
 0x589   : > { %12498 = vmatpush1.bf16.msra.mxu0 %v14575_v24  ;;  %12007 = vmatprep.subr.bf16.mxu1 %v14580_v26  ;;  %v14653_v24 = vld [vmem:[%s16515_s6 + $0x1640] ss:$8 sps:$4 sm:$0xff]   ;;  %v14658_v26 = vld [vmem:[%s16515_s6 + $0xa54] ss:$8 sps:$4 sm:$0xff]  }
 0x58a   : > { %12499 = vmatprep.subr.bf16.mxu0 %v14583_v27  ;;  %v14661_v27 = vld [vmem:[%s16515_s6 + $0x1654] ss:$8 sps:$4 sm:$0xff]  }
 0x58c   : > { %12008 = vmatpush1.bf16.msra.mxu1 %v14578_v28  ;;  %v14656_v28 = vld [vmem:[%s16515_s6 + $0xa50] ss:$8 sps:$4 sm:$0xff]  }
 0x58d   : > { %12500 = vmatpush1.bf16.msra.mxu0 %v14581_v31  ;;  %12009 = vmatprep.subr.bf16.mxu1 %v14586_v32  ;;  %v14659_v31 = vld [vmem:[%s16515_s6 + $0x1650] ss:$8 sps:$4 sm:$0xff]   ;;  %v14664_v32 = vld [vmem:[%s16515_s6 + $0xa64] ss:$8 sps:$4 sm:$0xff]  }
 0x58e   : > { %12501 = vmatprep.subr.bf16.mxu0 %v14589_v33  ;;  %v14667_v33 = vld [vmem:[%s16515_s6 + $0x1664] ss:$8 sps:$4 sm:$0xff]  }
 0x590   : > { %12010 = vmatpush1.bf16.msra.mxu1 %v14584_v38  ;;  %v14662_v38 = vld [vmem:[%s16515_s6 + $0xa60] ss:$8 sps:$4 sm:$0xff]  }
 0x591   : > { %12502 = vmatpush1.bf16.msra.mxu0 %v14587_v39  ;;  %12011 = vmatprep.subr.bf16.mxu1 %v14592_v44  ;;  %v14665_v39 = vld [vmem:[%s16515_s6 + $0x1660] ss:$8 sps:$4 sm:$0xff]   ;;  %v14670_v44 = vld [vmem:[%s16515_s6 + $0xa74] ss:$8 sps:$4 sm:$0xff]  }
 0x592   : > { %12503 = vmatprep.subr.bf16.mxu0 %v14595_v45  ;;  %v14673_v45 = vld [vmem:[%s16515_s6 + $0x1674] ss:$8 sps:$4 sm:$0xff]  }
 0x594   : > { %12012 = vmatpush1.bf16.msra.mxu1 %v14590_v17  ;;  %v14668_v17 = vld [vmem:[%s16515_s6 + $0xa70] ss:$8 sps:$4 sm:$0xff]  }
 0x595   : > { %12504 = vmatpush1.bf16.msra.mxu0 %v14593_v29  ;;  %12013 = vmatprep.subr.bf16.mxu1 %v14598_v34  ;;  %v14671_v29 = vld [vmem:[%s16515_s6 + $0x1670] ss:$8 sps:$4 sm:$0xff]   ;;  %v14676_v34 = vld [vmem:[%s16515_s6 + $0xa84] ss:$8 sps:$4 sm:$0xff]  }
 0x596   : > { %12505 = vmatprep.subr.bf16.mxu0 %v14601_v47  ;;  %v14679_v47 = vld [vmem:[%s16515_s6 + $0x1684] ss:$8 sps:$4 sm:$0xff]  }
 0x598   : > { %12014 = vmatpush1.bf16.msra.mxu1 %v14596_v10  ;;  %v14674_v10 = vld [vmem:[%s16515_s6 + $0xa80] ss:$8 sps:$4 sm:$0xff]  }
 0x599   : > { %12506 = vmatpush1.bf16.msra.mxu0 %v14599_v22  ;;  %12015 = vmatprep.subr.bf16.mxu1 %v14604_v48  ;;  %v14677_v22 = vld [vmem:[%s16515_s6 + $0x1680] ss:$8 sps:$4 sm:$0xff]   ;;  %v14682_v48 = vld [vmem:[%s16515_s6 + $0xa94] ss:$8 sps:$4 sm:$0xff]  }
 0x59a   : > { %12507 = vmatprep.subr.bf16.mxu0 %v14607_v40  ;;  %v14685_v40 = vld [vmem:[%s16515_s6 + $0x1694] ss:$8 sps:$4 sm:$0xff]  }
 0x59c   : > { %12016 = vmatpush1.bf16.msra.mxu1 %v14602_v41  ;;  %v14680_v41 = vld [vmem:[%s16515_s6 + $0xa90] ss:$8 sps:$4 sm:$0xff]  }
 0x59d   : > { %12508 = vmatpush1.bf16.msra.mxu0 %v14605_v49  ;;  %12017 = vmatprep.subr.bf16.mxu1 %v14610_v50  ;;  %v14683_v49 = vld [vmem:[%s16515_s6 + $0x1690] ss:$8 sps:$4 sm:$0xff]   ;;  %v14688_v50 = vld [vmem:[%s16515_s6 + $0xaa4] ss:$8 sps:$4 sm:$0xff]  }
 0x59e   : > { %12509 = vmatprep.subr.bf16.mxu0 %v14613_v51  ;;  %v14691_v51 = vld [vmem:[%s16515_s6 + $0x16a4] ss:$8 sps:$4 sm:$0xff]  }
 0x5a0   : > { %12018 = vmatpush1.bf16.msra.mxu1 %v14608_v37  ;;  %v14686_v37 = vld [vmem:[%s16515_s6 + $0xaa0] ss:$8 sps:$4 sm:$0xff]  }
 0x5a1   : > { %12510 = vmatpush1.bf16.msra.mxu0 %v14611_v53  ;;  %12019 = vmatprep.subr.bf16.mxu1 %v14616_v54  ;;  %v14689_v53 = vld [vmem:[%s16515_s6 + $0x16a0] ss:$8 sps:$4 sm:$0xff]   ;;  %v14694_v54 = vld [vmem:[%s16515_s6 + $0xab4] ss:$8 sps:$4 sm:$0xff]  }
 0x5a2   : > { %12511 = vmatprep.subr.bf16.mxu0 %v14619_v55  ;;  %v14697_v55 = vld [vmem:[%s16515_s6 + $0x16b4] ss:$8 sps:$4 sm:$0xff]  }
 0x5a4   : > { %12020 = vmatpush1.bf16.msra.mxu1 %v14614_v0  ;;  %v14700_v0 = vld [vmem:[%s16515_s6 + $0xac4] ss:$8 sps:$4 sm:$0xff]  }
 0x5a5   : > { %12512 = vmatpush1.bf16.msra.mxu0 %v14617_v30  ;;  %12021 = vmatprep.subr.bf16.mxu1 %v14622_v57  ;;  %v14703_v30 = vld [vmem:[%s16515_s6 + $0x16c4] ss:$8 sps:$4 sm:$0xff]   ;;  %v14698_v57 = vld [vmem:[%s16515_s6 + $0xac0] ss:$8 sps:$4 sm:$0xff]  }
 0x5a6   : > { %12513 = vmatprep.subr.bf16.mxu0 %v14625_v20  ;;  %v14701_v20 = vld [vmem:[%s16515_s6 + $0x16c0] ss:$8 sps:$4 sm:$0xff]  }
 0x5a8   : > { %12022 = vmatpush1.bf16.msra.mxu1 %v14620_v11  ;;  %v14706_v11 = vld [vmem:[%s16515_s6 + $0xad4] ss:$8 sps:$4 sm:$0xff]  }
 0x5a9   : > { %12514 = vmatpush1.bf16.msra.mxu0 %v14623_v35  ;;  %12032 = vmatprep.subr.bf16.mxu1 %v14628_v52  ;;  %v14709_v35 = vld [vmem:[%s16515_s6 + $0x16d4] ss:$8 sps:$4 sm:$0xff]   ;;  %v14704_v52 = vld [vmem:[%s16515_s6 + $0xad0] ss:$8 sps:$4 sm:$0xff]  }
 0x5aa   : > { %12524 = vmatprep.subr.bf16.mxu0 %v14631_v2  ;;  %v14707_v2 = vld [vmem:[%s16515_s6 + $0x16d0] ss:$8 sps:$4 sm:$0xff]  }
 0x5ab   : > { %12024 = vmatmul.mubr.bf16.vlgmr.msra.gmra.mrb[0].mxu1 %v7488_v42  ;;  %v14710_v42 = vld [vmem:[%s16515_s6 + $0xae0] ss:$8 sps:$4 sm:$0xff]  }
 0x5ac   : > { %12516 = vmatmul.mubr.bf16.vlgmr.msra.gmra.mrb[0].mxu0 %v7635_v3  ;;  %12033 = vmatpush1.bf16.msra.mxu1 %v14626_v4  ;;  %v14713_v3 = vld [vmem:[%s16515_s6 + $0x16e0] ss:$8 sps:$4 sm:$0xff]   ;;  %v14718_v4 = vld [vmem:[%s16515_s6 + $0xaf4] ss:$8 sps:$4 sm:$0xff]  }
 0x5ad   : > { %12525 = vmatpush1.bf16.msra.mxu0 %v14629_v5  ;;  %12034 = vmatprep.subr.bf16.mxu1 %v14634_v6  ;;  %v14721_v5 = vld [vmem:[%s16515_s6 + $0x16f4] ss:$8 sps:$4 sm:$0xff]   ;;  %v14716_v6 = vld [vmem:[%s16515_s6 + $0xaf0] ss:$8 sps:$4 sm:$0xff]  }
 0x5ae   : > { %12526 = vmatprep.subr.bf16.mxu0 %v14637_v7  ;;  %12064 = vmatprep.mubr.bf16.mxu1 %v17389_v61  ;;  %v14719_v7 = vld [vmem:[%s16515_s6 + $0x16f0] ss:$8 sps:$4 sm:$0xff]  }
 0x5af   : > { %12556 = vmatprep.mubr.bf16.mxu0 %v17392_v58 }
 0x5b0   : > { %12035 = vmatpush1.bf16.msra.mxu1 %v14632_v59  ;;  %v14725_v59 = vld [vmem:[%s16515_s6 + $0xb04] ss:$8 sps:$4 sm:$0xff]  }
 0x5b1   : > { %12527 = vmatpush1.bf16.msra.mxu0 %v14635_v9  ;;  %12036 = vmatprep.subr.bf16.mxu1 %v14640_v12  ;;  %v14729_v9 = vld [vmem:[%s16515_s6 + $0x1704] ss:$8 sps:$4 sm:$0xff]   ;;  %v17458_v12 = vrot.slane %v17367_v46, %v16520_v25  ;;  %v7491_v46 = vcombine.high %v17389_v61, %v17389_v61 }
 0x5b2   : > { %12528 = vmatprep.subr.bf16.mxu0 %v14643_v13  ;;  %v17462_v13 = vrot.slane %v17370_v1, %v16520_v25  ;;  %v14730_v1 = vld [vmem:[%s16515_s6 + $0xb10] ss:$8 sps:$4 sm:$0xff]   ;;  %v14738_v61 = vld [vmem:[%s16515_s6 + $0xb24] ss:$8 sps:$4 sm:$0xff]  }
 0x5b4   : > { %12037 = vmatpush1.bf16.msra.mxu1 %v14638_v14  ;;  %v14723_v14 = vld [vmem:[%s16515_s6 + $0xb00] ss:$8 sps:$4 sm:$0xff]  }
 0x5b5   : > { %12529 = vmatpush1.bf16.msra.mxu0 %v14641_v15  ;;  %12038 = vmatprep.subr.bf16.mxu1 %v14646_v43  ;;  %v14727_v15 = vld [vmem:[%s16515_s6 + $0x1700] ss:$8 sps:$4 sm:$0xff]   ;;  %v14732_v43 = vld [vmem:[%s16515_s6 + $0xb14] ss:$8 sps:$4 sm:$0xff]  }
 0x5b6   : > { %12530 = vmatprep.subr.bf16.mxu0 %v14649_v16  ;;  %v14735_v16 = vld [vmem:[%s16515_s6 + $0x1714] ss:$8 sps:$4 sm:$0xff]  }
 0x5b8   : > { %12039 = vmatpush1.bf16.msra.mxu1 %v14644_v8  ;;  %v7638_v8 = vcombine.high %v17392_v58, %v17392_v58  ;;  %v14736_v58 = vld [vmem:[%s16515_s6 + $0xb20] ss:$8 sps:$4 sm:$0xff]  }
 0x5b9   : > { %12531 = vmatpush1.bf16.msra.mxu0 %v14647_v18  ;;  %12040 = vmatprep.subr.bf16.mxu1 %v14652_v60  ;;  %v14733_v18 = vld [vmem:[%s16515_s6 + $0x1710] ss:$8 sps:$4 sm:$0xff]   ;;  %v14741_v60 = vld [vmem:[%s16515_s6 + $0x1724] ss:$8 sps:$4 sm:$0xff]  }
 0x5ba   : > { %12532 = vmatprep.subr.bf16.mxu0 %v14655_v21  ;;  %v14739_v21 = vld [vmem:[%s16515_s6 + $0x1720] ss:$8 sps:$4 sm:$0xff]  }
 0x5bc   : > { %12041 = vmatpush1.bf16.msra.mxu1 %v14650_v23  ;;  %v14744_v23 = vld [vmem:[%s16515_s6 + $0xb34] ss:$8 sps:$4 sm:$0xff]  }
 0x5bd   : > { %12533 = vmatpush1.bf16.msra.mxu0 %v14653_v24  ;;  %12042 = vmatprep.subr.bf16.mxu1 %v14658_v26  ;;  %v14747_v24 = vld [vmem:[%s16515_s6 + $0x1734] ss:$8 sps:$4 sm:$0xff]   ;;  %v14742_v26 = vld [vmem:[%s16515_s6 + $0xb30] ss:$8 sps:$4 sm:$0xff]  }
 0x5be   : > { %12534 = vmatprep.subr.bf16.mxu0 %v14661_v27  ;;  %v14745_v27 = vld [vmem:[%s16515_s6 + $0x1730] ss:$8 sps:$4 sm:$0xff]  }
 0x5c0   : > { %12043 = vmatpush1.bf16.msra.mxu1 %v14656_v28  ;;  %v14750_v28 = vld [vmem:[%s16515_s6 + $0xb44] ss:$8 sps:$4 sm:$0xff]  }
 0x5c1   : > { %12535 = vmatpush1.bf16.msra.mxu0 %v14659_v31  ;;  %12044 = vmatprep.subr.bf16.mxu1 %v14664_v32  ;;  %v14753_v31 = vld [vmem:[%s16515_s6 + $0x1744] ss:$8 sps:$4 sm:$0xff]   ;;  %v14748_v32 = vld [vmem:[%s16515_s6 + $0xb40] ss:$8 sps:$4 sm:$0xff]  }
 0x5c2   : > { %12536 = vmatprep.subr.bf16.mxu0 %v14667_v33  ;;  %v14751_v33 = vld [vmem:[%s16515_s6 + $0x1740] ss:$8 sps:$4 sm:$0xff]  }
 0x5c4   : > { %12045 = vmatpush1.bf16.msra.mxu1 %v14662_v38  ;;  %v14756_v38 = vld [vmem:[%s16515_s6 + $0xb54] ss:$8 sps:$4 sm:$0xff]  }
 0x5c5   : > { %12537 = vmatpush1.bf16.msra.mxu0 %v14665_v39  ;;  %12046 = vmatprep.subr.bf16.mxu1 %v14670_v44  ;;  %v14759_v39 = vld [vmem:[%s16515_s6 + $0x1754] ss:$8 sps:$4 sm:$0xff]   ;;  %v14754_v44 = vld [vmem:[%s16515_s6 + $0xb50] ss:$8 sps:$4 sm:$0xff]  }
 0x5c6   : > { %12538 = vmatprep.subr.bf16.mxu0 %v14673_v45  ;;  %v14757_v45 = vld [vmem:[%s16515_s6 + $0x1750] ss:$8 sps:$4 sm:$0xff]  }
 0x5c8   : > { %12047 = vmatpush1.bf16.msra.mxu1 %v14668_v17  ;;  %v14762_v17 = vld [vmem:[%s16515_s6 + $0xb64] ss:$8 sps:$4 sm:$0xff]  }
 0x5c9   : > { %12539 = vmatpush1.bf16.msra.mxu0 %v14671_v29  ;;  %12048 = vmatprep.subr.bf16.mxu1 %v14676_v34  ;;  %v14765_v29 = vld [vmem:[%s16515_s6 + $0x1764] ss:$8 sps:$4 sm:$0xff]   ;;  %v14760_v34 = vld [vmem:[%s16515_s6 + $0xb60] ss:$8 sps:$4 sm:$0xff]  }
 0x5ca   : > { %12540 = vmatprep.subr.bf16.mxu0 %v14679_v47  ;;  %v14763_v47 = vld [vmem:[%s16515_s6 + $0x1760] ss:$8 sps:$4 sm:$0xff]  }
 0x5cc   : > { %12049 = vmatpush1.bf16.msra.mxu1 %v14674_v10  ;;  %v14768_v10 = vld [vmem:[%s16515_s6 + $0xb74] ss:$8 sps:$4 sm:$0xff]  }
 0x5cd   : > { %12541 = vmatpush1.bf16.msra.mxu0 %v14677_v22  ;;  %12050 = vmatprep.subr.bf16.mxu1 %v14682_v48  ;;  %v14771_v22 = vld [vmem:[%s16515_s6 + $0x1774] ss:$8 sps:$4 sm:$0xff]   ;;  %v14766_v48 = vld [vmem:[%s16515_s6 + $0xb70] ss:$8 sps:$4 sm:$0xff]  }
 0x5ce   : > { %12542 = vmatprep.subr.bf16.mxu0 %v14685_v40  ;;  %v14769_v40 = vld [vmem:[%s16515_s6 + $0x1770] ss:$8 sps:$4 sm:$0xff]  }
 0x5d0   : > { %12051 = vmatpush1.bf16.msra.mxu1 %v14680_v41  ;;  %v14774_v41 = vld [vmem:[%s16515_s6 + $0xb84] ss:$8 sps:$4 sm:$0xff]  }
 0x5d1   : > { %12543 = vmatpush1.bf16.msra.mxu0 %v14683_v49  ;;  %12052 = vmatprep.subr.bf16.mxu1 %v14688_v50  ;;  %v14777_v49 = vld [vmem:[%s16515_s6 + $0x1784] ss:$8 sps:$4 sm:$0xff]   ;;  %v14772_v50 = vld [vmem:[%s16515_s6 + $0xb80] ss:$8 sps:$4 sm:$0xff]  }
 0x5d2   : > { %12544 = vmatprep.subr.bf16.mxu0 %v14691_v51  ;;  %v14775_v51 = vld [vmem:[%s16515_s6 + $0x1780] ss:$8 sps:$4 sm:$0xff]  }
 0x5d4   : > { %12053 = vmatpush1.bf16.msra.mxu1 %v14686_v37  ;;  %v14780_v37 = vld [vmem:[%s16515_s6 + $0xb94] ss:$8 sps:$4 sm:$0xff]  }
 0x5d5   : > { %12545 = vmatpush1.bf16.msra.mxu0 %v14689_v53  ;;  %12054 = vmatprep.subr.bf16.mxu1 %v14694_v54  ;;  %v14783_v53 = vld [vmem:[%s16515_s6 + $0x1794] ss:$8 sps:$4 sm:$0xff]   ;;  %v14778_v54 = vld [vmem:[%s16515_s6 + $0xb90] ss:$8 sps:$4 sm:$0xff]  }
 0x5d6   : > { %12546 = vmatprep.subr.bf16.mxu0 %v14697_v55  ;;  %v14781_v55 = vld [vmem:[%s16515_s6 + $0x1790] ss:$8 sps:$4 sm:$0xff]  }
 0x5d8   : > { %12055 = vmatpush1.bf16.msra.mxu1 %v14692_v62  ;;  %v14786_v62 = vld [vmem:[%s16515_s6 + $0xba4] ss:$8 sps:$4 sm:$0xff]  }
 0x5d9   : > { %12547 = vmatpush1.bf16.msra.mxu0 %v14695_v63  ;;  %12056 = vmatprep.subr.bf16.mxu1 %v14700_v0  ;;  %v14789_v63 = vld [vmem:[%s16515_s6 + $0x17a4] ss:$8 sps:$4 sm:$0xff]   ;;  %v14784_v0 = vld [vmem:[%s16515_s6 + $0xba0] ss:$8 sps:$4 sm:$0xff]  }
 0x5da   : > { %12548 = vmatprep.subr.bf16.mxu0 %v14703_v30  ;;  %v14787_v30 = vld [vmem:[%s16515_s6 + $0x17a0] ss:$8 sps:$4 sm:$0xff]  }
 0x5dc   : > { %12057 = vmatpush1.bf16.msra.mxu1 %v14698_v57  ;;  %v14792_v57 = vld [vmem:[%s16515_s6 + $0xbb4] ss:$8 sps:$4 sm:$0xff]  }
 0x5dd   : > { %12549 = vmatpush1.bf16.msra.mxu0 %v14701_v20  ;;  %12058 = vmatprep.subr.bf16.mxu1 %v14706_v11  ;;  %v14795_v20 = vld [vmem:[%s16515_s6 + $0x17b4] ss:$8 sps:$4 sm:$0xff]   ;;  %v14790_v11 = vld [vmem:[%s16515_s6 + $0xbb0] ss:$8 sps:$4 sm:$0xff]  }
 0x5de   : > { %12550 = vmatprep.subr.bf16.mxu0 %v14709_v35  ;;  %v14793_v35 = vld [vmem:[%s16515_s6 + $0x17b0] ss:$8 sps:$4 sm:$0xff]  }
 0x5e0   : > { %12059 = vmatpush1.bf16.msra.mxu1 %v14704_v52  ;;  %v14798_v52 = vld [vmem:[%s16515_s6 + $0xbc4] ss:$8 sps:$4 sm:$0xff]  }
 0x5e1   : > { %12551 = vmatpush1.bf16.msra.mxu0 %v14707_v2  ;;  %12060 = vmatprep.subr.bf16.mxu1 %v14712_v36  ;;  %v14801_v2 = vld [vmem:[%s16515_s6 + $0x17c4] ss:$8 sps:$4 sm:$0xff]   ;;  %v14796_v36 = vld [vmem:[%s16515_s6 + $0xbc0] ss:$8 sps:$4 sm:$0xff]  }
 0x5e2   : > { %12552 = vmatprep.subr.bf16.mxu0 %v14715_v56  ;;  %v14799_v56 = vld [vmem:[%s16515_s6 + $0x17c0] ss:$8 sps:$4 sm:$0xff]  }
 0x5e4   : > { %12061 = vmatpush1.bf16.msra.mxu1 %v14710_v42  ;;  %v14804_v42 = vld [vmem:[%s16515_s6 + $0xbd4] ss:$8 sps:$4 sm:$0xff]  }
 0x5e5   : > { %12553 = vmatpush1.bf16.msra.mxu0 %v14713_v3  ;;  %12062 = vmatprep.subr.bf16.mxu1 %v14718_v4  ;;  %v14807_v3 = vld [vmem:[%s16515_s6 + $0x17d4] ss:$8 sps:$4 sm:$0xff]   ;;  %v14802_v4 = vld [vmem:[%s16515_s6 + $0xbd0] ss:$8 sps:$4 sm:$0xff]  }
 0x5e6   : > { %12554 = vmatprep.subr.bf16.mxu0 %v14721_v5  ;;  %v14805_v5 = vld [vmem:[%s16515_s6 + $0x17d0] ss:$8 sps:$4 sm:$0xff]  }
 0x5e8   : > { %12063 = vmatpush1.bf16.msra.mxu1 %v14716_v6  ;;  %v14810_v6 = vld [vmem:[%s16515_s6 + $0xbe4] ss:$8 sps:$4 sm:$0xff]  }
 0x5e9   : > { %12555 = vmatpush1.bf16.msra.mxu0 %v14719_v7  ;;  %12073 = vmatprep.subr.bf16.mxu1 %v14725_v59  ;;  %v14813_v7 = vld [vmem:[%s16515_s6 + $0x17e4] ss:$8 sps:$4 sm:$0xff]   ;;  %v14808_v59 = vld [vmem:[%s16515_s6 + $0xbe0] ss:$8 sps:$4 sm:$0xff]  }
 0x5ea   : > { %12565 = vmatprep.subr.bf16.mxu0 %v14729_v9  ;;  %v14811_v9 = vld [vmem:[%s16515_s6 + $0x17e0] ss:$8 sps:$4 sm:$0xff]  }
 0x5eb   : > { %12065 = vmatmul.mubr.bf16.vlgmr.msra.gmra.mrb[0].mxu1 %v17458_v12 }
 0x5ec   : > { %12557 = vmatmul.mubr.bf16.vlgmr.msra.gmra.mrb[0].mxu0 %v17462_v13  ;;  %12074 = vmatpush1.bf16.msra.mxu1 %v14723_v14  ;;  %v14816_v14 = vld [vmem:[%s16515_s6 + $0xbf4] ss:$8 sps:$4 sm:$0xff]  }
 0x5ed   : > { %12566 = vmatpush1.bf16.msra.mxu0 %v14727_v15  ;;  %12075 = vmatprep.subr.bf16.mxu1 %v14732_v43  ;;  %v14819_v15 = vld [vmem:[%s16515_s6 + $0x17f4] ss:$8 sps:$4 sm:$0xff]   ;;  %v14814_v43 = vld [vmem:[%s16515_s6 + $0xbf0] ss:$8 sps:$4 sm:$0xff]  }
 0x5ee   : > { %12567 = vmatprep.subr.bf16.mxu0 %v14735_v16  ;;  %12105 = vmatprep.mubr.bf16.mxu1 %v7491_v46  ;;  %v14817_v16 = vld [vmem:[%s16515_s6 + $0x17f0] ss:$8 sps:$4 sm:$0xff]   ;;  %v14822_v46 = vld [vmem:[%s16515_s6 + $0x1804] ss:$8 sps:$4 sm:$0xff]  }
 0x5ef   : > { %12597 = vmatprep.mubr.bf16.mxu0 %v7638_v8  ;;  %v7489_v8 = vcombine.high %v17458_v12, %v17458_v12  ;;  %v14828_v12 = vld [vmem:[%s16515_s6 + $0x1824] ss:$8 sps:$4 sm:$0xff]  }
 0x5f0   : > { %12076 = vmatpush1.bf16.msra.mxu1 %v14730_v1  ;;  %v7636_v1 = vcombine.high %v17462_v13, %v17462_v13  ;;  %v14826_v13 = vld [vmem:[%s16515_s6 + $0x1820] ss:$8 sps:$4 sm:$0xff]  }
 0x5f1   : > { %12568 = vmatpush1.bf16.msra.mxu0 %v14733_v18  ;;  %12077 = vmatprep.subr.bf16.mxu1 %v14738_v61  ;;  %v14820_v18 = vld [vmem:[%s16515_s6 + $0x1800] ss:$8 sps:$4 sm:$0xff]   ;;  %v14825_v61 = vld [vmem:[%s16515_s6 + $0x1814] ss:$8 sps:$4 sm:$0xff]  }
 0x5f2   : > { %12569 = vmatprep.subr.bf16.mxu0 %v14741_v60  ;;  %v14823_v60 = vld [vmem:[%s16515_s6 + $0x1810] ss:$8 sps:$4 sm:$0xff]  }
 0x5f4   : > { %12078 = vmatpush1.bf16.msra.mxu1 %v14736_v58  ;;  %v14873_v58 = vmov 0  }
 0x5f5   : > { %12570 = vmatpush1.bf16.msra.mxu0 %v14739_v21  ;;  %12079 = vmatprep.subr.bf16.mxu1 %v14744_v23  ;;  %v14831_v21 = vld [vmem:[%s16515_s6 + $0x1834] ss:$8 sps:$4 sm:$0xff]   ;;  %v14829_v23 = vld [vmem:[%s16515_s6 + $0x1830] ss:$8 sps:$4 sm:$0xff]  }
 0x5f6   : > { %12571 = vmatprep.subr.bf16.mxu0 %v14747_v24  ;;  %v14834_v24 = vld [vmem:[%s16515_s6 + $0x1844] ss:$8 sps:$4 sm:$0xff]  }
 0x5f8   : > { %12080 = vmatpush1.bf16.msra.mxu1 %v14742_v26  ;;  %v14832_v26 = vld [vmem:[%s16515_s6 + $0x1840] ss:$8 sps:$4 sm:$0xff]  }
 0x5f9   : > { %12572 = vmatpush1.bf16.msra.mxu0 %v14745_v27  ;;  %12081 = vmatprep.subr.bf16.mxu1 %v14750_v28  ;;  %v14837_v27 = vld [vmem:[%s16515_s6 + $0x1854] ss:$8 sps:$4 sm:$0xff]   ;;  %v14835_v28 = vld [vmem:[%s16515_s6 + $0x1850] ss:$8 sps:$4 sm:$0xff]  }
 0x5fa   : > { %12573 = vmatprep.subr.bf16.mxu0 %v14753_v31  ;;  %v14840_v31 = vld [vmem:[%s16515_s6 + $0x1864] ss:$8 sps:$4 sm:$0xff]  }
 0x5fc   : > { %12082 = vmatpush1.bf16.msra.mxu1 %v14748_v32  ;;  %v14838_v32 = vld [vmem:[%s16515_s6 + $0x1860] ss:$8 sps:$4 sm:$0xff]  }
 0x5fd   : > { %12574 = vmatpush1.bf16.msra.mxu0 %v14751_v33  ;;  %12083 = vmatprep.subr.bf16.mxu1 %v14756_v38  ;;  %v14843_v33 = vld [vmem:[%s16515_s6 + $0x1874] ss:$8 sps:$4 sm:$0xff]   ;;  %v14841_v38 = vld [vmem:[%s16515_s6 + $0x1870] ss:$8 sps:$4 sm:$0xff]  }
 0x5fe   : > { %12575 = vmatprep.subr.bf16.mxu0 %v14759_v39  ;;  %v12749_v39 = vld.sshfl [vmem:[%s17576_s0 + $0x30] sm:$0x1 pattern:$0x75316420] }
 0x600   : > { %12084 = vmatpush1.bf16.msra.mxu1 %v14754_v44  ;;  %v7652_v44 = vrot.slane %v12749_v39, %v16520_v25 }
 0x601   : > { %12576 = vmatpush1.bf16.msra.mxu0 %v14757_v45  ;;  %12085 = vmatprep.subr.bf16.mxu1 %v14762_v17 }
 0x602   : > { %12577 = vmatprep.subr.bf16.mxu0 %v14765_v29 }
 0x604   : > { %12086 = vmatpush1.bf16.msra.mxu1 %v14760_v34 }
 0x605   : > { %12578 = vmatpush1.bf16.msra.mxu0 %v14763_v47  ;;  %12087 = vmatprep.subr.bf16.mxu1 %v14768_v10  ;;  %v7330_v47 = vsub.s32 0, %v16503_v19  ;;  %v7326_v10 = vld [vmem:[%s6526_s29] sm:$0x3] }
 0x606   : > { %12579 = vmatprep.subr.bf16.mxu0 %v14771_v22  ;;  %v7334_v22 = vsub.s32 1, %v16503_v19 }
 0x607   : > { %v7331_v25 = vrot.slane %v7326_v10, %v7330_v47 }
 0x608   : > { %12088 = vmatpush1.bf16.msra.mxu1 %v14766_v48  ;;  %v7335_v48 = vrot.slane %v7326_v10, %v7334_v22 }
 0x609   : > { %12580 = vmatpush1.bf16.msra.mxu0 %v14769_v40  ;;  %12089 = vmatprep.subr.bf16.mxu1 %v14774_v41 }
 0x60a   : > { %12581 = vmatprep.subr.bf16.mxu0 %v14777_v49 }
 0x60c   : > { %12090 = vmatpush1.bf16.msra.mxu1 %v14772_v50 }
 0x60d   : > { %12582 = vmatpush1.bf16.msra.mxu0 %v14775_v51  ;;  %12091 = vmatprep.subr.bf16.mxu1 %v14780_v37 }
 0x60e   : > { %12583 = vmatprep.subr.bf16.mxu0 %v14783_v53 }
 0x610   : > { %12092 = vmatpush1.bf16.msra.mxu1 %v14778_v54 }
 0x611   : > { %12584 = vmatpush1.bf16.msra.mxu0 %v14781_v55  ;;  %12093 = vmatprep.subr.bf16.mxu1 %v14786_v62 }
 0x612   : > { %12585 = vmatprep.subr.bf16.mxu0 %v14789_v63 }
 0x614   : > { %12094 = vmatpush1.bf16.msra.mxu1 %v14784_v0 }
 0x615   : > { %12586 = vmatpush1.bf16.msra.mxu0 %v14787_v30  ;;  %12095 = vmatprep.subr.bf16.mxu1 %v14792_v57 }
 0x616   : > { %12587 = vmatprep.subr.bf16.mxu0 %v14795_v20 }
 0x618   : > { %12096 = vmatpush1.bf16.msra.mxu1 %v14790_v11 }
 0x619   : > { %12588 = vmatpush1.bf16.msra.mxu0 %v14793_v35  ;;  %12097 = vmatprep.subr.bf16.mxu1 %v14798_v52 }
 0x61a   : > { %12589 = vmatprep.subr.bf16.mxu0 %v14801_v2 }
 0x61c   : > { %12098 = vmatpush1.bf16.msra.mxu1 %v14796_v36 }
 0x61d   : > { %12590 = vmatpush1.bf16.msra.mxu0 %v14799_v56  ;;  %12099 = vmatprep.subr.bf16.mxu1 %v14804_v42 }
 0x61e   : > { %12591 = vmatprep.subr.bf16.mxu0 %v14807_v3 }
 0x620   : > { %12100 = vmatpush1.bf16.msra.mxu1 %v14802_v4 }
 0x621   : > { %12592 = vmatpush1.bf16.msra.mxu0 %v14805_v5  ;;  %12101 = vmatprep.subr.bf16.mxu1 %v14810_v6 }
 0x622   : > { %12593 = vmatprep.subr.bf16.mxu0 %v14813_v7 }
 0x624   : > { %12102 = vmatpush1.bf16.msra.mxu1 %v14808_v59 }
 0x625   : > { %12594 = vmatpush1.bf16.msra.mxu0 %v14811_v9  ;;  %12103 = vmatprep.subr.bf16.mxu1 %v14816_v14 }
 0x626   : > { %12595 = vmatprep.subr.bf16.mxu0 %v14819_v15 }
 0x628   : > { %12104 = vmatpush1.bf16.msra.mxu1 %v14814_v43 }
 0x629   : > { %12596 = vmatpush1.bf16.msra.mxu0 %v14817_v16 }
 0x62a   : > { %12606 = vmatprep.subr.bf16.mxu0 %v14822_v46 }
 0x62b   : > { %12106 = vmatmul.mubr.bf16.vlgmr.msra.gmra.mrb[0].mxu1 %v7489_v8 }
 0x62c   : > { %12598 = vmatmul.mubr.bf16.vlgmr.msra.gmra.mrb[0].mxu0 %v7636_v1 }
 0x62d   : > { %12607 = vmatpush1.bf16.msra.mxu0 %v14820_v18  ;;  %12638 = vmatprep.mubr.bf16.mxu0 %v14873_v58 }
 0x62e   : > { %12608 = vmatprep.subr.bf16.mxu0 %v14825_v61 }
 0x631   : > { %12609 = vmatpush1.bf16.msra.mxu0 %v14823_v60 }
 0x632   : > { %12610 = vmatprep.subr.bf16.mxu0 %v14828_v12 }
 0x635   : > { %12611 = vmatpush1.bf16.msra.mxu0 %v14826_v13 }
 0x636   : > { %12612 = vmatprep.subr.bf16.mxu0 %v14831_v21 }
 0x639   : > { %12613 = vmatpush1.bf16.msra.mxu0 %v14829_v23 }
 0x63a   : > { %12614 = vmatprep.subr.bf16.mxu0 %v14834_v24 }
 0x63d   : > { %12615 = vmatpush1.bf16.msra.mxu0 %v14832_v26 }
 0x63e   : > { %12616 = vmatprep.subr.bf16.mxu0 %v14837_v27 }
 0x641   : > { %12617 = vmatpush1.bf16.msra.mxu0 %v14835_v28 }
 0x642   : > { %12618 = vmatprep.subr.bf16.mxu0 %v14840_v31 }
 0x645   : > { %12619 = vmatpush1.bf16.msra.mxu0 %v14838_v32 }
 0x646   : > { %12620 = vmatprep.subr.bf16.mxu0 %v14843_v33 }
 0x649   : > { %12621 = vmatpush1.bf16.msra.mxu0 %v14841_v38 }
 0x64c   : > { %12639 = vmatmul.mubr.bf16.vlgmr.msra.gmra.mrb[0].mxu0 %v7652_v44 }
 0x6fe   : > { %v12107_v45 = vpop.f32.mrb[0].mxu1 }
 0x6ff   : > { %v12109_v17 = vpop.f32.mrb[1].mxu1  ;;  %v13538_v40 = vadd.f32 %v12107_v45, %v7331_v25 }
 0x700   : > { %v12111_v29 = vpop.f32.mrb[2].mxu1  ;;  %v13540_v41 = vadd.f32 %v12109_v17, %v7335_v48 }
 0x701   : > { %v12112_v34 = vpop.f32.mrb[3].mxu1 }
 0x71f   : > { %v12640_v49 = vpop.f32.mrb[0].mxu0 }
 0x720   : > { %v13539_v50 = vadd.f32 %v13538_v40, %v12640_v49  ;;  %v12642_v51 = vpop.f32.mrb[1].mxu0 }
 0x721   : > { %v13541_v37 = vadd.f32 %v13540_v41, %v12642_v51  ;;  %v12644_v53 = vpop.f32.mrb[2].mxu0 }
 0x722   : > { %v12645_v54 = vpop.f32.mrb[3].mxu0 }
 0x723   : > { %v12649_v55 = vcombine.low %v13539_v50, %v13541_v37 }
 0x725   : > { %13534 = vst.sshfl [vmem:[%s6532_s4] sm:$0x33 pattern:$0x76325410] %v12649_v55 }
 0x726 PF: > { %p10_p9 = scmp.ge.s32.totalorder %s14911_s16, 6   ;;  %s17580_s12 = smov %s14866_s13 }
 0x727   : > { %s17581_s13 = smov %s14920_s19  ;;  %s17582_s14 = smov %s14911_s16 }
 0x728   :  { %12 = sbr.rel (!%p10_p9) target bundleno = 2 (0x2), region = 128 }

</bundles_post_ra>
